<compile_context>
chip_gen: v7x
topology: tpu7x:2x2x1
jax: 0.10.0
libtpu: 0.0.40
codegen_flags: <defaults>
</compile_context>

<pallas_src>
import jax
import jax.numpy as jnp
from jax.experimental import pallas as pl
from jax.experimental.pallas import tpu as pltpu

EPS = 1e-5


def _fused_bn_relu_conv1x1_bn_relu_kernel(
    x_ref,    # (Cin, P)    f32   P = N*H*W, channels on the sublane axis
    w_ref,    # (tcout, Cin) f32  conv-weight block in native layout
    g1_ref,   # (Cin, 1)    f32   BN1 gamma
    b1_ref,   # (Cin, 1)    f32   BN1 beta
    g2_ref,   # (tcout, 1)  f32   BN2 gamma block
    b2_ref,   # (tcout, 1)  f32   BN2 beta block
    o_ref,    # (tcout, P)  f32
):
    x = x_ref[...]
    P = x.shape[1]
    inv_p = jnp.float32(1.0 / P)
    ones_p = jnp.ones((P, 1), dtype=jnp.float32)

    # ---- BatchNorm2d #1 (train mode, biased variance) ----
    # Per-channel sums over the lane-sparse P axis on the MXU (vex slot) rather
    # than ~2*Cin/8 cross-lane XLU reduces; recomputed per Cout block so the
    # grid can run with "parallel" semantics (no cross-step scratch).
    s1 = jnp.dot(x, ones_p, preferred_element_type=jnp.float32)        # sum x    (Cin,1)
    s2 = jnp.dot(x * x, ones_p, preferred_element_type=jnp.float32)    # sum x^2  (Cin,1)
    m1 = s1 * inv_p
    var1 = jnp.maximum(s2 * inv_p - m1 * m1, 0.0)
    scale1 = g1_ref[...] * jax.lax.rsqrt(var1 + EPS)                   # (Cin,1)
    shift1 = b1_ref[...] - m1 * scale1                                 # (Cin,1)
    # ---- fused BN1 affine + ReLU #1 ----
    h = jnp.maximum(x * scale1 + shift1, 0.0)                          # (Cin, P)

    # ---- Conv2d 1x1, stride 1, no bias == channel matmul on the MXU ----
    # f32 kept for accuracy (bf16 weights would violate the ~1e-3 budget).
    y = jnp.dot(w_ref[...], h, preferred_element_type=jnp.float32)     # (tcout, P)

    # ---- BatchNorm2d #2 (train mode) on this Cout block ----
    # BN2 stats are per-output-channel over P, so Cout tiling preserves them.
    t1 = jnp.dot(y, ones_p, preferred_element_type=jnp.float32)        # (tcout,1)
    t2 = jnp.dot(y * y, ones_p, preferred_element_type=jnp.float32)    # (tcout,1)
    m2 = t1 * inv_p
    var2 = jnp.maximum(t2 * inv_p - m2 * m2, 0.0)
    scale2 = g2_ref[...] * jax.lax.rsqrt(var2 + EPS)
    shift2 = b2_ref[...] - m2 * scale2
    # ---- fused BN2 affine + ReLU #2 ----
    o_ref[...] = jnp.maximum(y * scale2 + shift2, 0.0)


@jax.jit
def fused_forward(x_nchw, conv_w, g1, b1, g2, b2):
    """x_nchw: (N, Cin, H, W) f32; conv_w: (Cout, Cin, 1, 1) f32. Returns NCHW."""
    N, C, H, W = x_nchw.shape
    Cout = conv_w.shape[0]
    P = N * H * W

    # NCHW -> (Cin, P).  Zero-copy reshape for the module's N=1.
    if N == 1:
        x2d = x_nchw.reshape(C, P)
    else:
        x2d = jnp.moveaxis(x_nchw, 1, 0).reshape(C, P)

    # Conv weight in its native (Cout, Cin) layout -- zero-copy reshape.
    # TODO(synk): a *persisted* bf16 copy of the weight (cast once, outside the
    # per-call path) would cut ~75% of remaining HBM traffic; needs the 1e-3
    # accuracy budget renegotiated (~3e-3 rel err at K=1584).
    w2d = conv_w.reshape(Cout, C)

    # Small Cout grid: pipeline the weight DMA against compute; on v7x the
    # "parallel" axis lets both TensorCores take independent blocks.
    # Block rows must be sublane-aligned (multiple of 8).
    n_blocks = 4
    while n_blocks > 1 and (Cout % n_blocks != 0 or (Cout // n_blocks) % 8 != 0):
        n_blocks -= 1
    tcout = Cout // n_blocks

    cost = pl.CostEstimate(
        flops=2 * Cout * C * P + 4 * C * P + 4 * Cout * P,
        transcendentals=n_blocks * C + Cout,
        bytes_accessed=4 * (C * P + Cout * C + Cout * P + 2 * C + 2 * Cout),
    )

    out2d = pl.pallas_call(
        _fused_bn_relu_conv1x1_bn_relu_kernel,
        out_shape=jax.ShapeDtypeStruct((Cout, P), jnp.float32),
        grid=(n_blocks,),
        in_specs=[
            pl.BlockSpec((C, P), lambda i: (0, 0)),       # x: resident across steps
            pl.BlockSpec((tcout, C), lambda i: (i, 0)),   # w: one Cout block per step
            pl.BlockSpec((C, 1), lambda i: (0, 0)),       # BN1 gamma
            pl.BlockSpec((C, 1), lambda i: (0, 0)),       # BN1 beta
            pl.BlockSpec((tcout, 1), lambda i: (i, 0)),   # BN2 gamma block
            pl.BlockSpec((tcout, 1), lambda i: (i, 0)),   # BN2 beta block
        ],
        out_specs=pl.BlockSpec((tcout, P), lambda i: (i, 0)),
        compiler_params=pltpu.CompilerParams(
            dimension_semantics=("parallel",),
        ),
        cost_estimate=cost,
    )(
        x2d,
        w2d,
        g1.reshape(C, 1),
        b1.reshape(C, 1),
        g2.reshape(Cout, 1),
        b2.reshape(Cout, 1),
    )

    # (Cout, P) -> NCHW (zero-copy reshape for N=1).
    if N == 1:
        return out2d.reshape(1, Cout, H, W)
    return jnp.moveaxis(out2d.reshape(Cout, N, H, W), 0, 1)


def _reference_forward(x_nchw, conv_w, g1, b1, g2, b2):
    """Pure-JAX reference of the PyTorch forward (train-mode BN)."""
    def bn_train(x, g, b):
        m = jnp.mean(x, axis=(0, 2, 3), keepdims=True)
        v = jnp.mean((x - m) ** 2, axis=(0, 2, 3), keepdims=True)
        return (x - m) * (g.reshape(1, -1, 1, 1) * jax.lax.rsqrt(v + EPS)) \
            + b.reshape(1, -1, 1, 1)

    h = jnp.maximum(bn_train(x_nchw, g1, b1), 0.0)
    y = jnp.einsum("nchw,oc->nohw", h, conv_w[:, :, 0, 0])
    return jnp.maximum(bn_train(y, g2, b2), 0.0)


if __name__ == "__main__":
    # Shapes implied by the module: Conv2d(1584 -> 192, 1x1), input (1, 1584, 7, 7).
    N, Cin, H, W, Cout = 1, 1584, 7, 7, 192

    key = jax.random.PRNGKey(0)
    kx, kw, kg1, kb1, kg2, kb2 = jax.random.split(key, 6)
    x = jax.random.normal(kx, (N, Cin, H, W), dtype=jnp.float32)
    conv_w = jax.random.normal(kw, (Cout, Cin, 1, 1), dtype=jnp.float32) * 0.025

    # Non-trivial affine params to exercise the gamma/beta path.
    g1 = 1.0 + 0.1 * jax.random.normal(kg1, (Cin,), dtype=jnp.float32)
    b1 = 0.1 * jax.random.normal(kb1, (Cin,), dtype=jnp.float32)
    g2 = 1.0 + 0.1 * jax.random.normal(kg2, (Cout,), dtype=jnp.float32)
    b2 = 0.1 * jax.random.normal(kb2, (Cout,), dtype=jnp.float32)

    out = fused_forward(x, conv_w, g1, b1, g2, b2)
    jax.block_until_ready(out)

    ref = _reference_forward(x, conv_w, g1, b1, g2, b2)
    assert out.shape == (N, Cout, H, W), out.shape
    assert jnp.allclose(out, ref, atol=1e-3, rtol=1e-3), \
        float(jnp.max(jnp.abs(out - ref)))

    print("KERNEL_OK")
</pallas_src>

<mosaic_0001>
module attributes {stable_mosaic.version = 11 : i64} {
  func.func @_fused_bn_relu_conv1x1_bn_relu_kernel(%arg0: i32, %arg1: memref<1584x49xf32, #tpu.memory_space<vmem>>, %arg2: memref<48x1584xf32, #tpu.memory_space<vmem>>, %arg3: memref<1584x1xf32, #tpu.memory_space<vmem>>, %arg4: memref<1584x1xf32, #tpu.memory_space<vmem>>, %arg5: memref<48x1xf32, #tpu.memory_space<vmem>>, %arg6: memref<48x1xf32, #tpu.memory_space<vmem>>, %arg7: memref<48x49xf32, #tpu.memory_space<vmem>>) attributes {dimension_semantics = [#tpu.dimension_semantics<parallel>], iteration_bounds = array<i64: 4>, scalar_prefetch = 0 : i64, scratch_operands = 0 : i64, tpu.core_type = #tpu.core_type<tc>, window_params = [{pipeline_mode = #tpu.pipeline_mode<synchronous>, transform_indices = @transform_0, window_bounds = array<i64: 1584, 49>}, {transform_indices = @transform_1, window_bounds = array<i64: 48, 1584>}, {pipeline_mode = #tpu.pipeline_mode<synchronous>, transform_indices = @transform_2, window_bounds = array<i64: 1584, 1>}, {pipeline_mode = #tpu.pipeline_mode<synchronous>, transform_indices = @transform_3, window_bounds = array<i64: 1584, 1>}, {transform_indices = @transform_4, window_bounds = array<i64: 48, 1>}, {transform_indices = @transform_5, window_bounds = array<i64: 48, 1>}, {transform_indices = @transform_6, window_bounds = array<i64: 48, 49>}]} {
    %c0 = arith.constant 0 : index
    %c0_0 = arith.constant 0 : index
    %0 = vector.load %arg1[%c0, %c0_0] : memref<1584x49xf32, #tpu.memory_space<vmem>>, vector<1584x49xf32>
    %cst = arith.constant 1.000000e+00 : f32
    %1 = vector.broadcast %cst : f32 to vector<49x1xf32>
    %cst_1 = arith.constant dense<0.000000e+00> : vector<1584x1xf32>
    %2 = tpu.matmul %0, %1, %cst_1 {dimension_numbers = #tpu.dot_dimension_numbers<[1], [0], [0], [1], [0, 0, 1, 1], [], []>} : vector<1584x49xf32>, vector<49x1xf32>, vector<1584x1xf32> -> vector<1584x1xf32>
    %3 = arith.mulf %0, %0 : vector<1584x49xf32>
    %cst_2 = arith.constant dense<0.000000e+00> : vector<1584x1xf32>
    %4 = tpu.matmul %3, %1, %cst_2 {dimension_numbers = #tpu.dot_dimension_numbers<[1], [0], [0], [1], [0, 0, 1, 1], [], []>} : vector<1584x49xf32>, vector<49x1xf32>, vector<1584x1xf32> -> vector<1584x1xf32>
    %cst_3 = arith.constant 0.0204081628 : f32
    %5 = vector.broadcast %cst_3 : f32 to vector<1584x1xf32>
    %6 = arith.mulf %2, %5 : vector<1584x1xf32>
    %cst_4 = arith.constant 0.0204081628 : f32
    %7 = vector.broadcast %cst_4 : f32 to vector<1584x1xf32>
    %8 = arith.mulf %4, %7 : vector<1584x1xf32>
    %9 = arith.mulf %6, %6 : vector<1584x1xf32>
    %10 = arith.subf %8, %9 : vector<1584x1xf32>
    %cst_5 = arith.constant 0.000000e+00 : f32
    %11 = vector.broadcast %cst_5 : f32 to vector<1584x1xf32>
    %12 = arith.maximumf %10, %11 : vector<1584x1xf32>
    %c0_6 = arith.constant 0 : index
    %c0_7 = arith.constant 0 : index
    %13 = vector.load %arg3[%c0_6, %c0_7] : memref<1584x1xf32, #tpu.memory_space<vmem>>, vector<1584x1xf32>
    %cst_8 = arith.constant 9.99999974E-6 : f32
    %14 = vector.broadcast %cst_8 : f32 to vector<1584x1xf32>
    %15 = arith.addf %12, %14 : vector<1584x1xf32>
    %16 = math.rsqrt %15 : vector<1584x1xf32>
    %17 = arith.mulf %13, %16 : vector<1584x1xf32>
    %c0_9 = arith.constant 0 : index
    %c0_10 = arith.constant 0 : index
    %18 = vector.load %arg4[%c0_9, %c0_10] : memref<1584x1xf32, #tpu.memory_space<vmem>>, vector<1584x1xf32>
    %19 = arith.mulf %6, %17 : vector<1584x1xf32>
    %20 = arith.subf %18, %19 : vector<1584x1xf32>
    %21 = vector.broadcast %17 : vector<1584x1xf32> to vector<1584x49xf32>
    %22 = arith.mulf %0, %21 : vector<1584x49xf32>
    %23 = vector.broadcast %20 : vector<1584x1xf32> to vector<1584x49xf32>
    %24 = arith.addf %22, %23 : vector<1584x49xf32>
    %cst_11 = arith.constant 0.000000e+00 : f32
    %25 = vector.broadcast %cst_11 : f32 to vector<1584x49xf32>
    %26 = arith.maximumf %24, %25 : vector<1584x49xf32>
    %c0_12 = arith.constant 0 : index
    %c0_13 = arith.constant 0 : index
    %27 = vector.load %arg2[%c0_12, %c0_13] : memref<48x1584xf32, #tpu.memory_space<vmem>>, vector<48x1584xf32>
    %cst_14 = arith.constant dense<0.000000e+00> : vector<48x49xf32>
    %28 = tpu.matmul %27, %26, %cst_14 {dimension_numbers = #tpu.dot_dimension_numbers<[1], [0], [0], [1], [0, 0, 1, 1], [], []>} : vector<48x1584xf32>, vector<1584x49xf32>, vector<48x49xf32> -> vector<48x49xf32>
    %cst_15 = arith.constant dense<0.000000e+00> : vector<48x1xf32>
    %29 = tpu.matmul %28, %1, %cst_15 {dimension_numbers = #tpu.dot_dimension_numbers<[1], [0], [0], [1], [0, 0, 1, 1], [], []>} : vector<48x49xf32>, vector<49x1xf32>, vector<48x1xf32> -> vector<48x1xf32>
    %30 = arith.mulf %28, %28 : vector<48x49xf32>
    %cst_16 = arith.constant dense<0.000000e+00> : vector<48x1xf32>
    %31 = tpu.matmul %30, %1, %cst_16 {dimension_numbers = #tpu.dot_dimension_numbers<[1], [0], [0], [1], [0, 0, 1, 1], [], []>} : vector<48x49xf32>, vector<49x1xf32>, vector<48x1xf32> -> vector<48x1xf32>
    %cst_17 = arith.constant 0.0204081628 : f32
    %32 = vector.broadcast %cst_17 : f32 to vector<48x1xf32>
    %33 = arith.mulf %29, %32 : vector<48x1xf32>
    %cst_18 = arith.constant 0.0204081628 : f32
    %34 = vector.broadcast %cst_18 : f32 to vector<48x1xf32>
    %35 = arith.mulf %31, %34 : vector<48x1xf32>
    %36 = arith.mulf %33, %33 : vector<48x1xf32>
    %37 = arith.subf %35, %36 : vector<48x1xf32>
    %cst_19 = arith.constant 0.000000e+00 : f32
    %38 = vector.broadcast %cst_19 : f32 to vector<48x1xf32>
    %39 = arith.maximumf %37, %38 : vector<48x1xf32>
    %c0_20 = arith.constant 0 : index
    %c0_21 = arith.constant 0 : index
    %40 = vector.load %arg5[%c0_20, %c0_21] : memref<48x1xf32, #tpu.memory_space<vmem>>, vector<48x1xf32>
    %cst_22 = arith.constant 9.99999974E-6 : f32
    %41 = vector.broadcast %cst_22 : f32 to vector<48x1xf32>
    %42 = arith.addf %39, %41 : vector<48x1xf32>
    %43 = math.rsqrt %42 : vector<48x1xf32>
    %44 = arith.mulf %40, %43 : vector<48x1xf32>
    %c0_23 = arith.constant 0 : index
    %c0_24 = arith.constant 0 : index
    %45 = vector.load %arg6[%c0_23, %c0_24] : memref<48x1xf32, #tpu.memory_space<vmem>>, vector<48x1xf32>
    %46 = arith.mulf %33, %44 : vector<48x1xf32>
    %47 = arith.subf %45, %46 : vector<48x1xf32>
    %48 = vector.broadcast %44 : vector<48x1xf32> to vector<48x49xf32>
    %49 = arith.mulf %28, %48 : vector<48x49xf32>
    %50 = vector.broadcast %47 : vector<48x1xf32> to vector<48x49xf32>
    %51 = arith.addf %49, %50 : vector<48x49xf32>
    %cst_25 = arith.constant 0.000000e+00 : f32
    %52 = vector.broadcast %cst_25 : f32 to vector<48x49xf32>
    %53 = arith.maximumf %51, %52 : vector<48x49xf32>
    %c0_26 = arith.constant 0 : index
    %c0_27 = arith.constant 0 : index
    %54 = vector.load %arg7[%c0_26, %c0_27] : memref<48x49xf32, #tpu.memory_space<vmem>>, vector<48x49xf32>
    tpu.vector_store %arg7[%c0_26, %c0_27], %53 {strides = array<i32>} : memref<48x49xf32, #tpu.memory_space<vmem>>, vector<48x49xf32>,
    return
  }
  func.func @transform_0(%arg0: i32) -> (i32, i32) {
    %c0_i32 = arith.constant 0 : i32
    %c0_i32_0 = arith.constant 0 : i32
    %c0_i32_1 = arith.constant 0 : i32
    return %c0_i32, %c0_i32_0 : i32, i32
  }
  func.func @transform_1(%arg0: i32) -> (i32, i32) {
    %c0_i32 = arith.constant 0 : i32
    %c0_i32_0 = arith.constant 0 : i32
    return %arg0, %c0_i32 : i32, i32
  }
  func.func @transform_2(%arg0: i32) -> (i32, i32) {
    %c0_i32 = arith.constant 0 : i32
    %c0_i32_0 = arith.constant 0 : i32
    %c0_i32_1 = arith.constant 0 : i32
    return %c0_i32, %c0_i32_0 : i32, i32
  }
  func.func @transform_3(%arg0: i32) -> (i32, i32) {
    %c0_i32 = arith.constant 0 : i32
    %c0_i32_0 = arith.constant 0 : i32
    %c0_i32_1 = arith.constant 0 : i32
    return %c0_i32, %c0_i32_0 : i32, i32
  }
  func.func @transform_4(%arg0: i32) -> (i32, i32) {
    %c0_i32 = arith.constant 0 : i32
    %c0_i32_0 = arith.constant 0 : i32
    return %arg0, %c0_i32 : i32, i32
  }
  func.func @transform_5(%arg0: i32) -> (i32, i32) {
    %c0_i32 = arith.constant 0 : i32
    %c0_i32_0 = arith.constant 0 : i32
    return %arg0, %c0_i32 : i32, i32
  }
  func.func @transform_6(%arg0: i32) -> (i32, i32) {
    %c0_i32 = arith.constant 0 : i32
    %c0_i32_0 = arith.constant 0 : i32
    return %arg0, %c0_i32 : i32, i32
  }
}

</mosaic_0001>

<bundles_post_ra>
// kernel: fused_forward.1
= control target key start
LH: loop header
LB: loop body
LE: loop exit
PB: predicated region body
PF: predicated region fallthrough
CT: control target
= control target key end

     0   :  { %s12955_s21 = smov 0   ;;  %s21700_s0 = inlined_call_operand.vmem [shape: f32[1584,49], index: 0, kind: input, shape index: {}]   ;;  %s21701_s1 = inlined_call_operand.vmem [shape: f32[192,1584], index: 1, kind: input, shape index: {}]   ;;  %s21702_s2 = inlined_call_operand.vmem [shape: f32[1584,1], index: 2, kind: input, shape index: {}]   ;;  %s21703_s3 = inlined_call_operand.vmem [shape: f32[1584,1], index: 3, kind: input, shape index: {}]   ;;  %s21704_s4 = inlined_call_operand.vmem [shape: f32[192,1], index: 4, kind: input, shape index: {}]   ;;  %s21705_s5 = inlined_call_operand.vmem [shape: f32[192,1], index: 5, kind: input, shape index: {}]   ;;  %s21706_s6 = inlined_call_operand.vmem [shape: f32[192,49], index: 6, kind: output, shape index: {}]  }
   0x1 LB: > { %s10181_s22 = sadd.s32 4294967295, %s12915_s21   ;;  %p10185_p0 = scmp.ge.s32.totalorder %s12915_s21, 1  ;;  %s12915_s21 = sphi %s12955_s21, %s16_s21  }
   0x2   : > { %p236_p1 = scmp.lt.s32.totalorder %s12915_s21, 5 }
   0x4   : > { %p237_p2 = pnand %p10185_p0, %p236_p1 }
   0x6   : > { %240 = sbr.rel (%p237_p2) target bundleno = 1864 (0x748), region = 44 }
   0xd   : > { %v302_v0 = vld [vmem:[%s21700_s0] sm:$0xff]  ;;  %v21709_v1 = vmov 1.0|1.0   ;;  %vm500_vm0 = vcmask 400384   ;;  %vm1095_vm1 = vcmask 1040384   ;;  %v303_v3 = vld [vmem:[%s21700_s0 + $0x8] sm:$0xff] }
   0xe   : > { %12047 = vmatprep.subr.bf16.mxu0 %v21709_v1  ;;  %12053 = vmatprep.subr.bf16.mxu1 %v21709_v1  ;;  %v2154_v2 = vmul.f32 %v302_v0, %v302_v0  ;;  %v304_v4 = vld [vmem:[%s21700_s0 + $0x10] sm:$0xff]  ;;  %v21707_v5 = vmov 1.0   ;;  %v2155_v6 = vmul.f32 %v303_v3, %v303_v3  ;;  %v305_v8 = vld [vmem:[%s21700_s0 + $0x18] sm:$0xff]  ;;  %v306_v9 = vld [vmem:[%s21700_s0 + $0x20] sm:$0xff]  ;;  %s18010_s29 = smul.u32 6, %s10181_s22  ;;  %vm9029_vm2 = vcmask 392192  }
   0xf   : > { %12048 = vmatpush3.bf16.msra.mxu0 %v21709_v1  ;;  %12054 = vmatpush3.bf16.msra.mxu1 %v21709_v1  ;;  %v2156_v7 = vmul.f32 %v304_v4, %v304_v4  ;;  %v2157_v10 = vmul.f32 %v305_v8, %v305_v8  ;;  %v2158_v11 = vmul.f32 %v306_v9, %v306_v9  ;;  %v307_v12 = vld [vmem:[%s21700_s0 + $0x28] sm:$0xff]  ;;  %v308_v13 = vld [vmem:[%s21700_s0 + $0x30] sm:$0xff]  ;;  %v309_v16 = vld [vmem:[%s21700_s0 + $0x38] sm:$0xff] }
  0x10   : > { %12049 = vmatprep.subr.bf16.mxu0 %v21709_v1  ;;  %12055 = vmatprep.subr.bf16.mxu1 %v21709_v1  ;;  %v2159_v14 = vmul.f32 %v307_v12, %v307_v12  ;;  %v2160_v15 = vmul.f32 %v308_v13, %v308_v13  ;;  %v310_v17 = vld [vmem:[%s21700_s0 + $0x40] sm:$0xff]  ;;  %v2161_v18 = vmul.f32 %v309_v16, %v309_v16  ;;  %v311_v20 = vld [vmem:[%s21700_s0 + $0x48] sm:$0xff]  ;;  %v312_v21 = vld [vmem:[%s21700_s0 + $0x50] sm:$0xff]  ;;  %p278_p3 = scmp.lt.s32.totalorder %s18010_s29, 23 }
  0x11   : > { %11372 = vmatprep.mubr.msk.f32.mxu0 %vm500_vm0, %v302_v0  ;;  %11683 = vmatprep.mubr.msk.f32.mxu1 %vm500_vm0, %v2154_v2  ;;  %v2162_v19 = vmul.f32 %v310_v17, %v310_v17  ;;  %v2163_v22 = vmul.f32 %v311_v20, %v311_v20  ;;  %v2164_v23 = vmul.f32 %v312_v21, %v312_v21  ;;  %v313_v24 = vld [vmem:[%s21700_s0 + $0x58] sm:$0xff]  ;;  %v314_v25 = vld [vmem:[%s21700_s0 + $0x60] sm:$0xff]  ;;  %v315_v28 = vld [vmem:[%s21700_s0 + $0x68] sm:$0xff] }
  0x12   : > { %v2165_v26 = vmul.f32 %v313_v24, %v313_v24  ;;  %v2166_v27 = vmul.f32 %v314_v25, %v314_v25  ;;  %v316_v29 = vld [vmem:[%s21700_s0 + $0x70] sm:$0xff]  ;;  %v2167_v30 = vmul.f32 %v315_v28, %v315_v28  ;;  %v317_v32 = vld [vmem:[%s21700_s0 + $0x78] sm:$0xff]  ;;  %v318_v33 = vld [vmem:[%s21700_s0 + $0x80] sm:$0xff]  ;;  %s23522_s29 = smov (!%p278_p3, %s18010_s29), 23 }
  0x13   : > { %12050 = vmatpush3.bf16.msra.mxu0 %v21709_v1  ;;  %12056 = vmatpush3.bf16.msra.mxu1 %v21709_v1  ;;  %v2168_v31 = vmul.f32 %v316_v29, %v316_v29  ;;  %v2169_v34 = vmul.f32 %v317_v32, %v317_v32  ;;  %v2170_v35 = vmul.f32 %v318_v33, %v318_v33  ;;  %v319_v36 = vld [vmem:[%s21700_s0 + $0x88] sm:$0xff]  ;;  %v320_v37 = vld [vmem:[%s21700_s0 + $0x90] sm:$0xff]  ;;  %v321_v40 = vld [vmem:[%s21700_s0 + $0x98] sm:$0xff]  ;;  %s12283_s11 = smul.u32 104, %s23522_s29 }
  0x14   : > { %12051 = vmatprep.subr.bf16.mxu0 %v21709_v1  ;;  %12057 = vmatprep.subr.bf16.mxu1 %v21709_v1  ;;  %v2171_v38 = vmul.f32 %v319_v36, %v319_v36  ;;  %v2172_v39 = vmul.f32 %v320_v37, %v320_v37  ;;  %v322_v41 = vld [vmem:[%s21700_s0 + $0xa0] sm:$0xff]  ;;  %v2173_v42 = vmul.f32 %v321_v40, %v321_v40  ;;  %v323_v44 = vld [vmem:[%s21700_s0 + $0xa8] sm:$0xff]  ;;  %v324_v45 = vld [vmem:[%s21700_s0 + $0xb0] sm:$0xff] }
  0x15   : > { %v2174_v43 = vmul.f32 %v322_v41, %v322_v41  ;;  %v2175_v46 = vmul.f32 %v323_v44, %v323_v44  ;;  %v2176_v47 = vmul.f32 %v324_v45, %v324_v45  ;;  %v325_v48 = vld [vmem:[%s21700_s0 + $0xb8] sm:$0xff]  ;;  %v326_v49 = vld [vmem:[%s21700_s0 + $0xc0] sm:$0xff]  ;;  %v327_v52 = vld [vmem:[%s21700_s0 + $0xc8] sm:$0xff]  ;;  %s18076_s16 = scalar_lea.vmem %s21701_s1, %s12283_s11 }
  0x16   : > { %v2177_v50 = vmul.f32 %v325_v48, %v325_v48  ;;  %v2178_v51 = vmul.f32 %v326_v49, %v326_v49  ;;  %v328_v53 = vld [vmem:[%s21700_s0 + $0xd0] sm:$0xff]  ;;  %v2179_v54 = vmul.f32 %v327_v52, %v327_v52  ;;  %v329_v56 = vld [vmem:[%s21700_s0 + $0xd8] sm:$0xff]  ;;  %v330_v57 = vld [vmem:[%s21700_s0 + $0xe0] sm:$0xff] }
  0x17   : > { %12052 = vmatpush3.bf16.msra.mxu0 %v21709_v1  ;;  %12058 = vmatpush3.bf16.msra.mxu1 %v21709_v1  ;;  %v2180_v55 = vmul.f32 %v328_v53, %v328_v53  ;;  %v2181_v58 = vmul.f32 %v329_v56, %v329_v56  ;;  %v2182_v59 = vmul.f32 %v330_v57, %v330_v57  ;;  %v331_v60 = vld [vmem:[%s21700_s0 + $0xe8] sm:$0xff]  ;;  %v332_v61 = vld [vmem:[%s21700_s0 + $0xf0] sm:$0xff]  ;;  %v333_v0 = vld [vmem:[%s21700_s0 + $0xf8] sm:$0xff] }
  0x18   : > { %11370 = vmatprep.subr.msk.mxu0 %vm1095_vm1, %v21707_v5  ;;  %11681 = vmatprep.subr.msk.mxu1 %vm1095_vm1, %v21707_v5  ;;  %v2183_v62 = vmul.f32 %v331_v60, %v331_v60  ;;  %v2184_v63 = vmul.f32 %v332_v61, %v332_v61  ;;  %v334_v2 = vld [vmem:[%s21700_s0 + $0x100] sm:$0xff] }
  0x1b   : > { %11371 = vmatpush3.msk.msra.mxu0 %vm1095_vm1, %v21707_v5  ;;  %11682 = vmatpush3.msk.msra.mxu1 %vm1095_vm1, %v21707_v5 }
  0x1c   : > { %11373 = vmatmul.mubr.msk.f32.vlgmr.msra.gmra.mrb[0].mxu0 %vm500_vm0, %v303_v3  ;;  %11684 = vmatmul.mubr.msk.f32.vlgmr.msra.gmra.mrb[0].mxu1 %vm500_vm0, %v2155_v6  ;;  %v2185_v3 = vmul.f32 %v333_v0, %v333_v0  ;;  %v335_v6 = vld [vmem:[%s21700_s0 + $0x108] sm:$0xff] }
  0x1d   : > { %11375 = vmatprep.mubr.msk.f32.mxu0 %vm500_vm0, %v304_v4  ;;  %11686 = vmatprep.mubr.msk.f32.mxu1 %vm500_vm0, %v2156_v7  ;;  %v2186_v4 = vmul.f32 %v334_v2, %v334_v2  ;;  %v336_v7 = vld [vmem:[%s21700_s0 + $0x110] sm:$0xff] }
  0x20   : > { %11376 = vmatmul.mubr.msk.f32.gmra.mrb[2].mxu0 %vm500_vm0, %v305_v8  ;;  %11687 = vmatmul.mubr.msk.f32.gmra.mrb[2].mxu1 %vm500_vm0, %v2157_v10  ;;  %v2187_v8 = vmul.f32 %v335_v6, %v335_v6  ;;  %v337_v10 = vld [vmem:[%s21700_s0 + $0x118] sm:$0xff] }
  0x21   : > { %11378 = vmatprep.mubr.msk.f32.mxu0 %vm500_vm0, %v306_v9  ;;  %11689 = vmatprep.mubr.msk.f32.mxu1 %vm500_vm0, %v2158_v11  ;;  %v2188_v9 = vmul.f32 %v336_v7, %v336_v7  ;;  %v338_v11 = vld [vmem:[%s21700_s0 + $0x120] sm:$0xff] }
  0x24   : > { %11379 = vmatmul.mubr.msk.f32.gmra.mrb[4].mxu0 %vm500_vm0, %v307_v12  ;;  %11690 = vmatmul.mubr.msk.f32.gmra.mrb[4].mxu1 %vm500_vm0, %v2159_v14  ;;  %v2189_v12 = vmul.f32 %v337_v10, %v337_v10  ;;  %v339_v14 = vld [vmem:[%s21700_s0 + $0x128] sm:$0xff] }
  0x25   : > { %11381 = vmatprep.mubr.msk.f32.mxu0 %vm500_vm0, %v308_v13  ;;  %11692 = vmatprep.mubr.msk.f32.mxu1 %vm500_vm0, %v2160_v15  ;;  %v2190_v13 = vmul.f32 %v338_v11, %v338_v11  ;;  %v340_v15 = vld [vmem:[%s21700_s0 + $0x130] sm:$0xff] }
  0x28   : > { %11382 = vmatmul.mubr.msk.f32.gmra.mrb[6].mxu0 %vm500_vm0, %v309_v16  ;;  %11693 = vmatmul.mubr.msk.f32.gmra.mrb[6].mxu1 %vm500_vm0, %v2161_v18  ;;  %v2191_v16 = vmul.f32 %v339_v14, %v339_v14  ;;  %v341_v18 = vld [vmem:[%s21700_s0 + $0x138] sm:$0xff] }
  0x29   : > { %11384 = vmatprep.mubr.msk.f32.mxu0 %vm500_vm0, %v310_v17  ;;  %11695 = vmatprep.mubr.msk.f32.mxu1 %vm500_vm0, %v2162_v19  ;;  %v2192_v17 = vmul.f32 %v340_v15, %v340_v15  ;;  %v342_v19 = vld [vmem:[%s21700_s0 + $0x140] sm:$0xff] }
  0x2c   : > { %11385 = vmatmul.mubr.msk.f32.gmra.mrb[8].mxu0 %vm500_vm0, %v311_v20  ;;  %11696 = vmatmul.mubr.msk.f32.gmra.mrb[8].mxu1 %vm500_vm0, %v2163_v22  ;;  %v2193_v20 = vmul.f32 %v341_v18, %v341_v18  ;;  %v343_v22 = vld [vmem:[%s21700_s0 + $0x148] sm:$0xff] }
  0x2d   : > { %11387 = vmatprep.mubr.msk.f32.mxu0 %vm500_vm0, %v312_v21  ;;  %11698 = vmatprep.mubr.msk.f32.mxu1 %vm500_vm0, %v2164_v23  ;;  %v2194_v21 = vmul.f32 %v342_v19, %v342_v19  ;;  %v344_v23 = vld [vmem:[%s21700_s0 + $0x150] sm:$0xff] }
  0x30   : > { %11388 = vmatmul.mubr.msk.f32.gmra.mrb[10].mxu0 %vm500_vm0, %v313_v24  ;;  %11699 = vmatmul.mubr.msk.f32.gmra.mrb[10].mxu1 %vm500_vm0, %v2165_v26  ;;  %v2195_v24 = vmul.f32 %v343_v22, %v343_v22  ;;  %v345_v26 = vld [vmem:[%s21700_s0 + $0x158] sm:$0xff] }
  0x31   : > { %11390 = vmatprep.mubr.msk.f32.mxu0 %vm500_vm0, %v314_v25  ;;  %11701 = vmatprep.mubr.msk.f32.mxu1 %vm500_vm0, %v2166_v27  ;;  %v2196_v25 = vmul.f32 %v344_v23, %v344_v23  ;;  %v346_v27 = vld [vmem:[%s21700_s0 + $0x160] sm:$0xff] }
  0x34   : > { %11391 = vmatmul.mubr.msk.f32.gmra.mrb[12].mxu0 %vm500_vm0, %v315_v28  ;;  %11702 = vmatmul.mubr.msk.f32.gmra.mrb[12].mxu1 %vm500_vm0, %v2167_v30  ;;  %v2197_v28 = vmul.f32 %v345_v26, %v345_v26  ;;  %v347_v30 = vld [vmem:[%s21700_s0 + $0x168] sm:$0xff] }
  0x35   : > { %11393 = vmatprep.mubr.msk.f32.mxu0 %vm500_vm0, %v316_v29  ;;  %11704 = vmatprep.mubr.msk.f32.mxu1 %vm500_vm0, %v2168_v31  ;;  %v2198_v29 = vmul.f32 %v346_v27, %v346_v27  ;;  %v348_v31 = vld [vmem:[%s21700_s0 + $0x170] sm:$0xff] }
  0x38   : > { %11394 = vmatmul.mubr.msk.f32.gmra.mrb[14].mxu0 %vm500_vm0, %v317_v32  ;;  %11705 = vmatmul.mubr.msk.f32.gmra.mrb[14].mxu1 %vm500_vm0, %v2169_v34  ;;  %v2199_v32 = vmul.f32 %v347_v30, %v347_v30  ;;  %v349_v34 = vld [vmem:[%s21700_s0 + $0x178] sm:$0xff] }
  0x39   : > { %11396 = vmatprep.mubr.msk.f32.mxu0 %vm500_vm0, %v318_v33  ;;  %11707 = vmatprep.mubr.msk.f32.mxu1 %vm500_vm0, %v2170_v35  ;;  %v2200_v33 = vmul.f32 %v348_v31, %v348_v31  ;;  %v350_v35 = vld [vmem:[%s21700_s0 + $0x180] sm:$0xff] }
  0x3c   : > { %11397 = vmatmul.mubr.msk.f32.gmra.mrb[16].mxu0 %vm500_vm0, %v319_v36  ;;  %11708 = vmatmul.mubr.msk.f32.gmra.mrb[16].mxu1 %vm500_vm0, %v2171_v38  ;;  %v2201_v36 = vmul.f32 %v349_v34, %v349_v34  ;;  %v351_v38 = vld [vmem:[%s21700_s0 + $0x188] sm:$0xff] }
  0x3d   : > { %11399 = vmatprep.mubr.msk.f32.mxu0 %vm500_vm0, %v320_v37  ;;  %11710 = vmatprep.mubr.msk.f32.mxu1 %vm500_vm0, %v2172_v39  ;;  %v2202_v37 = vmul.f32 %v350_v35, %v350_v35  ;;  %v352_v39 = vld [vmem:[%s21700_s0 + $0x190] sm:$0xff] }
  0x40   : > { %11400 = vmatmul.mubr.msk.f32.gmra.mrb[18].mxu0 %vm500_vm0, %v321_v40  ;;  %11711 = vmatmul.mubr.msk.f32.gmra.mrb[18].mxu1 %vm500_vm0, %v2173_v42  ;;  %v2203_v40 = vmul.f32 %v351_v38, %v351_v38  ;;  %v353_v42 = vld [vmem:[%s21700_s0 + $0x198] sm:$0xff] }
  0x41   : > { %11402 = vmatprep.mubr.msk.f32.mxu0 %vm500_vm0, %v322_v41  ;;  %11713 = vmatprep.mubr.msk.f32.mxu1 %vm500_vm0, %v2174_v43  ;;  %v2204_v41 = vmul.f32 %v352_v39, %v352_v39  ;;  %v354_v43 = vld [vmem:[%s21700_s0 + $0x1a0] sm:$0xff] }
  0x44   : > { %11403 = vmatmul.mubr.msk.f32.gmra.mrb[20].mxu0 %vm500_vm0, %v323_v44  ;;  %11714 = vmatmul.mubr.msk.f32.gmra.mrb[20].mxu1 %vm500_vm0, %v2175_v46  ;;  %v2205_v44 = vmul.f32 %v353_v42, %v353_v42  ;;  %v355_v46 = vld [vmem:[%s21700_s0 + $0x1a8] sm:$0xff] }
  0x45   : > { %11405 = vmatprep.mubr.msk.f32.mxu0 %vm500_vm0, %v324_v45  ;;  %11716 = vmatprep.mubr.msk.f32.mxu1 %vm500_vm0, %v2176_v47  ;;  %v2206_v45 = vmul.f32 %v354_v43, %v354_v43  ;;  %v356_v47 = vld [vmem:[%s21700_s0 + $0x1b0] sm:$0xff] }
  0x48   : > { %11406 = vmatmul.mubr.msk.f32.gmra.mrb[22].mxu0 %vm500_vm0, %v325_v48  ;;  %11717 = vmatmul.mubr.msk.f32.gmra.mrb[22].mxu1 %vm500_vm0, %v2177_v50  ;;  %v2207_v48 = vmul.f32 %v355_v46, %v355_v46  ;;  %v357_v50 = vld [vmem:[%s21700_s0 + $0x1b8] sm:$0xff] }
  0x49   : > { %11408 = vmatprep.mubr.msk.f32.mxu0 %vm500_vm0, %v326_v49  ;;  %11719 = vmatprep.mubr.msk.f32.mxu1 %vm500_vm0, %v2178_v51  ;;  %v2208_v49 = vmul.f32 %v356_v47, %v356_v47  ;;  %v358_v51 = vld [vmem:[%s21700_s0 + $0x1c0] sm:$0xff] }
  0x4c   : > { %11409 = vmatmul.mubr.msk.f32.gmra.mrb[24].mxu0 %vm500_vm0, %v327_v52  ;;  %11720 = vmatmul.mubr.msk.f32.gmra.mrb[24].mxu1 %vm500_vm0, %v2179_v54  ;;  %v2209_v52 = vmul.f32 %v357_v50, %v357_v50  ;;  %v359_v54 = vld [vmem:[%s21700_s0 + $0x1c8] sm:$0xff] }
  0x4d   : > { %11411 = vmatprep.mubr.msk.f32.mxu0 %vm500_vm0, %v328_v53  ;;  %11722 = vmatprep.mubr.msk.f32.mxu1 %vm500_vm0, %v2180_v55  ;;  %v2210_v53 = vmul.f32 %v358_v51, %v358_v51  ;;  %v360_v55 = vld [vmem:[%s21700_s0 + $0x1d0] sm:$0xff] }
  0x50   : > { %11412 = vmatmul.mubr.msk.f32.gmra.mrb[26].mxu0 %vm500_vm0, %v329_v56  ;;  %11723 = vmatmul.mubr.msk.f32.gmra.mrb[26].mxu1 %vm500_vm0, %v2181_v58  ;;  %v12919_v56 = vmov 0   ;;  %v2212_v58 = vmul.f32 %v360_v55, %v360_v55 }
  0x51   : > { %11414 = vmatprep.mubr.msk.f32.mxu0 %vm500_vm0, %v330_v57  ;;  %11725 = vmatprep.mubr.msk.f32.mxu1 %vm500_vm0, %v2182_v59  ;;  %v2211_v57 = vmul.f32 %v359_v54, %v359_v54  ;;  %v361_v59 = vld [vmem:[%s21700_s0 + $0x1d8] sm:$0xff] }
  0x52   : > { %12295 = vset.pattern.permute.xlu0 %v12919_v56  ;;  %12296 = vset.pattern.permute.xlu1 %v12919_v56  ;;  %v391_v56 = vld [vmem:[%s21700_s0 + $0x2c8] sm:$0xff] }
  0x54   : > { %11415 = vmatmul.mubr.msk.f32.gmra.mrb[28].mxu0 %vm500_vm0, %v331_v60  ;;  %11726 = vmatmul.mubr.msk.f32.gmra.mrb[28].mxu1 %vm500_vm0, %v2183_v62  ;;  %v362_v60 = vld [vmem:[%s21700_s0 + $0x1e0] sm:$0xff] }
  0x55   : > { %11417 = vmatprep.mubr.msk.f32.mxu0 %vm500_vm0, %v332_v61  ;;  %11728 = vmatprep.mubr.msk.f32.mxu1 %vm500_vm0, %v2184_v63  ;;  %v2213_v61 = vmul.f32 %v361_v59, %v361_v59  ;;  %v2214_v62 = vmul.f32 %v362_v60, %v362_v60  ;;  %v363_v63 = vld [vmem:[%s21700_s0 + $0x1e8] sm:$0xff] }
  0x58   : > { %11418 = vmatmul.mubr.msk.f32.gmra.mrb[30].mxu0 %vm500_vm0, %v333_v0  ;;  %11729 = vmatmul.mubr.msk.f32.gmra.mrb[30].mxu1 %vm500_vm0, %v2185_v3  ;;  %v364_v0 = vld [vmem:[%s21700_s0 + $0x1f0] sm:$0xff] }
  0x59   : > { %11420 = vmatprep.mubr.msk.f32.mxu0 %vm500_vm0, %v334_v2  ;;  %11731 = vmatprep.mubr.msk.f32.mxu1 %vm500_vm0, %v2186_v4  ;;  %v2215_v2 = vmul.f32 %v363_v63, %v363_v63  ;;  %v2216_v3 = vmul.f32 %v364_v0, %v364_v0  ;;  %v365_v4 = vld [vmem:[%s21700_s0 + $0x1f8] sm:$0xff] }
  0x5c   : > { %11421 = vmatmul.mubr.msk.f32.gmra.mrb[32].mxu0 %vm500_vm0, %v335_v6  ;;  %11732 = vmatmul.mubr.msk.f32.gmra.mrb[32].mxu1 %vm500_vm0, %v2187_v8  ;;  %v366_v6 = vld [vmem:[%s21700_s0 + $0x200] sm:$0xff] }
  0x5d   : > { %11423 = vmatprep.mubr.msk.f32.mxu0 %vm500_vm0, %v336_v7  ;;  %11734 = vmatprep.mubr.msk.f32.mxu1 %vm500_vm0, %v2188_v9  ;;  %v2217_v7 = vmul.f32 %v365_v4, %v365_v4  ;;  %v2218_v8 = vmul.f32 %v366_v6, %v366_v6  ;;  %v367_v9 = vld [vmem:[%s21700_s0 + $0x208] sm:$0xff] }
  0x60   : > { %11424 = vmatmul.mubr.msk.f32.gmra.mrb[34].mxu0 %vm500_vm0, %v337_v10  ;;  %11735 = vmatmul.mubr.msk.f32.gmra.mrb[34].mxu1 %vm500_vm0, %v2189_v12  ;;  %v368_v10 = vld [vmem:[%s21700_s0 + $0x210] sm:$0xff] }
  0x61   : > { %11426 = vmatprep.mubr.msk.f32.mxu0 %vm500_vm0, %v338_v11  ;;  %11737 = vmatprep.mubr.msk.f32.mxu1 %vm500_vm0, %v2190_v13  ;;  %v2219_v11 = vmul.f32 %v367_v9, %v367_v9  ;;  %v2220_v12 = vmul.f32 %v368_v10, %v368_v10  ;;  %v369_v13 = vld [vmem:[%s21700_s0 + $0x218] sm:$0xff] }
  0x64   : > { %11427 = vmatmul.mubr.msk.f32.gmra.mrb[36].mxu0 %vm500_vm0, %v339_v14  ;;  %11738 = vmatmul.mubr.msk.f32.gmra.mrb[36].mxu1 %vm500_vm0, %v2191_v16  ;;  %v370_v14 = vld [vmem:[%s21700_s0 + $0x220] sm:$0xff] }
  0x65   : > { %11429 = vmatprep.mubr.msk.f32.mxu0 %vm500_vm0, %v340_v15  ;;  %11740 = vmatprep.mubr.msk.f32.mxu1 %vm500_vm0, %v2192_v17  ;;  %v2221_v15 = vmul.f32 %v369_v13, %v369_v13  ;;  %v2222_v16 = vmul.f32 %v370_v14, %v370_v14  ;;  %v371_v17 = vld [vmem:[%s21700_s0 + $0x228] sm:$0xff] }
  0x68   : > { %11430 = vmatmul.mubr.msk.f32.gmra.mrb[38].mxu0 %vm500_vm0, %v341_v18  ;;  %11741 = vmatmul.mubr.msk.f32.gmra.mrb[38].mxu1 %vm500_vm0, %v2193_v20  ;;  %v372_v18 = vld [vmem:[%s21700_s0 + $0x230] sm:$0xff] }
  0x69   : > { %11432 = vmatprep.mubr.msk.f32.mxu0 %vm500_vm0, %v342_v19  ;;  %11743 = vmatprep.mubr.msk.f32.mxu1 %vm500_vm0, %v2194_v21  ;;  %v2223_v19 = vmul.f32 %v371_v17, %v371_v17  ;;  %v2224_v20 = vmul.f32 %v372_v18, %v372_v18  ;;  %v373_v21 = vld [vmem:[%s21700_s0 + $0x238] sm:$0xff] }
  0x6c   : > { %11433 = vmatmul.mubr.msk.f32.gmra.mrb[40].mxu0 %vm500_vm0, %v343_v22  ;;  %11744 = vmatmul.mubr.msk.f32.gmra.mrb[40].mxu1 %vm500_vm0, %v2195_v24  ;;  %v2225_v22 = vmul.f32 %v373_v21, %v373_v21  ;;  %v375_v24 = vld [vmem:[%s21700_s0 + $0x248] sm:$0xff] }
  0x6d   : > { %11435 = vmatprep.mubr.msk.f32.mxu0 %vm500_vm0, %v344_v23  ;;  %11746 = vmatprep.mubr.msk.f32.mxu1 %vm500_vm0, %v2196_v25  ;;  %v374_v23 = vld [vmem:[%s21700_s0 + $0x240] sm:$0xff] }
  0x6e   : > { %v2226_v25 = vmul.f32 %v374_v23, %v374_v23 }
  0x70   : > { %11436 = vmatmul.mubr.msk.f32.gmra.mrb[42].mxu0 %vm500_vm0, %v345_v26  ;;  %11747 = vmatmul.mubr.msk.f32.gmra.mrb[42].mxu1 %vm500_vm0, %v2197_v28  ;;  %v2227_v26 = vmul.f32 %v375_v24, %v375_v24  ;;  %v377_v28 = vld [vmem:[%s21700_s0 + $0x258] sm:$0xff] }
  0x71   : > { %11438 = vmatprep.mubr.msk.f32.mxu0 %vm500_vm0, %v346_v27  ;;  %11749 = vmatprep.mubr.msk.f32.mxu1 %vm500_vm0, %v2198_v29  ;;  %v376_v27 = vld [vmem:[%s21700_s0 + $0x250] sm:$0xff] }
  0x72   : > { %v2228_v29 = vmul.f32 %v376_v27, %v376_v27 }
  0x74   : > { %11439 = vmatmul.mubr.msk.f32.gmra.mrb[44].mxu0 %vm500_vm0, %v347_v30  ;;  %11750 = vmatmul.mubr.msk.f32.gmra.mrb[44].mxu1 %vm500_vm0, %v2199_v32  ;;  %v2229_v30 = vmul.f32 %v377_v28, %v377_v28  ;;  %v379_v32 = vld [vmem:[%s21700_s0 + $0x268] sm:$0xff] }
  0x75   : > { %11441 = vmatprep.mubr.msk.f32.mxu0 %vm500_vm0, %v348_v31  ;;  %11752 = vmatprep.mubr.msk.f32.mxu1 %vm500_vm0, %v2200_v33  ;;  %v378_v31 = vld [vmem:[%s21700_s0 + $0x260] sm:$0xff] }
  0x76   : > { %v2230_v33 = vmul.f32 %v378_v31, %v378_v31 }
  0x78   : > { %11442 = vmatmul.mubr.msk.f32.gmra.mrb[46].mxu0 %vm500_vm0, %v349_v34  ;;  %11753 = vmatmul.mubr.msk.f32.gmra.mrb[46].mxu1 %vm500_vm0, %v2201_v36  ;;  %v2231_v34 = vmul.f32 %v379_v32, %v379_v32  ;;  %v381_v36 = vld [vmem:[%s21700_s0 + $0x278] sm:$0xff] }
  0x79   : > { %11444 = vmatprep.mubr.msk.f32.mxu0 %vm500_vm0, %v350_v35  ;;  %11755 = vmatprep.mubr.msk.f32.mxu1 %vm500_vm0, %v2202_v37  ;;  %v380_v35 = vld [vmem:[%s21700_s0 + $0x270] sm:$0xff] }
  0x7a   : > { %v2232_v37 = vmul.f32 %v380_v35, %v380_v35 }
  0x7c   : > { %11445 = vmatmul.mubr.msk.f32.gmra.mrb[48].mxu0 %vm500_vm0, %v351_v38  ;;  %11756 = vmatmul.mubr.msk.f32.gmra.mrb[48].mxu1 %vm500_vm0, %v2203_v40  ;;  %v2233_v38 = vmul.f32 %v381_v36, %v381_v36  ;;  %v383_v40 = vld [vmem:[%s21700_s0 + $0x288] sm:$0xff] }
  0x7d   : > { %11447 = vmatprep.mubr.msk.f32.mxu0 %vm500_vm0, %v352_v39  ;;  %11758 = vmatprep.mubr.msk.f32.mxu1 %vm500_vm0, %v2204_v41  ;;  %v382_v39 = vld [vmem:[%s21700_s0 + $0x280] sm:$0xff] }
  0x7e   : > { %v2234_v41 = vmul.f32 %v382_v39, %v382_v39 }
  0x80   : > { %11448 = vmatmul.mubr.msk.f32.gmra.mrb[50].mxu0 %vm500_vm0, %v353_v42  ;;  %11759 = vmatmul.mubr.msk.f32.gmra.mrb[50].mxu1 %vm500_vm0, %v2205_v44  ;;  %v2235_v42 = vmul.f32 %v383_v40, %v383_v40  ;;  %v385_v44 = vld [vmem:[%s21700_s0 + $0x298] sm:$0xff] }
  0x81   : > { %11450 = vmatprep.mubr.msk.f32.mxu0 %vm500_vm0, %v354_v43  ;;  %11761 = vmatprep.mubr.msk.f32.mxu1 %vm500_vm0, %v2206_v45  ;;  %v384_v43 = vld [vmem:[%s21700_s0 + $0x290] sm:$0xff] }
  0x82   : > { %v2236_v45 = vmul.f32 %v384_v43, %v384_v43 }
  0x84   : > { %11451 = vmatmul.mubr.msk.f32.gmra.mrb[52].mxu0 %vm500_vm0, %v355_v46  ;;  %11762 = vmatmul.mubr.msk.f32.gmra.mrb[52].mxu1 %vm500_vm0, %v2207_v48  ;;  %v2237_v46 = vmul.f32 %v385_v44, %v385_v44  ;;  %v387_v48 = vld [vmem:[%s21700_s0 + $0x2a8] sm:$0xff] }
  0x85   : > { %11453 = vmatprep.mubr.msk.f32.mxu0 %vm500_vm0, %v356_v47  ;;  %11764 = vmatprep.mubr.msk.f32.mxu1 %vm500_vm0, %v2208_v49  ;;  %v386_v47 = vld [vmem:[%s21700_s0 + $0x2a0] sm:$0xff] }
  0x86   : > { %v2238_v49 = vmul.f32 %v386_v47, %v386_v47 }
  0x88   : > { %11454 = vmatmul.mubr.msk.f32.gmra.mrb[54].mxu0 %vm500_vm0, %v357_v50  ;;  %11765 = vmatmul.mubr.msk.f32.gmra.mrb[54].mxu1 %vm500_vm0, %v2209_v52  ;;  %v2239_v50 = vmul.f32 %v387_v48, %v387_v48  ;;  %v389_v52 = vld [vmem:[%s21700_s0 + $0x2b8] sm:$0xff] }
  0x89   : > { %11456 = vmatprep.mubr.msk.f32.mxu0 %vm500_vm0, %v358_v51  ;;  %11767 = vmatprep.mubr.msk.f32.mxu1 %vm500_vm0, %v2210_v53  ;;  %v388_v51 = vld [vmem:[%s21700_s0 + $0x2b0] sm:$0xff] }
  0x8a   : > { %v2240_v53 = vmul.f32 %v388_v51, %v388_v51 }
  0x8c   : > { %11457 = vmatmul.mubr.msk.f32.gmra.mrb[56].mxu0 %vm500_vm0, %v359_v54  ;;  %11768 = vmatmul.mubr.msk.f32.gmra.mrb[56].mxu1 %vm500_vm0, %v2211_v57  ;;  %v2241_v54 = vmul.f32 %v389_v52, %v389_v52 }
  0x8d   : > { %11459 = vmatprep.mubr.msk.f32.mxu0 %vm500_vm0, %v360_v55  ;;  %11770 = vmatprep.mubr.msk.f32.mxu1 %vm500_vm0, %v2212_v58  ;;  %v390_v55 = vld [vmem:[%s21700_s0 + $0x2c0] sm:$0xff]  ;;  %v2243_v58 = vmul.f32 %v391_v56, %v391_v56 }
  0x8e   : > { %v2242_v57 = vmul.f32 %v390_v55, %v390_v55 }
  0x90   : > { %11460 = vmatmul.mubr.msk.f32.gmra.mrb[58].mxu0 %vm500_vm0, %v361_v59  ;;  %11771 = vmatmul.mubr.msk.f32.gmra.mrb[58].mxu1 %vm500_vm0, %v2213_v61  ;;  %v392_v59 = vld [vmem:[%s21700_s0 + $0x2d0] sm:$0xff] }
  0x91   : > { %11462 = vmatprep.mubr.msk.f32.mxu0 %vm500_vm0, %v362_v60  ;;  %11773 = vmatprep.mubr.msk.f32.mxu1 %vm500_vm0, %v2214_v62  ;;  %v393_v60 = vld [vmem:[%s21700_s0 + $0x2d8] sm:$0xff] }
  0x94   : > { %11463 = vmatmul.mubr.msk.f32.gmra.mrb[60].mxu0 %vm500_vm0, %v363_v63  ;;  %11774 = vmatmul.mubr.msk.f32.gmra.mrb[60].mxu1 %vm500_vm0, %v2215_v2  ;;  %v2244_v63 = vmul.f32 %v392_v59, %v392_v59 }
  0x95   : > { %11465 = vmatprep.mubr.msk.f32.mxu0 %vm500_vm0, %v364_v0  ;;  %11776 = vmatprep.mubr.msk.f32.mxu1 %vm500_vm0, %v2216_v3  ;;  %v2245_v0 = vmul.f32 %v393_v60, %v393_v60 }
  0x98   : > { %11466 = vmatmul.mubr.msk.f32.gmra.mrb[62].mxu0 %vm500_vm0, %v365_v4  ;;  %11777 = vmatmul.mubr.msk.f32.gmra.mrb[62].mxu1 %vm500_vm0, %v2217_v7 }
  0x99   : > { %11468 = vmatprep.mubr.msk.f32.mxu0 %vm500_vm0, %v366_v6  ;;  %11779 = vmatprep.mubr.msk.f32.mxu1 %vm500_vm0, %v2218_v8 }
  0x9c   : > { %11469 = vmatmul.mubr.msk.f32.gmra.mrb[64].mxu0 %vm500_vm0, %v367_v9  ;;  %11780 = vmatmul.mubr.msk.f32.gmra.mrb[64].mxu1 %vm500_vm0, %v2219_v11 }
  0x9d   : > { %11471 = vmatprep.mubr.msk.f32.mxu0 %vm500_vm0, %v368_v10  ;;  %11782 = vmatprep.mubr.msk.f32.mxu1 %vm500_vm0, %v2220_v12 }
  0xa0   : > { %11472 = vmatmul.mubr.msk.f32.gmra.mrb[66].mxu0 %vm500_vm0, %v369_v13  ;;  %11783 = vmatmul.mubr.msk.f32.gmra.mrb[66].mxu1 %vm500_vm0, %v2221_v15 }
  0xa1   : > { %11474 = vmatprep.mubr.msk.f32.mxu0 %vm500_vm0, %v370_v14  ;;  %11785 = vmatprep.mubr.msk.f32.mxu1 %vm500_vm0, %v2222_v16 }
  0xa4   : > { %11475 = vmatmul.mubr.msk.f32.gmra.mrb[68].mxu0 %vm500_vm0, %v371_v17  ;;  %11786 = vmatmul.mubr.msk.f32.gmra.mrb[68].mxu1 %vm500_vm0, %v2223_v19 }
  0xa5   : > { %11477 = vmatprep.mubr.msk.f32.mxu0 %vm500_vm0, %v372_v18  ;;  %11788 = vmatprep.mubr.msk.f32.mxu1 %vm500_vm0, %v2224_v20 }
  0xa8   : > { %11478 = vmatmul.mubr.msk.f32.gmra.mrb[70].mxu0 %vm500_vm0, %v373_v21  ;;  %11789 = vmatmul.mubr.msk.f32.gmra.mrb[70].mxu1 %vm500_vm0, %v2225_v22 }
  0xa9   : > { %11480 = vmatprep.mubr.msk.f32.mxu0 %vm500_vm0, %v374_v23  ;;  %11791 = vmatprep.mubr.msk.f32.mxu1 %vm500_vm0, %v2226_v25  ;;  %v394_v23 = vld [vmem:[%s21700_s0 + $0x2e0] sm:$0xff] }
  0xac   : > { %11481 = vmatmul.mubr.msk.f32.gmra.mrb[72].mxu0 %vm500_vm0, %v375_v24  ;;  %11792 = vmatmul.mubr.msk.f32.gmra.mrb[72].mxu1 %vm500_vm0, %v2227_v26  ;;  %v395_v24 = vld [vmem:[%s21700_s0 + $0x2e8] sm:$0xff] }
  0xad   : > { %11483 = vmatprep.mubr.msk.f32.mxu0 %vm500_vm0, %v376_v27  ;;  %11794 = vmatprep.mubr.msk.f32.mxu1 %vm500_vm0, %v2228_v29  ;;  %v2246_v29 = vmul.f32 %v394_v23, %v394_v23 }
  0xb0   : > { %11484 = vmatmul.mubr.msk.f32.gmra.mrb[74].mxu0 %vm500_vm0, %v377_v28  ;;  %11795 = vmatmul.mubr.msk.f32.gmra.mrb[74].mxu1 %vm500_vm0, %v2229_v30  ;;  %v2247_v30 = vmul.f32 %v395_v24, %v395_v24 }
  0xb1   : > { %11486 = vmatprep.mubr.msk.f32.mxu0 %vm500_vm0, %v378_v31  ;;  %11797 = vmatprep.mubr.msk.f32.mxu1 %vm500_vm0, %v2230_v33 }
  0xb4   : > { %11487 = vmatmul.mubr.msk.f32.gmra.mrb[76].mxu0 %vm500_vm0, %v379_v32  ;;  %11798 = vmatmul.mubr.msk.f32.gmra.mrb[76].mxu1 %vm500_vm0, %v2231_v34 }
  0xb5   : > { %11489 = vmatprep.mubr.msk.f32.mxu0 %vm500_vm0, %v380_v35  ;;  %11800 = vmatprep.mubr.msk.f32.mxu1 %vm500_vm0, %v2232_v37 }
  0xb8   : > { %11490 = vmatmul.mubr.msk.f32.gmra.mrb[78].mxu0 %vm500_vm0, %v381_v36  ;;  %11801 = vmatmul.mubr.msk.f32.gmra.mrb[78].mxu1 %vm500_vm0, %v2233_v38 }
  0xb9   : > { %11492 = vmatprep.mubr.msk.f32.mxu0 %vm500_vm0, %v382_v39  ;;  %11803 = vmatprep.mubr.msk.f32.mxu1 %vm500_vm0, %v2234_v41 }
  0xbc   : > { %11493 = vmatmul.mubr.msk.f32.gmra.mrb[80].mxu0 %vm500_vm0, %v383_v40  ;;  %11804 = vmatmul.mubr.msk.f32.gmra.mrb[80].mxu1 %vm500_vm0, %v2235_v42 }
  0xbd   : > { %11495 = vmatprep.mubr.msk.f32.mxu0 %vm500_vm0, %v384_v43  ;;  %11806 = vmatprep.mubr.msk.f32.mxu1 %vm500_vm0, %v2236_v45 }
  0xc0   : > { %11496 = vmatmul.mubr.msk.f32.gmra.mrb[82].mxu0 %vm500_vm0, %v385_v44  ;;  %11807 = vmatmul.mubr.msk.f32.gmra.mrb[82].mxu1 %vm500_vm0, %v2237_v46 }
  0xc1   : > { %11498 = vmatprep.mubr.msk.f32.mxu0 %vm500_vm0, %v386_v47  ;;  %11809 = vmatprep.mubr.msk.f32.mxu1 %vm500_vm0, %v2238_v49 }
  0xc4   : > { %11499 = vmatmul.mubr.msk.f32.gmra.mrb[84].mxu0 %vm500_vm0, %v387_v48  ;;  %11810 = vmatmul.mubr.msk.f32.gmra.mrb[84].mxu1 %vm500_vm0, %v2239_v50 }
  0xc5   : > { %11501 = vmatprep.mubr.msk.f32.mxu0 %vm500_vm0, %v388_v51  ;;  %11812 = vmatprep.mubr.msk.f32.mxu1 %vm500_vm0, %v2240_v53 }
  0xc8   : > { %11502 = vmatmul.mubr.msk.f32.gmra.mrb[86].mxu0 %vm500_vm0, %v389_v52  ;;  %11813 = vmatmul.mubr.msk.f32.gmra.mrb[86].mxu1 %vm500_vm0, %v2241_v54 }
  0xc9   : > { %11504 = vmatprep.mubr.msk.f32.mxu0 %vm500_vm0, %v390_v55  ;;  %11815 = vmatprep.mubr.msk.f32.mxu1 %vm500_vm0, %v2242_v57 }
  0xcc   : > { %11505 = vmatmul.mubr.msk.f32.gmra.mrb[88].mxu0 %vm500_vm0, %v391_v56  ;;  %11816 = vmatmul.mubr.msk.f32.gmra.mrb[88].mxu1 %vm500_vm0, %v2243_v58 }
  0xcd   : > { %11507 = vmatprep.mubr.msk.f32.mxu0 %vm500_vm0, %v392_v59  ;;  %11818 = vmatprep.mubr.msk.f32.mxu1 %vm500_vm0, %v2244_v63  ;;  %v396_v59 = vld [vmem:[%s21700_s0 + $0x2f0] sm:$0xff] }
  0xd0   : > { %11508 = vmatmul.mubr.msk.f32.gmra.mrb[90].mxu0 %vm500_vm0, %v393_v60  ;;  %11819 = vmatmul.mubr.msk.f32.gmra.mrb[90].mxu1 %vm500_vm0, %v2245_v0  ;;  %v397_v60 = vld [vmem:[%s21700_s0 + $0x2f8] sm:$0xff] }
  0xd1   : > { %11510 = vmatprep.mubr.msk.f32.mxu0 %vm500_vm0, %v394_v23  ;;  %11821 = vmatprep.mubr.msk.f32.mxu1 %vm500_vm0, %v2246_v29 }
  0xd4   : > { %11511 = vmatmul.mubr.msk.f32.gmra.mrb[92].mxu0 %vm500_vm0, %v395_v24  ;;  %11822 = vmatmul.mubr.msk.f32.gmra.mrb[92].mxu1 %vm500_vm0, %v2247_v30  ;;  %v4992_v30 = vld [vmem:[%s21702_s2 + $0x8] sm:$0xff] }
  0xd5   : > { %11513 = vmatprep.mubr.msk.f32.mxu0 %vm500_vm0, %v396_v59 }
  0xd8   : > { %11514 = vmatmul.mubr.msk.f32.gmra.mrb[94].mxu0 %vm500_vm0, %v397_v60 }
  0xef   : > { %v11374_v61 = vpop.f32.mrb[0].mxu0  ;;  %v11685_v62 = vpop.f32.mrb[0].mxu1 }
  0xf0   : > { %v13440_v2 = vmul.f32 0.020408163, %v11374_v61  ;;  %v1165_v3 = vpop.f32.mrb[1].mxu0  ;;  %v4200_v4 = vmul.f32 0.020408163, %v11685_v62  ;;  %v3012_v6 = vpop.f32.mrb[1].mxu1 }
  0xf1   : > { %v13443_v7 = vmul.f32 0.020408163, %v1165_v3  ;;  %v4199_v8 = vmul.f32 0.020408163, %v3012_v6  ;;  %v2248_v3 = vmul.f32 %v396_v59, %v396_v59 }
  0xf2   : > { %v4398_v9 = vmul.f32 %v13440_v2, %v13440_v2 }
  0xf3   : > { %v4397_v10 = vmul.f32 %v13443_v7, %v13443_v7  ;;  %v11377_v11 = vpop.f32.mrb[2].mxu0  ;;  %v11688_v12 = vpop.f32.mrb[2].mxu1  ;;  %11824 = vmatprep.mubr.msk.f32.mxu1 %vm500_vm0, %v2248_v3 }
  0xf4   : > { %v4596_v13 = vsub.f32 %v4200_v4, %v4398_v9  ;;  %v13451_v14 = vmul.f32 0.020408163, %v11377_v11  ;;  %v1175_v15 = vpop.f32.mrb[3].mxu0  ;;  %v4202_v16 = vmul.f32 0.020408163, %v11688_v12  ;;  %v3022_v17 = vpop.f32.mrb[3].mxu1 }
  0xf5   : > { %v4595_v18 = vsub.f32 %v4199_v8, %v4397_v10  ;;  %v13453_v19 = vmul.f32 0.020408163, %v1175_v15  ;;  %v4201_v20 = vmul.f32 0.020408163, %v3022_v17  ;;  %v2249_v10 = vmul.f32 %v397_v60, %v397_v60 }
  0xf6   : > { %v4794_v21 = vmax.f32 %v4596_v13, 0.0  ;;  %v4400_v22 = vmul.f32 %v13451_v14, %v13451_v14 }
  0xf7   : > { %v4793_v25 = vmax.f32 %v4595_v18, 0.0  ;;  %v4399_v26 = vmul.f32 %v13453_v19, %v13453_v19  ;;  %v11380_v27 = vpop.f32.mrb[4].mxu0  ;;  %v11691_v28 = vpop.f32.mrb[4].mxu1  ;;  %11825 = vmatmul.mubr.msk.f32.gmra.mrb[94].mxu1 %vm500_vm0, %v2249_v10 }
  0xf8   : > { %v5190_v31 = vadd.f32 1e-05, %v4794_v21  ;;  %v4598_v32 = vsub.f32 %v4202_v16, %v4400_v22  ;;  %v13466_v33 = vmul.f32 0.020408163, %v11380_v27  ;;  %v1185_v34 = vpop.f32.mrb[5].mxu0  ;;  %v3032_v35 = vpop.f32.mrb[5].mxu1 }
  0xf9   : > { %v5189_v36 = vadd.f32 1e-05, %v4793_v25  ;;  %v4597_v37 = vsub.f32 %v4201_v20, %v4399_v26  ;;  %v13469_v38 = vmul.f32 0.020408163, %v1185_v34  ;;  %v4204_v39 = vmul.f32 0.020408163, %v11691_v28 }
  0xfa   : > { %12297 = vrsqrt.f32 %v5190_v31  ;;  %v4796_v40 = vmax.f32 %v4598_v32, 0.0  ;;  %v4402_v41 = vmul.f32 %v13466_v33, %v13466_v33  ;;  %v4203_v42 = vmul.f32 0.020408163, %v3032_v35  ;;  %v4991_v31 = vld [vmem:[%s21702_s2] sm:$0xff] }
  0xfb   : > { %12299 = vrsqrt.f32 %v5189_v36  ;;  %v4795_v43 = vmax.f32 %v4597_v37, 0.0  ;;  %v4401_v44 = vmul.f32 %v13469_v38, %v13469_v38  ;;  %v11383_v45 = vpop.f32.mrb[6].mxu0  ;;  %v11694_v46 = vpop.f32.mrb[6].mxu1 }
  0xfc   : > { %v5192_v47 = vadd.f32 1e-05, %v4796_v40  ;;  %v4600_v48 = vsub.f32 %v4204_v39, %v4402_v41  ;;  %v13477_v49 = vmul.f32 0.020408163, %v11383_v45  ;;  %v1195_v50 = vpop.f32.mrb[7].mxu0  ;;  %v3042_v51 = vpop.f32.mrb[7].mxu1 }
  0xfd   : > { %v5191_v52 = vadd.f32 1e-05, %v4795_v43  ;;  %v4599_v53 = vsub.f32 %v4203_v42, %v4401_v44  ;;  %v13479_v54 = vmul.f32 0.020408163, %v1195_v50  ;;  %v4206_v55 = vmul.f32 0.020408163, %v11694_v46 }
  0xfe   : > { %v4798_v56 = vmax.f32 %v4600_v48, 0.0  ;;  %v4404_v57 = vmul.f32 %v13477_v49, %v13477_v49  ;;  %v4205_v58 = vmul.f32 0.020408163, %v3042_v51  ;;  %12301 = vrsqrt.f32 %v5192_v47  ;;  %v398_v41 = vld [vmem:[%s21700_s0 + $0x300] sm:$0xff]  ;;  %v399_v42 = vld [vmem:[%s21700_s0 + $0x308] sm:$0xff] }
  0xff   : > { %v4797_v61 = vmax.f32 %v4599_v53, 0.0  ;;  %v4403_v62 = vmul.f32 %v13479_v54, %v13479_v54  ;;  %v11386_v63 = vpop.f32.mrb[8].mxu0  ;;  %v11697_v0 = vpop.f32.mrb[8].mxu1  ;;  %12303 = vrsqrt.f32 %v5191_v52  ;;  %11516 = vmatprep.mubr.msk.f32.mxu0 %vm500_vm0, %v398_v41 }
 0x100   : > { %v4602_v4 = vsub.f32 %v4206_v55, %v4404_v57  ;;  %v13492_v6 = vmul.f32 0.020408163, %v11386_v63  ;;  %v1205_v8 = vpop.f32.mrb[9].mxu0  ;;  %v3052_v9 = vpop.f32.mrb[9].mxu1  ;;  %v4208_v15 = vmul.f32 0.020408163, %v11697_v0  ;;  %11517 = vmatmul.mubr.msk.f32.gmra.mrb[96].mxu0 %vm500_vm0, %v399_v42 }
 0x101   : > { %v5193_v11 = vadd.f32 1e-05, %v4797_v61  ;;  %v4601_v12 = vsub.f32 %v4205_v58, %v4403_v62  ;;  %v13495_v13 = vmul.f32 0.020408163, %v1205_v8  ;;  %v5194_v16 = vadd.f32 1e-05, %v4798_v56 }
 0x102   : > { %v4406_v17 = vmul.f32 %v13492_v6, %v13492_v6  ;;  %v4207_v18 = vmul.f32 0.020408163, %v3052_v9  ;;  %v4800_v20 = vmax.f32 %v4602_v4, 0.0  ;;  %v4994_v61 = vld [vmem:[%s21702_s2 + $0x18] sm:$0xff] }
 0x103   : > { %v4799_v21 = vmax.f32 %v4601_v12, 0.0  ;;  %v4405_v22 = vmul.f32 %v13495_v13, %v13495_v13  ;;  %v11389_v23 = vpop.f32.mrb[10].mxu0  ;;  %v11700_v24 = vpop.f32.mrb[10].mxu1  ;;  %12305 = vrsqrt.f32 %v5193_v11 }
 0x104   : > { %v12298_v25 = vpop.eup %12297  ;;  %v4604_v26 = vsub.f32 %v4208_v15, %v4406_v17  ;;  %v13503_v27 = vmul.f32 0.020408163, %v11389_v23  ;;  %v1215_v28 = vpop.f32.mrb[11].mxu0  ;;  %v4210_v37 = vmul.f32 0.020408163, %v11700_v24  ;;  %12307 = vrsqrt.f32 %v5194_v16  ;;  %v5783_v15 = vld [vmem:[%s21703_s3] sm:$0xff] }
 0x105   : > { %v3062_v29 = vpop.f32.mrb[11].mxu1  ;;  %v12300_v32 = vpop.eup %12299  ;;  %v5195_v34 = vadd.f32 1e-05, %v4799_v21  ;;  %v4603_v35 = vsub.f32 %v4207_v18, %v4405_v22  ;;  %v13511_v36 = vmul.f32 0.020408163, %v1215_v28  ;;  %v5586_v46 = vmul.f32 %v12298_v25, %v4992_v30  ;;  %v5784_v17 = vld [vmem:[%s21703_s3 + $0x8] sm:$0xff] }
 0x106   : > { %v4408_v39 = vmul.f32 %v13503_v27, %v13503_v27  ;;  %v4209_v40 = vmul.f32 0.020408163, %v3062_v29  ;;  %v5196_v43 = vadd.f32 1e-05, %v4800_v20  ;;  %v4802_v50 = vmax.f32 %v4604_v26, 0.0  ;;  %v4993_v25 = vld [vmem:[%s21702_s2 + $0x10] sm:$0xff] }
 0x107   : > { %v4801_v44 = vmax.f32 %v4603_v35, 0.0  ;;  %v4407_v45 = vmul.f32 %v13511_v36, %v13511_v36  ;;  %v11392_v47 = vpop.f32.mrb[12].mxu0  ;;  %v11703_v48 = vpop.f32.mrb[12].mxu1  ;;  %v5585_v56 = vmul.f32 %v12300_v32, %v4991_v31  ;;  %12309 = vrsqrt.f32 %v5195_v34  ;;  %6384 = vperm.xlu0 %12295, %v5586_v46   ;;  %v400_v30 = vld [vmem:[%s21700_s0 + $0x310] sm:$0xff]  ;;  %v401_v31 = vld [vmem:[%s21700_s0 + $0x318] sm:$0xff] }
 0x108   : > { %v4606_v51 = vsub.f32 %v4210_v37, %v4408_v39  ;;  %v13524_v52 = vmul.f32 0.020408163, %v11392_v47  ;;  %v1225_v53 = vpop.f32.mrb[13].mxu0  ;;  %v3072_v55 = vpop.f32.mrb[13].mxu1  ;;  %v5982_v59 = vmul.f32 %v5586_v46, %v13440_v2  ;;  %v4212_v3 = vmul.f32 0.020408163, %v11703_v48  ;;  %11519 = vmatprep.mubr.msk.f32.mxu0 %vm500_vm0, %v400_v30 }
 0x109   : > { %v12302_v57 = vpop.eup %12301  ;;  %v4605_v58 = vsub.f32 %v4209_v40, %v4407_v45  ;;  %v13528_v60 = vmul.f32 0.020408163, %v1225_v53  ;;  %v5197_v62 = vadd.f32 1e-05, %v4801_v44  ;;  %v4211_v9 = vmul.f32 0.020408163, %v3072_v55  ;;  %11520 = vmatmul.mubr.msk.f32.gmra.mrb[98].mxu0 %vm500_vm0, %v401_v31 }
 0x10a   : > { %v4804_v63 = vmax.f32 %v4606_v51, 0.0  ;;  %v4410_v0 = vmul.f32 %v13524_v52, %v13524_v52  ;;  %v5588_v12 = vmul.f32 %v12302_v57, %v4994_v61  ;;  %v5981_v16 = vmul.f32 %v5585_v56, %v13443_v7  ;;  %v12304_v21 = vpop.eup %12303  ;;  %v4996_v55 = vld [vmem:[%s21702_s2 + $0x28] sm:$0xff] }
 0x10b   : > { %v4803_v4 = vmax.f32 %v4605_v58, 0.0  ;;  %v4409_v8 = vmul.f32 %v13528_v60, %v13528_v60  ;;  %v11395_v10 = vpop.f32.mrb[14].mxu0  ;;  %v11706_v11 = vpop.f32.mrb[14].mxu1  ;;  %12311 = vrsqrt.f32 %v5196_v43  ;;  %v5198_v22 = vadd.f32 1e-05, %v4802_v50  ;;  %6379 = vperm.xlu0 %12295, %v5585_v56   ;;  %v5785_v56 = vld [vmem:[%s21703_s3 + $0x10] sm:$0xff] }
 0x10c   : > { %v4608_v2 = vsub.f32 %v4212_v3, %v4410_v0  ;;  %v1235_v18 = vpop.f32.mrb[15].mxu0  ;;  %v3082_v20 = vpop.f32.mrb[15].mxu1  ;;  %v13544_v24 = vmul.f32 0.020408163, %v11395_v10  ;;  %12313 = vrsqrt.f32 %v5197_v62  ;;  %v5200_v7 = vadd.f32 1e-05, %v4804_v63  ;;  %6394 = vperm.xlu1 %12296, %v5588_v12  }
 0x10d   : > { %v4607_v23 = vsub.f32 %v4211_v9, %v4409_v8  ;;  %v12306_v26 = vpop.eup %12305  ;;  %v5199_v28 = vadd.f32 1e-05, %v4803_v4  ;;  %v13550_v29 = vmul.f32 %v5588_v12, %v13451_v14  ;;  %v6179_v32 = vsub.f32 %v5783_v15, %v5981_v16  ;;  %v4995_v14 = vld [vmem:[%s21702_s2 + $0x20] sm:$0xff] }
 0x10e   : > { %v6180_v34 = vsub.f32 %v5784_v17, %v5982_v59  ;;  %v4412_v35 = vmul.f32 %v13544_v24, %v13544_v24  ;;  %v13560_v37 = vmul.f32 0.020408163, %v1235_v18  ;;  %v12308_v41 = vpop.eup %12307  ;;  %v4214_v43 = vmul.f32 0.020408163, %v11706_v11  ;;  %v4997_v59 = vld [vmem:[%s21702_s2 + $0x30] sm:$0xff] }
 0x10f   : > { %v11398_v39 = vpop.f32.mrb[16].mxu0  ;;  %v11709_v40 = vpop.f32.mrb[16].mxu1  ;;  %v4805_v42 = vmax.f32 %v4607_v23, 0.0  ;;  %v4213_v44 = vmul.f32 0.020408163, %v3082_v20  ;;  %v5587_v45 = vmul.f32 %v12304_v21, %v4993_v25  ;;  %12315 = vrsqrt.f32 %v5198_v22  ;;  %7567 = vperm.xlu0 %12295, %v6179_v32   ;;  %v402_v22 = vld [vmem:[%s21700_s0 + $0x320] sm:$0xff] }
 0x110   : > { %v4806_v46 = vmax.f32 %v4608_v2, 0.0  ;;  %v4411_v47 = vmul.f32 %v13560_v37, %v13560_v37  ;;  %v1245_v48 = vpop.f32.mrb[17].mxu0  ;;  %v3092_v50 = vpop.f32.mrb[17].mxu1  ;;  %7572 = vperm.xlu1 %12296, %v6180_v34   ;;  %v4610_v51 = vsub.f32 %v4214_v43, %v4412_v35  ;;  %v5589_v53 = vmul.f32 %v12306_v26, %v4995_v14  ;;  %v403_v23 = vld [vmem:[%s21700_s0 + $0x328] sm:$0xff]  ;;  %11522 = vmatprep.mubr.msk.f32.mxu0 %vm500_vm0, %v402_v22  ;;  %v4998_v32 = vld [vmem:[%s21702_s2 + $0x38] sm:$0xff]  ;;  %v4999_v43 = vld [vmem:[%s21702_s2 + $0x40] sm:$0xff] }
 0x111   : > { %v5983_v57 = vmul.f32 %v5587_v45, %v13453_v19  ;;  %v13576_v58 = vmul.f32 0.020408163, %v11398_v39  ;;  %v12310_v61 = vpop.eup %12309  ;;  %12317 = vrsqrt.f32 %v5200_v7  ;;  %v13581_v63 = vmul.f32 0.020408163, %v1245_v48  ;;  %v5786_v7 = vld [vmem:[%s21703_s3 + $0x18] sm:$0xff]  ;;  %11523 = vmatmul.mubr.msk.f32.gmra.mrb[100].mxu0 %vm500_vm0, %v403_v23 }
 0x112   : > { %v4609_v62 = vsub.f32 %v4213_v44, %v4411_v47  ;;  %v4216_v0 = vmul.f32 0.020408163, %v11709_v40  ;;  %12319 = vrsqrt.f32 %v5199_v28  ;;  %v5201_v8 = vadd.f32 1e-05, %v4805_v42 }
 0x113   : > { %v11401_v3 = vpop.f32.mrb[18].mxu0  ;;  %v11712_v4 = vpop.f32.mrb[18].mxu1  ;;  %v4414_v9 = vmul.f32 %v13576_v58, %v13576_v58  ;;  %v4215_v19 = vmul.f32 0.020408163, %v3092_v50  ;;  %v5202_v2 = vadd.f32 1e-05, %v4806_v46  ;;  %6399 = vperm.xlu0 %12295, %v5589_v53   ;;  %v5590_v15 = vmul.f32 %v12308_v41, %v4996_v55 }
 0x114   : > { %v1255_v10 = vpop.f32.mrb[19].mxu0  ;;  %v3102_v11 = vpop.f32.mrb[19].mxu1  ;;  %v4807_v12 = vmax.f32 %v4609_v62, 0.0  ;;  %v4413_v16 = vmul.f32 %v13581_v63, %v13581_v63  ;;  %v4808_v17 = vmax.f32 %v4610_v51, 0.0  ;;  %6389 = vperm.xlu1 %12296, %v5587_v45   ;;  %v6181_v18 = vsub.f32 %v5785_v56, %v5983_v57  ;;  %v5787_v62 = vld [vmem:[%s21703_s3 + $0x20] sm:$0xff] }
 0x115   : > { %v4612_v20 = vsub.f32 %v4216_v0, %v4414_v9  ;;  %v13588_v21 = vmul.f32 %v5589_v53, %v13469_v38  ;;  %v12312_v25 = vpop.eup %12311  ;;  %v5591_v28 = vmul.f32 %v12310_v61, %v4997_v59  ;;  %v13599_v30 = vmul.f32 0.020408163, %v11401_v3 }
 0x116   : > { %v4611_v26 = vsub.f32 %v4215_v19, %v4413_v16  ;;  %v13601_v31 = vmul.f32 0.020408163, %v1255_v10  ;;  %v12314_v38 = vpop.eup %12313  ;;  %12321 = vrsqrt.f32 %v5201_v8  ;;  %v4218_v34 = vmul.f32 0.020408163, %v11712_v4  ;;  %v5001_v16 = vld [vmem:[%s21702_s2 + $0x50] sm:$0xff] }
 0x117   : > { %v11404_v35 = vpop.f32.mrb[20].mxu0  ;;  %v11715_v14 = vpop.f32.mrb[20].mxu1  ;;  %v5203_v39 = vadd.f32 1e-05, %v4807_v12  ;;  %7577 = vperm.xlu0 %12295, %v6181_v18   ;;  %v4416_v41 = vmul.f32 %v13599_v30, %v13599_v30  ;;  %12323 = vrsqrt.f32 %v5202_v2  ;;  %v6182_v46 = vsub.f32 %v5786_v7, %v13550_v29 }
 0x118   : > { %v4809_v40 = vmax.f32 %v4611_v26, 0.0  ;;  %v4415_v42 = vmul.f32 %v13601_v31, %v13601_v31  ;;  %v1265_v44 = vpop.f32.mrb[21].mxu0  ;;  %v3112_v45 = vpop.f32.mrb[21].mxu1  ;;  %6404 = vperm.xlu1 %12296, %v5590_v15   ;;  %v4217_v47 = vmul.f32 0.020408163, %v3102_v11  ;;  %v13617_v48 = vmul.f32 %v5590_v15, %v13466_v33 }
 0x119   : > { %v12316_v50 = vpop.eup %12315  ;;  %v5204_v51 = vadd.f32 1e-05, %v4808_v17  ;;  %v5592_v53 = vmul.f32 %v12312_v25, %v4998_v32  ;;  %v4614_v55 = vsub.f32 %v4218_v34, %v4416_v41  ;;  %v13620_v56 = vmul.f32 %v5591_v28, %v13479_v54  ;;  %v5000_v54 = vld [vmem:[%s21702_s2 + $0x48] sm:$0xff] }
 0x11a   : > { %v4810_v61 = vmax.f32 %v4612_v20, 0.0  ;;  %v4613_v0 = vsub.f32 %v4217_v47, %v4415_v42  ;;  %v5593_v29 = vmul.f32 %v12314_v38, %v4999_v43  ;;  %v13625_v3 = vmul.f32 0.020408163, %v11404_v35  ;;  %v13666_v43 = vld [vmem:[%s21700_s0 + $0x330] sm:$0xff] }
 0x11b   : > { %v11407_v57 = vpop.f32.mrb[22].mxu0  ;;  %v11718_v59 = vpop.f32.mrb[22].mxu1  ;;  %12325 = vrsqrt.f32 %v5203_v39  ;;  %v5205_v9 = vadd.f32 1e-05, %v4809_v40  ;;  %6409 = vperm.xlu0 %12295, %v5591_v28   ;;  %v13630_v19 = vmul.f32 0.020408163, %v1265_v44  ;;  %v6183_v17 = vsub.f32 %v5787_v62, %v13588_v21  ;;  %11525 = vmatprep.mubr.msk.f32.mxu0 %vm500_vm0, %v13666_v43 }
 0x11c   : > { %v1275_v33 = vpop.f32.mrb[23].mxu0  ;;  %v3122_v4 = vpop.f32.mrb[23].mxu1  ;;  %7582 = vperm.xlu1 %12296, %v6182_v46   ;;  %v4811_v11 = vmax.f32 %v4613_v0, 0.0  ;;  %v4418_v2 = vmul.f32 %v13625_v3, %v13625_v3  ;;  %v4220_v12 = vmul.f32 0.020408163, %v11715_v14  ;;  %12327 = vrsqrt.f32 %v5204_v51  ;;  %v5788_v21 = vld [vmem:[%s21703_s3 + $0x28] sm:$0xff] }
 0x11d   : > { %v12318_v8 = vpop.eup %12317  ;;  %v4219_v15 = vmul.f32 0.020408163, %v3112_v45  ;;  %v4417_v18 = vmul.f32 %v13630_v19, %v13630_v19  ;;  %v13641_v20 = vmul.f32 %v5592_v53, %v13477_v49  ;;  %v5206_v25 = vadd.f32 1e-05, %v4810_v61  ;;  %v5002_v14 = vld [vmem:[%s21702_s2 + $0x58] sm:$0xff]  ;;  %22066 = vst [vmem:[#allocation2_spill] sm:$0xff] %v13666_v43 }
 0x11e   : > { %v12320_v10 = vpop.eup %12319  ;;  %v13643_v26 = vmul.f32 %v12316_v50, %v5000_v54  ;;  %v4616_v7 = vsub.f32 %v4220_v12, %v4418_v2  ;;  %v13646_v28 = vmul.f32 %v5593_v29, %v13495_v13  ;;  %v4812_v34 = vmax.f32 %v4614_v55, 0.0  ;;  %v5003_v13 = vld [vmem:[%s21702_s2 + $0x60] sm:$0xff]  ;;  %v13671_v44 = vld [vmem:[%s21700_s0 + $0x338] sm:$0xff]  ;;  %v5004_v2 = vld [vmem:[%s21702_s2 + $0x68] sm:$0xff] }
 0x11f   : > { %v11410_v22 = vpop.f32.mrb[24].mxu0  ;;  %v11721_v23 = vpop.f32.mrb[24].mxu1  ;;  %7587 = vperm.xlu0 %12295, %v6183_v17   ;;  %v4615_v35 = vsub.f32 %v4219_v15, %v4417_v18  ;;  %v13651_v49 = vmul.f32 %v12320_v10, %v5001_v16  ;;  %v13656_v39 = vmul.f32 0.020408163, %v11407_v57  ;;  %12329 = vrsqrt.f32 %v5205_v9  ;;  %22067 = vst [vmem:[#allocation3_spill] sm:$0xff] %v13671_v44  ;;  %v5789_v57 = vld [vmem:[%s21703_s3 + $0x30] sm:$0xff]  ;;  %11526 = vmatmul.mubr.msk.f32.gmra.mrb[102].mxu0 %vm500_vm0, %v13671_v44 }
 0x120   : > { %v1285_v38 = vpop.f32.mrb[25].mxu0  ;;  %v3132_v32 = vpop.f32.mrb[25].mxu1  ;;  %6414 = vperm.xlu1 %12296, %v5592_v53   ;;  %v5207_v41 = vadd.f32 1e-05, %v4811_v11  ;;  %v13661_v42 = vmul.f32 0.020408163, %v1275_v33  ;;  %12331 = vrsqrt.f32 %v5206_v25  ;;  %v6184_v55 = vsub.f32 %v5788_v21, %v13617_v48 }
 0x121   : > { %v12322_v40 = vpop.eup %12321  ;;  %v4813_v45 = vmax.f32 %v4615_v35, 0.0  ;;  %v4420_v46 = vmul.f32 %v13656_v39, %v13656_v39  ;;  %v4222_v47 = vmul.f32 0.020408163, %v11718_v59  ;;  %v4221_v50 = vmul.f32 0.020408163, %v3122_v4 }
 0x122   : > { %v12324_v53 = vpop.eup %12323  ;;  %v4419_v61 = vmul.f32 %v13661_v42, %v13661_v42  ;;  %v13685_v62 = vmul.f32 %v13643_v26, %v13492_v6  ;;  %v5208_v33 = vadd.f32 1e-05, %v4812_v34  ;;  %v13689_v4 = vmul.f32 %v12318_v8, %v5002_v14 }
 0x123   : > { %v11413_v51 = vpop.f32.mrb[26].mxu0  ;;  %v11724_v0 = vpop.f32.mrb[26].mxu1  ;;  %6419 = vperm.xlu0 %12295, %v5593_v29   ;;  %v4618_v48 = vsub.f32 %v4222_v47, %v4420_v46  ;;  %v13693_v9 = vmul.f32 %v13651_v49, %v13511_v36  ;;  %v4814_v10 = vmax.f32 %v4616_v7, 0.0  ;;  %v13695_v6 = vmul.f32 %v12322_v40, %v5003_v13  ;;  %v5005_v29 = vld [vmem:[%s21702_s2 + $0x70] sm:$0xff] }
 0x124   : > { %v1295_v59 = vpop.f32.mrb[27].mxu0  ;;  %v3142_v54 = vpop.f32.mrb[27].mxu1  ;;  %7592 = vperm.xlu1 %12296, %v6184_v55   ;;  %v4617_v11 = vsub.f32 %v4221_v50, %v4419_v61  ;;  %v13700_v12 = vmul.f32 0.020408163, %v11410_v22  ;;  %12333 = vrsqrt.f32 %v5207_v41  ;;  %v6185_v36 = vsub.f32 %v5789_v57, %v13620_v56  ;;  %v5790_v56 = vld [vmem:[%s21703_s3 + $0x38] sm:$0xff] }
 0x125   : > { %v12326_v8 = vpop.eup %12325  ;;  %v5209_v15 = vadd.f32 1e-05, %v4813_v45  ;;  %v13706_v16 = vmul.f32 0.020408163, %v1285_v38  ;;  %v13714_v22 = vmul.f32 0.020408163, %v11721_v23  ;;  %12335 = vrsqrt.f32 %v5208_v33 }
 0x126   : > { %v4815_v25 = vmax.f32 %v4617_v11, 0.0  ;;  %v13712_v7 = vmul.f32 %v13700_v12, %v13700_v12  ;;  %v4223_v34 = vmul.f32 0.020408163, %v3132_v32  ;;  %v12328_v35 = vpop.eup %12327  ;;  %v13723_v14 = vmul.f32 %v13689_v4, %v13503_v27  ;;  %v5791_v32 = vld [vmem:[%s21703_s3 + $0x40] sm:$0xff] }
 0x127   : > { %v11416_v17 = vpop.f32.mrb[28].mxu0  ;;  %v13708_v18 = vpop.f32.mrb[28].mxu1  ;;  %7597 = vperm.xlu0 %12295, %v6185_v36   ;;  %v4421_v38 = vmul.f32 %v13706_v16, %v13706_v16  ;;  %v5210_v23 = vadd.f32 1e-05, %v4814_v10  ;;  %v13729_v40 = vmul.f32 %v12324_v53, %v5004_v2  ;;  %v13735_v45 = vmul.f32 %v13695_v6, %v13528_v60  ;;  %v13740_v27 = vld [vmem:[%s21700_s0 + $0x340] sm:$0xff]  ;;  %v5006_v53 = vld [vmem:[%s21702_s2 + $0x78] sm:$0xff] }
 0x128   : > { %v1305_v21 = vpop.f32.mrb[29].mxu0  ;;  %v3152_v13 = vpop.f32.mrb[29].mxu1  ;;  %6424 = vperm.xlu1 %12296, %v13643_v26   ;;  %v4620_v41 = vsub.f32 %v13714_v22, %v13712_v7  ;;  %22068 = vst [vmem:[#allocation4_spill] sm:$0xff] %v13740_v27  ;;  %v13745_v26 = vld [vmem:[%s21700_s0 + $0x348] sm:$0xff]  ;;  %v4816_v46 = vmax.f32 %v4618_v48, 0.0  ;;  %v13747_v50 = vmul.f32 %v12326_v8, %v5005_v29  ;;  %11528 = vmatprep.mubr.msk.f32.mxu0 %vm500_vm0, %v13740_v27  ;;  %12337 = vrsqrt.f32 %v5209_v15 }
 0x129   : > { %22069 = vst [vmem:[#allocation5_spill] sm:$0xff] %v13745_v26  ;;  %v4619_v47 = vsub.f32 %v4223_v34, %v4421_v38  ;;  %v13752_v60 = vmul.f32 0.020408163, %v11413_v51  ;;  %v12330_v61 = vpop.eup %12329  ;;  %v6186_v33 = vsub.f32 %v5790_v56, %v13641_v20  ;;  %v5211_v48 = vadd.f32 1e-05, %v4815_v25  ;;  %11529 = vmatmul.mubr.msk.f32.gmra.mrb[104].mxu0 %vm500_vm0, %v13745_v26  ;;  %v5007_v20 = vld [vmem:[%s21702_s2 + $0x80] sm:$0xff] }
 0x12a   : > { %v13761_v10 = vmul.f32 0.020408163, %v1295_v59  ;;  %v4226_v8 = vmul.f32 0.020408163, %v11724_v0  ;;  %v4225_v36 = vmul.f32 0.020408163, %v3142_v54  ;;  %v12332_v59 = vpop.eup %12331  ;;  %v6187_v15 = vsub.f32 %v5791_v32, %v13646_v28 }
 0x12b   : > { %v13754_v55 = vpop.f32.mrb[30].mxu0  ;;  %v13756_v57 = vpop.f32.mrb[30].mxu1  ;;  %6429 = vperm.xlu0 %12295, %v13651_v49   ;;  %v4817_v51 = vmax.f32 %v4619_v47, 0.0  ;;  %v4424_v29 = vmul.f32 %v13752_v60, %v13752_v60  ;;  %v13780_v49 = vmul.f32 %v13729_v40, %v13524_v52  ;;  %12339 = vrsqrt.f32 %v5210_v23  ;;  %v5792_v0 = vld [vmem:[%s21703_s3 + $0x48] sm:$0xff]  ;;  %v13788_v54 = vld [vmem:[%s21703_s3 + $0x50] sm:$0xff] }
 0x12c   : > { %v13763_v11 = vpop.f32.mrb[31].mxu0  ;;  %v13765_v2 = vpop.f32.mrb[31].mxu1  ;;  %7602 = vperm.xlu1 %12296, %v6186_v33   ;;  %v4423_v25 = vmul.f32 %v13761_v10, %v13761_v10  ;;  %v13790_v7 = vmul.f32 %v12328_v35, %v5006_v53  ;;  %v5008_v22 = vld [vmem:[%s21702_s2 + $0x88] sm:$0xff]  ;;  %v13797_v52 = vmul.f32 %v13747_v50, %v13560_v37  ;;  %v5212_v38 = vadd.f32 1e-05, %v4816_v46  ;;  %v5009_v46 = vld [vmem:[%s21702_s2 + $0x90] sm:$0xff] }
 0x12d   : > { %v4622_v28 = vsub.f32 %v4226_v8, %v4424_v29  ;;  %v13803_v32 = vmul.f32 %v12330_v61, %v5007_v20  ;;  %v13805_v47 = vmul.f32 0.020408163, %v11416_v17  ;;  %12341 = vrsqrt.f32 %v5211_v48 }
 0x12e   : > { %v4621_v23 = vsub.f32 %v4225_v36, %v4423_v25  ;;  %v12334_v33 = vpop.eup %12333  ;;  %v4818_v29 = vmax.f32 %v4620_v41, 0.0  ;;  %v5213_v37 = vadd.f32 1e-05, %v4817_v51  ;;  %v13811_v8 = vmul.f32 0.020408163, %v1305_v21  ;;  %v13827_v21 = vld [vmem:[%s21700_s0 + $0x350] sm:$0xff] }
 0x12f   : > { %v13799_v34 = vpop.f32.mrb[32].mxu0  ;;  %v13801_v56 = vpop.f32.mrb[32].mxu1  ;;  %7607 = vperm.xlu0 %12295, %v6187_v15   ;;  %v13819_v17 = vmul.f32 %v13805_v47, %v13805_v47  ;;  %v13822_v36 = vmul.f32 0.020408163, %v13708_v18  ;;  %v4227_v20 = vmul.f32 0.020408163, %v3152_v13  ;;  %v6188_v48 = vsub.f32 %v5792_v0, %v13685_v62  ;;  %11531 = vmatprep.mubr.msk.f32.mxu0 %vm500_vm0, %v13827_v21 }
 0x130   : > { %v13807_v35 = vpop.f32.mrb[33].mxu0  ;;  %v13809_v53 = vpop.f32.mrb[33].mxu1  ;;  %6434 = vperm.xlu1 %12296, %v13689_v4   ;;  %v4819_v61 = vmax.f32 %v4621_v23, 0.0  ;;  %22070 = vst [vmem:[#allocation6_spill] sm:$0xff] %v13827_v21  ;;  %v6189_v4 = vsub.f32 %v13788_v54, %v13693_v9  ;;  %v4425_v51 = vmul.f32 %v13811_v8, %v13811_v8  ;;  %v13836_v15 = vmul.f32 %v13790_v7, %v13544_v24  ;;  %v13847_v62 = vld [vmem:[%s21700_s0 + $0x358] sm:$0xff] }
 0x131   : > { %v12336_v41 = vpop.eup %12335  ;;  %22071 = vst [vmem:[#allocation7_spill] sm:$0xff] %v13847_v62  ;;  %12343 = vrsqrt.f32 %v5212_v38  ;;  %v13849_v9 = vmul.f32 %v12332_v59, %v5008_v22  ;;  %v4624_v25 = vsub.f32 %v13822_v36, %v13819_v17  ;;  %v13855_v24 = vmul.f32 %v13803_v32, %v13581_v63  ;;  %11532 = vmatmul.mubr.msk.f32.gmra.mrb[106].mxu0 %vm500_vm0, %v13847_v62  ;;  %v5010_v22 = vld [vmem:[%s21702_s2 + $0x98] sm:$0xff] }
 0x132   : > { %v5214_v23 = vadd.f32 1e-05, %v4818_v29  ;;  %v4623_v38 = vsub.f32 %v4227_v20, %v4425_v51  ;;  %v13864_v59 = vmul.f32 %v12334_v33, %v5009_v46  ;;  %v13870_v63 = vmul.f32 0.020408163, %v13754_v55  ;;  %v12338_v17 = vpop.eup %12337 }
 0x133   : > { %v13838_v18 = vpop.f32.mrb[34].mxu0  ;;  %v13840_v13 = vpop.f32.mrb[34].mxu1  ;;  %6439 = vperm.xlu0 %12295, %v13695_v6   ;;  %12345 = vrsqrt.f32 %v5213_v37  ;;  %v4820_v36 = vmax.f32 %v4622_v28, 0.0  ;;  %v5215_v5 = vadd.f32 1e-05, %v4819_v61  ;;  %v5011_v6 = vld [vmem:[%s21702_s2 + $0xa0] sm:$0xff]  ;;  %v13895_v61 = vmul.f32 %v13849_v9, %v13576_v58 }
 0x134   : > { %v13857_v0 = vpop.f32.mrb[35].mxu0  ;;  %v13859_v54 = vpop.f32.mrb[35].mxu1  ;;  %7612 = vperm.xlu1 %12296, %v6188_v48   ;;  %v13873_v1 = vmul.f32 0.020408163, %v13763_v11  ;;  %v4821_v33 = vmax.f32 %v4623_v38, 0.0  ;;  %v13880_v29 = vmul.f32 %v13870_v63, %v13870_v63  ;;  %v5794_v11 = vld [vmem:[%s21703_s3 + $0x58] sm:$0xff]  ;;  %12347 = vrsqrt.f32 %v5214_v23 }
 0x135   : > { %v13883_v55 = vmul.f32 0.020408163, %v13756_v57  ;;  %v4229_v46 = vmul.f32 0.020408163, %v13765_v2  ;;  %v12340_v57 = vpop.eup %12339  ;;  %v5795_v2 = vld [vmem:[%s21703_s3 + $0x60] sm:$0xff]  ;;  %v13904_v51 = vmul.f32 %v12336_v41, %v5010_v22  ;;  %v5012_v58 = vld [vmem:[%s21702_s2 + $0xa8] sm:$0xff]  ;;  %v13913_v62 = vmul.f32 %v13864_v59, %v13601_v31 }
 0x136   : > { %v4427_v28 = vmul.f32 %v13873_v1, %v13873_v1  ;;  %v13918_v26 = vmul.f32 %v12338_v17, %v5011_v6  ;;  %v13921_v41 = vmul.f32 0.020408163, %v13799_v34  ;;  %v5013_v22 = vld [vmem:[%s21702_s2 + $0xb0] sm:$0xff]  ;;  %v13929_v31 = vld [vmem:[%s21700_s0 + $0x360] sm:$0xff]  ;;  %v6190_v17 = vsub.f32 %v5794_v11, %v13723_v14 }
 0x137   : > { %v13886_v37 = vpop.f32.mrb[36].mxu0  ;;  %v13899_v48 = vpop.f32.mrb[36].mxu1  ;;  %7617 = vperm.xlu0 %12295, %v6189_v4   ;;  %v4626_v38 = vsub.f32 %v13883_v55, %v13880_v29  ;;  %v5216_v4 = vadd.f32 1e-05, %v4820_v36  ;;  %22072 = vst [vmem:[#allocation8_spill] sm:$0xff] %v13929_v31  ;;  %12349 = vrsqrt.f32 %v5215_v5  ;;  %11534 = vmatprep.mubr.msk.f32.mxu0 %vm500_vm0, %v13929_v31  ;;  %v13964_v31 = vmul.f32 %v12340_v57, %v5012_v58 }
 0x138   : > { %v13897_v20 = vpop.f32.mrb[37].mxu0  ;;  %v13915_v21 = vpop.f32.mrb[37].mxu1  ;;  %6444 = vperm.xlu1 %12296, %v13729_v40   ;;  %v4625_v23 = vsub.f32 %v4229_v46, %v4427_v28  ;;  %v13934_v40 = vld [vmem:[%s21700_s0 + $0x368] sm:$0xff]  ;;  %v5217_v34 = vadd.f32 1e-05, %v4821_v33  ;;  %v4822_v46 = vmax.f32 %v4624_v25, 0.0  ;;  %v4430_v28 = vmul.f32 %v13921_v41, %v13921_v41 }
 0x139   : > { %22073 = vst [vmem:[#allocation9_spill] sm:$0xff] %v13934_v40  ;;  %v12342_v36 = vpop.eup %12341  ;;  %v13938_v6 = vmul.f32 0.020408163, %v13807_v35  ;;  %v4232_v27 = vmul.f32 0.020408163, %v13801_v56  ;;  %11535 = vmatmul.mubr.msk.f32.gmra.mrb[108].mxu0 %vm500_vm0, %v13934_v40  ;;  %v6191_v35 = vsub.f32 %v5795_v2, %v13735_v45  ;;  %v13960_v25 = vmul.f32 %v13904_v51, %v13599_v30  ;;  %v5796_v45 = vld [vmem:[%s21703_s3 + $0x68] sm:$0xff] }
 0x13a   : > { %v4231_v14 = vmul.f32 0.020408163, %v13809_v53  ;;  %v4823_v53 = vmax.f32 %v4625_v23, 0.0  ;;  %12351 = vrsqrt.f32 %v5216_v4  ;;  %v13973_v30 = vmul.f32 %v12342_v36, %v5013_v22 }
 0x13b   : > { %v13940_v29 = vpop.f32.mrb[38].mxu0  ;;  %v13942_v55 = vpop.f32.mrb[38].mxu1  ;;  %6449 = vperm.xlu0 %12295, %v13747_v50   ;;  %v4429_v33 = vmul.f32 %v13938_v6, %v13938_v6  ;;  %v4628_v44 = vsub.f32 %v4232_v27, %v4430_v28  ;;  %v13968_v50 = vmul.f32 %v13918_v26, %v13630_v19  ;;  %v13979_v57 = vmul.f32 0.020408163, %v13838_v18 }
 0x13c   : > { %v13950_v5 = vpop.f32.mrb[39].mxu0  ;;  %v13962_v11 = vpop.f32.mrb[39].mxu1  ;;  %7622 = vperm.xlu1 %12296, %v6190_v17   ;;  %v5014_v17 = vld [vmem:[%s21702_s2 + $0xb8] sm:$0xff]  ;;  %v5218_v4 = vadd.f32 1e-05, %v4822_v46  ;;  %12353 = vrsqrt.f32 %v5217_v34  ;;  %v4824_v36 = vmax.f32 %v4626_v38, 0.0 }
 0x13d   : > { %v12344_v56 = vpop.eup %12343  ;;  %v4627_v2 = vsub.f32 %v4231_v14, %v4429_v33  ;;  %22074 = vst [vmem:[#allocation10_spill] sm:$0xff] %v13979_v57  ;;  %v13986_v23 = vmul.f32 0.020408163, %v13857_v0  ;;  %v4432_v18 = vmul.f32 %v13979_v57, %v13979_v57  ;;  %v4234_v14 = vmul.f32 0.020408163, %v13840_v13  ;;  %v5015_v34 = vld [vmem:[%s21702_s2 + $0xc0] sm:$0xff] }
 0x13e   : > { %v12346_v19 = vpop.eup %12345  ;;  %v13996_v33 = vmul.f32 0.020408163, %v13859_v54  ;;  %v5797_v0 = vld [vmem:[%s21703_s3 + $0x70] sm:$0xff]  ;;  %v5219_v46 = vadd.f32 1e-05, %v4823_v53  ;;  %v4826_v38 = vmax.f32 %v4628_v44, 0.0  ;;  %v14011_v13 = vmul.f32 %v13964_v31, %v13625_v3 }
 0x13f   : > { %v13981_v27 = vpop.f32.mrb[40].mxu0  ;;  %v13983_v58 = vpop.f32.mrb[40].mxu1  ;;  %22075 = vst [vmem:[#allocation11_spill] sm:$0xff] %v13986_v23  ;;  %7627 = vperm.xlu0 %12295, %v6191_v35   ;;  %v14007_v35 = vmul.f32 %v13986_v23, %v13986_v23  ;;  %v14016_v54 = vld [vmem:[%s21700_s0 + $0x370] sm:$0xff]  ;;  %v4825_v44 = vmax.f32 %v4627_v2, 0.0  ;;  %v14023_v40 = vmul.f32 %v12344_v56, %v5014_v17  ;;  %v4630_v43 = vsub.f32 %v4234_v14, %v4432_v18 }
 0x140   : > { %v13988_v28 = vpop.f32.mrb[41].mxu0  ;;  %v13990_v22 = vpop.f32.mrb[41].mxu1  ;;  %6454 = vperm.xlu1 %12296, %v13790_v7   ;;  %22076 = vst [vmem:[#allocation12_spill] sm:$0xff] %v14011_v13  ;;  %22077 = vst [vmem:[#allocation13_spill] sm:$0xff] %v14016_v54  ;;  %v14021_v7 = vld [vmem:[%s21700_s0 + $0x378] sm:$0xff]  ;;  %v14027_v57 = vmul.f32 %v13973_v30, %v13661_v42  ;;  %11537 = vmatprep.mubr.msk.f32.mxu0 %vm500_vm0, %v14016_v54  ;;  %v14038_v13 = vld [vmem:[%s21700_s0 + $0x380] sm:$0xff]  ;;  %v6192_v56 = vsub.f32 %v5796_v45, %v13780_v49  ;;  %12355 = vrsqrt.f32 %v5218_v4 }
 0x141   : > { %22078 = vst [vmem:[#allocation14_spill] sm:$0xff] %v14021_v7  ;;  %v12348_v53 = vpop.eup %12347  ;;  %22079 = vst [vmem:[#allocation15_spill] sm:$0xff] %v14038_v13  ;;  %v4629_v2 = vsub.f32 %v13996_v33, %v14007_v35  ;;  %v14043_v17 = vmul.f32 %v12346_v19, %v5015_v34  ;;  %v5016_v42 = vld [vmem:[%s21702_s2 + $0xc8] sm:$0xff]  ;;  %v14049_v18 = vmul.f32 0.020408163, %v13886_v37  ;;  %11538 = vmatmul.mubr.msk.f32.gmra.mrb[110].mxu0 %vm500_vm0, %v14021_v7  ;;  %v5017_v37 = vld [vmem:[%s21702_s2 + $0xd0] sm:$0xff]  ;;  %12357 = vrsqrt.f32 %v5219_v46 }
 0x142   : > { %v12350_v49 = vpop.eup %12349  ;;  %v6193_v45 = vsub.f32 %v5797_v0, %v13797_v52  ;;  %v5220_v19 = vadd.f32 1e-05, %v4824_v36  ;;  %v14060_v33 = vmul.f32 0.020408163, %v13897_v20  ;;  %11540 = vmatprep.mubr.msk.f32.mxu0 %vm500_vm0, %v14038_v13  ;;  %v14070_v34 = vld [vmem:[%s21700_s0 + $0x388] sm:$0xff]  ;;  %v5798_v36 = vld [vmem:[%s21703_s3 + $0x78] sm:$0xff]  ;;  %v14089_v7 = vmul.f32 %v12348_v53, %v5016_v42 }
 0x143   : > { %v14029_v3 = vpop.f32.mrb[42].mxu0  ;;  %v14031_v23 = vpop.f32.mrb[42].mxu1  ;;  %22080 = vst [vmem:[#allocation16_spill] sm:$0xff] %v14049_v18  ;;  %6459 = vperm.xlu0 %12295, %v13803_v32   ;;  %22082 = vst [vmem:[#allocation18_spill] sm:$0xff] %v14070_v34  ;;  %v5222_v32 = vadd.f32 1e-05, %v4826_v38  ;;  %v4434_v52 = vmul.f32 %v14049_v18, %v14049_v18  ;;  %v14093_v18 = vmul.f32 %v14043_v17, %v13706_v16 }
 0x144   : > { %v14051_v14 = vpop.f32.mrb[43].mxu0  ;;  %v14053_v54 = vpop.f32.mrb[43].mxu1  ;;  %22081 = vst [vmem:[#allocation17_spill] sm:$0xff] %v14060_v33  ;;  %7632 = vperm.xlu1 %12296, %v6192_v56   ;;  %v4236_v20 = vmul.f32 0.020408163, %v13899_v48  ;;  %v4433_v35 = vmul.f32 %v14060_v33, %v14060_v33  ;;  %v14083_v56 = vmul.f32 %v14023_v40, %v13656_v39  ;;  %v4828_v48 = vmax.f32 %v4630_v43, 0.0 }
 0x145   : > { %v4235_v4 = vmul.f32 0.020408163, %v13915_v21  ;;  %v5221_v0 = vadd.f32 1e-05, %v4825_v44  ;;  %11541 = vmatmul.mubr.msk.f32.gmra.mrb[112].mxu0 %vm500_vm0, %v14070_v34  ;;  %v12352_v39 = vpop.eup %12351  ;;  %12359 = vrsqrt.f32 %v5220_v19  ;;  %v5018_v43 = vld [vmem:[%s21702_s2 + $0xd8] sm:$0xff]  ;;  %v6194_v42 = vsub.f32 %v5798_v36, %v13836_v15 }
 0x146   : > { %22083 = vst [vmem:[#allocation19_spill] sm:$0xff] %v14083_v56  ;;  %v4632_v21 = vsub.f32 %v4236_v20, %v4434_v52  ;;  %v14101_v56 = vmul.f32 %v12350_v49, %v5017_v37  ;;  %v14107_v16 = vmul.f32 0.020408163, %v13940_v29  ;;  %v12354_v53 = vpop.eup %12353  ;;  %12361 = vrsqrt.f32 %v5222_v32  ;;  %v5019_v49 = vld [vmem:[%s21702_s2 + $0xe0] sm:$0xff]  ;;  %v14125_v29 = vld [vmem:[%s21700_s0 + $0x398] sm:$0xff] }
 0x147   : > { %v14085_v38 = vpop.f32.mrb[44].mxu0  ;;  %v14087_v13 = vpop.f32.mrb[44].mxu1  ;;  %7637 = vperm.xlu0 %12295, %v6193_v45   ;;  %v4631_v33 = vsub.f32 %v4235_v4, %v4433_v35  ;;  %v14112_v52 = vmul.f32 0.020408163, %v13950_v5  ;;  %v14120_v45 = vld [vmem:[%s21700_s0 + $0x390] sm:$0xff]  ;;  %22085 = vst [vmem:[#allocation21_spill] sm:$0xff] %v14125_v29  ;;  %12363 = vrsqrt.f32 %v5221_v0  ;;  %v14142_v4 = vmul.f32 %v14089_v7, %v13700_v12 }
 0x148   : > { %v14095_v46 = vpop.f32.mrb[45].mxu0  ;;  %v14097_v44 = vpop.f32.mrb[45].mxu1  ;;  %6464 = vperm.xlu1 %12296, %v13849_v9   ;;  %22084 = vst [vmem:[#allocation20_spill] sm:$0xff] %v14120_v45  ;;  %v4827_v9 = vmax.f32 %v4629_v2, 0.0  ;;  %v4436_v15 = vmul.f32 %v14107_v16, %v14107_v16  ;;  %v4238_v5 = vmul.f32 0.020408163, %v13942_v55  ;;  %11543 = vmatprep.mubr.msk.f32.mxu0 %vm500_vm0, %v14120_v45  ;;  %v14151_v35 = vmul.f32 %v12352_v39, %v5018_v43 }
 0x149   : > { %v4237_v19 = vmul.f32 0.020408163, %v13962_v11  ;;  %v5799_v32 = vld [vmem:[%s21703_s3 + $0x80] sm:$0xff]  ;;  %v5224_v20 = vadd.f32 1e-05, %v4828_v48  ;;  %v4435_v2 = vmul.f32 %v14112_v52, %v14112_v52  ;;  %22086 = vst [vmem:[#allocation22_spill] sm:$0xff] %v14142_v4  ;;  %11544 = vmatmul.mubr.msk.f32.gmra.mrb[114].mxu0 %vm500_vm0, %v14125_v29  ;;  %v14155_v48 = vmul.f32 %v14101_v56, %v13761_v10 }
 0x14a   : > { %v4830_v36 = vmax.f32 %v4632_v21, 0.0  ;;  %v4634_v0 = vsub.f32 %v4238_v5, %v4436_v15  ;;  %v5800_v12 = vld [vmem:[%s21703_s3 + $0x88] sm:$0xff]  ;;  %v4829_v34 = vmax.f32 %v4631_v33, 0.0  ;;  %v14162_v29 = vmul.f32 %v12354_v53, %v5019_v49  ;;  %v12356_v10 = vpop.eup %12355 }
 0x14b   : > { %v14131_v37 = vpop.f32.mrb[46].mxu0  ;;  %v14146_v11 = vpop.f32.mrb[46].mxu1  ;;  %6469 = vperm.xlu0 %12295, %v13864_v59   ;;  %22087 = vst [vmem:[#allocation23_spill] sm:$0xff] %v14155_v48  ;;  %v4633_v4 = vsub.f32 %v4237_v19, %v4435_v2  ;;  %v5020_v59 = vld [vmem:[%s21702_s2 + $0xe8] sm:$0xff]  ;;  %v14168_v21 = vmul.f32 0.020408163, %v13981_v27  ;;  %v6195_v39 = vsub.f32 %v5799_v32, %v13855_v24 }
 0x14c   : > { %v14144_v55 = vpop.f32.mrb[47].mxu0  ;;  %v14157_v45 = vpop.f32.mrb[47].mxu1  ;;  %7642 = vperm.xlu1 %12296, %v6194_v42   ;;  %v5223_v43 = vadd.f32 1e-05, %v4827_v9  ;;  %v14172_v42 = vmul.f32 0.020408163, %v13988_v28  ;;  %v6196_v28 = vsub.f32 %v5800_v12, %v13895_v61  ;;  %v14212_v12 = vmul.f32 %v14162_v29, %v13811_v8 }
 0x14d   : > { %v14180_v53 = vmul.f32 %v14168_v21, %v14168_v21  ;;  %v14183_v49 = vmul.f32 0.020408163, %v13983_v58  ;;  %v14186_v27 = vmul.f32 0.020408163, %v13990_v22  ;;  %v12358_v24 = vpop.eup %12357  ;;  %v5801_v9 = vld [vmem:[%s21703_s3 + $0x90] sm:$0xff]  ;;  %v14198_v58 = vmul.f32 %v14151_v35, %v13752_v60  ;;  %v14217_v60 = vld [vmem:[%s21700_s0 + $0x3a0] sm:$0xff] }
 0x14e   : > { %v5226_v19 = vadd.f32 1e-05, %v4830_v36  ;;  %v4437_v32 = vmul.f32 %v14172_v42, %v14172_v42  ;;  %v5225_v2 = vadd.f32 1e-05, %v4829_v34  ;;  %v5021_v36 = vld [vmem:[%s21702_s2 + $0xf0] sm:$0xff]  ;;  %22089 = vst [vmem:[#allocation25_spill] sm:$0xff] %v14212_v12  ;;  %12365 = vrsqrt.f32 %v5223_v43  ;;  %11546 = vmatprep.mubr.msk.f32.mxu0 %vm500_vm0, %v14217_v60 }
 0x14f   : > { %v14174_v15 = vpop.f32.mrb[48].mxu0  ;;  %v14176_v33 = vpop.f32.mrb[48].mxu1  ;;  %7647 = vperm.xlu0 %12295, %v6195_v39   ;;  %22088 = vst [vmem:[#allocation24_spill] sm:$0xff] %v14198_v58  ;;  %v14203_v39 = vmul.f32 %v12356_v10, %v5020_v59  ;;  %v4636_v61 = vsub.f32 %v14183_v49, %v14180_v53  ;;  %22090 = vst [vmem:[#allocation26_spill] sm:$0xff] %v14217_v60  ;;  %v4832_v59 = vmax.f32 %v4634_v0, 0.0  ;;  %v5022_v8 = vld [vmem:[%s21702_s2 + $0xf8] sm:$0xff]  ;;  %12367 = vrsqrt.f32 %v5224_v20 }
 0x150   : > { %v14188_v5 = vpop.f32.mrb[49].mxu0  ;;  %v14200_v22 = vpop.f32.mrb[49].mxu1  ;;  %6474 = vperm.xlu1 %12296, %v13904_v51   ;;  %v14222_v51 = vld [vmem:[%s21700_s0 + $0x3a8] sm:$0xff]  ;;  %v4635_v10 = vsub.f32 %v14186_v27, %v4437_v32  ;;  %v14229_v53 = vmul.f32 0.020408163, %v14029_v3  ;;  %v6197_v43 = vsub.f32 %v5801_v9, %v13913_v62  ;;  %v4831_v0 = vmax.f32 %v4633_v4, 0.0 }
 0x151   : > { %22091 = vst [vmem:[#allocation27_spill] sm:$0xff] %v14222_v51  ;;  %v12360_v34 = vpop.eup %12359  ;;  %v14239_v27 = vmul.f32 0.020408163, %v14051_v14  ;;  %11547 = vmatmul.mubr.msk.f32.gmra.mrb[116].mxu0 %vm500_vm0, %v14222_v51  ;;  %v14248_v3 = vmul.f32 %v12358_v24, %v5021_v36  ;;  %v14255_v62 = vmul.f32 0.020408163, %v14031_v23  ;;  %12369 = vrsqrt.f32 %v5226_v19  ;;  %v5802_v23 = vld [vmem:[%s21703_s3 + $0x98] sm:$0xff] }
 0x152   : > { %22092 = vst [vmem:[#allocation28_spill] sm:$0xff] %v14229_v53  ;;  %v12362_v58 = vpop.eup %12361  ;;  %v14252_v60 = vmul.f32 %v14229_v53, %v14229_v53  ;;  %v14258_v14 = vmul.f32 0.020408163, %v14053_v54  ;;  %v14260_v4 = vmul.f32 %v12360_v34, %v5022_v8  ;;  %v14268_v24 = vmul.f32 %v14203_v39, %v13805_v47  ;;  %v12705_v19 = vld [vmem:[%s21700_s0 + $0x300] sm:$0xff]  ;;  %v12706_v47 = vld [vmem:[%s21700_s0 + $0x308] sm:$0xff] }
 0x153   : > { %v14231_v49 = vpop.f32.mrb[50].mxu0  ;;  %v14233_v12 = vpop.f32.mrb[50].mxu1  ;;  %22093 = vst [vmem:[#allocation29_spill] sm:$0xff] %v14239_v27  ;;  %6479 = vperm.xlu0 %12295, %v13918_v26   ;;  %v14264_v26 = vmul.f32 %v14239_v27, %v14239_v27  ;;  %v5228_v9 = vadd.f32 1e-05, %v4832_v59  ;;  %v2250_v36 = vmul.f32 %v12705_v19, %v12705_v19  ;;  %v2251_v34 = vmul.f32 %v12706_v47, %v12706_v47  ;;  %v5024_v51 = vld [vmem:[%s21702_s2 + $0x108] sm:$0xff] }
 0x154   : > { %v14241_v32 = vpop.f32.mrb[51].mxu0  ;;  %v14243_v48 = vpop.f32.mrb[51].mxu1  ;;  %7652 = vperm.xlu1 %12296, %v6196_v28   ;;  %22094 = vst [vmem:[#allocation30_spill] sm:$0xff] %v14268_v24  ;;  %v4638_v54 = vsub.f32 %v14255_v62, %v14252_v60  ;;  %v5023_v28 = vld [vmem:[%s21702_s2 + $0x100] sm:$0xff]  ;;  %12371 = vrsqrt.f32 %v5225_v2  ;;  %v5227_v60 = vadd.f32 1e-05, %v4831_v0 }
 0x155   : > { %v12364_v20 = vpop.eup %12363  ;;  %v4637_v62 = vsub.f32 %v14258_v14, %v14264_v26  ;;  %v14300_v47 = vld [vmem:[%s21700_s0 + $0x3b0] sm:$0xff]  ;;  %v5803_v2 = vld [vmem:[%s21703_s3 + $0xa0] sm:$0xff]  ;;  %v4834_v0 = vmax.f32 %v4636_v61, 0.0  ;;  %v4833_v14 = vmax.f32 %v4635_v10, 0.0  ;;  %11827 = vmatprep.mubr.msk.f32.mxu1 %vm500_vm0, %v2250_v36  ;;  %v14308_v26 = vmul.f32 %v14248_v3, %v13873_v1  ;;  %v14316_v27 = vld [vmem:[%s21700_s0 + $0x3b8] sm:$0xff] }
 0x156   : > { %22095 = vst [vmem:[#allocation31_spill] sm:$0xff] %v14300_v47  ;;  %v14311_v53 = vmul.f32 0.020408163, %v14085_v38  ;;  %22097 = vst [vmem:[#allocation33_spill] sm:$0xff] %v14316_v27  ;;  %11828 = vmatmul.mubr.msk.f32.gmra.mrb[96].mxu1 %vm500_vm0, %v2251_v34  ;;  %v14323_v61 = vmul.f32 0.020408163, %v14095_v46  ;;  %v14330_v38 = vmul.f32 %v14260_v4, %v13870_v63  ;;  %12373 = vrsqrt.f32 %v5228_v9  ;;  %11549 = vmatprep.mubr.msk.f32.mxu0 %vm500_vm0, %v14300_v47 }
 0x157   : > { %v14284_v8 = vpop.f32.mrb[52].mxu0  ;;  %v14286_v59 = vpop.f32.mrb[52].mxu1  ;;  %7657 = vperm.xlu0 %12295, %v6197_v43   ;;  %v14319_v43 = vmul.f32 %v12364_v20, %v5023_v28  ;;  %v14326_v1 = vmul.f32 0.020408163, %v14087_v13  ;;  %v14332_v10 = vmul.f32 %v12362_v58, %v5024_v51  ;;  %v14339_v20 = vmul.f32 0.020408163, %v14097_v44  ;;  %11550 = vmatmul.mubr.msk.f32.gmra.mrb[118].mxu0 %vm500_vm0, %v14316_v27 }
 0x158   : > { %v14293_v24 = vpop.f32.mrb[53].mxu0  ;;  %v14295_v19 = vpop.f32.mrb[53].mxu1  ;;  %22096 = vst [vmem:[#allocation32_spill] sm:$0xff] %v14311_v53  ;;  %6484 = vperm.xlu1 %12296, %v13964_v31   ;;  %22099 = vst [vmem:[#allocation35_spill] sm:$0xff] %v14330_v38  ;;  %v14336_v31 = vmul.f32 %v14311_v53, %v14311_v53  ;;  %v6198_v63 = vsub.f32 %v5802_v23, %v13960_v25  ;;  %v6199_v13 = vsub.f32 %v5803_v2, %v13968_v50  ;;  %v5025_v50 = vld [vmem:[%s21702_s2 + $0x110] sm:$0xff] }
 0x159   : > { %22098 = vst [vmem:[#allocation34_spill] sm:$0xff] %v14319_v43  ;;  %22100 = vst [vmem:[#allocation36_spill] sm:$0xff] %v14332_v10  ;;  %12375 = vrsqrt.f32 %v5227_v60  ;;  %v14351_v58 = vmul.f32 %v14323_v61, %v14323_v61  ;;  %v12366_v9 = vpop.eup %12365  ;;  %v5230_v36 = vadd.f32 1e-05, %v4834_v0  ;;  %v12707_v23 = vld [vmem:[%s21700_s0 + $0x310] sm:$0xff]  ;;  %v12708_v60 = vld [vmem:[%s21700_s0 + $0x318] sm:$0xff]  ;;  %v14381_v47 = vmul.f32 %v14319_v43, %v13938_v6 }
 0x15a   : > { %v4640_v25 = vsub.f32 %v14326_v1, %v14336_v31  ;;  %v2252_v34 = vmul.f32 %v12707_v23, %v12707_v23  ;;  %v2253_v2 = vmul.f32 %v12708_v60, %v12708_v60  ;;  %v12368_v27 = vpop.eup %12367  ;;  %v5229_v0 = vadd.f32 1e-05, %v4833_v14  ;;  %v5026_v23 = vld [vmem:[%s21702_s2 + $0x118] sm:$0xff] }
 0x15b   : > { %v14341_v28 = vpop.f32.mrb[54].mxu0  ;;  %v14343_v46 = vpop.f32.mrb[54].mxu1  ;;  %6489 = vperm.xlu0 %12295, %v13973_v30   ;;  %v5804_v30 = vld [vmem:[%s21703_s3 + $0xa8] sm:$0xff]  ;;  %v4836_v1 = vmax.f32 %v4638_v54, 0.0  ;;  %v4639_v31 = vsub.f32 %v14339_v20, %v14351_v58  ;;  %22101 = vst [vmem:[#allocation37_spill] sm:$0xff] %v14381_v47  ;;  %v4835_v60 = vmax.f32 %v4637_v62, 0.0  ;;  %v14392_v54 = vmul.f32 %v14332_v10, %v13921_v41 }
 0x15c   : > { %v14353_v51 = vpop.f32.mrb[55].mxu0  ;;  %v14355_v44 = vpop.f32.mrb[55].mxu1  ;;  %7662 = vperm.xlu1 %12296, %v6198_v63   ;;  %11830 = vmatprep.mubr.msk.f32.mxu1 %vm500_vm0, %v2252_v34  ;;  %v14385_v63 = vmul.f32 0.020408163, %v14131_v37  ;;  %v14388_v14 = vmul.f32 0.020408163, %v14144_v55  ;;  %v14396_v38 = vmul.f32 %v12366_v9, %v5025_v50  ;;  %12377 = vrsqrt.f32 %v5229_v0 }
 0x15d   : > { %22104 = vst [vmem:[#allocation40_spill] sm:$0xff] %v14392_v54  ;;  %v12370_v58 = vpop.eup %12369  ;;  %11831 = vmatmul.mubr.msk.f32.gmra.mrb[98].mxu1 %vm500_vm0, %v2253_v2  ;;  %v14400_v6 = vmul.f32 0.020408163, %v14146_v11  ;;  %v14403_v37 = vmul.f32 0.020408163, %v14157_v45  ;;  %v22106_v55 = vld [vmem:[#allocation12_spill] sm:$0xff]  ;;  %12379 = vrsqrt.f32 %v5230_v36 }
 0x15e   : > { %22102 = vst [vmem:[#allocation38_spill] sm:$0xff] %v14385_v63  ;;  %22103 = vst [vmem:[#allocation39_spill] sm:$0xff] %v14388_v14  ;;  %v6200_v34 = vsub.f32 %v5804_v30, %v22106_v55  ;;  %v14410_v41 = vmul.f32 %v14385_v63, %v14385_v63  ;;  %v14414_v9 = vmul.f32 %v14388_v14, %v14388_v14  ;;  %v14421_v45 = vld [vmem:[%s21700_s0 + $0x3c0] sm:$0xff]  ;;  %v14426_v11 = vld [vmem:[%s21700_s0 + $0x3c8] sm:$0xff]  ;;  %v5231_v0 = vadd.f32 1e-05, %v4835_v60 }
 0x15f   : > { %v14394_v20 = vpop.f32.mrb[56].mxu0  ;;  %22105 = vst [vmem:[#allocation41_spill] sm:$0xff] %v14396_v38  ;;  %7667 = vperm.xlu0 %12295, %v6199_v13   ;;  %v14416_v50 = vpop.f32.mrb[56].mxu1  ;;  %22107 = vst [vmem:[#allocation12_spill] sm:$0xff] %v14421_v45  ;;  %v5805_v2 = vld [vmem:[%s21703_s3 + $0xb0] sm:$0xff]  ;;  %v14435_v30 = vld [vmem:[%s21703_s3 + $0xb8] sm:$0xff]  ;;  %v14437_v55 = vmul.f32 %v12368_v27, %v5026_v23  ;;  %11552 = vmatprep.mubr.msk.f32.mxu0 %vm500_vm0, %v14421_v45 }
 0x160   : > { %v14405_v62 = vpop.f32.mrb[57].mxu0  ;;  %22108 = vst [vmem:[#allocation42_spill] sm:$0xff] %v14426_v11  ;;  %v12372_v13 = vpop.eup %12371  ;;  %6494 = vperm.xlu1 %12296, %v14023_v40   ;;  %v5027_v54 = vld [vmem:[%s21702_s2 + $0x120] sm:$0xff]  ;;  %v12710_v10 = vld [vmem:[%s21700_s0 + $0x328] sm:$0xff]  ;;  %v5232_v27 = vadd.f32 1e-05, %v4836_v1  ;;  %v4642_v23 = vsub.f32 %v14400_v6, %v14410_v41  ;;  %11553 = vmatmul.mubr.msk.f32.gmra.mrb[120].mxu0 %vm500_vm0, %v14426_v11  ;;  %12381 = vrsqrt.f32 %v5231_v0 }
 0x161   : > { %22109 = vst [vmem:[#allocation43_spill] sm:$0xff] %v14437_v55  ;;  %v12709_v40 = vld [vmem:[%s21700_s0 + $0x320] sm:$0xff]  ;;  %v2255_v63 = vmul.f32 %v12710_v10, %v12710_v10  ;;  %v14448_v14 = vpop.f32.mrb[57].mxu1  ;;  %v22110_v10 = vld [vmem:[#allocation11_spill] sm:$0xff]  ;;  %v14468_v60 = vmul.f32 0.020408163, %v14174_v15  ;;  %v12374_v45 = vpop.eup %12373  ;;  %v14478_v11 = vmul.f32 %v12372_v13, %v5027_v54  ;;  %v6201_v13 = vsub.f32 %v5805_v2, %v14027_v57 }
 0x162   : > { %v2254_v47 = vmul.f32 %v12709_v40, %v12709_v40  ;;  %v14465_v1 = vmul.f32 %v14396_v38, %v22110_v10  ;;  %v14471_v6 = vmul.f32 0.020408163, %v14188_v5  ;;  %v4838_v36 = vmax.f32 %v4640_v25, 0.0  ;;  %v5028_v15 = vld [vmem:[%s21702_s2 + $0x128] sm:$0xff]  ;;  %v22116_v54 = vld [vmem:[#allocation10_spill] sm:$0xff] }
 0x163   : > { %v14456_v53 = vpop.f32.mrb[58].mxu0  ;;  %v14458_v40 = vpop.f32.mrb[58].mxu1  ;;  %22112 = vst [vmem:[#allocation44_spill] sm:$0xff] %v14468_v60  ;;  %6499 = vperm.xlu0 %12295, %v14043_v17   ;;  %22115 = vst [vmem:[#allocation47_spill] sm:$0xff] %v14478_v11  ;;  %v4247_v5 = vmul.f32 0.020408163, %v14200_v22  ;;  %v4446_v17 = vmul.f32 %v14468_v60, %v14468_v60  ;;  %12383 = vrsqrt.f32 %v5232_v27 }
 0x164   : > { %11833 = vmatprep.mubr.msk.f32.mxu1 %vm500_vm0, %v2254_v47  ;;  %22111 = vst [vmem:[#allocation11_spill] sm:$0xff] %v14465_v1  ;;  %22113 = vst [vmem:[#allocation45_spill] sm:$0xff] %v14471_v6  ;;  %v14473_v41 = vpop.f32.mrb[59].mxu0  ;;  %v14475_v43 = vpop.f32.mrb[59].mxu1  ;;  %v14485_v47 = vmul.f32 0.020408163, %v14176_v33  ;;  %7672 = vperm.xlu1 %12296, %v6200_v34   ;;  %v4445_v25 = vmul.f32 %v14471_v6, %v14471_v6  ;;  %v14510_v6 = vmul.f32 %v12370_v58, %v5028_v15 }
 0x165   : > { %22114 = vst [vmem:[#allocation46_spill] sm:$0xff] %v14475_v43  ;;  %11834 = vmatmul.mubr.msk.f32.gmra.mrb[100].mxu1 %vm500_vm0, %v2255_v63  ;;  %v12376_v10 = vpop.eup %12375  ;;  %v4837_v1 = vmax.f32 %v4639_v31, 0.0  ;;  %v14494_v63 = vmul.f32 %v14437_v55, %v22116_v54  ;;  %v22118_v38 = vld [vmem:[#allocation19_spill] sm:$0xff]  ;;  %v22119_v43 = vld [vmem:[#allocation2_spill] sm:$0xff]  ;;  %v14525_v55 = vld [vmem:[%s21700_s0 + $0x3d0] sm:$0xff] }
 0x166   : > { %v6202_v33 = vsub.f32 %v14435_v30, %v22118_v38  ;;  %v2256_v22 = vmul.f32 %v22119_v43, %v22119_v43  ;;  %v14508_v60 = vld [vmem:[%s21703_s3 + $0xc0] sm:$0xff]  ;;  %22120 = vst [vmem:[#allocation19_spill] sm:$0xff] %v14510_v6  ;;  %v4644_v54 = vsub.f32 %v14485_v47, %v4446_v17  ;;  %v4643_v57 = vsub.f32 %v4247_v5, %v4445_v25  ;;  %v5029_v38 = vld [vmem:[%s21702_s2 + $0x130] sm:$0xff]  ;;  %v22121_v2 = vld [vmem:[#allocation3_spill] sm:$0xff] }
 0x167   : > { %22117 = vst [vmem:[#allocation10_spill] sm:$0xff] %v14494_v63  ;;  %v14501_v34 = vpop.f32.mrb[60].mxu0  ;;  %v14503_v31 = vpop.f32.mrb[60].mxu1  ;;  %v2257_v43 = vmul.f32 %v22121_v2, %v22121_v2  ;;  %22122 = vst [vmem:[#allocation2_spill] sm:$0xff] %v14525_v55  ;;  %7677 = vperm.xlu0 %12295, %v6201_v13   ;;  %v5234_v58 = vadd.f32 1e-05, %v4838_v36  ;;  %11555 = vmatprep.mubr.msk.f32.mxu0 %vm500_vm0, %v14525_v55 }
 0x168   : > { %v14518_v30 = vpop.f32.mrb[61].mxu0  ;;  %v14520_v63 = vpop.f32.mrb[61].mxu1  ;;  %11836 = vmatprep.mubr.msk.f32.mxu1 %vm500_vm0, %v2256_v22  ;;  %v5030_v15 = vld [vmem:[%s21702_s2 + $0x138] sm:$0xff]  ;;  %v14536_v17 = vmul.f32 0.020408163, %v14231_v49  ;;  %6504 = vperm.xlu1 %12296, %v14089_v7   ;;  %v4840_v36 = vmax.f32 %v4642_v23, 0.0  ;;  %v14548_v22 = vmul.f32 %v12376_v10, %v5029_v38  ;;  %v6203_v23 = vsub.f32 %v14508_v60, %v14093_v18 }
 0x169   : > { %v22123_v47 = vld [vmem:[#allocation17_spill] sm:$0xff]  ;;  %v5233_v0 = vadd.f32 1e-05, %v4837_v1  ;;  %11837 = vmatmul.mubr.msk.f32.gmra.mrb[102].mxu1 %vm500_vm0, %v2257_v43  ;;  %v14546_v13 = vmul.f32 0.020408163, %v14241_v32  ;;  %v12378_v32 = vpop.eup %12377  ;;  %v14568_v1 = vmul.f32 %v12374_v45, %v5030_v15  ;;  %v22128_v10 = vld [vmem:[#allocation16_spill] sm:$0xff]  ;;  %v22129_v18 = vsub.f32 %v14403_v37, %v14414_v9 }
 0x16a   : > { %v14533_v5 = vmul.f32 %v14478_v11, %v22123_v47  ;;  %22124 = vst [vmem:[#allocation3_spill] sm:$0xff] %v14536_v17  ;;  %v14541_v25 = vld [vmem:[%s21700_s0 + $0x3d8] sm:$0xff]  ;;  %22126 = vst [vmem:[#allocation48_spill] sm:$0xff] %v14548_v22  ;;  %v14552_v49 = vmul.f32 %v14536_v17, %v14536_v17  ;;  %v14555_v2 = vmul.f32 0.020408163, %v14233_v12  ;;  %v5031_v15 = vld [vmem:[%s21702_s2 + $0x140] sm:$0xff] }
 0x16b   : > { %22125 = vst [vmem:[#allocation17_spill] sm:$0xff] %v14541_v25  ;;  %v14558_v47 = vmul.f32 0.020408163, %v14243_v48  ;;  %v14560_v7 = vpop.f32.mrb[62].mxu0  ;;  %v14562_v27 = vpop.f32.mrb[62].mxu1  ;;  %22127 = vst [vmem:[#allocation49_spill] sm:$0xff] %v14568_v1  ;;  %v14572_v12 = vmul.f32 %v14546_v13, %v14546_v13  ;;  %v14576_v48 = vmul.f32 %v14510_v6, %v22128_v10  ;;  %11556 = vmatmul.mubr.msk.f32.gmra.mrb[122].mxu0 %vm500_vm0, %v14541_v25  ;;  %6509 = vperm.xlu0 %12295, %v14101_v56  }
 0x16c   : > { %v14578_v38 = vpop.f32.mrb[63].mxu0  ;;  %v14580_v43 = vpop.f32.mrb[63].mxu1  ;;  %v4839_v45 = vmax.f32 %v22129_v18, 0.0  ;;  %v22130_v10 = vld [vmem:[#allocation4_spill] sm:$0xff]  ;;  %v22131_v6 = vld [vmem:[#allocation5_spill] sm:$0xff]  ;;  %7682 = vperm.xlu1 %12296, %v6202_v33   ;;  %12385 = vrsqrt.f32 %v5233_v0  ;;  %v4841_v11 = vmax.f32 %v4643_v57, 0.0 }
 0x16d   : > { %v2258_v55 = vmul.f32 %v22130_v10, %v22130_v10  ;;  %v2259_v17 = vmul.f32 %v22131_v6, %v22131_v6  ;;  %v12380_v25 = vpop.eup %12379  ;;  %v5236_v56 = vadd.f32 1e-05, %v4840_v36  ;;  %v5032_v9 = vld [vmem:[%s21702_s2 + $0x148] sm:$0xff]  ;;  %12387 = vrsqrt.f32 %v5234_v58 }
 0x16e   : > { %v4842_v18 = vmax.f32 %v4644_v54, 0.0  ;;  %v14605_v10 = vmul.f32 %v14548_v22, %v14112_v52  ;;  %v14608_v6 = vmul.f32 0.020408163, %v14284_v8  ;;  %v5808_v0 = vld [vmem:[%s21703_s3 + $0xc8] sm:$0xff]  ;;  %v14617_v36 = vmul.f32 %v12378_v32, %v5031_v15 }
 0x16f   : > { %11839 = vmatprep.mubr.msk.f32.mxu1 %vm500_vm0, %v2258_v55  ;;  %v14610_v33 = vpop.f32.mrb[64].mxu0  ;;  %v14612_v57 = vpop.f32.mrb[64].mxu1  ;;  %v14621_v55 = vmul.f32 0.020408163, %v14293_v24  ;;  %v14624_v52 = vmul.f32 0.020408163, %v14286_v59  ;;  %v14628_v8 = vmul.f32 %v14568_v1, %v14107_v16  ;;  %7687 = vperm.xlu0 %12295, %v6203_v23   ;;  %v14632_v60 = vmul.f32 %v12380_v25, %v5032_v9 }
 0x170   : > { %22132 = vst [vmem:[#allocation16_spill] sm:$0xff] %v14608_v6  ;;  %22133 = vst [vmem:[#allocation4_spill] sm:$0xff] %v14617_v36  ;;  %11840 = vmatmul.mubr.msk.f32.gmra.mrb[104].mxu1 %vm500_vm0, %v2259_v17  ;;  %v14630_v54 = vpop.f32.mrb[65].mxu0  ;;  %v5235_v58 = vadd.f32 1e-05, %v4839_v45  ;;  %v14636_v32 = vmul.f32 %v14608_v6, %v14608_v6  ;;  %v14641_v17 = vpop.f32.mrb[65].mxu1  ;;  %6514 = vperm.xlu1 %12296, %v14151_v35   ;;  %12389 = vrsqrt.f32 %v5236_v56 }
 0x171   : > { %22134 = vst [vmem:[#allocation5_spill] sm:$0xff] %v14621_v55  ;;  %22135 = vst [vmem:[#allocation50_spill] sm:$0xff] %v14632_v60  ;;  %v14639_v24 = vmul.f32 0.020408163, %v14295_v19  ;;  %v14646_v16 = vld [vmem:[%s21700_s0 + $0x3e0] sm:$0xff]  ;;  %v14651_v25 = vmul.f32 %v14621_v55, %v14621_v55  ;;  %v14658_v19 = vld [vmem:[%s21700_s0 + $0x3e8] sm:$0xff]  ;;  %v12382_v23 = vpop.eup %12381 }
 0x172   : > { %22136 = vst [vmem:[#allocation51_spill] sm:$0xff] %v14646_v16  ;;  %v5237_v59 = vadd.f32 1e-05, %v4841_v11  ;;  %11558 = vmatprep.mubr.msk.f32.mxu0 %vm500_vm0, %v14646_v16  ;;  %22137 = vst [vmem:[#allocation52_spill] sm:$0xff] %v14658_v19  ;;  %v5238_v45 = vadd.f32 1e-05, %v4842_v18  ;;  %v12384_v18 = vpop.eup %12383  ;;  %12391 = vrsqrt.f32 %v5235_v58 }
 0x173   : > { %v5033_v35 = vld [vmem:[%s21702_s2 + $0x150] sm:$0xff]  ;;  %v22138_v11 = vld [vmem:[#allocation6_spill] sm:$0xff]  ;;  %v22139_v37 = vld [vmem:[#allocation7_spill] sm:$0xff]  ;;  %v14669_v1 = vpop.f32.mrb[66].mxu0  ;;  %v14671_v22 = vpop.f32.mrb[66].mxu1  ;;  %11559 = vmatmul.mubr.msk.f32.gmra.mrb[124].mxu0 %vm500_vm0, %v14658_v19  ;;  %6519 = vperm.xlu0 %12295, %v14162_v29  }
 0x174   : > { %v2260_v9 = vmul.f32 %v22138_v11, %v22138_v11  ;;  %v2261_v16 = vmul.f32 %v22139_v37, %v22139_v37  ;;  %22140 = vst [vmem:[#allocation6_spill] sm:$0xff] %v14669_v1  ;;  %22141 = vst [vmem:[#allocation7_spill] sm:$0xff] %v14671_v22  ;;  %v22142_v6 = vld [vmem:[#allocation22_spill] sm:$0xff]  ;;  %v5809_v55 = vld [vmem:[%s21703_s3 + $0xd0] sm:$0xff]  ;;  %v14683_v37 = vmul.f32 %v14617_v36, %v14172_v42  ;;  %v14685_v1 = vpop.f32.mrb[67].mxu0  ;;  %v14687_v22 = vpop.f32.mrb[67].mxu1  ;;  %12393 = vrsqrt.f32 %v5237_v59 }
 0x175   : > { %v6204_v15 = vsub.f32 %v5808_v0, %v22142_v6  ;;  %v5034_v56 = vld [vmem:[%s21702_s2 + $0x158] sm:$0xff]  ;;  %v14695_v6 = vmul.f32 0.020408163, %v14341_v28  ;;  %v14698_v0 = vmul.f32 0.020408163, %v14353_v51  ;;  %v14702_v42 = vmul.f32 %v14632_v60, %v14168_v21  ;;  %v22147_v28 = vld [vmem:[#allocation23_spill] sm:$0xff] }
 0x176   : > { %11842 = vmatprep.mubr.msk.f32.mxu1 %vm500_vm0, %v2260_v9  ;;  %v14704_v29 = vmul.f32 %v12382_v23, %v5033_v35  ;;  %v14708_v58 = vmul.f32 0.020408163, %v14343_v46  ;;  %v14711_v9 = vmul.f32 0.020408163, %v14355_v44  ;;  %v6205_v11 = vsub.f32 %v5809_v55, %v22147_v28  ;;  %v5810_v51 = vld [vmem:[%s21703_s3 + $0xd8] sm:$0xff]  ;;  %v12386_v44 = vpop.eup %12385  ;;  %v22152_v35 = vld [vmem:[#allocation8_spill] sm:$0xff] }
 0x177   : > { %22143 = vst [vmem:[#allocation22_spill] sm:$0xff] %v14695_v6  ;;  %22144 = vst [vmem:[#allocation53_spill] sm:$0xff] %v14698_v0  ;;  %7692 = vperm.xlu1 %12296, %v6204_v15   ;;  %11843 = vmatmul.mubr.msk.f32.gmra.mrb[106].mxu1 %vm500_vm0, %v2261_v16  ;;  %12395 = vrsqrt.f32 %v5238_v45  ;;  %v14719_v21 = vmul.f32 %v14695_v6, %v14695_v6  ;;  %v14723_v16 = vmul.f32 %v14698_v0, %v14698_v0  ;;  %v14725_v46 = vpop.f32.mrb[68].mxu0  ;;  %v14727_v59 = vpop.f32.mrb[68].mxu1  ;;  %v5035_v45 = vld [vmem:[%s21702_s2 + $0x160] sm:$0xff]  ;;  %v22153_v60 = vld [vmem:[#allocation9_spill] sm:$0xff] }
 0x178   : > { %22145 = vst [vmem:[#allocation54_spill] sm:$0xff] %v14702_v42  ;;  %22146 = vst [vmem:[#allocation55_spill] sm:$0xff] %v14704_v29  ;;  %v22150_v55 = vsub.f32 %v14558_v47, %v14572_v12  ;;  %v14732_v15 = vmul.f32 %v12384_v18, %v5034_v56  ;;  %v2262_v28 = vmul.f32 %v22152_v35, %v22152_v35  ;;  %v14741_v36 = vpop.f32.mrb[69].mxu0  ;;  %v14743_v6 = vpop.f32.mrb[69].mxu1  ;;  %v14748_v47 = vld [vmem:[%s21700_s0 + $0x3f0] sm:$0xff]  ;;  %v14753_v12 = vld [vmem:[%s21700_s0 + $0x3f8] sm:$0xff]  ;;  %7697 = vperm.xlu0 %12295, %v6205_v11  }
 0x179   : > { %22148 = vst [vmem:[#allocation23_spill] sm:$0xff] %v14725_v46  ;;  %22149 = vst [vmem:[#allocation56_spill] sm:$0xff] %v14727_v59  ;;  %v2263_v19 = vmul.f32 %v22153_v60, %v22153_v60  ;;  %v12388_v18 = vpop.eup %12387  ;;  %v22158_v56 = vsub.f32 %v14555_v2, %v14552_v49  ;;  %11561 = vmatprep.mubr.msk.f32.mxu0 %vm500_vm0, %v14748_v47  ;;  %v22159_v11 = vld [vmem:[#allocation29_spill] sm:$0xff]  ;;  %v14774_v2 = vmul.f32 0.020408163, %v14394_v20  ;;  %v22174_v59 = vld [vmem:[#allocation14_spill] sm:$0xff] }
 0x17a   : > { %v4843_v23 = vmax.f32 %v22150_v55, 0.0  ;;  %22151 = vst [vmem:[#allocation57_spill] sm:$0xff] %v14732_v15  ;;  %22154 = vst [vmem:[#allocation8_spill] sm:$0xff] %v14741_v36  ;;  %11845 = vmatprep.mubr.msk.f32.mxu1 %vm500_vm0, %v2262_v28  ;;  %v14771_v49 = vmul.f32 %v14704_v29, %v22159_v11  ;;  %v22163_v55 = vld [vmem:[#allocation24_spill] sm:$0xff]  ;;  %v5036_v28 = vld [vmem:[%s21702_s2 + $0x168] sm:$0xff]  ;;  %11562 = vmatmul.mubr.msk.f32.gmra.mrb[126].mxu0 %vm500_vm0, %v14753_v12 }
 0x17b   : > { %22155 = vst [vmem:[#allocation9_spill] sm:$0xff] %v14743_v6  ;;  %22156 = vst [vmem:[#allocation58_spill] sm:$0xff] %v14748_v47  ;;  %v4844_v60 = vmax.f32 %v22158_v56, 0.0  ;;  %6524 = vperm.xlu1 %12296, %v14203_v39   ;;  %v5811_v6 = vld [vmem:[%s21703_s3 + $0xe0] sm:$0xff]  ;;  %v14777_v56 = vmul.f32 0.020408163, %v14405_v62  ;;  %v6206_v35 = vsub.f32 %v5810_v51, %v22163_v55  ;;  %v14785_v47 = vmul.f32 %v12386_v44, %v5035_v45 }
 0x17c   : > { %22157 = vst [vmem:[#allocation59_spill] sm:$0xff] %v14753_v12  ;;  %22160 = vst [vmem:[#allocation29_spill] sm:$0xff] %v14771_v49  ;;  %v14783_v39 = vld [vmem:[%s21703_s3 + $0xe8] sm:$0xff]  ;;  %11846 = vmatmul.mubr.msk.f32.gmra.mrb[108].mxu1 %vm500_vm0, %v2263_v19  ;;  %v14792_v20 = vmul.f32 0.020408163, %v14416_v50  ;;  %v14801_v44 = vmul.f32 %v14774_v2, %v14774_v2  ;;  %v22165_v45 = vld [vmem:[#allocation28_spill] sm:$0xff]  ;;  %6529 = vperm.xlu0 %12295, %v14248_v3  }
 0x17d   : > { %22161 = vst [vmem:[#allocation60_spill] sm:$0xff] %v14774_v2  ;;  %22162 = vst [vmem:[#allocation61_spill] sm:$0xff] %v14777_v56  ;;  %v14795_v62 = vmul.f32 0.020408163, %v14448_v14  ;;  %v5239_v51 = vadd.f32 1e-05, %v4843_v23  ;;  %v14805_v19 = vmul.f32 %v14777_v56, %v14777_v56  ;;  %v14809_v55 = vmul.f32 %v14732_v15, %v22165_v45 }
 0x17e   : > { %22164 = vst [vmem:[#allocation24_spill] sm:$0xff] %v14785_v47  ;;  %v14811_v50 = vpop.f32.mrb[70].mxu0  ;;  %v14813_v14 = vpop.f32.mrb[70].mxu1  ;;  %v14818_v23 = vld [vmem:[%s21700_s0 + $0x400] sm:$0xff]  ;;  %v14823_v11 = vld [vmem:[%s21700_s0 + $0x408] sm:$0xff]  ;;  %v14829_v45 = vld [vmem:[%s21703_s3 + $0xf0] sm:$0xff]  ;;  %v14839_v56 = vmul.f32 %v12388_v18, %v5036_v28 }
 0x17f   : > { %22166 = vst [vmem:[#allocation28_spill] sm:$0xff] %v14811_v50  ;;  %22167 = vst [vmem:[#allocation62_spill] sm:$0xff] %v14813_v14  ;;  %v5240_v15 = vadd.f32 1e-05, %v4844_v60  ;;  %v22170_v29 = vld [vmem:[#allocation13_spill] sm:$0xff]  ;;  %v14833_v2 = vpop.f32.mrb[71].mxu0  ;;  %11564 = vmatprep.mubr.msk.f32.mxu0 %vm500_vm0, %v14818_v23  ;;  %v12390_v50 = vpop.eup %12389  ;;  %7702 = vperm.xlu1 %12296, %v6206_v35   ;;  %v14856_v35 = vmul.f32 %v14785_v47, %v14323_v61  ;;  %12397 = vrsqrt.f32 %v5239_v51 }
 0x180   : > { %22168 = vst [vmem:[#allocation63_spill] sm:$0xff] %v14818_v23  ;;  %22169 = vst [vmem:[#allocation64_spill] sm:$0xff] %v14823_v11  ;;  %v2264_v12 = vmul.f32 %v22170_v29, %v22170_v29  ;;  %v14835_v14 = vpop.f32.mrb[71].mxu1  ;;  %v2265_v29 = vmul.f32 %v22174_v59, %v22174_v59  ;;  %v12392_v36 = vpop.eup %12391  ;;  %v5037_v18 = vld [vmem:[%s21702_s2 + $0x170] sm:$0xff]  ;;  %v14859_v28 = vmul.f32 0.020408163, %v14456_v53  ;;  %11565 = vmatmul.mubr.msk.f32.gmra.mrb[128].mxu0 %vm500_vm0, %v14823_v11 }
 0x181   : > { %22171 = vst [vmem:[#allocation13_spill] sm:$0xff] %v14833_v2  ;;  %22172 = vst [vmem:[#allocation65_spill] sm:$0xff] %v14835_v14  ;;  %v22175_v2 = vld [vmem:[#allocation25_spill] sm:$0xff]  ;;  %v22176_v14 = vld [vmem:[#allocation30_spill] sm:$0xff]  ;;  %v14861_v59 = vpop.f32.mrb[72].mxu0  ;;  %12399 = vrsqrt.f32 %v5240_v15 }
 0x182   : > { %22173 = vst [vmem:[#allocation66_spill] sm:$0xff] %v14839_v56  ;;  %v6207_v46 = vsub.f32 %v5811_v6, %v22175_v2  ;;  %v6208_v0 = vsub.f32 %v14783_v39, %v22176_v14  ;;  %11848 = vmatprep.mubr.msk.f32.mxu1 %vm500_vm0, %v2264_v12  ;;  %22177 = vst [vmem:[#allocation14_spill] sm:$0xff] %v14859_v28  ;;  %v14865_v6 = vpop.f32.mrb[72].mxu1  ;;  %v12394_v2 = vpop.eup %12393  ;;  %v6209_v39 = vsub.f32 %v14829_v45, %v14308_v26  ;;  %v22181_v53 = vld [vmem:[#allocation15_spill] sm:$0xff]  ;;  %v5039_v3 = vld [vmem:[%s21702_s2 + $0x180] sm:$0xff] }
 0x183   : > { %22178 = vst [vmem:[#allocation25_spill] sm:$0xff] %v14861_v59  ;;  %22179 = vst [vmem:[#allocation30_spill] sm:$0xff] %v14865_v6  ;;  %v22180_v12 = vsub.f32 %v14639_v24, %v14651_v25  ;;  %11849 = vmatmul.mubr.msk.f32.gmra.mrb[110].mxu1 %vm500_vm0, %v2265_v29  ;;  %v2266_v14 = vmul.f32 %v22181_v53, %v22181_v53  ;;  %v14878_v60 = vpop.f32.mrb[73].mxu0  ;;  %v14880_v47 = vpop.f32.mrb[73].mxu1  ;;  %v14885_v26 = vld [vmem:[%s21700_s0 + $0x410] sm:$0xff]  ;;  %v14890_v24 = vld [vmem:[%s21700_s0 + $0x418] sm:$0xff]  ;;  %v14897_v45 = vmul.f32 %v14859_v28, %v14859_v28 }
 0x184   : > { %22182 = vst [vmem:[#allocation15_spill] sm:$0xff] %v14878_v60  ;;  %22183 = vst [vmem:[#allocation67_spill] sm:$0xff] %v14880_v47  ;;  %v12396_v25 = vpop.eup %12395  ;;  %7707 = vperm.xlu0 %12295, %v6207_v46   ;;  %v5038_v51 = vld [vmem:[%s21702_s2 + $0x178] sm:$0xff]  ;;  %v14900_v29 = vmul.f32 0.020408163, %v14473_v41  ;;  %11567 = vmatprep.mubr.msk.f32.mxu0 %vm500_vm0, %v14885_v26  ;;  %v22188_v46 = vsub.f32 %v14624_v52, %v14636_v32  ;;  %v14910_v47 = vmul.f32 %v12392_v36, %v5037_v18  ;;  %v22190_v41 = vld [vmem:[#allocation32_spill] sm:$0xff] }
 0x185   : > { %v4845_v61 = vmax.f32 %v22180_v12, 0.0  ;;  %22184 = vst [vmem:[#allocation68_spill] sm:$0xff] %v14885_v26  ;;  %22185 = vst [vmem:[#allocation69_spill] sm:$0xff] %v14890_v24  ;;  %v22187_v12 = vld [vmem:[#allocation18_spill] sm:$0xff]  ;;  %6534 = vperm.xlu1 %12296, %v14260_v4   ;;  %v14913_v28 = vmul.f32 0.020408163, %v14458_v40  ;;  %11851 = vmatprep.mubr.msk.f32.mxu1 %vm500_vm0, %v2266_v14  ;;  %v14918_v6 = vmul.f32 %v14839_v56, %v22190_v41 }
 0x186   : > { %22186 = vst [vmem:[#allocation70_spill] sm:$0xff] %v14900_v29  ;;  %v2267_v53 = vmul.f32 %v22187_v12, %v22187_v12  ;;  %v4846_v15 = vmax.f32 %v22188_v46, 0.0  ;;  %22189 = vst [vmem:[#allocation18_spill] sm:$0xff] %v14910_v47  ;;  %v5040_v12 = vld [vmem:[%s21702_s2 + $0x188] sm:$0xff]  ;;  %v14925_v4 = vmul.f32 %v14900_v29, %v14900_v29  ;;  %v22191_v52 = vld [vmem:[#allocation46_spill] sm:$0xff]  ;;  %v14930_v32 = vmul.f32 %v12394_v2, %v5039_v3  ;;  %v14936_v14 = vpop.f32.mrb[74].mxu0 }
 0x187   : > { %v14928_v36 = vmul.f32 0.020408163, %v22191_v52  ;;  %v22193_v40 = vld [vmem:[#allocation20_spill] sm:$0xff]  ;;  %11568 = vmatmul.mubr.msk.f32.gmra.mrb[130].mxu0 %vm500_vm0, %v14890_v24  ;;  %22194 = vst [vmem:[#allocation46_spill] sm:$0xff] %v14936_v14  ;;  %v5241_v46 = vadd.f32 1e-05, %v4845_v61  ;;  %v14938_v41 = vmul.f32 %v12390_v50, %v5038_v51  ;;  %v14955_v50 = vmul.f32 %v12396_v25, %v5040_v12 }
 0x188   : > { %22192 = vst [vmem:[#allocation32_spill] sm:$0xff] %v14930_v32  ;;  %v2268_v18 = vmul.f32 %v22193_v40, %v22193_v40  ;;  %11852 = vmatmul.mubr.msk.f32.gmra.mrb[112].mxu1 %vm500_vm0, %v2267_v53  ;;  %v22196_v52 = vld [vmem:[#allocation21_spill] sm:$0xff]  ;;  %v14945_v2 = vpop.f32.mrb[75].mxu0  ;;  %v22198_v26 = vld [vmem:[#allocation34_spill] sm:$0xff]  ;;  %v14957_v51 = vpop.f32.mrb[74].mxu1  ;;  %v22203_v53 = vsub.f32 %v14711_v9, %v14723_v16  ;;  %v22204_v56 = vld [vmem:[#allocation39_spill] sm:$0xff] }
 0x189   : > { %22195 = vst [vmem:[#allocation20_spill] sm:$0xff] %v14938_v41  ;;  %v2269_v3 = vmul.f32 %v22196_v52, %v22196_v52  ;;  %22197 = vst [vmem:[#allocation21_spill] sm:$0xff] %v14945_v2  ;;  %6539 = vperm.xlu0 %12295, %v22198_v26   ;;  %v22199_v24 = vld [vmem:[#allocation45_spill] sm:$0xff]  ;;  %7712 = vperm.xlu1 %12296, %v6208_v0   ;;  %v14964_v26 = vmul.f32 %v14910_v47, %v22204_v56  ;;  %v14967_v40 = vmul.f32 0.020408163, %v14501_v34  ;;  %v22208_v25 = vld [vmem:[#allocation44_spill] sm:$0xff]  ;;  %v14982_v16 = vpop.permute.xlu0 %6384 }
 0x18a   : > { %v14952_v61 = vmul.f32 %v14930_v32, %v22199_v24  ;;  %11854 = vmatprep.mubr.msk.f32.mxu1 %vm500_vm0, %v2268_v18  ;;  %22201 = vst [vmem:[#allocation45_spill] sm:$0xff] %v14955_v50  ;;  %22202 = vst [vmem:[#allocation71_spill] sm:$0xff] %v14957_v51  ;;  %v4847_v52 = vmax.f32 %v22203_v53, 0.0  ;;  %v14970_v24 = vmul.f32 0.020408163, %v14518_v30  ;;  %v14974_v12 = vmul.f32 %v14955_v50, %v22208_v25  ;;  %v14993_v56 = vpop.f32.mrb[75].mxu1  ;;  %v12398_v32 = vpop.eup %12397 }
 0x18b   : > { %22205 = vst [vmem:[#allocation39_spill] sm:$0xff] %v14964_v26  ;;  %22206 = vst [vmem:[#allocation72_spill] sm:$0xff] %v14967_v40  ;;  %v5242_v18 = vadd.f32 1e-05, %v4846_v15  ;;  %v14977_v0 = vmul.f32 0.020408163, %v14503_v31  ;;  %12401 = vrsqrt.f32 %v5241_v46  ;;  %v14987_v34 = vmul.f32 %v14967_v40, %v14967_v40 }
 0x18c   : > { %22200 = vst [vmem:[#allocation34_spill] sm:$0xff] %v14952_v61  ;;  %22207 = vst [vmem:[#allocation73_spill] sm:$0xff] %v14970_v24  ;;  %v14980_v9 = vmul.f32 0.020408163, %v14520_v63  ;;  %11855 = vmatmul.mubr.msk.f32.gmra.mrb[114].mxu1 %vm500_vm0, %v2269_v3  ;;  %v14991_v30 = vmul.f32 %v14970_v24, %v14970_v24  ;;  %v14998_v63 = vld [vmem:[%s21700_s0 + $0x420] sm:$0xff]  ;;  %v15003_v31 = vld [vmem:[%s21700_s0 + $0x428] sm:$0xff]  ;;  %v22213_v53 = vsub.f32 %v14708_v58, %v14719_v21 }
 0x18d   : > { %22209 = vst [vmem:[#allocation44_spill] sm:$0xff] %v14974_v12  ;;  %22210 = vst [vmem:[#allocation74_spill] sm:$0xff] %v14993_v56  ;;  %7717 = vperm.xlu0 %12295, %v6209_v39   ;;  %v5814_v15 = vld [vmem:[%s21703_s3 + $0xf8] sm:$0xff]  ;;  %v5815_v46 = vld [vmem:[%s21703_s3 + $0x100] sm:$0xff]  ;;  %11570 = vmatprep.mubr.msk.f32.mxu0 %vm500_vm0, %v14998_v63  ;;  %v5243_v40 = vadd.f32 1e-05, %v4847_v52  ;;  %12403 = vrsqrt.f32 %v5242_v18 }
 0x18e   : > { %22211 = vst [vmem:[#allocation75_spill] sm:$0xff] %v14998_v63  ;;  %22212 = vst [vmem:[#allocation76_spill] sm:$0xff] %v15003_v31  ;;  %v15014_v3 = vld [vmem:[%s21703_s3 + $0x108] sm:$0xff]  ;;  %v4848_v25 = vmax.f32 %v22213_v53, 0.0  ;;  %v22214_v50 = vld [vmem:[#allocation38_spill] sm:$0xff]  ;;  %11571 = vmatmul.mubr.msk.f32.gmra.mrb[132].mxu0 %vm500_vm0, %v15003_v31  ;;  %v12400_v53 = vpop.eup %12399 }
 0x18f   : > { %v15021_v39 = vmul.f32 %v14938_v41, %v22214_v50  ;;  %v22216_v47 = vld [vmem:[#allocation36_spill] sm:$0xff]  ;;  %v22217_v21 = vld [vmem:[#allocation26_spill] sm:$0xff]  ;;  %v15039_v41 = vpop.f32.mrb[76].mxu0  ;;  %v15049_v56 = vld [vmem:[%s21700_s0 + $0x438] sm:$0xff]  ;;  %v15065_v11 = vmul.f32 0.020408163, %v14560_v7  ;;  %12405 = vrsqrt.f32 %v5243_v40 }
 0x190   : > { %6544 = vperm.xlu1 %12296, %v22216_v47   ;;  %v5041_v58 = vld [vmem:[%s21702_s2 + $0x190] sm:$0xff]  ;;  %v2270_v50 = vmul.f32 %v22217_v21, %v22217_v21  ;;  %v22218_v47 = vld [vmem:[#allocation27_spill] sm:$0xff]  ;;  %22219 = vst [vmem:[#allocation36_spill] sm:$0xff] %v15039_v41  ;;  %v6380_v21 = vpop.permute.xlu0 %6379  ;;  %v22223_v2 = vld [vmem:[#allocation37_spill] sm:$0xff]  ;;  %v15084_v7 = vmul.f32 0.020408163, %v14580_v43 }
 0x191   : > { %22215 = vst [vmem:[#allocation38_spill] sm:$0xff] %v15021_v39  ;;  %v2271_v52 = vmul.f32 %v22218_v47, %v22218_v47  ;;  %v15044_v51 = vld [vmem:[%s21700_s0 + $0x430] sm:$0xff]  ;;  %22221 = vst [vmem:[#allocation27_spill] sm:$0xff] %v15049_v56  ;;  %v22222_v63 = vld [vmem:[#allocation35_spill] sm:$0xff]  ;;  %v6211_v18 = vsub.f32 %v5815_v46, %v22223_v2  ;;  %v15069_v2 = vpop.f32.mrb[77].mxu0  ;;  %v15074_v46 = vmul.f32 %v12398_v32, %v5041_v58 }
 0x192   : > { %22220 = vst [vmem:[#allocation26_spill] sm:$0xff] %v15044_v51  ;;  %v6210_v31 = vsub.f32 %v5814_v15, %v22222_v63  ;;  %v22224_v14 = vld [vmem:[#allocation40_spill] sm:$0xff]  ;;  %11857 = vmatprep.mubr.msk.f32.mxu1 %vm500_vm0, %v2270_v50  ;;  %v5042_v24 = vld [vmem:[%s21702_s2 + $0x198] sm:$0xff]  ;;  %22225 = vst [vmem:[#allocation35_spill] sm:$0xff] %v15065_v11  ;;  %11573 = vmatprep.mubr.msk.f32.mxu0 %vm500_vm0, %v15044_v51  ;;  %v15071_v63 = vpop.permute.xlu1 %6394  ;;  %v15078_v50 = vmul.f32 0.020408163, %v14578_v38  ;;  %v15091_v32 = vmul.f32 %v15065_v11, %v15065_v11 }
 0x193   : > { %v15058_v41 = vld [vmem:[%s21703_s3 + $0x110] sm:$0xff]  ;;  %22226 = vst [vmem:[#allocation37_spill] sm:$0xff] %v15069_v2  ;;  %v22227_v15 = vld [vmem:[#allocation41_spill] sm:$0xff]  ;;  %22228 = vst [vmem:[#allocation40_spill] sm:$0xff] %v15074_v46  ;;  %11858 = vmatmul.mubr.msk.f32.gmra.mrb[116].mxu1 %vm500_vm0, %v2271_v52  ;;  %v15081_v47 = vmul.f32 0.020408163, %v14562_v27  ;;  %v22230_v2 = vsub.f32 %v14795_v62, %v14805_v19  ;;  %11574 = vmatmul.mubr.msk.f32.gmra.mrb[134].mxu0 %vm500_vm0, %v15049_v56  ;;  %v22232_v62 = vsub.f32 %v14792_v20, %v14801_v44 }
 0x194   : > { %6549 = vperm.xlu0 %12295, %v22227_v15   ;;  %22229 = vst [vmem:[#allocation41_spill] sm:$0xff] %v15078_v50  ;;  %7722 = vperm.xlu1 %12296, %v6210_v31   ;;  %v5244_v51 = vadd.f32 1e-05, %v4848_v25  ;;  %v15095_v38 = vpop.f32.mrb[76].mxu1  ;;  %v12711_v27 = vld [vmem:[%s21700_s0] sm:$0xff]  ;;  %v15103_v40 = vld [vmem:[%s21703_s3 + $0x118] sm:$0xff]  ;;  %v15110_v31 = vmul.f32 %v15078_v50, %v15078_v50  ;;  %v7568_v52 = vpop.permute.xlu0 %7567  ;;  %v15126_v44 = vmul.f32 %v12400_v53, %v5042_v24 }
 0x195   : > { %v4849_v15 = vmax.f32 %v22230_v2, 0.0  ;;  %22231 = vst [vmem:[#allocation77_spill] sm:$0xff] %v15095_v38  ;;  %v7367_v43 = vmul.f32 %v12711_v27, %v6380_v21  ;;  %v4850_v19 = vmax.f32 %v22232_v62, 0.0  ;;  %v22233_v25 = vld [vmem:[#allocation31_spill] sm:$0xff]  ;;  %v15119_v27 = vld [vmem:[%s21703_s3 + $0x120] sm:$0xff]  ;;  %v15132_v38 = vpop.f32.mrb[77].mxu1  ;;  %v12402_v62 = vpop.eup %12401 }
 0x196   : > { %v2272_v58 = vmul.f32 %v22233_v25, %v22233_v25  ;;  %v22234_v2 = vld [vmem:[#allocation11_spill] sm:$0xff]  ;;  %22235 = vst [vmem:[#allocation31_spill] sm:$0xff] %v15126_v44  ;;  %v22236_v25 = vld [vmem:[#allocation33_spill] sm:$0xff]  ;;  %v15137_v21 = vld [vmem:[%s21700_s0 + $0x440] sm:$0xff]  ;;  %v15141_v50 = vpop.permute.xlu1 %7572  ;;  %12407 = vrsqrt.f32 %v5244_v51  ;;  %v15181_v29 = vmul.f32 0.020408163, %v14612_v57 }
 0x197   : > { %v15124_v20 = vld [vmem:[%s21703_s3 + $0x128] sm:$0xff]  ;;  %v2273_v11 = vmul.f32 %v22236_v25, %v22236_v25  ;;  %22237 = vst [vmem:[#allocation11_spill] sm:$0xff] %v15132_v38  ;;  %22238 = vst [vmem:[#allocation33_spill] sm:$0xff] %v15137_v21  ;;  %v15139_v56 = vadd.f32 %v7568_v52, %v7367_v43  ;;  %v15146_v24 = vld [vmem:[%s21703_s3 + $0x130] sm:$0xff]  ;;  %v5245_v23 = vadd.f32 1e-05, %v4849_v15  ;;  %11576 = vmatprep.mubr.msk.f32.mxu0 %vm500_vm0, %v15137_v21 }
 0x198   : > { %7727 = vperm.xlu0 %12295, %v6211_v18   ;;  %v15151_v53 = vld [vmem:[%s21703_s3 + $0x138] sm:$0xff]  ;;  %v5043_v43 = vld [vmem:[%s21702_s2 + $0x1a0] sm:$0xff]  ;;  %11860 = vmatprep.mubr.msk.f32.mxu1 %vm500_vm0, %v2272_v58  ;;  %v15161_v18 = vmul.f32 %v15074_v46, %v14546_v13  ;;  %v15166_v52 = vld [vmem:[%s21700_s0 + $0x448] sm:$0xff]  ;;  %v15173_v58 = vmul.f32 0.020408163, %v14610_v33  ;;  %v15185_v15 = vpop.f32.mrb[78].mxu0 }
 0x199   : > { %22240 = vst [vmem:[#allocation79_spill] sm:$0xff] %v15166_v52  ;;  %v22241_v38 = vld [vmem:[#allocation43_spill] sm:$0xff]  ;;  %v22242_v60 = vld [vmem:[#allocation10_spill] sm:$0xff]  ;;  %11861 = vmatmul.mubr.msk.f32.gmra.mrb[118].mxu1 %vm500_vm0, %v2273_v11  ;;  %v15176_v13 = vmul.f32 0.020408163, %v14630_v54  ;;  %22245 = vst [vmem:[#allocation80_spill] sm:$0xff] %v15185_v15  ;;  %v15192_v54 = vpop.permute.xlu0 %6399  ;;  %11577 = vmatmul.mubr.msk.f32.gmra.mrb[136].mxu0 %vm500_vm0, %v15166_v52  ;;  %v12404_v15 = vpop.eup %12403  ;;  %12409 = vrsqrt.f32 %v5245_v23 }
 0x19a   : > { %22239 = vst [vmem:[#allocation78_spill] sm:$0xff] %v15161_v18  ;;  %6554 = vperm.xlu1 %12296, %v22241_v38   ;;  %22243 = vst [vmem:[#allocation43_spill] sm:$0xff] %v15173_v58  ;;  %v5246_v59 = vadd.f32 1e-05, %v4850_v19  ;;  %v15190_v33 = vld [vmem:[%s21700_s0 + $0x450] sm:$0xff]  ;;  %v15199_v57 = vld [vmem:[%s21703_s3 + $0x140] sm:$0xff]  ;;  %v22250_v19 = vsub.f32 %v14913_v28, %v14897_v45  ;;  %v15216_v11 = vmul.f32 %v15173_v58, %v15173_v58 }
 0x19b   : > { %22244 = vst [vmem:[#allocation10_spill] sm:$0xff] %v15176_v13  ;;  %22246 = vst [vmem:[#allocation81_spill] sm:$0xff] %v15190_v33  ;;  %v15204_v51 = vld [vmem:[%s21703_s3 + $0x148] sm:$0xff]  ;;  %v15209_v38 = vld [vmem:[%s21703_s3 + $0x150] sm:$0xff]  ;;  %v15220_v25 = vmul.f32 %v15176_v13, %v15176_v13  ;;  %v15224_v21 = vpop.f32.mrb[79].mxu0  ;;  %v22253_v28 = vsub.f32 %v14928_v36, %v14925_v4  ;;  %11579 = vmatprep.mubr.msk.f32.mxu0 %vm500_vm0, %v15190_v33  ;;  %v15251_v36 = vpop.f32.mrb[78].mxu1  ;;  %v22263_v33 = vsub.f32 %v15058_v41, %v22234_v2 }
 0x19c   : > { %22247 = vst [vmem:[#allocation82_spill] sm:$0xff] %v15192_v54  ;;  %22248 = vst [vmem:[#allocation83_spill] sm:$0xff] %v15204_v51  ;;  %v4852_v46 = vmax.f32 %v22250_v19, 0.0  ;;  %v15226_v54 = vpop.permute.xlu1 %6389  ;;  %v22252_v18 = vld [vmem:[#allocation47_spill] sm:$0xff]  ;;  %v15232_v19 = vmul.f32 %v12402_v62, %v5043_v43  ;;  %v15238_v13 = vmul.f32 0.020408163, %v14641_v17  ;;  %v22259_v62 = vsub.f32 %v15014_v3, %v22224_v14 }
 0x19d   : > { %22249 = vst [vmem:[#allocation84_spill] sm:$0xff] %v15209_v38  ;;  %22251 = vst [vmem:[#allocation85_spill] sm:$0xff] %v15224_v21  ;;  %6559 = vperm.xlu0 %12295, %v22252_v18   ;;  %v4851_v45 = vmax.f32 %v22253_v28, 0.0  ;;  %v5044_v58 = vld [vmem:[%s21702_s2 + $0x1a8] sm:$0xff]  ;;  %v15249_v4 = vld [vmem:[%s21700_s0 + $0x458] sm:$0xff]  ;;  %12411 = vrsqrt.f32 %v5246_v59  ;;  %v15273_v23 = vpop.permute.xlu0 %7577  ;;  %v22270_v41 = vsub.f32 %v14977_v0, %v14987_v34 }
 0x19e   : > { %22254 = vst [vmem:[#allocation47_spill] sm:$0xff] %v15232_v19  ;;  %v22255_v52 = vld [vmem:[#allocation3_spill] sm:$0xff]  ;;  %22257 = vst [vmem:[#allocation86_spill] sm:$0xff] %v15249_v4  ;;  %7732 = vperm.xlu1 %12296, %v22259_v62   ;;  %v15269_v14 = vld [vmem:[%s21703_s3 + $0x158] sm:$0xff]  ;;  %v12406_v62 = vpop.eup %12405  ;;  %v15287_v28 = vmul.f32 %v12404_v15, %v5044_v58  ;;  %11580 = vmatmul.mubr.msk.f32.gmra.mrb[138].mxu0 %vm500_vm0, %v15249_v4  ;;  %v5248_v58 = vadd.f32 1e-05, %v4852_v46 }
 0x19f   : > { %v15242_v21 = vmul.f32 %v15126_v44, %v22255_v52  ;;  %22258 = vst [vmem:[#allocation87_spill] sm:$0xff] %v15251_v36  ;;  %v15280_v52 = vld [vmem:[%s21703_s3 + $0x160] sm:$0xff]  ;;  %v15285_v59 = vld [vmem:[%s21703_s3 + $0x168] sm:$0xff]  ;;  %v5045_v17 = vld [vmem:[%s21702_s2 + $0x1b0] sm:$0xff]  ;;  %v5247_v15 = vadd.f32 1e-05, %v4851_v45 }
 0x1a0   : > { %22260 = vst [vmem:[#allocation88_spill] sm:$0xff] %v15287_v28  ;;  %v22261_v3 = vld [vmem:[#allocation12_spill] sm:$0xff]  ;;  %v22262_v43 = vld [vmem:[#allocation42_spill] sm:$0xff]  ;;  %v15298_v36 = vpop.permute.xlu1 %6404  ;;  %v22264_v49 = vld [vmem:[#allocation5_spill] sm:$0xff]  ;;  %v4854_v46 = vmax.f32 %v22270_v41, 0.0 }
 0x1a1   : > { %22256 = vst [vmem:[#allocation3_spill] sm:$0xff] %v15242_v21  ;;  %v2274_v18 = vmul.f32 %v22261_v3, %v22261_v3  ;;  %v2275_v44 = vmul.f32 %v22262_v43, %v22262_v43  ;;  %7737 = vperm.xlu0 %12295, %v22263_v33   ;;  %v15305_v38 = vmul.f32 %v15232_v19, %v22264_v49  ;;  %v22266_v42 = vld [vmem:[#allocation6_spill] sm:$0xff]  ;;  %v22268_v51 = vld [vmem:[#allocation19_spill] sm:$0xff]  ;;  %v15316_v4 = vld [vmem:[%s21703_s3 + $0x170] sm:$0xff]  ;;  %v15323_v49 = vmul.f32 0.020408163, %v14685_v1  ;;  %v12408_v33 = vpop.eup %12407 }
 0x1a2   : > { %v15308_v3 = vmul.f32 0.020408163, %v22266_v42  ;;  %6564 = vperm.xlu1 %12296, %v22268_v51   ;;  %22269 = vst [vmem:[#allocation5_spill] sm:$0xff] %v15316_v4  ;;  %v22272_v42 = vld [vmem:[#allocation7_spill] sm:$0xff]  ;;  %v22273_v51 = vsub.f32 %v14980_v9, %v14991_v30  ;;  %v15333_v43 = vmul.f32 %v12406_v62, %v5045_v17  ;;  %v15340_v1 = vpop.f32.mrb[79].mxu1  ;;  %v15345_v34 = vld [vmem:[%s21700_s0 + $0x460] sm:$0xff]  ;;  %v15352_v30 = vpop.permute.xlu0 %6409  ;;  %12413 = vrsqrt.f32 %v5247_v15 }
 0x1a3   : > { %22265 = vst [vmem:[#allocation12_spill] sm:$0xff] %v15305_v38  ;;  %11863 = vmatprep.mubr.msk.f32.mxu1 %vm500_vm0, %v2274_v18  ;;  %22271 = vst [vmem:[#allocation6_spill] sm:$0xff] %v15323_v49  ;;  %v15326_v2 = vmul.f32 0.020408163, %v22272_v42  ;;  %v15350_v9 = vld [vmem:[%s21700_s0 + $0x468] sm:$0xff]  ;;  %v15359_v17 = vld [vmem:[%s21703_s3 + $0x178] sm:$0xff]  ;;  %v15363_v18 = vmul.f32 %v15323_v49, %v15323_v49  ;;  %11582 = vmatprep.mubr.msk.f32.mxu0 %vm500_vm0, %v15345_v34  ;;  %12415 = vrsqrt.f32 %v5248_v58 }
 0x1a4   : > { %22267 = vst [vmem:[#allocation42_spill] sm:$0xff] %v15308_v3  ;;  %v4853_v45 = vmax.f32 %v22273_v51, 0.0  ;;  %22274 = vst [vmem:[#allocation19_spill] sm:$0xff] %v15333_v43  ;;  %11864 = vmatmul.mubr.msk.f32.gmra.mrb[120].mxu1 %vm500_vm0, %v2275_v44  ;;  %v15338_v0 = vmul.f32 %v15308_v3, %v15308_v3  ;;  %v15366_v62 = vmul.f32 0.020408163, %v14687_v22  ;;  %v22279_v41 = vld [vmem:[#allocation16_spill] sm:$0xff]  ;;  %v15385_v3 = vpop.permute.xlu1 %7582  ;;  %11583 = vmatmul.mubr.msk.f32.gmra.mrb[140].mxu0 %vm500_vm0, %v15350_v9 }
 0x1a5   : > { %22275 = vst [vmem:[#allocation7_spill] sm:$0xff] %v15340_v1  ;;  %22276 = vst [vmem:[#allocation89_spill] sm:$0xff] %v15345_v34  ;;  %v15370_v42 = vmul.f32 %v15287_v28, %v22279_v41  ;;  %v15374_v51 = vpop.f32.mrb[80].mxu0  ;;  %v15379_v44 = vld [vmem:[%s21700_s0 + $0x470] sm:$0xff]  ;;  %v12712_v22 = vld [vmem:[%s21700_s0 + $0x8] sm:$0xff]  ;;  %v12410_v28 = vpop.eup %12409  ;;  %v22292_v58 = vsub.f32 %v15081_v47, %v15091_v32 }
 0x1a6   : > { %22277 = vst [vmem:[#allocation90_spill] sm:$0xff] %v15350_v9  ;;  %22278 = vst [vmem:[#allocation91_spill] sm:$0xff] %v15359_v17  ;;  %v7368_v19 = vmul.f32 %v12712_v22, %v14982_v16  ;;  %v22283_v41 = vld [vmem:[#allocation48_spill] sm:$0xff]  ;;  %v15397_v34 = vpop.f32.mrb[81].mxu0  ;;  %v22285_v16 = vsub.f32 %v15103_v40, %v22242_v60  ;;  %v5250_v15 = vadd.f32 1e-05, %v4854_v46  ;;  %11585 = vmatprep.mubr.msk.f32.mxu0 %vm500_vm0, %v15379_v44 }
 0x1a7   : > { %22280 = vst [vmem:[#allocation16_spill] sm:$0xff] %v15370_v42  ;;  %22281 = vst [vmem:[#allocation92_spill] sm:$0xff] %v15374_v51  ;;  %6569 = vperm.xlu0 %12295, %v22283_v41   ;;  %v5046_v51 = vld [vmem:[%s21702_s2 + $0x1b8] sm:$0xff]  ;;  %v15405_v22 = vld [vmem:[%s21703_s3 + $0x180] sm:$0xff]  ;;  %v15416_v60 = vpop.f32.mrb[80].mxu1  ;;  %v12412_v4 = vpop.eup %12411 }
 0x1a8   : > { %22282 = vst [vmem:[#allocation93_spill] sm:$0xff] %v15379_v44  ;;  %22284 = vst [vmem:[#allocation48_spill] sm:$0xff] %v15397_v34  ;;  %7742 = vperm.xlu1 %12296, %v22285_v16   ;;  %v15410_v41 = vld [vmem:[%s21703_s3 + $0x188] sm:$0xff]  ;;  %v22287_v49 = vld [vmem:[#allocation2_spill] sm:$0xff]  ;;  %v5249_v40 = vadd.f32 1e-05, %v4853_v45  ;;  %v15433_v45 = vpop.permute.xlu0 %7587  ;;  %12417 = vrsqrt.f32 %v5250_v15 }
 0x1a9   : > { %22286 = vst [vmem:[#allocation94_spill] sm:$0xff] %v15410_v41  ;;  %v2276_v34 = vmul.f32 %v22287_v49, %v22287_v49  ;;  %22288 = vst [vmem:[#allocation2_spill] sm:$0xff] %v15416_v60  ;;  %v22289_v46 = vld [vmem:[#allocation17_spill] sm:$0xff]  ;;  %v4856_v60 = vmax.f32 %v22292_v58, 0.0  ;;  %v22296_v17 = vld [vmem:[#allocation8_spill] sm:$0xff] }
 0x1aa   : > { %v2277_v16 = vmul.f32 %v22289_v46, %v22289_v46  ;;  %v22290_v9 = vld [vmem:[#allocation53_spill] sm:$0xff]  ;;  %v15438_v46 = vmul.f32 %v12408_v33, %v5046_v51  ;;  %v15448_v44 = vmul.f32 0.020408163, %v22296_v17  ;;  %v15456_v33 = vpop.permute.xlu1 %6414  ;;  %v22298_v51 = vsub.f32 %v15119_v27, %v14533_v5  ;;  %v5048_v17 = vld [vmem:[%s21702_s2 + $0x1c8] sm:$0xff]  ;;  %v22312_v41 = vld [vmem:[#allocation4_spill] sm:$0xff] }
 0x1ab   : > { %v15424_v26 = vmul.f32 %v15333_v43, %v22290_v9  ;;  %v15431_v49 = vld [vmem:[%s21700_s0 + $0x478] sm:$0xff]  ;;  %v5047_v9 = vld [vmem:[%s21702_s2 + $0x1c0] sm:$0xff]  ;;  %11866 = vmatprep.mubr.msk.f32.mxu1 %vm500_vm0, %v2276_v34  ;;  %v22294_v43 = vld [vmem:[#allocation23_spill] sm:$0xff]  ;;  %v22301_v5 = vsub.f32 %v15084_v7, %v15110_v31  ;;  %12419 = vrsqrt.f32 %v5249_v40 }
 0x1ac   : > { %22293 = vst [vmem:[#allocation53_spill] sm:$0xff] %v15438_v46  ;;  %v15445_v39 = vmul.f32 0.020408163, %v22294_v43  ;;  %22297 = vst [vmem:[#allocation8_spill] sm:$0xff] %v15448_v44  ;;  %v12713_v47 = vld [vmem:[%s21700_s0 + $0x18] sm:$0xff]  ;;  %7747 = vperm.xlu0 %12295, %v22298_v51   ;;  %11867 = vmatmul.mubr.msk.f32.gmra.mrb[122].mxu1 %vm500_vm0, %v2277_v16  ;;  %v15483_v16 = vpop.f32.mrb[81].mxu1  ;;  %v15494_v7 = vmul.f32 %v15448_v44, %v15448_v44  ;;  %v15508_v40 = vpop.permute.xlu0 %6419 }
 0x1ad   : > { %22291 = vst [vmem:[#allocation17_spill] sm:$0xff] %v15424_v26  ;;  %v15454_v32 = vmul.f32 %v12713_v47, %v15071_v63  ;;  %v22299_v63 = vld [vmem:[#allocation56_spill] sm:$0xff]  ;;  %v8556_v47 = vadd.f32 %v15141_v50, %v7368_v19  ;;  %v22300_v1 = vld [vmem:[#allocation49_spill] sm:$0xff]  ;;  %v4855_v27 = vmax.f32 %v22301_v5, 0.0  ;;  %11586 = vmatmul.mubr.msk.f32.gmra.mrb[142].mxu0 %vm500_vm0, %v15431_v49  ;;  %v15488_v50 = vld [vmem:[%s21700_s0 + $0x480] sm:$0xff]  ;;  %v15490_v19 = vmul.f32 %v12410_v28, %v5047_v9 }
 0x1ae   : > { %22295 = vst [vmem:[#allocation23_spill] sm:$0xff] %v15445_v39  ;;  %v15470_v58 = vmul.f32 0.020408163, %v22299_v63  ;;  %6574 = vperm.xlu1 %12296, %v22300_v1   ;;  %v15479_v51 = vmul.f32 %v15445_v39, %v15445_v39  ;;  %22302 = vst [vmem:[#allocation56_spill] sm:$0xff] %v15488_v50  ;;  %v22304_v31 = vld [vmem:[#allocation9_spill] sm:$0xff]  ;;  %11588 = vmatprep.mubr.msk.f32.mxu0 %vm500_vm0, %v15488_v50  ;;  %v15504_v15 = vld [vmem:[%s21700_s0 + $0x488] sm:$0xff]  ;;  %v15515_v5 = vmul.f32 %v12412_v4, %v5048_v17  ;;  %v15530_v12 = vpop.permute.xlu1 %7592 }
 0x1af   : > { %22303 = vst [vmem:[#allocation49_spill] sm:$0xff] %v15490_v19  ;;  %v15497_v1 = vmul.f32 0.020408163, %v22304_v31  ;;  %v15506_v63 = vpop.f32.mrb[82].mxu0  ;;  %v5252_v28 = vadd.f32 1e-05, %v4856_v60  ;;  %v22313_v4 = vsub.f32 %v15181_v29, %v15216_v11  ;;  %v22317_v11 = vsub.f32 %v15124_v20, %v14576_v48 }
 0x1b0   : > { %22305 = vst [vmem:[#allocation9_spill] sm:$0xff] %v15506_v63  ;;  %v15513_v9 = vld [vmem:[%s21703_s3 + $0x190] sm:$0xff]  ;;  %22307 = vst [vmem:[#allocation96_spill] sm:$0xff] %v15515_v5  ;;  %v22308_v34 = vld [vmem:[#allocation22_spill] sm:$0xff]  ;;  %v15528_v60 = vpop.f32.mrb[83].mxu0  ;;  %6579 = vperm.xlu0 %12295, %v22312_v41   ;;  %v15542_v50 = vpop.f32.mrb[82].mxu1 }
 0x1b1   : > { %22306 = vst [vmem:[#allocation95_spill] sm:$0xff] %v15513_v9  ;;  %v15521_v43 = vmul.f32 %v15438_v46, %v22308_v34  ;;  %v15526_v39 = vld [vmem:[%s21700_s0 + $0x490] sm:$0xff]  ;;  %22311 = vst [vmem:[#allocation98_spill] sm:$0xff] %v15528_v60  ;;  %v4858_v17 = vmax.f32 %v22313_v4, 0.0  ;;  %v22314_v34 = vld [vmem:[#allocation51_spill] sm:$0xff]  ;;  %v8753_v60 = vmax.f32 %v15139_v56, 0.0  ;;  %11589 = vmatmul.mubr.msk.f32.gmra.mrb[144].mxu0 %vm500_vm0, %v15504_v15  ;;  %12421 = vrsqrt.f32 %v5252_v28 }
 0x1b2   : > { %22310 = vst [vmem:[#allocation97_spill] sm:$0xff] %v15526_v39  ;;  %v2278_v46 = vmul.f32 %v22314_v34, %v22314_v34  ;;  %v22315_v63 = vld [vmem:[#allocation52_spill] sm:$0xff]  ;;  %22316 = vst [vmem:[#allocation4_spill] sm:$0xff] %v15542_v50  ;;  %v8754_v61 = vmax.f32 %v8556_v47, 0.0  ;;  %7752 = vperm.xlu1 %12296, %v22317_v11   ;;  %v5251_v4 = vadd.f32 1e-05, %v4855_v27  ;;  %11591 = vmatprep.mubr.msk.f32.mxu0 %vm500_vm0, %v15526_v39 }
 0x1b3   : > { %22309 = vst [vmem:[#allocation22_spill] sm:$0xff] %v15521_v43  ;;  %v2279_v44 = vmul.f32 %v22315_v63, %v22315_v63  ;;  %v12714_v41 = vld [vmem:[%s21700_s0 + $0x10] sm:$0xff]  ;;  %v12414_v63 = vpop.eup %12413  ;;  %v22319_v47 = vld [vmem:[#allocation61_spill] sm:$0xff]  ;;  %v22327_v34 = vld [vmem:[#allocation62_spill] sm:$0xff]  ;;  %v22331_v39 = vsub.f32 %v15146_v24, %v14605_v10 }
 0x1b4   : > { %v7369_v29 = vmul.f32 %v12714_v41, %v15226_v54  ;;  %v5049_v56 = vld [vmem:[%s21702_s2 + $0x1d0] sm:$0xff]  ;;  %11869 = vmatprep.mubr.msk.f32.mxu1 %vm500_vm0, %v2278_v46  ;;  %v15562_v54 = vmul.f32 %v15490_v19, %v22319_v47  ;;  %v22323_v27 = vld [vmem:[#allocation13_spill] sm:$0xff]  ;;  %v12416_v31 = vpop.eup %12415  ;;  %v15580_v47 = vpop.permute.xlu0 %7597  ;;  %v15592_v9 = vmul.f32 0.020408163, %v22327_v34  ;;  %12423 = vrsqrt.f32 %v5251_v4  ;;  %v22341_v21 = vld [vmem:[#allocation59_spill] sm:$0xff] }
 0x1b5   : > { %v22321_v48 = vld [vmem:[#allocation28_spill] sm:$0xff]  ;;  %v15568_v41 = vmul.f32 0.020408163, %v22323_v27  ;;  %v15575_v11 = vld [vmem:[%s21700_s0 + $0x498] sm:$0xff]  ;;  %11870 = vmatmul.mubr.msk.f32.gmra.mrb[124].mxu1 %vm500_vm0, %v2279_v44  ;;  %7757 = vperm.xlu0 %12295, %v22331_v39   ;;  %v5254_v44 = vadd.f32 1e-05, %v4858_v17 }
 0x1b6   : > { %22320 = vst [vmem:[#allocation51_spill] sm:$0xff] %v15562_v54  ;;  %v15565_v20 = vmul.f32 0.020408163, %v22321_v48  ;;  %v15578_v46 = vadd.f32 %v15273_v23, %v7369_v29  ;;  %v22325_v48 = vsub.f32 %v15238_v13, %v15220_v25  ;;  %v15588_v27 = vld [vmem:[%s21703_s3 + $0x198] sm:$0xff]  ;;  %v22328_v50 = vld [vmem:[#allocation60_spill] sm:$0xff]  ;;  %v12715_v29 = vld [vmem:[%s21700_s0 + $0x20] sm:$0xff]  ;;  %11592 = vmatmul.mubr.msk.f32.gmra.mrb[146].mxu0 %vm500_vm0, %v15575_v11 }
 0x1b7   : > { %22324 = vst [vmem:[#allocation61_spill] sm:$0xff] %v15568_v41  ;;  %22326 = vst [vmem:[#allocation28_spill] sm:$0xff] %v15588_v27  ;;  %v15596_v23 = vmul.f32 %v15515_v5, %v22328_v50  ;;  %v22330_v25 = vld [vmem:[#allocation82_spill] sm:$0xff]  ;;  %v15613_v50 = vpack.c.bf16 %v8754_v61, %v8753_v60  ;;  %v15625_v10 = vmul.f32 %v15568_v41, %v15568_v41  ;;  %v15629_v39 = vpop.f32.mrb[83].mxu1  ;;  %v12716_v61 = vld [vmem:[%s21700_s0 + $0x28] sm:$0xff]  ;;  %v15642_v4 = vpop.f32.mrb[84].mxu0  ;;  %12425 = vrsqrt.f32 %v5254_v44 }
 0x1b8   : > { %22322 = vst [vmem:[#allocation52_spill] sm:$0xff] %v15565_v20  ;;  %v4857_v19 = vmax.f32 %v22325_v48, 0.0  ;;  %v15602_v13 = vmul.f32 %v12715_v29, %v22330_v25  ;;  %v15604_v48 = vpop.permute.xlu1 %6424  ;;  %v15611_v34 = vmul.f32 %v15565_v20, %v15565_v20  ;;  %v22333_v5 = vld [vmem:[#allocation50_spill] sm:$0xff]  ;;  %v15621_v25 = vmul.f32 %v12414_v63, %v5049_v56  ;;  %v22337_v60 = vld [vmem:[#allocation65_spill] sm:$0xff]  ;;  %v15649_v56 = vpop.eup %12417  ;;  %v15690_v44 = vld [vmem:[%s21703_s3 + $0x1a8] sm:$0xff] }
 0x1b9   : > { %22329 = vst [vmem:[#allocation13_spill] sm:$0xff] %v15596_v23  ;;  %22332 = vst [vmem:[#allocation62_spill] sm:$0xff] %v15613_v50  ;;  %6584 = vperm.xlu1 %12296, %v22333_v5   ;;  %v15619_v29 = vld [vmem:[%s21703_s3 + $0x1a0] sm:$0xff]  ;;  %v7372_v24 = vmul.f32 %v12716_v61, %v15298_v36  ;;  %v15640_v17 = vmul.f32 0.020408163, %v22337_v60  ;;  %v15652_v61 = vpop.permute.xlu0 %6429  ;;  %v5050_v5 = vld [vmem:[%s21702_s2 + $0x1d8] sm:$0xff]  ;;  %v2281_v27 = vmul.f32 %v22341_v21, %v22341_v21 }
 0x1ba   : > { %22334 = vst [vmem:[#allocation60_spill] sm:$0xff] %v15619_v29  ;;  %22335 = vst [vmem:[#allocation82_spill] sm:$0xff] %v15621_v25  ;;  %v15647_v63 = vld [vmem:[%s21700_s0 + $0x4a0] sm:$0xff]  ;;  %v5253_v28 = vadd.f32 1e-05, %v4857_v19  ;;  %v15663_v50 = vpop.f32.mrb[85].mxu0  ;;  %v12420_v19 = vpop.eup %12419  ;;  %v15708_v38 = vmul.f32 %v12416_v31, %v5050_v5 }
 0x1bb   : > { %22336 = vst [vmem:[#allocation50_spill] sm:$0xff] %v15629_v39  ;;  %22338 = vst [vmem:[#allocation65_spill] sm:$0xff] %v15642_v4  ;;  %v22340_v60 = vld [vmem:[#allocation58_spill] sm:$0xff]  ;;  %11594 = vmatprep.mubr.msk.f32.mxu0 %vm500_vm0, %v15647_v63  ;;  %v15668_v36 = vld [vmem:[%s21700_s0 + $0x4a8] sm:$0xff]  ;;  %v8558_v4 = vadd.f32 %v15385_v3, %v15454_v32  ;;  %v22345_v39 = vsub.f32 %v15151_v53, %v14628_v8  ;;  %v22346_v3 = vsub.f32 %v15326_v2, %v15338_v0 }
 0x1bc   : > { %22339 = vst [vmem:[#allocation99_spill] sm:$0xff] %v15647_v63  ;;  %v2280_v20 = vmul.f32 %v22340_v60, %v22340_v60  ;;  %22342 = vst [vmem:[#allocation58_spill] sm:$0xff] %v15663_v50  ;;  %v15672_v41 = vpop.permute.xlu1 %7602  ;;  %v22343_v60 = vld [vmem:[#allocation55_spill] sm:$0xff]  ;;  %v15679_v63 = vpop.f32.mrb[84].mxu1  ;;  %v22348_v21 = vld [vmem:[#allocation70_spill] sm:$0xff]  ;;  %11595 = vmatmul.mubr.msk.f32.gmra.mrb[148].mxu0 %vm500_vm0, %v15668_v36  ;;  %12427 = vrsqrt.f32 %v5253_v28  ;;  %v22360_v28 = vsub.f32 %v15199_v57, %v14683_v37 }
 0x1bd   : > { %6589 = vperm.xlu0 %12295, %v22343_v60   ;;  %22344 = vst [vmem:[#allocation59_spill] sm:$0xff] %v15679_v63  ;;  %7762 = vperm.xlu1 %12296, %v22345_v39   ;;  %v4860_v32 = vmax.f32 %v22346_v3, 0.0  ;;  %22347 = vst [vmem:[#allocation55_spill] sm:$0xff] %v15690_v44  ;;  %v5051_v60 = vld [vmem:[%s21702_s2 + $0x1e0] sm:$0xff]  ;;  %v15698_v50 = vmul.f32 %v15621_v25, %v22348_v21  ;;  %v22350_v8 = vld [vmem:[#allocation25_spill] sm:$0xff]  ;;  %v22353_v39 = vsub.f32 %v15366_v62, %v15363_v18  ;;  %v15724_v62 = vpop.permute.xlu0 %7607  ;;  %v15791_v25 = vpop.f32.mrb[86].mxu0 }
 0x1be   : > { %11872 = vmatprep.mubr.msk.f32.mxu1 %vm500_vm0, %v2280_v20  ;;  %v15701_v53 = vmul.f32 0.020408163, %v22350_v8  ;;  %v22352_v2 = vld [vmem:[#allocation63_spill] sm:$0xff]  ;;  %v22357_v63 = vld [vmem:[#allocation64_spill] sm:$0xff]  ;;  %22368 = vst [vmem:[#allocation100_spill] sm:$0xff] %v15791_v25  ;;  %v15811_v44 = vpop.f32.mrb[87].mxu0 }
 0x1bf   : > { %22349 = vst [vmem:[#allocation70_spill] sm:$0xff] %v15698_v50  ;;  %v2282_v0 = vmul.f32 %v22352_v2, %v22352_v2  ;;  %v4859_v3 = vmax.f32 %v22353_v39, 0.0  ;;  %22354 = vst [vmem:[#allocation63_spill] sm:$0xff] %v15708_v38  ;;  %11873 = vmatmul.mubr.msk.f32.gmra.mrb[126].mxu1 %vm500_vm0, %v2281_v27  ;;  %v22355_v29 = vld [vmem:[#allocation15_spill] sm:$0xff]  ;;  %v2283_v21 = vmul.f32 %v22357_v63, %v22357_v63  ;;  %v12717_v8 = vld [vmem:[%s21700_s0 + $0x30] sm:$0xff]  ;;  %v8756_v63 = vmax.f32 %v8558_v4, 0.0 }
 0x1c0   : > { %22351 = vst [vmem:[#allocation25_spill] sm:$0xff] %v15701_v53  ;;  %v15712_v20 = vmul.f32 0.020408163, %v22355_v29  ;;  %v15722_v18 = vmul.f32 %v12717_v8, %v15352_v30  ;;  %v15729_v31 = vld [vmem:[%s21703_s3 + $0x1b0] sm:$0xff]  ;;  %v15733_v27 = vmul.f32 %v15701_v53, %v15701_v53  ;;  %v22359_v29 = vld [vmem:[#allocation30_spill] sm:$0xff]  ;;  %v15739_v30 = vpop.permute.xlu1 %6434  ;;  %v15746_v39 = vmul.f32 %v12420_v19, %v5051_v60  ;;  %v5052_v37 = vld [vmem:[%s21702_s2 + $0x1e8] sm:$0xff] }
 0x1c1   : > { %22358 = vst [vmem:[#allocation64_spill] sm:$0xff] %v15729_v31  ;;  %v15736_v5 = vmul.f32 0.020408163, %v22359_v29  ;;  %11875 = vmatprep.mubr.msk.f32.mxu1 %vm500_vm0, %v2282_v0  ;;  %7767 = vperm.xlu0 %12295, %v22360_v28   ;;  %v15754_v29 = vadd.f32 %v15433_v45, %v15602_v13  ;;  %v15757_v4 = vadd.f32 %v15530_v12, %v7372_v24  ;;  %v22362_v0 = vld [vmem:[#allocation57_spill] sm:$0xff]  ;;  %v22363_v19 = vld [vmem:[#allocation67_spill] sm:$0xff]  ;;  %v15768_v28 = vpop.f32.mrb[85].mxu1  ;;  %v15780_v13 = vpop.eup %12421 }
 0x1c2   : > { %22356 = vst [vmem:[#allocation15_spill] sm:$0xff] %v15712_v20  ;;  %22361 = vst [vmem:[#allocation30_spill] sm:$0xff] %v15746_v39  ;;  %v15750_v8 = vmul.f32 %v15712_v20, %v15712_v20  ;;  %6594 = vperm.xlu1 %12296, %v22362_v0   ;;  %v15766_v60 = vmul.f32 0.020408163, %v22363_v19  ;;  %v15773_v45 = vld [vmem:[%s21700_s0 + $0x4b0] sm:$0xff]  ;;  %v15778_v12 = vld [vmem:[%s21700_s0 + $0x4b8] sm:$0xff]  ;;  %v12424_v53 = vpop.eup %12423  ;;  %v15793_v42 = vpop.permute.xlu0 %6439 }
 0x1c3   : > { %22364 = vst [vmem:[#allocation57_spill] sm:$0xff] %v15773_v45  ;;  %22365 = vst [vmem:[#allocation67_spill] sm:$0xff] %v15778_v12  ;;  %v5256_v24 = vadd.f32 1e-05, %v4860_v32  ;;  %v5255_v0 = vadd.f32 1e-05, %v4859_v3  ;;  %11876 = vmatmul.mubr.msk.f32.gmra.mrb[128].mxu1 %vm500_vm0, %v2283_v21  ;;  %11597 = vmatprep.mubr.msk.f32.mxu0 %vm500_vm0, %v15773_v45  ;;  %v22369_v32 = vsub.f32 %v15470_v58, %v15479_v51 }
 0x1c4   : > { %v22366_v2 = vld [vmem:[#allocation14_spill] sm:$0xff]  ;;  %v22370_v21 = vld [vmem:[#allocation68_spill] sm:$0xff]  ;;  %11598 = vmatmul.mubr.msk.f32.gmra.mrb[150].mxu0 %vm500_vm0, %v15778_v12  ;;  %v22374_v58 = vmax.f32 %v15578_v46, 0.0  ;;  %v15827_v20 = vld [vmem:[%s21703_s3 + $0x1b8] sm:$0xff]  ;;  %v22386_v12 = vsub.f32 %v15497_v1, %v15494_v7 }
 0x1c5   : > { %v15787_v57 = vmul.f32 %v15708_v38, %v22366_v2  ;;  %v4862_v3 = vmax.f32 %v22369_v32, 0.0  ;;  %v2284_v26 = vmul.f32 %v22370_v21, %v22370_v21  ;;  %v22371_v2 = vld [vmem:[#allocation69_spill] sm:$0xff]  ;;  %v15809_v31 = vld [vmem:[%s21700_s0 + $0x4c0] sm:$0xff]  ;;  %v22376_v19 = vld [vmem:[#allocation24_spill] sm:$0xff]  ;;  %12429 = vrsqrt.f32 %v5256_v24 }
 0x1c6   : > { %v2285_v38 = vmul.f32 %v22371_v2, %v22371_v2  ;;  %22372 = vst [vmem:[#allocation68_spill] sm:$0xff] %v15809_v31  ;;  %22373 = vst [vmem:[#allocation69_spill] sm:$0xff] %v15811_v44  ;;  %v15815_v51 = vpack.c.bf16 %v8756_v63, %v22374_v58  ;;  %v12718_v32 = vld [vmem:[%s21700_s0 + $0x38] sm:$0xff]  ;;  %v15821_v2 = vpop.permute.xlu1 %7612  ;;  %6599 = vperm.xlu0 %12295, %v22376_v19   ;;  %v15830_v44 = vmul.f32 %v15649_v56, %v5052_v37  ;;  %v5053_v46 = vld [vmem:[%s21702_s2 + $0x1f0] sm:$0xff]  ;;  %v15844_v19 = vpop.f32.mrb[86].mxu1 }
 0x1c7   : > { %22367 = vst [vmem:[#allocation14_spill] sm:$0xff] %v15787_v57  ;;  %v7374_v21 = vmul.f32 %v12718_v32, %v15456_v33  ;;  %22377 = vst [vmem:[#allocation24_spill] sm:$0xff] %v15827_v20  ;;  %v22379_v63 = vld [vmem:[#allocation73_spill] sm:$0xff]  ;;  %v15842_v33 = vld [vmem:[%s21700_s0 + $0x4c8] sm:$0xff]  ;;  %v8757_v32 = vmax.f32 %v15754_v29, 0.0  ;;  %v8758_v56 = vmax.f32 %v15757_v4, 0.0  ;;  %11878 = vmatprep.mubr.msk.f32.mxu1 %vm500_vm0, %v2284_v26  ;;  %v15863_v29 = vpop.eup %12425  ;;  %11600 = vmatprep.mubr.msk.f32.mxu0 %vm500_vm0, %v15809_v31  ;;  %v15877_v26 = vpop.permute.xlu0 %7617  ;;  %12431 = vrsqrt.f32 %v5255_v0 }
 0x1c8   : > { %22375 = vst [vmem:[#allocation101_spill] sm:$0xff] %v15815_v51  ;;  %22378 = vst [vmem:[#allocation102_spill] sm:$0xff] %v15830_v44  ;;  %v15837_v58 = vmul.f32 %v15746_v39, %v22379_v63  ;;  %v22383_v37 = vld [vmem:[#allocation83_spill] sm:$0xff]  ;;  %v22384_v51 = vld [vmem:[#allocation54_spill] sm:$0xff]  ;;  %v4861_v63 = vmax.f32 %v22386_v12, 0.0  ;;  %11879 = vmatmul.mubr.msk.f32.gmra.mrb[130].mxu1 %vm500_vm0, %v2285_v38  ;;  %11601 = vmatmul.mubr.msk.f32.gmra.mrb[152].mxu0 %vm500_vm0, %v15842_v33  ;;  %v12428_v31 = vpop.eup %12427 }
 0x1c9   : > { %22381 = vst [vmem:[#allocation103_spill] sm:$0xff] %v15842_v33  ;;  %22382 = vst [vmem:[#allocation104_spill] sm:$0xff] %v15844_v19  ;;  %v22385_v25 = vsub.f32 %v22383_v37, %v22384_v51  ;;  %v15857_v39 = vld [vmem:[%s21703_s3 + $0x1c0] sm:$0xff]  ;;  %v22392_v7 = vld [vmem:[#allocation71_spill] sm:$0xff]  ;;  %v15879_v37 = vmul.f32 %v12424_v53, %v5053_v46  ;;  %v15944_v43 = vadd.f32 %v15672_v41, %v7374_v21 }
 0x1ca   : > { %22380 = vst [vmem:[#allocation73_spill] sm:$0xff] %v15837_v58  ;;  %22387 = vst [vmem:[#allocation83_spill] sm:$0xff] %v15857_v39  ;;  %v22388_v19 = vld [vmem:[#allocation46_spill] sm:$0xff]  ;;  %v15870_v1 = vmul.f32 0.020408163, %v22392_v7  ;;  %v15891_v7 = vpop.permute.xlu1 %6444  ;;  %v22396_v0 = vld [vmem:[#allocation29_spill] sm:$0xff] }
 0x1cb   : > { %7772 = vperm.xlu1 %12296, %v22385_v25   ;;  %v15861_v45 = vmul.f32 0.020408163, %v22388_v19  ;;  %v22390_v25 = vld [vmem:[#allocation21_spill] sm:$0xff]  ;;  %v22393_v12 = vld [vmem:[#allocation74_spill] sm:$0xff]  ;;  %v5258_v19 = vadd.f32 1e-05, %v4862_v3 }
 0x1cc   : > { %v15867_v4 = vmul.f32 0.020408163, %v22390_v25  ;;  %v15873_v51 = vmul.f32 0.020408163, %v22393_v12  ;;  %22394 = vst [vmem:[#allocation21_spill] sm:$0xff] %v15879_v37  ;;  %v12719_v24 = vld [vmem:[%s21700_s0 + $0x40] sm:$0xff] }
 0x1cd   : > { %22389 = vst [vmem:[#allocation54_spill] sm:$0xff] %v15861_v45  ;;  %v15883_v38 = vmul.f32 %v15861_v45, %v15861_v45  ;;  %v7375_v25 = vmul.f32 %v12719_v24, %v15508_v40  ;;  %v22395_v12 = vld [vmem:[#allocation84_spill] sm:$0xff]  ;;  %v15908_v40 = vadd.f32 %v15580_v47, %v15722_v18  ;;  %v22400_v24 = vld [vmem:[#allocation66_spill] sm:$0xff]  ;;  %v15928_v18 = vld [vmem:[%s21700_s0 + $0x4d8] sm:$0xff]  ;;  %v15941_v39 = vpop.f32.mrb[88].mxu0  ;;  %12433 = vrsqrt.f32 %v5258_v19 }
 0x1ce   : > { %22391 = vst [vmem:[#allocation46_spill] sm:$0xff] %v15867_v4  ;;  %v22397_v3 = vsub.f32 %v22395_v12, %v22396_v0  ;;  %v15900_v46 = vmul.f32 %v15867_v4, %v15867_v4  ;;  %v22398_v45 = vld [vmem:[#allocation72_spill] sm:$0xff]  ;;  %v5257_v12 = vadd.f32 1e-05, %v4861_v63  ;;  %22401 = vst [vmem:[#allocation74_spill] sm:$0xff] %v15928_v18  ;;  %v15930_v63 = vpack.c.bf16 %v8758_v56, %v8757_v32  ;;  %v15946_v32 = vpop.permute.xlu0 %6449  ;;  %v15961_v41 = vpop.f32.mrb[89].mxu0 }
 0x1cf   : > { %v15904_v33 = vmul.f32 %v15830_v44, %v22398_v45  ;;  %6604 = vperm.xlu1 %12296, %v22400_v24   ;;  %v15918_v45 = vpop.f32.mrb[87].mxu1  ;;  %v15923_v47 = vld [vmem:[%s21700_s0 + $0x4d0] sm:$0xff]  ;;  %v22403_v24 = vsub.f32 %v15592_v9, %v15611_v34  ;;  %v22404_v44 = vld [vmem:[#allocation75_spill] sm:$0xff]  ;;  %22405 = vst [vmem:[#allocation29_spill] sm:$0xff] %v15941_v39  ;;  %v22407_v34 = vld [vmem:[#allocation41_spill] sm:$0xff]  ;;  %v15963_v21 = vpop.permute.xlu1 %7622 }
 0x1d0   : > { %7777 = vperm.xlu0 %12295, %v22397_v3   ;;  %v5054_v3 = vld [vmem:[%s21702_s2 + $0x1f8] sm:$0xff]  ;;  %22402 = vst [vmem:[#allocation84_spill] sm:$0xff] %v15930_v63  ;;  %v2286_v54 = vmul.f32 %v22404_v44, %v22404_v44  ;;  %11603 = vmatprep.mubr.msk.f32.mxu0 %vm500_vm0, %v15923_v47  ;;  %v22406_v56 = vld [vmem:[#allocation76_spill] sm:$0xff]  ;;  %v15959_v44 = vld [vmem:[%s21700_s0 + $0x4e0] sm:$0xff]  ;;  %12435 = vrsqrt.f32 %v5257_v12 }
 0x1d1   : > { %22399 = vst [vmem:[#allocation71_spill] sm:$0xff] %v15904_v33  ;;  %v4864_v0 = vmax.f32 %v22403_v24, 0.0  ;;  %v2287_v9 = vmul.f32 %v22406_v56, %v22406_v56  ;;  %v15952_v24 = vmul.f32 %v15879_v37, %v22407_v34  ;;  %11604 = vmatmul.mubr.msk.f32.gmra.mrb[154].mxu0 %vm500_vm0, %v15928_v18  ;;  %22409 = vst [vmem:[#allocation66_spill] sm:$0xff] %v15959_v44  ;;  %v22411_v19 = vld [vmem:[#allocation18_spill] sm:$0xff]  ;;  %v22414_v37 = vld [vmem:[#allocation36_spill] sm:$0xff] }
 0x1d2   : > { %22410 = vst [vmem:[#allocation75_spill] sm:$0xff] %v15961_v41  ;;  %v22412_v56 = vsub.f32 %v15640_v17, %v15625_v10  ;;  %v15970_v34 = vmul.f32 %v15780_v13, %v5054_v3  ;;  %11881 = vmatprep.mubr.msk.f32.mxu1 %vm500_vm0, %v2286_v54  ;;  %v15974_v20 = vmul.f32 0.020408163, %v22414_v37  ;;  %v22416_v63 = vld [vmem:[#allocation26_spill] sm:$0xff]  ;;  %v15981_v41 = vld [vmem:[%s21700_s0 + $0x4e8] sm:$0xff]  ;;  %v8759_v54 = vmax.f32 %v15908_v40, 0.0  ;;  %11606 = vmatprep.mubr.msk.f32.mxu0 %vm500_vm0, %v15959_v44 }
 0x1d3   : > { %22408 = vst [vmem:[#allocation72_spill] sm:$0xff] %v15952_v24  ;;  %v2288_v39 = vmul.f32 %v22416_v63, %v22416_v63  ;;  %22417 = vst [vmem:[#allocation18_spill] sm:$0xff] %v15981_v41  ;;  %v12720_v10 = vld [vmem:[%s21700_s0 + $0x48] sm:$0xff]  ;;  %v22419_v13 = vsub.f32 %v15269_v14, %v14809_v55  ;;  %v5055_v37 = vld [vmem:[%s21702_s2 + $0x200] sm:$0xff]  ;;  %11882 = vmatmul.mubr.msk.f32.gmra.mrb[132].mxu1 %vm500_vm0, %v2287_v9  ;;  %v16019_v9 = vadd.f32 %v15724_v62, %v7375_v25  ;;  %v16039_v62 = vpop.permute.xlu1 %6454 }
 0x1d4   : > { %6609 = vperm.xlu0 %12295, %v22411_v19   ;;  %v4863_v53 = vmax.f32 %v22412_v56, 0.0  ;;  %22413 = vst [vmem:[#allocation76_spill] sm:$0xff] %v15970_v34  ;;  %22415 = vst [vmem:[#allocation41_spill] sm:$0xff] %v15974_v20  ;;  %v15983_v19 = vpop.f32.mrb[88].mxu1  ;;  %v7376_v17 = vmul.f32 %v12720_v10, %v15604_v48  ;;  %v22420_v3 = vld [vmem:[#allocation37_spill] sm:$0xff]  ;;  %v16003_v48 = vld [vmem:[%s21703_s3 + $0x1c8] sm:$0xff]  ;;  %v16007_v55 = vmul.f32 %v15974_v20, %v15974_v20 }
 0x1d5   : > { %22418 = vst [vmem:[#allocation36_spill] sm:$0xff] %v15983_v19  ;;  %7782 = vperm.xlu1 %12296, %v22419_v13   ;;  %v15998_v63 = vmul.f32 0.020408163, %v22420_v3  ;;  %v5260_v56 = vadd.f32 1e-05, %v4864_v0  ;;  %22422 = vst [vmem:[#allocation37_spill] sm:$0xff] %v16003_v48  ;;  %11884 = vmatprep.mubr.msk.f32.mxu1 %vm500_vm0, %v2288_v39  ;;  %v16021_v13 = vpop.permute.xlu0 %7627  ;;  %v22427_v25 = vsub.f32 %v15280_v52, %v14856_v35 }
 0x1d6   : > { %v22423_v14 = vld [vmem:[#allocation27_spill] sm:$0xff]  ;;  %v22424_v12 = vld [vmem:[#allocation77_spill] sm:$0xff]  ;;  %v8760_v0 = vmax.f32 %v15944_v43, 0.0  ;;  %v16026_v3 = vld [vmem:[%s21703_s3 + $0x1d0] sm:$0xff]  ;;  %11607 = vmatmul.mubr.msk.f32.gmra.mrb[156].mxu0 %vm500_vm0, %v15981_v41  ;;  %v16037_v43 = vpop.eup %12429  ;;  %v5259_v20 = vadd.f32 1e-05, %v4863_v53  ;;  %v16044_v19 = vmul.f32 %v12428_v31, %v5055_v37 }
 0x1d7   : > { %22421 = vst [vmem:[#allocation26_spill] sm:$0xff] %v15998_v63  ;;  %v2289_v40 = vmul.f32 %v22423_v14, %v22423_v14  ;;  %v16012_v10 = vmul.f32 0.020408163, %v22424_v12  ;;  %22425 = vst [vmem:[#allocation27_spill] sm:$0xff] %v16026_v3  ;;  %v16030_v14 = vmul.f32 %v15998_v63, %v15998_v63  ;;  %v22426_v39 = vld [vmem:[#allocation11_spill] sm:$0xff]  ;;  %v12432_v4 = vpop.eup %12431  ;;  %v12721_v41 = vld [vmem:[%s21700_s0 + $0x50] sm:$0xff]  ;;  %12437 = vrsqrt.f32 %v5260_v56  ;;  %v16118_v50 = vpop.permute.xlu1 %7632 }
 0x1d8   : > { %v16033_v12 = vmul.f32 0.020408163, %v22426_v39  ;;  %7787 = vperm.xlu0 %12295, %v22427_v25   ;;  %22428 = vst [vmem:[#allocation77_spill] sm:$0xff] %v16044_v19  ;;  %v22429_v44 = vld [vmem:[#allocation35_spill] sm:$0xff]  ;;  %v16056_v18 = vmul.f32 %v12721_v41, %v15652_v61  ;;  %v22431_v35 = vld [vmem:[#allocation20_spill] sm:$0xff]  ;;  %v16070_v25 = vpop.f32.mrb[89].mxu1  ;;  %12439 = vrsqrt.f32 %v5259_v20 }
 0x1d9   : > { %v16050_v39 = vmul.f32 %v15970_v34, %v22429_v44  ;;  %6614 = vperm.xlu1 %12296, %v22431_v35   ;;  %v5056_v31 = vld [vmem:[%s21702_s2 + $0x208] sm:$0xff]  ;;  %11885 = vmatmul.mubr.msk.f32.gmra.mrb[134].mxu1 %vm500_vm0, %v2289_v40  ;;  %v22432_v44 = vld [vmem:[#allocation80_spill] sm:$0xff]  ;;  %v16080_v41 = vld [vmem:[%s21700_s0 + $0x4f8] sm:$0xff]  ;;  %v16083_v35 = vadd.f32 %v15821_v2, %v7376_v17  ;;  %v16092_v53 = vpop.f32.mrb[90].mxu0  ;;  %v16099_v2 = vpack.c.bf16 %v8760_v0, %v8759_v54  ;;  %v8761_v0 = vmax.f32 %v16019_v9, 0.0  ;;  %v16142_v9 = vpop.f32.mrb[90].mxu1 }
 0x1da   : > { %v16068_v37 = vmul.f32 0.020408163, %v22432_v44  ;;  %v16075_v61 = vld [vmem:[%s21700_s0 + $0x4f0] sm:$0xff]  ;;  %v22434_v44 = vsub.f32 %v15736_v5, %v15733_v27  ;;  %22435 = vst [vmem:[#allocation20_spill] sm:$0xff] %v16092_v53  ;;  %v16097_v63 = vld [vmem:[%s21700_s0 + $0x500] sm:$0xff]  ;;  %v12722_v17 = vld [vmem:[%s21700_s0 + $0x58] sm:$0xff]  ;;  %v16107_v27 = vpop.permute.xlu0 %6459 }
 0x1db   : > { %22430 = vst [vmem:[#allocation11_spill] sm:$0xff] %v16050_v39  ;;  %11609 = vmatprep.mubr.msk.f32.mxu0 %vm500_vm0, %v16075_v61  ;;  %22436 = vst [vmem:[#allocation80_spill] sm:$0xff] %v16097_v63  ;;  %v16105_v56 = vmul.f32 %v12722_v17, %v15739_v30  ;;  %v22438_v5 = vld [vmem:[#allocation33_spill] sm:$0xff]  ;;  %v22439_v40 = vld [vmem:[#allocation79_spill] sm:$0xff]  ;;  %v16115_v54 = vpop.f32.mrb[91].mxu0  ;;  %v16122_v30 = vmul.f32 %v15863_v29, %v5056_v31  ;;  %v22445_v31 = vsub.f32 %v15285_v59, %v14918_v6 }
 0x1dc   : > { %22433 = vst [vmem:[#allocation35_spill] sm:$0xff] %v16068_v37  ;;  %v4866_v52 = vmax.f32 %v22434_v44, 0.0  ;;  %22437 = vst [vmem:[#allocation105_spill] sm:$0xff] %v16099_v2  ;;  %v2290_v44 = vmul.f32 %v22438_v5, %v22438_v5  ;;  %v2291_v34 = vmul.f32 %v22439_v40, %v22439_v40  ;;  %11610 = vmatmul.mubr.msk.f32.gmra.mrb[158].mxu0 %vm500_vm0, %v16080_v41  ;;  %v22441_v3 = vld [vmem:[#allocation32_spill] sm:$0xff]  ;;  %v22443_v5 = vld [vmem:[#allocation10_spill] sm:$0xff] }
 0x1dd   : > { %22440 = vst [vmem:[#allocation33_spill] sm:$0xff] %v16115_v54  ;;  %6619 = vperm.xlu0 %12295, %v22441_v3   ;;  %22442 = vst [vmem:[#allocation79_spill] sm:$0xff] %v16122_v30  ;;  %v5057_v17 = vld [vmem:[%s21702_s2 + $0x210] sm:$0xff]  ;;  %v16129_v40 = vmul.f32 %v16044_v19, %v22443_v5  ;;  %v16133_v23 = vmul.f32 %v16068_v37, %v16068_v37  ;;  %11612 = vmatprep.mubr.msk.f32.mxu0 %vm500_vm0, %v16097_v63  ;;  %v16140_v29 = vld [vmem:[%s21700_s0 + $0x508] sm:$0xff]  ;;  %v16144_v3 = vpop.eup %12433 }
 0x1de   : > { %22444 = vst [vmem:[#allocation32_spill] sm:$0xff] %v16142_v9  ;;  %7792 = vperm.xlu1 %12296, %v22445_v31   ;;  %v22446_v5 = vsub.f32 %v15766_v60, %v15750_v8  ;;  %v16155_v37 = vld [vmem:[%s21703_s3 + $0x1d8] sm:$0xff]  ;;  %v16160_v48 = vld [vmem:[%s21703_s3 + $0x1e0] sm:$0xff]  ;;  %11887 = vmatprep.mubr.msk.f32.mxu1 %vm500_vm0, %v2290_v44  ;;  %v8762_v8 = vmax.f32 %v16083_v35, 0.0  ;;  %v5262_v60 = vadd.f32 1e-05, %v4866_v52  ;;  %v16175_v63 = vpop.eup %12435  ;;  %v16185_v52 = vmul.f32 %v12432_v4, %v5057_v17 }
 0x1df   : > { %22447 = vst [vmem:[#allocation10_spill] sm:$0xff] %v16155_v37  ;;  %22448 = vst [vmem:[#allocation106_spill] sm:$0xff] %v16160_v48  ;;  %v22449_v9 = vld [vmem:[#allocation81_spill] sm:$0xff]  ;;  %11888 = vmatmul.mubr.msk.f32.gmra.mrb[136].mxu1 %vm500_vm0, %v2291_v34  ;;  %v22452_v31 = vld [vmem:[#allocation86_spill] sm:$0xff]  ;;  %v16224_v48 = vpop.f32.mrb[91].mxu1 }
 0x1e0   : > { %v4865_v19 = vmax.f32 %v22446_v5, 0.0  ;;  %v2292_v6 = vmul.f32 %v22449_v9, %v22449_v9  ;;  %v22450_v59 = vld [vmem:[#allocation85_spill] sm:$0xff]  ;;  %v2293_v5 = vmul.f32 %v22452_v31, %v22452_v31  ;;  %v22453_v2 = vld [vmem:[#allocation87_spill] sm:$0xff]  ;;  %v12723_v44 = vld [vmem:[%s21700_s0 + $0x60] sm:$0xff]  ;;  %22455 = vst [vmem:[#allocation86_spill] sm:$0xff] %v16185_v52  ;;  %11613 = vmatmul.mubr.msk.f32.gmra.mrb[160].mxu0 %vm500_vm0, %v16140_v29  ;;  %v16197_v31 = vpop.permute.xlu1 %6464  ;;  %12441 = vrsqrt.f32 %v5262_v60 }
 0x1e1   : > { %v16166_v20 = vmul.f32 0.020408163, %v22450_v59  ;;  %v16173_v54 = vmul.f32 0.020408163, %v22453_v2  ;;  %v16181_v9 = vmul.f32 %v12723_v44, %v15793_v42  ;;  %v16183_v59 = vpop.permute.xlu0 %7637  ;;  %v22456_v35 = vld [vmem:[#allocation7_spill] sm:$0xff]  ;;  %v22457_v42 = vld [vmem:[#allocation5_spill] sm:$0xff] }
 0x1e2   : > { %22454 = vst [vmem:[#allocation85_spill] sm:$0xff] %v16183_v59  ;;  %11890 = vmatprep.mubr.msk.f32.mxu1 %vm500_vm0, %v2292_v6  ;;  %v16193_v2 = vmul.f32 0.020408163, %v22456_v35  ;;  %v22458_v44 = vld [vmem:[#allocation39_spill] sm:$0xff]  ;;  %v5058_v6 = vld [vmem:[%s21702_s2 + $0x218] sm:$0xff]  ;;  %v22467_v17 = vld [vmem:[#allocation90_spill] sm:$0xff] }
 0x1e3   : > { %22451 = vst [vmem:[#allocation81_spill] sm:$0xff] %v16166_v20  ;;  %v16189_v34 = vmul.f32 %v16166_v20, %v16166_v20  ;;  %v22459_v53 = vsub.f32 %v22457_v42, %v22458_v44  ;;  %v22460_v59 = vld [vmem:[#allocation43_spill] sm:$0xff]  ;;  %v22462_v42 = vld [vmem:[#allocation45_spill] sm:$0xff]  ;;  %v5261_v44 = vadd.f32 1e-05, %v4865_v19  ;;  %v22465_v19 = vsub.f32 %v15870_v1, %v15883_v38  ;;  %11891 = vmatmul.mubr.msk.f32.gmra.mrb[138].mxu1 %vm500_vm0, %v2293_v5  ;;  %v16256_v1 = vld [vmem:[%s21700_s0 + $0x520] sm:$0xff] }
 0x1e4   : > { %v16213_v20 = vmul.f32 %v16122_v30, %v22460_v59  ;;  %6624 = vperm.xlu1 %12296, %v22462_v42   ;;  %v22463_v4 = vld [vmem:[#allocation89_spill] sm:$0xff]  ;;  %v16229_v59 = vld [vmem:[%s21700_s0 + $0x510] sm:$0xff]  ;;  %v2295_v35 = vmul.f32 %v22467_v17, %v22467_v17  ;;  %v12724_v38 = vld [vmem:[%s21700_s0 + $0x68] sm:$0xff]  ;;  %v16267_v5 = vmul.f32 %v16037_v43, %v5058_v6  ;;  %v16285_v43 = vadd.f32 %v15963_v21, %v16105_v56  ;;  %v16287_v6 = vpop.permute.xlu1 %7642 }
 0x1e5   : > { %7797 = vperm.xlu0 %12295, %v22459_v53   ;;  %v16217_v53 = vadd.f32 %v15877_v26, %v16056_v18  ;;  %v2294_v58 = vmul.f32 %v22463_v4, %v22463_v4  ;;  %v16234_v26 = vld [vmem:[%s21700_s0 + $0x518] sm:$0xff]  ;;  %v16236_v18 = vpack.c.bf16 %v8762_v8, %v8761_v0  ;;  %v4868_v42 = vmax.f32 %v22465_v19, 0.0  ;;  %v16244_v4 = vld [vmem:[%s21703_s3 + $0x1e8] sm:$0xff]  ;;  %11615 = vmatprep.mubr.msk.f32.mxu0 %vm500_vm0, %v16229_v59  ;;  %v16251_v0 = vpop.f32.mrb[92].mxu0  ;;  %v16264_v60 = vpop.permute.xlu0 %6469  ;;  %v22469_v17 = vld [vmem:[#allocation6_spill] sm:$0xff] }
 0x1e6   : > { %22461 = vst [vmem:[#allocation87_spill] sm:$0xff] %v16213_v20  ;;  %22466 = vst [vmem:[#allocation5_spill] sm:$0xff] %v16244_v4  ;;  %v16262_v8 = vmul.f32 %v12724_v38, %v15891_v7  ;;  %v16272_v19 = vmul.f32 %v16185_v52, %v22469_v17  ;;  %v22471_v20 = vld [vmem:[#allocation92_spill] sm:$0xff]  ;;  %11616 = vmatmul.mubr.msk.f32.gmra.mrb[162].mxu0 %vm500_vm0, %v16234_v26  ;;  %v16279_v57 = vpop.f32.mrb[93].mxu0  ;;  %v16281_v7 = vpop.eup %12437  ;;  %v22476_v38 = vsub.f32 %v15873_v51, %v15900_v46  ;;  %v5059_v17 = vld [vmem:[%s21702_s2 + $0x220] sm:$0xff] }
 0x1e7   : > { %22464 = vst [vmem:[#allocation7_spill] sm:$0xff] %v16236_v18  ;;  %22468 = vst [vmem:[#allocation39_spill] sm:$0xff] %v16267_v5  ;;  %11893 = vmatprep.mubr.msk.f32.mxu1 %vm500_vm0, %v2294_v58  ;;  %v16275_v30 = vmul.f32 0.020408163, %v22471_v20  ;;  %v22475_v58 = vld [vmem:[#allocation40_spill] sm:$0xff]  ;;  %11618 = vmatprep.mubr.msk.f32.mxu0 %vm500_vm0, %v16256_v1  ;;  %v16306_v21 = vld [vmem:[%s21700_s0 + $0x528] sm:$0xff]  ;;  %12443 = vrsqrt.f32 %v5261_v44  ;;  %v2297_v44 = vmul.f32 %v15431_v49, %v15431_v49 }
 0x1e8   : > { %22470 = vst [vmem:[#allocation43_spill] sm:$0xff] %v16272_v19  ;;  %22473 = vst [vmem:[#allocation89_spill] sm:$0xff] %v16279_v57  ;;  %v4867_v20 = vmax.f32 %v22476_v38, 0.0  ;;  %v22477_v19 = vld [vmem:[#allocation93_spill] sm:$0xff]  ;;  %v22478_v37 = vld [vmem:[#allocation48_spill] sm:$0xff]  ;;  %v16308_v51 = vpop.f32.mrb[92].mxu1  ;;  %11894 = vmatmul.mubr.msk.f32.gmra.mrb[140].mxu1 %vm500_vm0, %v2295_v35  ;;  %v16342_v35 = vmul.f32 %v16175_v63, %v5059_v17  ;;  %v16358_v63 = vpop.permute.xlu1 %6474 }
 0x1e9   : > { %22472 = vst [vmem:[#allocation45_spill] sm:$0xff] %v16275_v30  ;;  %22474 = vst [vmem:[#allocation90_spill] sm:$0xff] %v16287_v6  ;;  %6629 = vperm.xlu0 %12295, %v22475_v58   ;;  %v2296_v52 = vmul.f32 %v22477_v19, %v22477_v19  ;;  %v16299_v18 = vmul.f32 0.020408163, %v22478_v37  ;;  %v8763_v46 = vmax.f32 %v16217_v53, 0.0  ;;  %v22480_v56 = vld [vmem:[#allocation91_spill] sm:$0xff]  ;;  %v16318_v19 = vmul.f32 %v16275_v30, %v16275_v30  ;;  %v7648_v33 = vpop.permute.xlu0 %7647 }
 0x1ea   : > { %v22481_v58 = vld [vmem:[#allocation38_spill] sm:$0xff]  ;;  %v5264_v6 = vadd.f32 1e-05, %v4868_v42  ;;  %v16323_v57 = vld [vmem:[%s21703_s3 + $0x1f0] sm:$0xff]  ;;  %22486 = vst [vmem:[#allocation93_spill] sm:$0xff] %v16342_v35  ;;  %v5060_v4 = vld [vmem:[%s21702_s2 + $0x228] sm:$0xff]  ;;  %11619 = vmatmul.mubr.msk.f32.gmra.mrb[164].mxu0 %vm500_vm0, %v16306_v21 }
 0x1eb   : > { %22479 = vst [vmem:[#allocation6_spill] sm:$0xff] %v16299_v18  ;;  %v22482_v38 = vsub.f32 %v22480_v56, %v22481_v58  ;;  %22483 = vst [vmem:[#allocation92_spill] sm:$0xff] %v16323_v57  ;;  %v16328_v53 = vmul.f32 %v16299_v18, %v16299_v18  ;;  %v22484_v56 = vld [vmem:[#allocation2_spill] sm:$0xff]  ;;  %v12725_v42 = vld [vmem:[%s21700_s0 + $0x70] sm:$0xff]  ;;  %11896 = vmatprep.mubr.msk.f32.mxu1 %vm500_vm0, %v2296_v52  ;;  %v16349_v49 = vmul.f32 0.020408163, %v15483_v16 }
 0x1ec   : > { %v16333_v58 = vmul.f32 0.020408163, %v22484_v56  ;;  %v16339_v37 = vmul.f32 %v12725_v42, %v15946_v32  ;;  %v22487_v56 = vld [vmem:[#allocation42_spill] sm:$0xff]  ;;  %v8764_v32 = vmax.f32 %v16285_v43, 0.0  ;;  %v22491_v52 = vld [vmem:[#allocation56_spill] sm:$0xff]  ;;  %12445 = vrsqrt.f32 %v5264_v6  ;;  %11897 = vmatmul.mubr.msk.f32.gmra.mrb[142].mxu1 %vm500_vm0, %v2297_v44  ;;  %v22501_v57 = vld [vmem:[#allocation47_spill] sm:$0xff] }
 0x1ed   : > { %7802 = vperm.xlu1 %12296, %v22482_v38   ;;  %v12440_v38 = vpop.eup %12439  ;;  %v16353_v30 = vmul.f32 %v16267_v5, %v22487_v56  ;;  %v22489_v17 = vld [vmem:[#allocation34_spill] sm:$0xff]  ;;  %v2298_v18 = vmul.f32 %v22491_v52, %v22491_v52  ;;  %v16369_v56 = vadd.f32 %v16021_v13, %v16181_v9  ;;  %v22492_v5 = vld [vmem:[#allocation31_spill] sm:$0xff]  ;;  %v16385_v13 = vld [vmem:[%s21700_s0 + $0x530] sm:$0xff] }
 0x1ee   : > { %22485 = vst [vmem:[#allocation40_spill] sm:$0xff] %v16339_v37  ;;  %v22490_v42 = vsub.f32 %v15405_v22, %v22489_v17  ;;  %v5263_v37 = vadd.f32 1e-05, %v4867_v20  ;;  %v12726_v43 = vld [vmem:[%s21700_s0 + $0x80] sm:$0xff]  ;;  %v16380_v17 = vpop.f32.mrb[93].mxu1  ;;  %v16390_v9 = vld [vmem:[%s21700_s0 + $0x538] sm:$0xff]  ;;  %11621 = vmatprep.mubr.msk.f32.mxu0 %vm500_vm0, %v16385_v13 }
 0x1ef   : > { %22488 = vst [vmem:[#allocation48_spill] sm:$0xff] %v16353_v30  ;;  %v7383_v30 = vmul.f32 %v12726_v43, %v16107_v27  ;;  %v12727_v27 = vld [vmem:[%s21700_s0 + $0x88] sm:$0xff]  ;;  %v5061_v52 = vld [vmem:[%s21702_s2 + $0x230] sm:$0xff]  ;;  %v2299_v43 = vmul.f32 %v15504_v15, %v15504_v15  ;;  %v16407_v22 = vpop.f32.mrb[94].mxu0  ;;  %11899 = vmatprep.mubr.msk.f32.mxu1 %vm500_vm0, %v2298_v18  ;;  %v22496_v15 = vld [vmem:[#allocation9_spill] sm:$0xff]  ;;  %11622 = vmatmul.mubr.msk.f32.gmra.mrb[166].mxu0 %vm500_vm0, %v16390_v9  ;;  %v7653_v18 = vpop.permute.xlu1 %7652 }
 0x1f0   : > { %7807 = vperm.xlu0 %12295, %v22490_v42   ;;  %v16397_v42 = vmul.f32 %v16144_v3, %v5060_v4  ;;  %v16414_v4 = vpop.permute.xlu0 %6479  ;;  %v22494_v6 = vld [vmem:[#allocation8_spill] sm:$0xff]  ;;  %v22498_v20 = vld [vmem:[#allocation97_spill] sm:$0xff]  ;;  %v16428_v24 = vpop.f32.mrb[95].mxu0  ;;  %12447 = vrsqrt.f32 %v5263_v37 }
 0x1f1   : > { %6634 = vperm.xlu1 %12296, %v22492_v5   ;;  %v7384_v5 = vmul.f32 %v12727_v27, %v16197_v31  ;;  %v16412_v31 = vld [vmem:[%s21700_s0 + $0x540] sm:$0xff]  ;;  %v8571_v3 = vadd.f32 %v7648_v33, %v7383_v30  ;;  %v16419_v44 = vmul.f32 %v16342_v35, %v22494_v6  ;;  %v16422_v27 = vmul.f32 0.020408163, %v22496_v15  ;;  %22499 = vst [vmem:[#allocation42_spill] sm:$0xff] %v16428_v24  ;;  %v16430_v33 = vpop.eup %12441  ;;  %v22508_v37 = vld [vmem:[#allocation44_spill] sm:$0xff]  ;;  %v22523_v39 = vld [vmem:[#allocation61_spill] sm:$0xff] }
 0x1f2   : > { %22493 = vst [vmem:[#allocation91_spill] sm:$0xff] %v16397_v42  ;;  %v2300_v16 = vmul.f32 %v22498_v20, %v22498_v20  ;;  %v16432_v30 = vpack.c.bf16 %v8764_v32, %v8763_v46  ;;  %v22502_v6 = vsub.f32 %v16012_v10, %v16007_v55  ;;  %11624 = vmatprep.mubr.msk.f32.mxu0 %vm500_vm0, %v16412_v31  ;;  %v16446_v20 = vld [vmem:[%s21700_s0 + $0x548] sm:$0xff]  ;;  %v16448_v46 = vpop.f32.mrb[94].mxu1 }
 0x1f3   : > { %22495 = vst [vmem:[#allocation38_spill] sm:$0xff] %v16419_v44  ;;  %22497 = vst [vmem:[#allocation2_spill] sm:$0xff] %v16422_v27  ;;  %v22503_v44 = vld [vmem:[#allocation98_spill] sm:$0xff]  ;;  %v8572_v32 = vadd.f32 %v7653_v18, %v7384_v5  ;;  %v22510_v55 = vsub.f32 %v16033_v12, %v16030_v14  ;;  %v16465_v24 = vmul.f32 %v16422_v27, %v16422_v27  ;;  %11900 = vmatmul.mubr.msk.f32.gmra.mrb[144].mxu1 %vm500_vm0, %v2299_v43  ;;  %v22513_v12 = vld [vmem:[#allocation4_spill] sm:$0xff] }
 0x1f4   : > { %22500 = vst [vmem:[#allocation34_spill] sm:$0xff] %v16432_v30  ;;  %6639 = vperm.xlu0 %12295, %v22501_v57   ;;  %v4870_v15 = vmax.f32 %v22502_v6, 0.0  ;;  %v16439_v35 = vmul.f32 0.020408163, %v22503_v44  ;;  %22505 = vst [vmem:[#allocation31_spill] sm:$0xff] %v16446_v20  ;;  %v22507_v57 = vld [vmem:[#allocation94_spill] sm:$0xff]  ;;  %v16461_v6 = vmul.f32 %v12440_v38, %v5061_v52  ;;  %v2301_v14 = vmul.f32 %v15575_v11, %v15575_v11  ;;  %v12444_v38 = vpop.eup %12443  ;;  %v7658_v27 = vpop.permute.xlu0 %7657 }
 0x1f5   : > { %22506 = vst [vmem:[#allocation8_spill] sm:$0xff] %v16448_v46  ;;  %v22509_v30 = vsub.f32 %v22507_v57, %v22508_v37  ;;  %v4869_v10 = vmax.f32 %v22510_v55, 0.0  ;;  %v16459_v44 = vld [vmem:[%s21703_s3 + $0x1f8] sm:$0xff]  ;;  %v22514_v18 = vld [vmem:[#allocation50_spill] sm:$0xff]  ;;  %v8769_v37 = vmax.f32 %v8571_v3, 0.0  ;;  %v8770_v55 = vmax.f32 %v8572_v32, 0.0  ;;  %11902 = vmatprep.mubr.msk.f32.mxu1 %vm500_vm0, %v2300_v16  ;;  %11625 = vmatmul.mubr.msk.f32.gmra.mrb[168].mxu0 %vm500_vm0, %v16446_v20  ;;  %v16504_v32 = vpop.permute.xlu1 %6484 }
 0x1f6   : > { %22504 = vst [vmem:[#allocation56_spill] sm:$0xff] %v16439_v35  ;;  %22511 = vst [vmem:[#allocation9_spill] sm:$0xff] %v16459_v44  ;;  %v16470_v5 = vmul.f32 %v16439_v35, %v16439_v35  ;;  %v16478_v57 = vmul.f32 0.020408163, %v22514_v18  ;;  %v12728_v52 = vld [vmem:[%s21700_s0 + $0x78] sm:$0xff]  ;;  %v16496_v35 = vpop.f32.mrb[95].mxu1 }
 0x1f7   : > { %7812 = vperm.xlu1 %12296, %v22509_v30   ;;  %22512 = vst [vmem:[#allocation97_spill] sm:$0xff] %v16461_v6  ;;  %v16475_v30 = vmul.f32 0.020408163, %v22513_v12  ;;  %v16484_v43 = vmul.f32 %v12728_v52, %v16039_v62  ;;  %v5062_v11 = vld [vmem:[%s21702_s2 + $0x238] sm:$0xff]  ;;  %v22516_v12 = vld [vmem:[#allocation23_spill] sm:$0xff]  ;;  %22518 = vst [vmem:[#allocation94_spill] sm:$0xff] %v16496_v35  ;;  %11903 = vmatmul.mubr.msk.f32.gmra.mrb[146].mxu1 %vm500_vm0, %v2301_v14 }
 0x1f8   : > { %v16492_v18 = vmul.f32 %v16397_v42, %v22516_v12  ;;  %v16501_v62 = vld [vmem:[%s21700_s0 + $0x550] sm:$0xff]  ;;  %v22519_v52 = vld [vmem:[#allocation95_spill] sm:$0xff]  ;;  %v22520_v16 = vld [vmem:[#allocation78_spill] sm:$0xff]  ;;  %v5266_v12 = vadd.f32 1e-05, %v4870_v15  ;;  %v16534_v20 = vmul.f32 %v16281_v7, %v5062_v11 }
 0x1f9   : > { %22515 = vst [vmem:[#allocation47_spill] sm:$0xff] %v16484_v43  ;;  %v22521_v43 = vsub.f32 %v22519_v52, %v22520_v16  ;;  %v16518_v35 = vld [vmem:[%s21700_s0 + $0x558] sm:$0xff]  ;;  %v12729_v3 = vld [vmem:[%s21700_s0 + $0x90] sm:$0xff]  ;;  %v12059_v16 = vpack.c.bf16 %v8770_v55, %v8769_v37  ;;  %v5265_v46 = vadd.f32 1e-05, %v4869_v10  ;;  %11627 = vmatprep.mubr.msk.f32.mxu0 %vm500_vm0, %v16501_v62  ;;  %v16544_v37 = vpop.permute.xlu0 %6489  ;;  %v22529_v7 = vld [vmem:[#allocation99_spill] sm:$0xff]  ;;  %v2303_v55 = vmul.f32 %v15668_v36, %v15668_v36 }
 0x1fa   : > { %22517 = vst [vmem:[#allocation98_spill] sm:$0xff] %v16492_v18  ;;  %v22522_v52 = vld [vmem:[#allocation88_spill] sm:$0xff]  ;;  %v16527_v18 = vmul.f32 %v16461_v6, %v22523_v39  ;;  %v12730_v42 = vld [vmem:[%s21700_s0 + $0x98] sm:$0xff]  ;;  %22525 = vst [vmem:[#allocation4_spill] sm:$0xff] %v16534_v20  ;;  %v16542_v39 = vpop.f32.mrb[96].mxu0  ;;  %11628 = vmatmul.mubr.msk.f32.gmra.mrb[170].mxu0 %vm500_vm0, %v16518_v35 }
 0x1fb   : > { %7817 = vperm.xlu0 %12295, %v22521_v43   ;;  %v7385_v43 = vmul.f32 %v12729_v3, %v16264_v60  ;;  %6644 = vperm.xlu1 %12296, %v22522_v52   ;;  %v7386_v44 = vmul.f32 %v12730_v42, %v16358_v63  ;;  %v22526_v60 = vld [vmem:[#allocation65_spill] sm:$0xff]  ;;  %22528 = vst [vmem:[#allocation23_spill] sm:$0xff] %v16542_v39  ;;  %v5063_v63 = vld [vmem:[%s21702_s2 + $0x240] sm:$0xff]  ;;  %v16563_v11 = vpop.f32.mrb[97].mxu0  ;;  %v22534_v36 = vld [vmem:[#allocation19_spill] sm:$0xff]  ;;  %12449 = vrsqrt.f32 %v5265_v46 }
 0x1fc   : > { %22524 = vst [vmem:[#allocation44_spill] sm:$0xff] %v16527_v18  ;;  %v16538_v3 = vmul.f32 0.020408163, %v22526_v60  ;;  %12060 = vmatprep.subr.bf16.mxu0 %v12059_v16  ;;  %v2302_v42 = vmul.f32 %v22529_v7, %v22529_v7  ;;  %v22530_v10 = vld [vmem:[#allocation58_spill] sm:$0xff]  ;;  %22532 = vst [vmem:[#allocation78_spill] sm:$0xff] %v16563_v11  ;;  %v16569_v52 = vadd.f32 %v16118_v50, %v16262_v8  ;;  %v7663_v60 = vpop.permute.xlu1 %7662  ;;  %v16586_v50 = vld [vmem:[%s21700_s0 + $0x568] sm:$0xff]  ;;  %12451 = vrsqrt.f32 %v5266_v12 }
 0x1fd   : > { %v8573_v15 = vadd.f32 %v7658_v27, %v7385_v43  ;;  %v16552_v14 = vmul.f32 0.020408163, %v22530_v10  ;;  %v16561_v27 = vld [vmem:[%s21700_s0 + $0x560] sm:$0xff]  ;;  %v16565_v43 = vpop.eup %12445  ;;  %v22535_v7 = vsub.f32 %v16173_v54, %v16133_v23  ;;  %v22536_v39 = vsub.f32 %v16193_v2, %v16189_v34  ;;  %22537 = vst [vmem:[#allocation88_spill] sm:$0xff] %v16586_v50  ;;  %v22541_v54 = vld [vmem:[#allocation59_spill] sm:$0xff] }
 0x1fe   : > { %22527 = vst [vmem:[#allocation50_spill] sm:$0xff] %v16538_v3  ;;  %v22533_v16 = vld [vmem:[#allocation62_spill] sm:$0xff]  ;;  %v16581_v11 = vmul.f32 %v16538_v3, %v16538_v3  ;;  %v8574_v8 = vadd.f32 %v7663_v60, %v7386_v44  ;;  %v16596_v34 = vmul.f32 0.020408163, %v22541_v54  ;;  %11905 = vmatprep.mubr.msk.f32.mxu1 %vm500_vm0, %v2302_v42  ;;  %v16600_v2 = vmul.f32 0.020408163, %v15768_v28  ;;  %11630 = vmatprep.mubr.msk.f32.mxu0 %vm500_vm0, %v16561_v27  ;;  %v7668_v28 = vpop.permute.xlu0 %7667 }
 0x1ff   : > { %22531 = vst [vmem:[#allocation95_spill] sm:$0xff] %v16552_v14  ;;  %12062 = vmatpush3.bf16.msra.mxu0 %v22533_v16  ;;  %6649 = vperm.xlu0 %12295, %v22534_v36   ;;  %v4872_v10 = vmax.f32 %v22535_v7, 0.0  ;;  %v4871_v18 = vmax.f32 %v22536_v39, 0.0  ;;  %v22538_v16 = vld [vmem:[#allocation28_spill] sm:$0xff]  ;;  %v22539_v36 = vld [vmem:[#allocation3_spill] sm:$0xff]  ;;  %v16593_v23 = vmul.f32 %v16552_v14, %v16552_v14  ;;  %v12448_v39 = vpop.eup %12447  ;;  %v16602_v7 = vmul.f32 %v12444_v38, %v5063_v63  ;;  %v22545_v60 = vld [vmem:[#allocation57_spill] sm:$0xff] }
 0x200   : > { %v22540_v6 = vsub.f32 %v22538_v16, %v22539_v36  ;;  %11906 = vmatmul.mubr.msk.f32.gmra.mrb[148].mxu1 %vm500_vm0, %v2303_v55  ;;  %v22543_v44 = vld [vmem:[#allocation52_spill] sm:$0xff]  ;;  %v2304_v16 = vmul.f32 %v22545_v60, %v22545_v60  ;;  %v8771_v42 = vmax.f32 %v8573_v15, 0.0  ;;  %v8772_v36 = vmax.f32 %v8574_v8, 0.0  ;;  %v5064_v46 = vld [vmem:[%s21702_s2 + $0x248] sm:$0xff]  ;;  %11631 = vmatmul.mubr.msk.f32.gmra.mrb[172].mxu0 %vm500_vm0, %v16586_v50  ;;  %v12731_v15 = vld [vmem:[%s21700_s0 + $0xa0] sm:$0xff]  ;;  %v16631_v54 = vpop.permute.xlu1 %6494 }
 0x201   : > { %22542 = vst [vmem:[#allocation61_spill] sm:$0xff] %v16602_v7  ;;  %v16625_v55 = vld [vmem:[%s21700_s0 + $0x570] sm:$0xff]  ;;  %v7387_v8 = vmul.f32 %v12731_v15, %v16414_v4  ;;  %v22549_v63 = vsub.f32 %v16333_v58, %v16318_v19  ;;  %v16648_v4 = vld [vmem:[%s21700_s0 + $0x578] sm:$0xff]  ;;  %v16654_v19 = vld [vmem:[%s21703_s3 + $0x200] sm:$0xff]  ;;  %v5268_v58 = vadd.f32 1e-05, %v4872_v10 }
 0x202   : > { %7822 = vperm.xlu1 %12296, %v22540_v6   ;;  %v16607_v6 = vmul.f32 %v16534_v20, %v22543_v44  ;;  %v22546_v44 = vld [vmem:[#allocation60_spill] sm:$0xff]  ;;  %v22550_v20 = vld [vmem:[#allocation67_spill] sm:$0xff]  ;;  %11908 = vmatprep.mubr.msk.f32.mxu1 %vm500_vm0, %v2304_v16  ;;  %22553 = vst [vmem:[#allocation58_spill] sm:$0xff] %v16648_v4  ;;  %v22554_v15 = vld [vmem:[#allocation53_spill] sm:$0xff]  ;;  %v16659_v16 = vmul.f32 %v16430_v33, %v5064_v46  ;;  %v16673_v10 = vpop.f32.mrb[98].mxu0 }
 0x203   : > { %v22547_v60 = vld [vmem:[#allocation12_spill] sm:$0xff]  ;;  %v2305_v3 = vmul.f32 %v22550_v20, %v22550_v20  ;;  %v5267_v20 = vadd.f32 1e-05, %v4871_v18  ;;  %11633 = vmatprep.mubr.msk.f32.mxu0 %vm500_vm0, %v16625_v55  ;;  %v22556_v12 = vld [vmem:[#allocation15_spill] sm:$0xff]  ;;  %22558 = vst [vmem:[#allocation28_spill] sm:$0xff] %v16673_v10  ;;  %v16705_v10 = vpop.f32.mrb[99].mxu0 }
 0x204   : > { %22544 = vst [vmem:[#allocation65_spill] sm:$0xff] %v16607_v6  ;;  %v22548_v38 = vsub.f32 %v22546_v44, %v22547_v60  ;;  %v4874_v6 = vmax.f32 %v22549_v63, 0.0  ;;  %v22551_v14 = vld [vmem:[#allocation100_spill] sm:$0xff]  ;;  %22555 = vst [vmem:[#allocation62_spill] sm:$0xff] %v16659_v16  ;;  %v12732_v33 = vld [vmem:[%s21700_s0 + $0xa8] sm:$0xff]  ;;  %11634 = vmatmul.mubr.msk.f32.gmra.mrb[174].mxu0 %vm500_vm0, %v16648_v4 }
 0x205   : > { %v16643_v50 = vmul.f32 0.020408163, %v22551_v14  ;;  %v8575_v14 = vadd.f32 %v7668_v28, %v7387_v8  ;;  %v5065_v63 = vld [vmem:[%s21702_s2 + $0x250] sm:$0xff]  ;;  %11909 = vmatmul.mubr.msk.f32.gmra.mrb[150].mxu1 %vm500_vm0, %v2305_v3  ;;  %v16679_v28 = vpop.permute.xlu0 %6499  ;;  %v22559_v3 = vsub.f32 %v16349_v49, %v16328_v53  ;;  %v22561_v60 = vld [vmem:[#allocation69_spill] sm:$0xff]  ;;  %22566 = vst [vmem:[#allocation3_spill] sm:$0xff] %v16705_v10  ;;  %12453 = vrsqrt.f32 %v5267_v20 }
 0x206   : > { %7827 = vperm.xlu0 %12295, %v22548_v38   ;;  %6654 = vperm.xlu1 %12296, %v22554_v15   ;;  %v12063_v38 = vpack.c.bf16 %v8772_v36, %v8771_v42  ;;  %v16667_v42 = vmul.f32 %v16602_v7, %v22556_v12  ;;  %v7388_v36 = vmul.f32 %v12732_v33, %v16504_v32  ;;  %v22560_v8 = vld [vmem:[#allocation68_spill] sm:$0xff]  ;;  %v16687_v15 = vmul.f32 0.020408163, %v22561_v60  ;;  %v16694_v32 = vld [vmem:[%s21700_s0 + $0x580] sm:$0xff]  ;;  %v7673_v12 = vpop.permute.xlu1 %7672  ;;  %v22563_v33 = vld [vmem:[#allocation49_spill] sm:$0xff] }
 0x207   : > { %22552 = vst [vmem:[#allocation99_spill] sm:$0xff] %v16643_v50  ;;  %v16671_v18 = vmul.f32 %v16643_v50, %v16643_v50  ;;  %v4873_v46 = vmax.f32 %v22559_v3, 0.0  ;;  %v2306_v44 = vmul.f32 %v22560_v8, %v22560_v8  ;;  %v5270_v49 = vadd.f32 1e-05, %v4874_v6  ;;  %v22564_v3 = vld [vmem:[#allocation103_spill] sm:$0xff]  ;;  %v22565_v60 = vld [vmem:[#allocation104_spill] sm:$0xff]  ;;  %11636 = vmatprep.mubr.msk.f32.mxu0 %vm500_vm0, %v16694_v32 }
 0x208   : > { %22557 = vst [vmem:[#allocation19_spill] sm:$0xff] %v16667_v42  ;;  %12064 = vmatprep.subr.bf16.mxu0 %v12063_v38  ;;  %v22562_v38 = vld [vmem:[#allocation101_spill] sm:$0xff]  ;;  %v2307_v8 = vmul.f32 %v22564_v3, %v22564_v3  ;;  %v16703_v42 = vmul.f32 0.020408163, %v22565_v60  ;;  %v16710_v7 = vld [vmem:[%s21700_s0 + $0x588] sm:$0xff]  ;;  %v16715_v53 = vmul.f32 %v12448_v39, %v5065_v63  ;;  %v16719_v6 = vmul.f32 %v16687_v15, %v16687_v15  ;;  %v22574_v20 = vld [vmem:[#allocation64_spill] sm:$0xff] }
 0x209   : > { %12066 = vmatpush3.bf16.msra.mxu0 %v22562_v38  ;;  %v8576_v38 = vadd.f32 %v7673_v12, %v7388_v36  ;;  %v22567_v50 = vld [vmem:[#allocation55_spill] sm:$0xff]  ;;  %11911 = vmatprep.mubr.msk.f32.mxu1 %vm500_vm0, %v2306_v44  ;;  %v16723_v3 = vmul.f32 0.020408163, %v15918_v45  ;;  %v8773_v60 = vmax.f32 %v8575_v14, 0.0  ;;  %v7678_v63 = vpop.permute.xlu0 %7677  ;;  %v5066_v45 = vld [vmem:[%s21702_s2 + $0x258] sm:$0xff]  ;;  %v2308_v14 = vmul.f32 %v15923_v47, %v15923_v47  ;;  %v22573_v44 = vld [vmem:[#allocation74_spill] sm:$0xff] }
 0x20a   : > { %6659 = vperm.xlu0 %12295, %v22563_v33   ;;  %v22568_v33 = vld [vmem:[#allocation16_spill] sm:$0xff]  ;;  %22570 = vst [vmem:[#allocation59_spill] sm:$0xff] %v16715_v53  ;;  %11912 = vmatmul.mubr.msk.f32.gmra.mrb[152].mxu1 %vm500_vm0, %v2307_v8  ;;  %v2309_v12 = vmul.f32 %v22573_v44, %v22573_v44  ;;  %v22575_v36 = vld [vmem:[#allocation17_spill] sm:$0xff]  ;;  %12455 = vrsqrt.f32 %v5268_v58  ;;  %v5269_v47 = vadd.f32 1e-05, %v4873_v46  ;;  %v22577_v44 = vsub.f32 %v16475_v30, %v16465_v24  ;;  %v5067_v24 = vld [vmem:[%s21702_s2 + $0x260] sm:$0xff] }
 0x20b   : > { %v22569_v4 = vsub.f32 %v22567_v50, %v22568_v33  ;;  %v22571_v50 = vld [vmem:[#allocation25_spill] sm:$0xff]  ;;  %11637 = vmatmul.mubr.msk.f32.gmra.mrb[176].mxu0 %vm500_vm0, %v16710_v7  ;;  %v16748_v8 = vld [vmem:[%s21700_s0 + $0x590] sm:$0xff]  ;;  %v8766_v33 = vmax.f32 %v16569_v52, 0.0  ;;  %12457 = vrsqrt.f32 %v5270_v49  ;;  %11914 = vmatprep.mubr.msk.f32.mxu1 %vm500_vm0, %v2308_v14  ;;  %v22580_v30 = vld [vmem:[#allocation46_spill] sm:$0xff]  ;;  %v16791_v14 = vpop.f32.mrb[100].mxu0 }
 0x20c   : > { %v16730_v39 = vmul.f32 %v16659_v16, %v22571_v50  ;;  %v16751_v50 = vpop.permute.xlu1 %6504  ;;  %v4876_v10 = vmax.f32 %v22577_v44, 0.0  ;;  %11639 = vmatprep.mubr.msk.f32.mxu0 %vm500_vm0, %v16748_v8  ;;  %v16764_v16 = vld [vmem:[%s21700_s0 + $0x598] sm:$0xff]  ;;  %v12733_v52 = vld [vmem:[%s21700_s0 + $0xb0] sm:$0xff]  ;;  %22587 = vst [vmem:[#allocation100_spill] sm:$0xff] %v16791_v14  ;;  %12459 = vrsqrt.f32 %v5269_v47  ;;  %v22599_v47 = vld [vmem:[#allocation54_spill] sm:$0xff] }
 0x20d   : > { %7832 = vperm.xlu1 %12296, %v22569_v4   ;;  %v8774_v4 = vmax.f32 %v8576_v38, 0.0  ;;  %v12450_v38 = vpop.eup %12449  ;;  %22578 = vst [vmem:[#allocation57_spill] sm:$0xff] %v16764_v16  ;;  %v22579_v58 = vld [vmem:[#allocation96_spill] sm:$0xff]  ;;  %v22584_v49 = vld [vmem:[#allocation29_spill] sm:$0xff] }
 0x20e   : > { %22572 = vst [vmem:[#allocation52_spill] sm:$0xff] %v16730_v39  ;;  %v22576_v39 = vsub.f32 %v22574_v20, %v22575_v36  ;;  %v7389_v36 = vmul.f32 %v12733_v52, %v16544_v37  ;;  %v22582_v20 = vsub.f32 %v16478_v57, %v16470_v5  ;;  %v16783_v37 = vmul.f32 %v16565_v43, %v5066_v45  ;;  %v16797_v43 = vpop.permute.xlu0 %6509  ;;  %v22588_v45 = vld [vmem:[#allocation75_spill] sm:$0xff] }
 0x20f   : > { %v12067_v46 = vpack.c.bf16 %v8774_v4, %v8773_v60  ;;  %11915 = vmatmul.mubr.msk.f32.gmra.mrb[154].mxu1 %vm500_vm0, %v2309_v12  ;;  %v16787_v60 = vmul.f32 0.020408163, %v22584_v49  ;;  %v22586_v4 = vld [vmem:[#allocation66_spill] sm:$0xff]  ;;  %v16800_v12 = vmul.f32 0.020408163, %v22588_v45  ;;  %11640 = vmatmul.mubr.msk.f32.gmra.mrb[178].mxu0 %vm500_vm0, %v16764_v16 }
 0x210   : > { %7837 = vperm.xlu0 %12295, %v22576_v39   ;;  %v16777_v39 = vmul.f32 %v16715_v53, %v22580_v30  ;;  %v4875_v44 = vmax.f32 %v22582_v20, 0.0  ;;  %22583 = vst [vmem:[#allocation12_spill] sm:$0xff] %v16783_v37  ;;  %v2310_v52 = vmul.f32 %v22586_v4, %v22586_v4  ;;  %v12734_v30 = vld [vmem:[%s21700_s0 + $0xb8] sm:$0xff]  ;;  %v8577_v57 = vadd.f32 %v7678_v63, %v7389_v36  ;;  %v22590_v20 = vld [vmem:[#allocation18_spill] sm:$0xff]  ;;  %v16806_v4 = vpop.f32.mrb[101].mxu0  ;;  %v7683_v14 = vpop.permute.xlu1 %7682 }
 0x211   : > { %6664 = vperm.xlu1 %12296, %v22579_v58   ;;  %22585 = vst [vmem:[#allocation67_spill] sm:$0xff] %v16787_v60  ;;  %v12452_v58 = vpop.eup %12451  ;;  %v7390_v5 = vmul.f32 %v12734_v30, %v16631_v54  ;;  %12068 = vmatprep.subr.bf16.mxu0 %v12067_v46  ;;  %22589 = vst [vmem:[#allocation53_spill] sm:$0xff] %v16800_v12  ;;  %v2311_v49 = vmul.f32 %v22590_v20, %v22590_v20  ;;  %v22593_v53 = vld [vmem:[#allocation82_spill] sm:$0xff]  ;;  %v5272_v54 = vadd.f32 1e-05, %v4876_v10  ;;  %v22594_v46 = vld [vmem:[#allocation36_spill] sm:$0xff] }
 0x212   : > { %22581 = vst [vmem:[#allocation60_spill] sm:$0xff] %v16777_v39  ;;  %22591 = vst [vmem:[#allocation15_spill] sm:$0xff] %v16806_v4  ;;  %v22592_v39 = vld [vmem:[#allocation84_spill] sm:$0xff]  ;;  %v16810_v63 = vmul.f32 %v12450_v38, %v5067_v24  ;;  %v16814_v36 = vmul.f32 %v16787_v60, %v16787_v60  ;;  %v16817_v30 = vmul.f32 0.020408163, %v22594_v46  ;;  %v16822_v45 = vld [vmem:[%s21700_s0 + $0x5a0] sm:$0xff]  ;;  %v16829_v10 = vmul.f32 %v16800_v12, %v16800_v12 }
 0x213   : > { %12070 = vmatpush3.bf16.msra.mxu0 %v22592_v39  ;;  %v8578_v20 = vadd.f32 %v7683_v14, %v7390_v5  ;;  %v22595_v39 = vld [vmem:[#allocation24_spill] sm:$0xff]  ;;  %v22596_v4 = vld [vmem:[#allocation22_spill] sm:$0xff]  ;;  %11917 = vmatprep.mubr.msk.f32.mxu1 %vm500_vm0, %v2310_v52  ;;  %v22598_v38 = vsub.f32 %v16596_v34, %v16581_v11  ;;  %v5068_v14 = vld [vmem:[%s21702_s2 + $0x268] sm:$0xff]  ;;  %v16846_v5 = vmul.f32 %v16783_v37, %v22599_v47  ;;  %v8775_v34 = vmax.f32 %v8577_v57, 0.0 }
 0x214   : > { %6669 = vperm.xlu0 %12295, %v22593_v53   ;;  %v22597_v16 = vsub.f32 %v22595_v39, %v22596_v4  ;;  %v16833_v53 = vmul.f32 0.020408163, %v16070_v25  ;;  %11918 = vmatmul.mubr.msk.f32.gmra.mrb[156].mxu1 %vm500_vm0, %v2311_v49  ;;  %v2312_v25 = vmul.f32 %v16075_v61, %v16075_v61  ;;  %v16853_v11 = vld [vmem:[%s21700_s0 + $0x5a8] sm:$0xff]  ;;  %v7688_v4 = vpop.permute.xlu0 %7687  ;;  %v2313_v49 = vmul.f32 %v16080_v41, %v16080_v41  ;;  %v16864_v61 = vld [vmem:[%s21700_s0 + $0x5b0] sm:$0xff]  ;;  %v12454_v39 = vpop.eup %12453 }
 0x215   : > { %v4878_v24 = vmax.f32 %v22598_v38, 0.0  ;;  %22600 = vst [vmem:[#allocation68_spill] sm:$0xff] %v16846_v5  ;;  %v8776_v52 = vmax.f32 %v8578_v20, 0.0  ;;  %11642 = vmatprep.mubr.msk.f32.mxu0 %vm500_vm0, %v16822_v45  ;;  %v22601_v38 = vmax.f32 %v16369_v56, 0.0  ;;  %v16870_v20 = vpop.permute.xlu1 %6514  ;;  %v22602_v47 = vld [vmem:[#allocation83_spill] sm:$0xff]  ;;  %12461 = vrsqrt.f32 %v5272_v54  ;;  %v22605_v5 = vld [vmem:[#allocation26_spill] sm:$0xff] }
 0x216   : > { %7842 = vperm.xlu1 %12296, %v22597_v16   ;;  %v22603_v46 = vld [vmem:[#allocation51_spill] sm:$0xff]  ;;  %v5271_v41 = vadd.f32 1e-05, %v4875_v44  ;;  %11920 = vmatprep.mubr.msk.f32.mxu1 %vm500_vm0, %v2312_v25  ;;  %v16878_v37 = vmul.f32 %v16810_v63, %v22605_v5  ;;  %v12735_v56 = vld [vmem:[%s21700_s0 + $0xc0] sm:$0xff]  ;;  %v16885_v12 = vmul.f32 %v12452_v58, %v5068_v14  ;;  %v5069_v44 = vld [vmem:[%s21702_s2 + $0x270] sm:$0xff]  ;;  %v12456_v5 = vpop.eup %12455  ;;  %v22610_v58 = vsub.f32 %v16600_v2, %v16593_v23 }
 0x217   : > { %v16868_v57 = vpack.c.bf16 %v8766_v33, %v22601_v38  ;;  %v22604_v16 = vsub.f32 %v22602_v47, %v22603_v46  ;;  %v7391_v33 = vmul.f32 %v12735_v56, %v16679_v28  ;;  %v22607_v38 = vld [vmem:[#allocation63_spill] sm:$0xff]  ;;  %v12071_v60 = vpack.c.bf16 %v8776_v52, %v8775_v34  ;;  %v22609_v54 = vld [vmem:[#allocation20_spill] sm:$0xff]  ;;  %11643 = vmatmul.mubr.msk.f32.gmra.mrb[180].mxu0 %vm500_vm0, %v16853_v11  ;;  %v16907_v47 = vpop.eup %12457  ;;  %v22612_v23 = vld [vmem:[#allocation33_spill] sm:$0xff] }
 0x218   : > { %22606 = vst [vmem:[#allocation69_spill] sm:$0xff] %v16878_v37  ;;  %22608 = vst [vmem:[#allocation101_spill] sm:$0xff] %v16885_v12  ;;  %v12736_v28 = vld [vmem:[%s21700_s0 + $0xc8] sm:$0xff]  ;;  %v5274_v34 = vadd.f32 1e-05, %v4878_v24  ;;  %v4877_v14 = vmax.f32 %v22610_v58, 0.0  ;;  %11921 = vmatmul.mubr.msk.f32.gmra.mrb[158].mxu1 %vm500_vm0, %v2313_v49  ;;  %11645 = vmatprep.mubr.msk.f32.mxu0 %vm500_vm0, %v16864_v61  ;;  %v2315_v24 = vmul.f32 %v16140_v29, %v16140_v29  ;;  %12463 = vrsqrt.f32 %v5271_v41 }
 0x219   : > { %7847 = vperm.xlu0 %12295, %v22604_v16   ;;  %v16891_v16 = vmul.f32 0.020408163, %v22609_v54  ;;  %v7392_v25 = vmul.f32 %v12736_v28, %v16751_v50  ;;  %v22611_v52 = vld [vmem:[#allocation80_spill] sm:$0xff]  ;;  %v8579_v56 = vadd.f32 %v7688_v4, %v7391_v33  ;;  %12072 = vmatprep.subr.bf16.mxu0 %v12071_v60  ;;  %v16916_v2 = vmul.f32 0.020408163, %v22612_v23  ;;  %v22613_v49 = vld [vmem:[#allocation105_spill] sm:$0xff]  ;;  %v7693_v54 = vpop.permute.xlu1 %7692 }
 0x21a   : > { %6674 = vperm.xlu1 %12296, %v22607_v38   ;;  %v2314_v46 = vmul.f32 %v22611_v52, %v22611_v52  ;;  %v16909_v38 = vpop.permute.xlu0 %6519  ;;  %12074 = vmatpush3.bf16.msra.mxu0 %v22613_v49  ;;  %v22614_v28 = vld [vmem:[#allocation30_spill] sm:$0xff]  ;;  %v16922_v4 = vmul.f32 %v12454_v39, %v5069_v44  ;;  %v22615_v60 = vld [vmem:[#allocation32_spill] sm:$0xff]  ;;  %v16928_v58 = vmul.f32 0.020408163, %v16224_v48  ;;  %v16933_v52 = vld [vmem:[%s21700_s0 + $0x5b8] sm:$0xff]  ;;  %v22619_v39 = vsub.f32 %v16703_v42, %v16671_v18 }
 0x21b   : > { %v16913_v50 = vmul.f32 %v16891_v16, %v16891_v16  ;;  %v16925_v33 = vmul.f32 0.020408163, %v22615_v60  ;;  %v8580_v29 = vadd.f32 %v7693_v54, %v7392_v25  ;;  %v22616_v23 = vld [vmem:[#allocation37_spill] sm:$0xff]  ;;  %v16946_v48 = vmul.f32 %v16916_v2, %v16916_v2  ;;  %11646 = vmatmul.mubr.msk.f32.gmra.mrb[182].mxu0 %vm500_vm0, %v16933_v52  ;;  %v22625_v42 = vld [vmem:[#allocation70_spill] sm:$0xff] }
 0x21c   : > { %v22617_v49 = vld [vmem:[#allocation13_spill] sm:$0xff]  ;;  %v4880_v41 = vmax.f32 %v22619_v39, 0.0  ;;  %11923 = vmatprep.mubr.msk.f32.mxu1 %vm500_vm0, %v2314_v46  ;;  %v2316_v18 = vmul.f32 %v16229_v59, %v16229_v59  ;;  %v2317_v60 = vmul.f32 %v16234_v26, %v16234_v26  ;;  %v16963_v46 = vpop.f32.mrb[102].mxu0  ;;  %12465 = vrsqrt.f32 %v5274_v34 }
 0x21d   : > { %6679 = vperm.xlu0 %12295, %v22614_v28   ;;  %v22618_v37 = vsub.f32 %v22616_v23, %v22617_v49  ;;  %v5070_v44 = vld [vmem:[%s21702_s2 + $0x278] sm:$0xff]  ;;  %11924 = vmatmul.mubr.msk.f32.gmra.mrb[160].mxu1 %vm500_vm0, %v2315_v24  ;;  %v16968_v23 = vld [vmem:[%s21700_s0 + $0x5c0] sm:$0xff]  ;;  %v8778_v49 = vmax.f32 %v8580_v29, 0.0  ;;  %v16974_v59 = vpop.f32.mrb[103].mxu0  ;;  %v16976_v26 = vpop.permute.xlu1 %6524  ;;  %v16989_v29 = vmul.f32 0.020408163, %v16251_v0 }
 0x21e   : > { %v22620_v28 = vld [vmem:[#allocation41_spill] sm:$0xff]  ;;  %v7698_v39 = vpop.permute.xlu0 %7697  ;;  %22623 = vst [vmem:[#allocation103_spill] sm:$0xff] %v16974_v59  ;;  %11926 = vmatprep.mubr.msk.f32.mxu1 %vm500_vm0, %v2316_v18  ;;  %v12737_v24 = vld [vmem:[%s21700_s0 + $0xd0] sm:$0xff]  ;;  %11648 = vmatprep.mubr.msk.f32.mxu0 %vm500_vm0, %v16968_v23 }
 0x21f   : > { %7852 = vperm.xlu1 %12296, %v22618_v37   ;;  %v16951_v25 = vmul.f32 %v16885_v12, %v22620_v28  ;;  %v22622_v37 = vsub.f32 %v16723_v3, %v16719_v6  ;;  %v12460_v6 = vpop.eup %12459  ;;  %v8777_v3 = vmax.f32 %v8579_v56, 0.0  ;;  %v5273_v28 = vadd.f32 1e-05, %v4877_v14  ;;  %v22628_v14 = vld [vmem:[#allocation81_spill] sm:$0xff] }
 0x220   : > { %v16981_v12 = vmul.f32 %v12456_v5, %v5070_v44  ;;  %v16986_v56 = vmul.f32 %v16922_v4, %v22628_v14  ;;  %v7393_v59 = vmul.f32 %v12737_v24, %v16797_v43  ;;  %v5276_v5 = vadd.f32 1e-05, %v4880_v41  ;;  %v5071_v44 = vld [vmem:[%s21702_s2 + $0x280] sm:$0xff]  ;;  %v17003_v0 = vpop.eup %12461  ;;  %v12738_v43 = vld [vmem:[%s21700_s0 + $0xd8] sm:$0xff]  ;;  %v17020_v24 = vld [vmem:[%s21700_s0 + $0x5c8] sm:$0xff] }
 0x221   : > { %22621 = vst [vmem:[#allocation49_spill] sm:$0xff] %v16951_v25  ;;  %v4879_v54 = vmax.f32 %v22622_v37, 0.0  ;;  %v22624_v37 = vld [vmem:[#allocation27_spill] sm:$0xff]  ;;  %v12075_v34 = vpack.c.bf16 %v8778_v49, %v8777_v3  ;;  %v7394_v18 = vmul.f32 %v12738_v43, %v16870_v20  ;;  %v22631_v41 = vsub.f32 %v16817_v30, %v16814_v36  ;;  %11927 = vmatmul.mubr.msk.f32.gmra.mrb[162].mxu1 %vm500_vm0, %v2317_v60  ;;  %v22632_v20 = vld [vmem:[#allocation89_spill] sm:$0xff] }
 0x222   : > { %v22626_v25 = vsub.f32 %v22624_v37, %v22625_v42  ;;  %22627 = vst [vmem:[#allocation104_spill] sm:$0xff] %v16981_v12  ;;  %22629 = vst [vmem:[#allocation55_spill] sm:$0xff] %v16986_v56  ;;  %v22630_v42 = vld [vmem:[#allocation102_spill] sm:$0xff]  ;;  %v8581_v37 = vadd.f32 %v7698_v39, %v7393_v59  ;;  %v17022_v14 = vpop.permute.xlu0 %6529  ;;  %v2319_v36 = vmul.f32 %v16306_v21, %v16306_v21  ;;  %v17030_v30 = vmul.f32 0.020408163, %v16308_v51  ;;  %v22633_v60 = vld [vmem:[#allocation7_spill] sm:$0xff] }
 0x223   : > { %6684 = vperm.xlu1 %12296, %v22630_v42   ;;  %v5275_v3 = vadd.f32 1e-05, %v4879_v54  ;;  %v4882_v49 = vmax.f32 %v22631_v41, 0.0  ;;  %12076 = vmatprep.subr.bf16.mxu0 %v12075_v34  ;;  %v17025_v54 = vmul.f32 0.020408163, %v22632_v20  ;;  %v7703_v42 = vpop.permute.xlu1 %7702  ;;  %v22634_v43 = vld [vmem:[#allocation21_spill] sm:$0xff]  ;;  %12467 = vrsqrt.f32 %v5273_v28 }
 0x224   : > { %7857 = vperm.xlu0 %12295, %v22626_v25   ;;  %v2318_v25 = vmul.f32 %v16256_v1, %v16256_v1  ;;  %v17015_v1 = vmul.f32 %v16989_v29, %v16989_v29  ;;  %12078 = vmatpush3.bf16.msra.mxu0 %v22633_v60  ;;  %v17035_v39 = vmul.f32 %v12460_v6, %v5071_v44  ;;  %v17038_v59 = vmul.f32 0.020408163, %v16380_v17  ;;  %v22636_v34 = vld [vmem:[#allocation35_spill] sm:$0xff]  ;;  %v17047_v21 = vld [vmem:[%s21700_s0 + $0x5d0] sm:$0xff]  ;;  %v22639_v20 = vld [vmem:[#allocation14_spill] sm:$0xff] }
 0x225   : > { %v17042_v41 = vmul.f32 %v16981_v12, %v22636_v34  ;;  %v8582_v51 = vadd.f32 %v7703_v42, %v7394_v18  ;;  %v22641_v6 = vsub.f32 %v16833_v53, %v16829_v10  ;;  %v5072_v17 = vld [vmem:[%s21702_s2 + $0x288] sm:$0xff]  ;;  %v4489_v44 = vmul.f32 %v17025_v54, %v17025_v54  ;;  %11649 = vmatmul.mubr.msk.f32.gmra.mrb[184].mxu0 %vm500_vm0, %v17020_v24  ;;  %v12464_v18 = vpop.eup %12463  ;;  %v17072_v34 = vld [vmem:[%s21700_s0 + $0x5d8] sm:$0xff] }
 0x226   : > { %11929 = vmatprep.mubr.msk.f32.mxu1 %vm500_vm0, %v2318_v25  ;;  %22635 = vst [vmem:[#allocation16_spill] sm:$0xff] %v17035_v39  ;;  %v22638_v25 = vld [vmem:[#allocation10_spill] sm:$0xff]  ;;  %12469 = vrsqrt.f32 %v5276_v5  ;;  %v5278_v42 = vadd.f32 1e-05, %v4882_v49  ;;  %v2320_v10 = vmul.f32 %v16385_v13, %v16385_v13  ;;  %v2321_v53 = vmul.f32 %v16390_v9, %v16390_v9  ;;  %11651 = vmatprep.mubr.msk.f32.mxu0 %vm500_vm0, %v17047_v21 }
 0x227   : > { %22637 = vst [vmem:[#allocation25_spill] sm:$0xff] %v17042_v41  ;;  %v22640_v60 = vsub.f32 %v22638_v25, %v22639_v20  ;;  %v4881_v28 = vmax.f32 %v22641_v6, 0.0  ;;  %11930 = vmatmul.mubr.msk.f32.gmra.mrb[164].mxu1 %vm500_vm0, %v2319_v36  ;;  %v17074_v25 = vpop.f32.mrb[104].mxu0  ;;  %v8779_v20 = vmax.f32 %v8581_v37, 0.0  ;;  %v7708_v6 = vpop.permute.xlu0 %7707  ;;  %12471 = vrsqrt.f32 %v5275_v3  ;;  %v17082_v13 = vld [vmem:[%s21700_s0 + $0x5e0] sm:$0xff] }
 0x228   : > { %6689 = vperm.xlu0 %12295, %v22634_v43   ;;  %22642 = vst [vmem:[#allocation74_spill] sm:$0xff] %v17074_v25  ;;  %v4687_v5 = vsub.f32 %v17038_v59, %v4489_v44  ;;  %v17084_v9 = vpop.f32.mrb[105].mxu0  ;;  %v17086_v49 = vpop.permute.xlu1 %6534  ;;  %v22644_v36 = vld [vmem:[#allocation106_spill] sm:$0xff]  ;;  %v22645_v43 = vld [vmem:[#allocation73_spill] sm:$0xff]  ;;  %v17092_v3 = vmul.f32 %v16907_v47, %v5072_v17  ;;  %v5073_v59 = vld [vmem:[%s21702_s2 + $0x290] sm:$0xff]  ;;  %11932 = vmatprep.mubr.msk.f32.mxu1 %vm500_vm0, %v2320_v10  ;;  %12473 = vrsqrt.f32 %v5278_v42 }
 0x229   : > { %7862 = vperm.xlu1 %12296, %v22640_v60   ;;  %v8780_v60 = vmax.f32 %v8582_v51, 0.0  ;;  %22643 = vst [vmem:[#allocation64_spill] sm:$0xff] %v17084_v9  ;;  %v22646_v37 = vsub.f32 %v22644_v36, %v22645_v43  ;;  %v22648_v51 = vld [vmem:[#allocation6_spill] sm:$0xff]  ;;  %v17103_v12 = vmul.f32 0.020408163, %v16407_v22  ;;  %v2322_v43 = vmul.f32 %v16412_v31, %v16412_v31  ;;  %v22650_v36 = vld [vmem:[#allocation76_spill] sm:$0xff]  ;;  %11652 = vmatmul.mubr.msk.f32.gmra.mrb[186].mxu0 %vm500_vm0, %v17072_v34  ;;  %v17117_v22 = vpop.eup %12465 }
 0x22a   : > { %22647 = vst [vmem:[#allocation17_spill] sm:$0xff] %v17092_v3  ;;  %v17100_v44 = vmul.f32 %v17035_v39, %v22648_v51  ;;  %v12739_v47 = vld [vmem:[%s21700_s0 + $0xe0] sm:$0xff]  ;;  %v5277_v10 = vadd.f32 1e-05, %v4881_v28  ;;  %v22651_v51 = vsub.f32 %v16928_v58, %v16946_v48  ;;  %v12740_v31 = vld [vmem:[%s21700_s0 + $0xe8] sm:$0xff]  ;;  %11654 = vmatprep.mubr.msk.f32.mxu0 %vm500_vm0, %v17082_v13  ;;  %v17140_v42 = vmul.f32 %v12464_v18, %v5073_v59  ;;  %v5074_v18 = vld [vmem:[%s21702_s2 + $0x298] sm:$0xff] }
 0x22b   : > { %v7395_v17 = vmul.f32 %v12739_v47, %v16909_v38  ;;  %11933 = vmatmul.mubr.msk.f32.gmra.mrb[166].mxu1 %vm500_vm0, %v2321_v53  ;;  %v17126_v38 = vmul.f32 %v17103_v12, %v17103_v12  ;;  %v22652_v58 = vld [vmem:[#allocation42_spill] sm:$0xff]  ;;  %v17136_v28 = vld [vmem:[%s21700_s0 + $0x5e8] sm:$0xff]  ;;  %v22656_v47 = vld [vmem:[#allocation8_spill] sm:$0xff]  ;;  %v4885_v41 = vmax.f32 %v4687_v5, 0.0  ;;  %v17185_v5 = vpop.f32.mrb[106].mxu0 }
 0x22c   : > { %7867 = vperm.xlu0 %12295, %v22646_v37   ;;  %22649 = vst [vmem:[#allocation96_spill] sm:$0xff] %v17100_v44  ;;  %v12079_v37 = vpack.c.bf16 %v8780_v60, %v8779_v20  ;;  %v4883_v39 = vmax.f32 %v22651_v51, 0.0  ;;  %v7396_v44 = vmul.f32 %v12740_v31, %v16976_v26  ;;  %v17129_v48 = vmul.f32 0.020408163, %v22652_v58  ;;  %v17138_v26 = vpop.permute.xlu0 %6539  ;;  %22654 = vst [vmem:[#allocation29_spill] sm:$0xff] %v17140_v42  ;;  %v22655_v53 = vld [vmem:[#allocation31_spill] sm:$0xff]  ;;  %v7713_v31 = vpop.permute.xlu1 %7712 }
 0x22d   : > { %6694 = vperm.xlu1 %12296, %v22650_v36   ;;  %v8583_v20 = vadd.f32 %v7708_v6, %v7395_v17  ;;  %22653 = vst [vmem:[#allocation46_spill] sm:$0xff] %v17138_v26  ;;  %v2323_v60 = vmul.f32 %v22655_v53, %v22655_v53  ;;  %v17145_v36 = vmul.f32 0.020408163, %v22656_v47  ;;  %11935 = vmatprep.mubr.msk.f32.mxu1 %vm500_vm0, %v2322_v43  ;;  %v22657_v51 = vld [vmem:[#allocation34_spill] sm:$0xff]  ;;  %v22658_v58 = vld [vmem:[#allocation77_spill] sm:$0xff]  ;;  %12475 = vrsqrt.f32 %v5277_v10 }
 0x22e   : > { %12080 = vmatprep.subr.bf16.mxu0 %v12079_v37  ;;  %v22659_v6 = vsub.f32 %v16925_v33, %v16913_v50  ;;  %v4491_v59 = vmul.f32 %v17129_v48, %v17129_v48  ;;  %v22660_v37 = vld [vmem:[#allocation94_spill] sm:$0xff]  ;;  %v22661_v47 = vld [vmem:[#allocation45_spill] sm:$0xff]  ;;  %v8584_v50 = vadd.f32 %v7713_v31, %v7396_v44  ;;  %v5279_v26 = vadd.f32 1e-05, %v4883_v39  ;;  %11655 = vmatmul.mubr.msk.f32.gmra.mrb[188].mxu0 %vm500_vm0, %v17136_v28 }
 0x22f   : > { %12082 = vmatpush3.bf16.msra.mxu0 %v22657_v51  ;;  %v4293_v53 = vmul.f32 0.020408163, %v22660_v37  ;;  %v17161_v43 = vmul.f32 %v17092_v3, %v22661_v47  ;;  %v17166_v51 = vld [vmem:[%s21700_s0 + $0x5f0] sm:$0xff]  ;;  %v22663_v33 = vld [vmem:[#allocation5_spill] sm:$0xff]  ;;  %v12468_v37 = vpop.eup %12467  ;;  %11936 = vmatmul.mubr.msk.f32.gmra.mrb[168].mxu1 %vm500_vm0, %v2323_v60  ;;  %v2324_v44 = vmul.f32 %v16501_v62, %v16501_v62  ;;  %v2325_v31 = vmul.f32 %v16518_v35, %v16518_v35  ;;  %v5075_v62 = vld [vmem:[%s21702_s2 + $0x2a0] sm:$0xff] }
 0x230   : > { %6699 = vperm.xlu0 %12295, %v22658_v58   ;;  %v4884_v17 = vmax.f32 %v22659_v6, 0.0  ;;  %v22664_v58 = vld [vmem:[#allocation71_spill] sm:$0xff]  ;;  %v17183_v39 = vld [vmem:[%s21700_s0 + $0x5f8] sm:$0xff]  ;;  %22666 = vst [vmem:[#allocation75_spill] sm:$0xff] %v17185_v5  ;;  %v17188_v10 = vmul.f32 %v17003_v0, %v5074_v18  ;;  %v22667_v60 = vld [vmem:[#allocation56_spill] sm:$0xff]  ;;  %11657 = vmatprep.mubr.msk.f32.mxu0 %vm500_vm0, %v17166_v51  ;;  %v17209_v18 = vpop.eup %12469  ;;  %v17219_v3 = vpop.permute.xlu1 %6544  ;;  %12477 = vrsqrt.f32 %v5279_v26 }
 0x231   : > { %22662 = vst [vmem:[#allocation66_spill] sm:$0xff] %v17161_v43  ;;  %v22665_v6 = vsub.f32 %v22663_v33, %v22664_v58  ;;  %v4689_v47 = vsub.f32 %v4293_v53, %v4491_v59  ;;  %v8781_v33 = vmax.f32 %v8583_v20, 0.0  ;;  %v8782_v58 = vmax.f32 %v8584_v50, 0.0  ;;  %v5076_v35 = vld [vmem:[%s21702_s2 + $0x2a8] sm:$0xff]  ;;  %v17205_v0 = vld [vmem:[%s21700_s0 + $0x600] sm:$0xff]  ;;  %v17207_v20 = vpop.f32.mrb[107].mxu0  ;;  %11938 = vmatprep.mubr.msk.f32.mxu1 %vm500_vm0, %v2324_v44 }
 0x232   : > { %v17198_v59 = vmul.f32 %v17140_v42, %v22667_v60  ;;  %22669 = vst [vmem:[#allocation84_spill] sm:$0xff] %v17207_v20  ;;  %v22670_v53 = vld [vmem:[#allocation47_spill] sm:$0xff]  ;;  %v22671_v50 = vld [vmem:[#allocation90_spill] sm:$0xff]  ;;  %v12741_v60 = vld [vmem:[%s21700_s0 + $0xf0] sm:$0xff]  ;;  %v5280_v9 = vadd.f32 1e-05, %v4884_v17  ;;  %v2326_v20 = vmul.f32 %v16561_v27, %v16561_v27  ;;  %11658 = vmatmul.mubr.msk.f32.gmra.mrb[190].mxu0 %vm500_vm0, %v17183_v39  ;;  %v17237_v44 = vmul.f32 %v12468_v37, %v5075_v62 }
 0x233   : > { %7872 = vperm.xlu1 %12296, %v22665_v6   ;;  %v7718_v6 = vpop.permute.xlu0 %7717  ;;  %v17213_v56 = vadd.f32 %v22671_v50, %v22670_v53  ;;  %v7397_v42 = vmul.f32 %v12741_v60, %v17022_v14  ;;  %22672 = vst [vmem:[#allocation82_spill] sm:$0xff] %v17219_v3  ;;  %v22674_v43 = vld [vmem:[#allocation72_spill] sm:$0xff]  ;;  %v12472_v53 = vpop.eup %12471  ;;  %v22676_v50 = vld [vmem:[#allocation79_spill] sm:$0xff]  ;;  %v12083_v25 = vpack.c.bf16 %v8782_v58, %v8781_v33  ;;  %v5281_v3 = vadd.f32 1e-05, %v4885_v41  ;;  %v12742_v17 = vld [vmem:[%s21700_s0 + $0xf8] sm:$0xff] }
 0x234   : > { %22668 = vst [vmem:[#allocation18_spill] sm:$0xff] %v17198_v59  ;;  %v22673_v59 = vld [vmem:[#allocation92_spill] sm:$0xff]  ;;  %v22677_v14 = vsub.f32 %v17030_v30, %v17015_v1  ;;  %v4887_v27 = vmax.f32 %v4689_v47, 0.0  ;;  %11939 = vmatmul.mubr.msk.f32.gmra.mrb[170].mxu1 %vm500_vm0, %v2325_v31  ;;  %v17241_v26 = vmul.f32 %v17117_v22, %v5076_v35  ;;  %11660 = vmatprep.mubr.msk.f32.mxu0 %vm500_vm0, %v17205_v0  ;;  %v22682_v31 = vld [vmem:[#allocation85_spill] sm:$0xff]  ;;  %v22683_v62 = vld [vmem:[#allocation86_spill] sm:$0xff]  ;;  %12479 = vrsqrt.f32 %v5280_v9 }
 0x235   : > { %v22675_v5 = vsub.f32 %v22673_v59, %v22674_v43  ;;  %v7398_v43 = vmul.f32 %v12742_v17, %v17086_v49  ;;  %v8585_v1 = vadd.f32 %v7718_v6, %v7397_v42  ;;  %12084 = vmatprep.subr.bf16.mxu0 %v12083_v25  ;;  %v22679_v41 = vld [vmem:[#allocation88_spill] sm:$0xff]  ;;  %11941 = vmatprep.mubr.msk.f32.mxu1 %vm500_vm0, %v2326_v20  ;;  %v22680_v49 = vld [vmem:[#allocation2_spill] sm:$0xff]  ;;  %v17260_v42 = vld [vmem:[%s21700_s0 + $0x608] sm:$0xff]  ;;  %v12474_v25 = vpop.eup %12473  ;;  %v8768_v58 = vmax.f32 %v17213_v56, 0.0  ;;  %v7723_v6 = vpop.permute.xlu1 %7722 }
 0x236   : > { %v4886_v60 = vmax.f32 %v22677_v14, 0.0  ;;  %22678 = vst [vmem:[#allocation36_spill] sm:$0xff] %v17241_v26  ;;  %v17252_v37 = vmul.f32 %v17188_v10, %v22680_v49  ;;  %v5077_v22 = vld [vmem:[%s21702_s2 + $0x2b0] sm:$0xff]  ;;  %12086 = vmatpush3.bf16.msra.mxu0 %v16868_v57  ;;  %v2328_v35 = vmul.f32 %v16625_v55, %v16625_v55  ;;  %v22685_v14 = vld [vmem:[#allocation11_spill] sm:$0xff]  ;;  %12481 = vrsqrt.f32 %v5281_v3  ;;  %v5078_v55 = vld [vmem:[%s21702_s2 + $0x2b8] sm:$0xff]  ;;  %v17294_v3 = vpop.f32.mrb[108].mxu0 }
 0x237   : > { %7877 = vperm.xlu0 %12295, %v22675_v5   ;;  %6704 = vperm.xlu1 %12296, %v22676_v50   ;;  %v17245_v30 = vpop.permute.xlu0 %6549  ;;  %v2327_v5 = vmul.f32 %v22679_v41, %v22679_v41  ;;  %v22681_v47 = vld [vmem:[#allocation40_spill] sm:$0xff]  ;;  %v8586_v20 = vadd.f32 %v7723_v6, %v7398_v43  ;;  %v22684_v50 = vld [vmem:[#allocation9_spill] sm:$0xff]  ;;  %v22687_v57 = vsub.f32 %v17145_v36, %v17126_v38  ;;  %v5283_v9 = vadd.f32 1e-05, %v4887_v27  ;;  %v22689_v43 = vld [vmem:[#allocation58_spill] sm:$0xff] }
 0x238   : > { %v8569_v33 = vadd.f32 %v22682_v31, %v22681_v47  ;;  %v17272_v59 = vld [vmem:[%s21700_s0 + $0x610] sm:$0xff]  ;;  %v22686_v17 = vsub.f32 %v22684_v50, %v22685_v14  ;;  %v5282_v56 = vadd.f32 1e-05, %v4886_v60  ;;  %v17284_v49 = vmul.f32 %v12472_v53, %v5077_v22  ;;  %v22690_v31 = vld [vmem:[#allocation95_spill] sm:$0xff]  ;;  %11661 = vmatmul.mubr.msk.f32.gmra.mrb[192].mxu0 %vm500_vm0, %v17260_v42  ;;  %22691 = vst [vmem:[#allocation22_spill] sm:$0xff] %v17294_v3  ;;  %v22692_v27 = vld [vmem:[#allocation50_spill] sm:$0xff] }
 0x239   : > { %v4888_v41 = vmax.f32 %v22687_v57, 0.0  ;;  %11942 = vmatmul.mubr.msk.f32.gmra.mrb[172].mxu1 %vm500_vm0, %v2327_v5  ;;  %v2329_v47 = vmul.f32 %v22689_v43, %v22689_v43  ;;  %v17290_v60 = vmul.f32 %v17237_v44, %v22690_v31  ;;  %v8783_v38 = vmax.f32 %v8585_v1, 0.0  ;;  %11663 = vmatprep.mubr.msk.f32.mxu0 %vm500_vm0, %v17272_v59  ;;  %v17310_v22 = vld [vmem:[%s21700_s0 + $0x618] sm:$0xff]  ;;  %v17312_v1 = vpop.f32.mrb[109].mxu0  ;;  %v5848_v50 = vld [vmem:[%s21703_s3 + $0x208] sm:$0xff] }
 0x23a   : > { %22688 = vst [vmem:[#allocation24_spill] sm:$0xff] %v17284_v49  ;;  %v8784_v36 = vmax.f32 %v8586_v20, 0.0  ;;  %11944 = vmatprep.mubr.msk.f32.mxu1 %vm500_vm0, %v2328_v35  ;;  %v2330_v53 = vmul.f32 %v16694_v32, %v16694_v32  ;;  %v17303_v5 = vmul.f32 %v17241_v26, %v22692_v27  ;;  %22693 = vst [vmem:[#allocation54_spill] sm:$0xff] %v17312_v1  ;;  %v8767_v20 = vmax.f32 %v8569_v33, 0.0  ;;  %v17314_v35 = vpop.permute.xlu1 %6554  ;;  %v22696_v57 = vld [vmem:[#allocation39_spill] sm:$0xff]  ;;  %v5851_v1 = vld [vmem:[%s21703_s3 + $0x220] sm:$0xff] }
 0x23b   : > { %6709 = vperm.xlu0 %12295, %v22683_v62   ;;  %7882 = vperm.xlu1 %12296, %v22686_v17   ;;  %v17296_v6 = vpop.permute.xlu0 %7727  ;;  %v12476_v62 = vpop.eup %12475  ;;  %v22694_v32 = vsub.f32 %v16654_v19, %v16129_v40  ;;  %v17323_v14 = vmul.f32 %v17209_v18, %v5078_v55  ;;  %v5079_v17 = vld [vmem:[%s21702_s2 + $0x2c0] sm:$0xff]  ;;  %12483 = vrsqrt.f32 %v5282_v56  ;;  %v5284_v43 = vadd.f32 1e-05, %v4888_v41  ;;  %v5080_v40 = vld [vmem:[%s21702_s2 + $0x2c8] sm:$0xff] }
 0x23c   : > { %v12087_v33 = vpack.c.bf16 %v8784_v36, %v8783_v38  ;;  %v12089_v19 = vpack.c.bf16 %v8768_v58, %v8767_v20  ;;  %12485 = vrsqrt.f32 %v5283_v9  ;;  %v2331_v18 = vmul.f32 %v16710_v7, %v16710_v7  ;;  %11664 = vmatmul.mubr.msk.f32.gmra.mrb[194].mxu0 %vm500_vm0, %v17310_v22  ;;  %v12478_v56 = vpop.eup %12477  ;;  %v22697_v31 = vld [vmem:[#allocation87_spill] sm:$0xff]  ;;  %v5849_v58 = vld [vmem:[%s21703_s3 + $0x210] sm:$0xff] }
 0x23d   : > { %22695 = vst [vmem:[#allocation83_spill] sm:$0xff] %v17323_v14  ;;  %11945 = vmatmul.mubr.msk.f32.gmra.mrb[174].mxu1 %vm500_vm0, %v2329_v47  ;;  %v17337_v55 = vmul.f32 %v17284_v49, %v16687_v15  ;;  %v6244_v38 = vsub.f32 %v5848_v50, %v22697_v31  ;;  %v17348_v7 = vmul.f32 %v12476_v62, %v5079_v17  ;;  %v22699_v47 = vld [vmem:[#allocation93_spill] sm:$0xff]  ;;  %v22701_v27 = vld [vmem:[#allocation99_spill] sm:$0xff]  ;;  %v17367_v62 = vld [vmem:[%s21700_s0 + $0x620] sm:$0xff]  ;;  %12487 = vrsqrt.f32 %v5284_v43 }
 0x23e   : > { %12088 = vmatprep.subr.bf16.mxu0 %v12087_v33  ;;  %11947 = vmatprep.mubr.msk.f32.mxu1 %vm500_vm0, %v2330_v53  ;;  %v2332_v15 = vmul.f32 %v16748_v8, %v16748_v8  ;;  %v17352_v9 = vpop.permute.xlu1 %7732  ;;  %v17355_v36 = vmul.f32 %v12474_v25, %v5080_v40  ;;  %v17359_v20 = vmul.f32 %v17323_v14, %v22701_v27  ;;  %v5081_v53 = vld [vmem:[%s21702_s2 + $0x2d0] sm:$0xff]  ;;  %v17372_v8 = vld [vmem:[%s21700_s0 + $0x628] sm:$0xff]  ;;  %v12480_v25 = vpop.eup %12479  ;;  %v22703_v17 = vld [vmem:[#allocation57_spill] sm:$0xff] }
 0x23f   : > { %7887 = vperm.xlu0 %12295, %v22694_v32   ;;  %6714 = vperm.xlu1 %12296, %v22696_v57   ;;  %v17341_v41 = vpop.permute.xlu0 %6559  ;;  %22698 = vst [vmem:[#allocation51_spill] sm:$0xff] %v17348_v7  ;;  %v22702_v32 = vld [vmem:[#allocation43_spill] sm:$0xff]  ;;  %v2333_v57 = vmul.f32 %v22703_v17, %v22703_v17  ;;  %v5082_v33 = vld [vmem:[%s21702_s2 + $0x2d8] sm:$0xff]  ;;  %v17381_v40 = vpop.f32.mrb[110].mxu0  ;;  %v2334_v31 = vmul.f32 %v16822_v45, %v16822_v45 }
 0x240   : > { %12090 = vmatpush3.bf16.msra.mxu0 %v12089_v19  ;;  %22700 = vst [vmem:[#allocation26_spill] sm:$0xff] %v17355_v36  ;;  %v6245_v50 = vsub.f32 %v5849_v58, %v22702_v32  ;;  %22704 = vst [vmem:[#allocation63_spill] sm:$0xff] %v17381_v40  ;;  %v12482_v43 = vpop.eup %12481  ;;  %11666 = vmatprep.mubr.msk.f32.mxu0 %vm500_vm0, %v17367_v62  ;;  %v22708_v32 = vld [vmem:[#allocation67_spill] sm:$0xff]  ;;  %v17413_v17 = vmul.f32 %v12480_v25, %v5082_v33  ;;  %v22712_v40 = vld [vmem:[#allocation48_spill] sm:$0xff] }
 0x241   : > { %11948 = vmatmul.mubr.msk.f32.gmra.mrb[176].mxu1 %vm500_vm0, %v2331_v18  ;;  %v22706_v18 = vld [vmem:[#allocation53_spill] sm:$0xff]  ;;  %v17405_v45 = vmul.f32 %v17355_v36, %v22708_v32  ;;  %11667 = vmatmul.mubr.msk.f32.gmra.mrb[196].mxu0 %vm500_vm0, %v17372_v8  ;;  %v2336_v25 = vmul.f32 %v16864_v61, %v16864_v61  ;;  %v5085_v61 = vld [vmem:[%s21702_s2 + $0x2f0] sm:$0xff] }
 0x242   : > { %11950 = vmatprep.mubr.msk.f32.mxu1 %vm500_vm0, %v2332_v15  ;;  %v17392_v58 = vmul.f32 %v17348_v7, %v22706_v18  ;;  %v17398_v27 = vpop.permute.xlu1 %6564  ;;  %v5850_v15 = vld [vmem:[%s21703_s3 + $0x218] sm:$0xff]  ;;  %22711 = vst [vmem:[#allocation105_spill] sm:$0xff] %v17413_v17 }
 0x243   : > { %6719 = vperm.xlu0 %12295, %v22699_v47   ;;  %7892 = vperm.xlu1 %12296, %v6244_v38   ;;  %v17383_v19 = vpop.permute.xlu0 %7737  ;;  %v17388_v38 = vmul.f32 %v12478_v56, %v5081_v53  ;;  %v17396_v47 = vpop.f32.mrb[111].mxu0  ;;  %22709 = vst [vmem:[#allocation33_spill] sm:$0xff] %v17405_v45  ;;  %v5083_v56 = vld [vmem:[%s21702_s2 + $0x2e0] sm:$0xff]  ;;  %v22710_v53 = vld [vmem:[#allocation91_spill] sm:$0xff]  ;;  %v6246_v3 = vsub.f32 %v5850_v15, %v22712_v40  ;;  %v22715_v45 = vld [vmem:[#allocation97_spill] sm:$0xff] }
 0x244   : > { %22707 = vst [vmem:[#allocation80_spill] sm:$0xff] %v17396_v47  ;;  %v17418_v18 = vpop.f32.mrb[112].mxu0 }
 0x245   : > { %22705 = vst [vmem:[#allocation20_spill] sm:$0xff] %v17388_v38  ;;  %11951 = vmatmul.mubr.msk.f32.gmra.mrb[178].mxu1 %vm500_vm0, %v2333_v57  ;;  %v12484_v32 = vpop.eup %12483  ;;  %v17429_v57 = vmul.f32 %v12482_v43, %v5083_v56  ;;  %v17436_v33 = vmul.f32 %v17388_v38, %v16916_v2  ;;  %v17438_v40 = vpop.f32.mrb[113].mxu0  ;;  %v17448_v43 = vmul.f32 %v17413_v17, %v16891_v16 }
 0x246   : > { %11953 = vmatprep.mubr.msk.f32.mxu1 %vm500_vm0, %v2334_v31  ;;  %v12486_v15 = vpop.eup %12485  ;;  %v22717_v31 = vld [vmem:[#allocation38_spill] sm:$0xff]  ;;  %v2337_v2 = vmul.f32 %v16933_v52, %v16933_v52  ;;  %v17456_v38 = vpop.f32.mrb[114].mxu0  ;;  %v2338_v16 = vmul.f32 %v16968_v23, %v16968_v23  ;;  %v22721_v23 = vld [vmem:[#allocation4_spill] sm:$0xff] }
 0x247   : > { %7897 = vperm.xlu0 %12295, %v6245_v50   ;;  %6724 = vperm.xlu1 %12296, %v22710_v53   ;;  %v2335_v50 = vmul.f32 %v16853_v11, %v16853_v11  ;;  %v17420_v47 = vpop.permute.xlu0 %6569  ;;  %22713 = vst [vmem:[#allocation30_spill] sm:$0xff] %v17429_v57  ;;  %v5084_v11 = vld [vmem:[%s21702_s2 + $0x2e8] sm:$0xff]  ;;  %22714 = vst [vmem:[#allocation32_spill] sm:$0xff] %v17436_v33  ;;  %v17440_v53 = vpop.permute.xlu1 %7742  ;;  %v6247_v56 = vsub.f32 %v5851_v1, %v22717_v31  ;;  %v5086_v1 = vld [vmem:[%s21702_s2 + $0x2f8] sm:$0xff] }
 0x248   : > { %22716 = vst [vmem:[#allocation37_spill] sm:$0xff] %v17448_v43  ;;  %v17454_v33 = vmul.f32 %v12484_v32, %v5084_v11  ;;  %v17470_v52 = vmul.f32 %v17429_v57, %v17025_v54  ;;  %v2339_v11 = vmul.f32 %v17020_v24, %v17020_v24  ;;  %v22724_v31 = vld [vmem:[#allocation98_spill] sm:$0xff] }
 0x249   : > { %11954 = vmatmul.mubr.msk.f32.gmra.mrb[180].mxu1 %vm500_vm0, %v2335_v50  ;;  %v17472_v50 = vpop.f32.mrb[115].mxu0 }
 0x24a   : > { %22718 = vst [vmem:[#allocation13_spill] sm:$0xff] %v17454_v33  ;;  %11956 = vmatprep.mubr.msk.f32.mxu1 %vm500_vm0, %v2336_v25  ;;  %22720 = vst [vmem:[#allocation27_spill] sm:$0xff] %v17470_v52  ;;  %v5852_v25 = vld [vmem:[%s21703_s3 + $0x228] sm:$0xff]  ;;  %v17487_v54 = vmul.f32 %v17454_v33, %v16989_v29  ;;  %v5853_v52 = vld [vmem:[%s21703_s3 + $0x230] sm:$0xff] }
 0x24b   : > { %6729 = vperm.xlu0 %12295, %v22715_v45   ;;  %7902 = vperm.xlu1 %12296, %v6246_v3   ;;  %v12488_v45 = vpop.eup %12487  ;;  %v17458_v36 = vpop.permute.xlu0 %7747  ;;  %v17463_v3 = vmul.f32 %v12486_v15, %v5085_v61  ;;  %v22727_v29 = vld [vmem:[#allocation61_spill] sm:$0xff] }
 0x24c   : > { %v17474_v32 = vpop.permute.xlu1 %6574  ;;  %v17483_v15 = vmul.f32 %v12488_v45, %v5086_v1  ;;  %22723 = vst [vmem:[#allocation81_spill] sm:$0xff] %v17487_v54  ;;  %v22728_v1 = vld [vmem:[#allocation44_spill] sm:$0xff] }
 0x24d   : > { %22719 = vst [vmem:[#allocation41_spill] sm:$0xff] %v17463_v3  ;;  %11957 = vmatmul.mubr.msk.f32.gmra.mrb[182].mxu1 %vm500_vm0, %v2337_v2  ;;  %v2340_v2 = vmul.f32 %v17047_v21, %v17047_v21  ;;  %v17500_v24 = vmul.f32 %v17463_v3, %v17129_v48  ;;  %v17513_v21 = vpop.f32.mrb[116].mxu0 }
 0x24e   : > { %22722 = vst [vmem:[#allocation70_spill] sm:$0xff] %v17483_v15  ;;  %11959 = vmatprep.mubr.msk.f32.mxu1 %vm500_vm0, %v2338_v16  ;;  %v17511_v16 = vmul.f32 %v17483_v15, %v17103_v12  ;;  %v5854_v12 = vld [vmem:[%s21703_s3 + $0x238] sm:$0xff] }
 0x24f   : > { %7907 = vperm.xlu0 %12295, %v6247_v56   ;;  %6734 = vperm.xlu1 %12296, %v22721_v23   ;;  %v17489_v61 = vpop.permute.xlu0 %6579  ;;  %v6248_v56 = vsub.f32 %v5852_v25, %v22724_v31  ;;  %22725 = vst [vmem:[#allocation102_spill] sm:$0xff] %v17500_v24  ;;  %v6249_v25 = vsub.f32 %v5853_v52, %v22728_v1  ;;  %v22731_v31 = vld [vmem:[#allocation23_spill] sm:$0xff]  ;;  %v22735_v1 = vld [vmem:[#allocation62_spill] sm:$0xff] }
 0x250   : > { %v17502_v45 = vpop.permute.xlu1 %7752  ;;  %v2341_v23 = vmul.f32 %v17072_v34, %v17072_v34  ;;  %22729 = vst [vmem:[#allocation7_spill] sm:$0xff] %v17511_v16  ;;  %v17518_v24 = vmul.f32 0.020408163, %v22731_v31  ;;  %v2342_v52 = vmul.f32 %v17082_v13, %v17082_v13  ;;  %v22734_v34 = vld [vmem:[#allocation78_spill] sm:$0xff]  ;;  %v22737_v31 = vld [vmem:[#allocation65_spill] sm:$0xff] }
 0x251   : > { %22726 = vst [vmem:[#allocation89_spill] sm:$0xff] %v17502_v45  ;;  %11960 = vmatmul.mubr.msk.f32.gmra.mrb[184].mxu1 %vm500_vm0, %v2339_v11  ;;  %v17523_v11 = vpop.f32.mrb[117].mxu0  ;;  %v6250_v16 = vsub.f32 %v5854_v12, %v22737_v31  ;;  %v11829_v12 = vpop.f32.mrb[96].mxu1  ;;  %v22740_v31 = vld [vmem:[#allocation28_spill] sm:$0xff] }
 0x252   : > { %11962 = vmatprep.mubr.msk.f32.mxu1 %vm500_vm0, %v2340_v2  ;;  %22732 = vst [vmem:[#allocation35_spill] sm:$0xff] %v17523_v11  ;;  %v2343_v2 = vmul.f32 %v17136_v28, %v17136_v28  ;;  %v4494_v54 = vmul.f32 %v17518_v24, %v17518_v24  ;;  %v17554_v15 = vmul.f32 0.020408163, %v22740_v31  ;;  %v4296_v3 = vmul.f32 0.020408163, %v11829_v12  ;;  %v3492_v33 = vpop.f32.mrb[97].mxu1 }
 0x253   : > { %6739 = vperm.xlu0 %12295, %v22727_v29   ;;  %7912 = vperm.xlu1 %12296, %v6248_v56   ;;  %v17515_v48 = vpop.permute.xlu0 %7757  ;;  %v17531_v29 = vmul.f32 0.020408163, %v22734_v34  ;;  %v2344_v34 = vmul.f32 %v17166_v51, %v17166_v51  ;;  %v4295_v51 = vmul.f32 0.020408163, %v3492_v33  ;;  %v17563_v17 = vpop.f32.mrb[118].mxu0  ;;  %v5856_v33 = vld [vmem:[%s21703_s3 + $0x248] sm:$0xff] }
 0x254   : > { %22730 = vst [vmem:[#allocation21_spill] sm:$0xff] %v17515_v48  ;;  %v17525_v56 = vpop.permute.xlu1 %6584  ;;  %22743 = vst [vmem:[#allocation73_spill] sm:$0xff] %v17563_v17  ;;  %v4692_v31 = vsub.f32 %v4296_v3, %v4494_v54  ;;  %v5857_v3 = vld [vmem:[%s21703_s3 + $0x250] sm:$0xff] }
 0x255   : > { %22733 = vst [vmem:[#allocation10_spill] sm:$0xff] %v17525_v56  ;;  %11963 = vmatmul.mubr.msk.f32.gmra.mrb[186].mxu1 %vm500_vm0, %v2341_v23  ;;  %v4493_v28 = vmul.f32 %v17531_v29, %v17531_v29  ;;  %v22786_v45 = vld [vmem:[#allocation84_spill] sm:$0xff] }
 0x256   : > { %11965 = vmatprep.mubr.msk.f32.mxu1 %vm500_vm0, %v2342_v52  ;;  %v22742_v52 = vld [vmem:[#allocation19_spill] sm:$0xff]  ;;  %v4890_v54 = vmax.f32 %v4692_v31, 0.0 }
 0x257   : > { %7917 = vperm.xlu0 %12295, %v6249_v25   ;;  %6744 = vperm.xlu1 %12296, %v22735_v1   ;;  %v17537_v13 = vpop.permute.xlu0 %6589  ;;  %v5855_v25 = vld [vmem:[%s21703_s3 + $0x240] sm:$0xff]  ;;  %v22739_v1 = vld [vmem:[#allocation59_spill] sm:$0xff] }
 0x258   : > { %22736 = vst [vmem:[#allocation14_spill] sm:$0xff] %v17537_v13  ;;  %v17548_v23 = vpop.permute.xlu1 %7762  ;;  %v22741_v13 = vld [vmem:[#allocation3_spill] sm:$0xff]  ;;  %v6251_v57 = vsub.f32 %v5855_v25, %v22742_v52  ;;  %v22748_v52 = vld [vmem:[#allocation100_spill] sm:$0xff]  ;;  %v5286_v48 = vadd.f32 1e-05, %v4890_v54 }
 0x259   : > { %22738 = vst [vmem:[#allocation106_spill] sm:$0xff] %v17548_v23  ;;  %v17557_v43 = vmul.f32 0.020408163, %v22741_v13  ;;  %11966 = vmatmul.mubr.msk.f32.gmra.mrb[188].mxu1 %vm500_vm0, %v2343_v2  ;;  %v17570_v13 = vpop.f32.mrb[119].mxu0  ;;  %v22747_v2 = vld [vmem:[#allocation12_spill] sm:$0xff] }
 0x25a   : > { %11968 = vmatprep.mubr.msk.f32.mxu1 %vm500_vm0, %v2344_v34  ;;  %22745 = vst [vmem:[#allocation76_spill] sm:$0xff] %v17570_v13  ;;  %12489 = vrsqrt.f32 %v5286_v48 }
 0x25b   : > { %6749 = vperm.xlu0 %12295, %v22739_v1   ;;  %7922 = vperm.xlu1 %12296, %v6250_v16   ;;  %v2345_v1 = vmul.f32 %v17183_v39, %v17183_v39  ;;  %v17565_v23 = vpop.permute.xlu0 %7767  ;;  %v2346_v16 = vmul.f32 %v17205_v0, %v17205_v0  ;;  %v4691_v39 = vsub.f32 %v4295_v51, %v4493_v28 }
 0x25c   : > { %22744 = vst [vmem:[#allocation6_spill] sm:$0xff] %v17565_v23  ;;  %v17572_v12 = vpop.permute.xlu1 %6594  ;;  %v4496_v0 = vmul.f32 %v17554_v15, %v17554_v15  ;;  %v4495_v25 = vmul.f32 %v17557_v43, %v17557_v43  ;;  %v22749_v23 = vld [vmem:[#allocation15_spill] sm:$0xff]  ;;  %v2347_v51 = vmul.f32 %v17260_v42, %v17260_v42  ;;  %v22753_v42 = vld [vmem:[#allocation60_spill] sm:$0xff] }
 0x25d   : > { %22746 = vst [vmem:[#allocation42_spill] sm:$0xff] %v17572_v12  ;;  %v4889_v34 = vmax.f32 %v4691_v39, 0.0  ;;  %v17586_v12 = vmul.f32 0.020408163, %v22748_v52  ;;  %v17589_v28 = vmul.f32 0.020408163, %v22749_v23  ;;  %11969 = vmatmul.mubr.msk.f32.gmra.mrb[190].mxu1 %vm500_vm0, %v2345_v1  ;;  %v2348_v39 = vmul.f32 %v17272_v59, %v17272_v59 }
 0x25e   : > { %11971 = vmatprep.mubr.msk.f32.mxu1 %vm500_vm0, %v2346_v16  ;;  %v6253_v13 = vsub.f32 %v5857_v3, %v22753_v42  ;;  %v2349_v59 = vmul.f32 %v17310_v22, %v17310_v22  ;;  %v2350_v22 = vmul.f32 %v17367_v62, %v17367_v62  ;;  %v2351_v62 = vmul.f32 %v17372_v8, %v17372_v8 }
 0x25f   : > { %7927 = vperm.xlu0 %12295, %v6251_v57   ;;  %6754 = vperm.xlu1 %12296, %v22747_v2   ;;  %v11832_v57 = vpop.f32.mrb[98].mxu1  ;;  %v17594_v31 = vpop.permute.xlu0 %6599  ;;  %v22751_v2 = vld [vmem:[#allocation52_spill] sm:$0xff]  ;;  %v5285_v23 = vadd.f32 1e-05, %v4889_v34  ;;  %v4498_v16 = vmul.f32 %v17586_v12, %v17586_v12 }
 0x260   : > { %22750 = vst [vmem:[#allocation31_spill] sm:$0xff] %v17594_v31  ;;  %v6252_v56 = vsub.f32 %v5856_v33, %v22751_v2  ;;  %v4298_v7 = vmul.f32 0.020408163, %v11832_v57  ;;  %v3502_v14 = vpop.f32.mrb[99].mxu1  ;;  %v17600_v52 = vpop.permute.xlu1 %7772  ;;  %v22758_v2 = vld [vmem:[#allocation103_spill] sm:$0xff] }
 0x261   : > { %22752 = vst [vmem:[#allocation8_spill] sm:$0xff] %v17600_v52  ;;  %v4297_v1 = vmul.f32 0.020408163, %v3502_v14  ;;  %v17604_v33 = vpop.f32.mrb[120].mxu0  ;;  %12491 = vrsqrt.f32 %v5285_v23  ;;  %11972 = vmatmul.mubr.msk.f32.gmra.mrb[192].mxu1 %vm500_vm0, %v2347_v51  ;;  %v11835_v3 = vpop.f32.mrb[100].mxu1  ;;  %v22759_v23 = vld [vmem:[#allocation101_spill] sm:$0xff] }
 0x262   : > { %v4694_v31 = vsub.f32 %v4298_v7, %v4496_v0  ;;  %22754 = vst [vmem:[#allocation34_spill] sm:$0xff] %v17604_v33  ;;  %v5858_v7 = vld [vmem:[%s21703_s3 + $0x258] sm:$0xff]  ;;  %v17621_v0 = vmul.f32 0.020408163, %v16963_v46  ;;  %11974 = vmatprep.mubr.msk.f32.mxu1 %vm500_vm0, %v2348_v39  ;;  %v4300_v57 = vmul.f32 0.020408163, %v11835_v3 }
 0x263   : > { %6759 = vperm.xlu0 %12295, %v16810_v63   ;;  %7932 = vperm.xlu1 %12296, %v6252_v56   ;;  %v4693_v54 = vsub.f32 %v4297_v1, %v4495_v25  ;;  %v17611_v63 = vpop.f32.mrb[121].mxu0  ;;  %v17613_v14 = vpop.permute.xlu0 %7777  ;;  %v4497_v56 = vmul.f32 %v17589_v28, %v17589_v28  ;;  %v5859_v46 = vld [vmem:[%s21703_s3 + $0x260] sm:$0xff] }
 0x264   : > { %22755 = vst [vmem:[#allocation77_spill] sm:$0xff] %v17611_v63  ;;  %22756 = vst [vmem:[#allocation94_spill] sm:$0xff] %v17613_v14  ;;  %v4892_v48 = vmax.f32 %v4694_v31, 0.0  ;;  %v17626_v25 = vpop.permute.xlu1 %6604  ;;  %v3512_v51 = vpop.f32.mrb[101].mxu1  ;;  %v17629_v31 = vmul.f32 0.020408163, %v22758_v2  ;;  %v4696_v14 = vsub.f32 %v4300_v57, %v4498_v16 }
 0x265   : > { %22757 = vst [vmem:[#allocation45_spill] sm:$0xff] %v17626_v25  ;;  %v4891_v34 = vmax.f32 %v4693_v54, 0.0  ;;  %v4299_v42 = vmul.f32 0.020408163, %v3512_v51  ;;  %11975 = vmatmul.mubr.msk.f32.gmra.mrb[194].mxu1 %vm500_vm0, %v2349_v59  ;;  %v22761_v54 = vld [vmem:[#allocation68_spill] sm:$0xff]  ;;  %v17654_v16 = vld [vmem:[%s21703_s3 + $0x278] sm:$0xff]  ;;  %v4500_v59 = vmul.f32 %v17621_v0, %v17621_v0  ;;  %v12490_v17 = vpop.eup %12489 }
 0x266   : > { %v5288_v1 = vadd.f32 1e-05, %v4892_v48  ;;  %v6254_v3 = vsub.f32 %v5858_v7, %v22761_v54  ;;  %v17644_v48 = vld [vmem:[%s21703_s3 + $0x268] sm:$0xff]  ;;  %v17649_v51 = vld [vmem:[%s21703_s3 + $0x270] sm:$0xff]  ;;  %11977 = vmatprep.mubr.msk.f32.mxu1 %vm500_vm0, %v2350_v22  ;;  %v4894_v57 = vmax.f32 %v4696_v14, 0.0  ;;  %v4499_v2 = vmul.f32 %v17629_v31, %v17629_v31 }
 0x267   : > { %7937 = vperm.xlu0 %12295, %v6253_v13   ;;  %6764 = vperm.xlu1 %12296, %v22759_v23   ;;  %v5287_v39 = vadd.f32 1e-05, %v4891_v34  ;;  %v17638_v13 = vpop.permute.xlu0 %6609  ;;  %v4695_v8 = vsub.f32 %v4299_v42, %v4497_v56  ;;  %v17665_v34 = vld [vmem:[%s21703_s3 + $0x280] sm:$0xff]  ;;  %v11838_v56 = vpop.f32.mrb[102].mxu1  ;;  %v5088_v22 = vld [vmem:[%s21702_s2 + $0x308] sm:$0xff] }
 0x268   : > { %22760 = vst [vmem:[#allocation5_spill] sm:$0xff] %v17638_v13  ;;  %12493 = vrsqrt.f32 %v5288_v1  ;;  %v17659_v7 = vpop.permute.xlu1 %7782  ;;  %v22763_v23 = vld [vmem:[#allocation74_spill] sm:$0xff]  ;;  %v4302_v42 = vmul.f32 0.020408163, %v11838_v56  ;;  %v3522_v54 = vpop.f32.mrb[103].mxu1  ;;  %v22765_v13 = vld [vmem:[#allocation64_spill] sm:$0xff] }
 0x269   : > { %22762 = vst [vmem:[#allocation71_spill] sm:$0xff] %v17659_v7  ;;  %12495 = vrsqrt.f32 %v5287_v39  ;;  %v17670_v1 = vmul.f32 0.020408163, %v22763_v23  ;;  %v17676_v25 = vmul.f32 0.020408163, %v22765_v13  ;;  %v22767_v39 = vld [vmem:[#allocation69_spill] sm:$0xff]  ;;  %11978 = vmatmul.mubr.msk.f32.gmra.mrb[196].mxu1 %vm500_vm0, %v2351_v62 }
 0x26a   : > { %v6255_v14 = vsub.f32 %v5859_v46, %v22767_v39  ;;  %v22768_v7 = vld [vmem:[#allocation49_spill] sm:$0xff]  ;;  %v5290_v63 = vadd.f32 1e-05, %v4894_v57  ;;  %v4301_v33 = vmul.f32 0.020408163, %v3522_v54  ;;  %v17682_v23 = vpop.f32.mrb[122].mxu0  ;;  %v4698_v46 = vsub.f32 %v4302_v42, %v4500_v59 }
 0x26b   : > { %6769 = vperm.xlu0 %12295, %v16922_v4   ;;  %22764 = vst [vmem:[#allocation56_spill] sm:$0xff] %v17670_v1  ;;  %7942 = vperm.xlu1 %12296, %v6254_v3   ;;  %v4893_v4 = vmax.f32 %v4695_v8, 0.0  ;;  %22766 = vst [vmem:[#allocation47_spill] sm:$0xff] %v17676_v25  ;;  %v6256_v52 = vsub.f32 %v17644_v48, %v22768_v7  ;;  %v17684_v49 = vpop.permute.xlu0 %7787  ;;  %v22771_v3 = vld [vmem:[#allocation55_spill] sm:$0xff]  ;;  %v22772_v56 = vld [vmem:[#allocation25_spill] sm:$0xff]  ;;  %v17693_v7 = vpop.f32.mrb[123].mxu0  ;;  %v4502_v13 = vmul.f32 %v17670_v1, %v17670_v1 }
 0x26c   : > { %22769 = vst [vmem:[#allocation90_spill] sm:$0xff] %v17682_v23  ;;  %22770 = vst [vmem:[#allocation92_spill] sm:$0xff] %v17684_v49  ;;  %v6257_v8 = vsub.f32 %v17649_v51, %v22771_v3  ;;  %v5087_v48 = vld [vmem:[%s21702_s2 + $0x300] sm:$0xff]  ;;  %v12492_v62 = vpop.eup %12491  ;;  %v17695_v57 = vpop.permute.xlu1 %6614  ;;  %v22775_v54 = vld [vmem:[#allocation96_spill] sm:$0xff]  ;;  %12497 = vrsqrt.f32 %v5290_v63  ;;  %v4697_v59 = vsub.f32 %v4301_v33, %v4499_v2  ;;  %v4896_v3 = vmax.f32 %v4698_v46, 0.0 }
 0x26d   : > { %v5289_v26 = vadd.f32 1e-05, %v4893_v4  ;;  %22773 = vst [vmem:[#allocation72_spill] sm:$0xff] %v17693_v7  ;;  %22774 = vst [vmem:[#allocation79_spill] sm:$0xff] %v17695_v57  ;;  %v17702_v51 = vld [vmem:[%s21703_s3 + $0x288] sm:$0xff]  ;;  %v17704_v4 = vmul.f32 %v12490_v17, %v5088_v22  ;;  %v22777_v42 = vld [vmem:[#allocation104_spill] sm:$0xff]  ;;  %v17719_v2 = vmul.f32 %v12492_v62, %v5087_v48 }
 0x26e   : > { %v17714_v39 = vld [vmem:[%s21703_s3 + $0x290] sm:$0xff]  ;;  %v4895_v57 = vmax.f32 %v4697_v59, 0.0  ;;  %v11841_v63 = vpop.f32.mrb[104].mxu1  ;;  %v22778_v33 = vld [vmem:[#allocation75_spill] sm:$0xff]  ;;  %v12743_v46 = vld [vmem:[%s21700_s0 + $0x100] sm:$0xff] }
 0x26f   : > { %7947 = vperm.xlu0 %12295, %v6255_v14   ;;  %22776 = vst [vmem:[#allocation88_spill] sm:$0xff] %v17704_v4  ;;  %6774 = vperm.xlu1 %12296, %v22777_v42   ;;  %12499 = vrsqrt.f32 %v5289_v26  ;;  %v4501_v14 = vmul.f32 %v17676_v25, %v17676_v25  ;;  %v17717_v17 = vmul.f32 0.020408163, %v22778_v33  ;;  %22780 = vst [vmem:[#allocation40_spill] sm:$0xff] %v17719_v2  ;;  %v5089_v26 = vld [vmem:[%s21702_s2 + $0x310] sm:$0xff]  ;;  %v22782_v42 = vld [vmem:[#allocation46_spill] sm:$0xff]  ;;  %v17732_v49 = vpop.permute.xlu0 %6619 }
 0x270   : > { %v17726_v22 = vmul.f32 %v17704_v4, %v17518_v24  ;;  %v7399_v59 = vmul.f32 %v12743_v46, %v22782_v42  ;;  %v22783_v33 = vld [vmem:[#allocation66_spill] sm:$0xff]  ;;  %v5292_v62 = vadd.f32 1e-05, %v4896_v3  ;;  %v4304_v7 = vmul.f32 0.020408163, %v11841_v63  ;;  %v3532_v23 = vpop.f32.mrb[105].mxu1  ;;  %v17739_v24 = vpop.permute.xlu1 %7792 }
 0x271   : > { %22779 = vst [vmem:[#allocation2_spill] sm:$0xff] %v17717_v17  ;;  %v5090_v1 = vld [vmem:[%s21702_s2 + $0x318] sm:$0xff]  ;;  %22784 = vst [vmem:[#allocation86_spill] sm:$0xff] %v17739_v24  ;;  %v5291_v4 = vadd.f32 1e-05, %v4895_v57  ;;  %v17747_v42 = vmul.f32 %v17719_v2, %v17531_v29  ;;  %v12744_v63 = vld [vmem:[%s21700_s0 + $0x108] sm:$0xff]  ;;  %v4504_v2 = vmul.f32 %v17717_v17, %v17717_v17 }
 0x272   : > { %22781 = vst [vmem:[#allocation85_spill] sm:$0xff] %v17726_v22  ;;  %v22785_v22 = vld [vmem:[#allocation16_spill] sm:$0xff]  ;;  %v4303_v25 = vmul.f32 0.020408163, %v3532_v23  ;;  %v17743_v46 = vmul.f32 0.020408163, %v22786_v45  ;;  %v12494_v3 = vpop.eup %12493  ;;  %12501 = vrsqrt.f32 %v5292_v62  ;;  %v4700_v23 = vsub.f32 %v4304_v7, %v4502_v13 }
 0x273   : > { %6779 = vperm.xlu0 %12295, %v22785_v22   ;;  %22788 = vst [vmem:[#allocation11_spill] sm:$0xff] %v17747_v42  ;;  %v22789_v48 = vld [vmem:[#allocation82_spill] sm:$0xff]  ;;  %7952 = vperm.xlu1 %12296, %v6256_v52   ;;  %v17758_v45 = vld [vmem:[%s21703_s3 + $0x298] sm:$0xff]  ;;  %v17760_v29 = vpop.f32.mrb[124].mxu0  ;;  %v12496_v57 = vpop.eup %12495  ;;  %v12745_v42 = vld [vmem:[%s21700_s0 + $0x110] sm:$0xff]  ;;  %12503 = vrsqrt.f32 %v5291_v4  ;;  %v17771_v22 = vmul.f32 %v12494_v3, %v5090_v1 }
 0x274   : > { %22787 = vst [vmem:[#allocation9_spill] sm:$0xff] %v17743_v46  ;;  %v7400_v11 = vmul.f32 %v12744_v63, %v22789_v48  ;;  %v22790_v24 = vld [vmem:[#allocation18_spill] sm:$0xff]  ;;  %22791 = vst [vmem:[#allocation58_spill] sm:$0xff] %v17760_v29  ;;  %v7401_v48 = vmul.f32 %v12745_v42, %v17245_v30  ;;  %v4699_v63 = vsub.f32 %v4303_v25, %v4501_v14  ;;  %v17773_v62 = vpop.f32.mrb[125].mxu0  ;;  %v17776_v7 = vpop.permute.xlu0 %7797  ;;  %v4898_v29 = vmax.f32 %v4700_v23, 0.0  ;;  %v22796_v3 = vld [vmem:[#allocation17_spill] sm:$0xff] }
 0x275   : > { %v17769_v52 = vld [vmem:[%s21703_s3 + $0x2a0] sm:$0xff]  ;;  %22792 = vst [vmem:[#allocation95_spill] sm:$0xff] %v17771_v22  ;;  %22793 = vst [vmem:[#allocation50_spill] sm:$0xff] %v17773_v62  ;;  %v17780_v30 = vmul.f32 %v12496_v57, %v5089_v26  ;;  %v17782_v42 = vpop.permute.xlu1 %6624  ;;  %v4503_v4 = vmul.f32 %v17743_v46, %v17743_v46  ;;  %v11844_v14 = vpop.f32.mrb[106].mxu1  ;;  %v8587_v26 = vadd.f32 %v17296_v6, %v7399_v59  ;;  %v17809_v6 = vld [vmem:[%s21703_s3 + $0x2a8] sm:$0xff] }
 0x276   : > { %v8588_v13 = vadd.f32 %v17352_v9, %v7400_v11  ;;  %22794 = vst [vmem:[#allocation39_spill] sm:$0xff] %v17776_v7  ;;  %v4897_v1 = vmax.f32 %v4699_v63, 0.0  ;;  %v5092_v9 = vld [vmem:[%s21702_s2 + $0x328] sm:$0xff]  ;;  %v17793_v11 = vmul.f32 %v17771_v22, %v17554_v15  ;;  %v5294_v23 = vadd.f32 1e-05, %v4898_v29  ;;  %v3542_v63 = vpop.f32.mrb[107].mxu1  ;;  %v12498_v62 = vpop.eup %12497 }
 0x277   : > { %7957 = vperm.xlu0 %12295, %v6257_v8   ;;  %6784 = vperm.xlu1 %12296, %v22796_v3   ;;  %v4306_v57 = vmul.f32 0.020408163, %v11844_v14  ;;  %v5091_v25 = vld [vmem:[%s21702_s2 + $0x320] sm:$0xff]  ;;  %v12746_v15 = vld [vmem:[%s21700_s0 + $0x118] sm:$0xff]  ;;  %v4305_v29 = vmul.f32 0.020408163, %v3542_v63  ;;  %v17813_v14 = vmul.f32 %v17780_v30, %v17557_v43  ;;  %v17817_v17 = vmul.f32 %v12498_v62, %v5092_v9 }
 0x278   : > { %22795 = vst [vmem:[#allocation87_spill] sm:$0xff] %v17793_v11  ;;  %v7402_v11 = vmul.f32 %v12746_v15, %v17314_v35  ;;  %v5293_v59 = vadd.f32 1e-05, %v4897_v1  ;;  %v8786_v8 = vmax.f32 %v8588_v13, 0.0  ;;  %v17815_v22 = vpop.permute.xlu0 %6629  ;;  %12505 = vrsqrt.f32 %v5294_v23  ;;  %v22797_v46 = vld [vmem:[#allocation29_spill] sm:$0xff]  ;;  %v17826_v1 = vld [vmem:[%s21703_s3 + $0x2b0] sm:$0xff] }
 0x279   : > { %v12500_v3 = vpop.eup %12499  ;;  %v4702_v7 = vsub.f32 %v4306_v57, %v4504_v2  ;;  %v17820_v15 = vpop.permute.xlu1 %7802  ;;  %v17831_v43 = vld [vmem:[%s21703_s3 + $0x2b8] sm:$0xff]  ;;  %v4701_v2 = vsub.f32 %v4305_v29, %v4503_v4  ;;  %v8785_v13 = vmax.f32 %v8587_v26, 0.0  ;;  %v17847_v4 = vmul.f32 %v17817_v17, %v17586_v12  ;;  %v17859_v26 = vld [vmem:[%s21703_s3 + $0x2c0] sm:$0xff] }
 0x27a   : > { %v8590_v35 = vadd.f32 %v17440_v53, %v7402_v11  ;;  %12507 = vrsqrt.f32 %v5293_v59  ;;  %v17833_v62 = vmul.f32 %v12500_v3, %v5091_v25  ;;  %v22798_v53 = vsub.f32 %v17654_v16, %v22772_v56  ;;  %v17840_v11 = vpop.f32.mrb[108].mxu1  ;;  %v5094_v23 = vld [vmem:[%s21702_s2 + $0x338] sm:$0xff]  ;;  %v17849_v25 = vpop.f32.mrb[126].mxu0  ;;  %v12747_v16 = vld [vmem:[%s21700_s0 + $0x120] sm:$0xff] }
 0x27b   : > { %6789 = vperm.xlu0 %12295, %v22797_v46   ;;  %v4900_v9 = vmax.f32 %v4702_v7, 0.0  ;;  %22799 = vst [vmem:[#allocation93_spill] sm:$0xff] %v17847_v4  ;;  %22800 = vst [vmem:[#allocation99_spill] sm:$0xff] %v17849_v25  ;;  %v7403_v56 = vmul.f32 %v12747_v16, %v17341_v41  ;;  %v8589_v7 = vadd.f32 %v17383_v19, %v7401_v48  ;;  %v4899_v57 = vmax.f32 %v4701_v2, 0.0  ;;  %v17861_v63 = vpop.f32.mrb[109].mxu1  ;;  %v17867_v59 = vpop.f32.mrb[127].mxu0 }
 0x27c   : > { %7962 = vperm.xlu1 %12296, %v22798_v53   ;;  %v17865_v12 = vmul.f32 %v17833_v62, %v17589_v28  ;;  %22802 = vst [vmem:[#allocation57_spill] sm:$0xff] %v17867_v59  ;;  %v12502_v29 = vpop.eup %12501  ;;  %v17869_v3 = vpack.c.bf16 %v8786_v8, %v8785_v13  ;;  %v7808_v41 = vpop.permute.xlu0 %7807  ;;  %v5093_v2 = vld [vmem:[%s21702_s2 + $0x330] sm:$0xff]  ;;  %v12748_v28 = vld [vmem:[%s21700_s0 + $0x128] sm:$0xff]  ;;  %v8788_v13 = vmax.f32 %v8590_v35, 0.0  ;;  %v22803_v19 = vsub.f32 %v17665_v34, %v22775_v54  ;;  %v12749_v25 = vld [vmem:[%s21700_s0 + $0x180] sm:$0xff] }
 0x27d   : > { %v5296_v53 = vadd.f32 1e-05, %v4900_v9  ;;  %v12504_v16 = vpop.eup %12503  ;;  %v17882_v8 = vmul.f32 %v12748_v28, %v17398_v27  ;;  %v17884_v46 = vpop.permute.xlu1 %6634  ;;  %v5295_v9 = vadd.f32 1e-05, %v4899_v57  ;;  %v17889_v48 = vmul.f32 %v12502_v29, %v5094_v23  ;;  %v22816_v4 = vld [vmem:[#allocation36_spill] sm:$0xff] }
 0x27e   : > { %22801 = vst [vmem:[#allocation43_spill] sm:$0xff] %v17865_v12  ;;  %v17892_v59 = vadd.f32 %v17458_v36, %v7403_v56  ;;  %v7415_v27 = vmul.f32 %v12749_v25, %v17732_v49  ;;  %v17902_v34 = vmul.f32 0.020408163, %v17418_v18  ;;  %v17904_v54 = vpop.f32.mrb[128].mxu0  ;;  %v8787_v23 = vmax.f32 %v8589_v7, 0.0  ;;  %v17906_v36 = vpop.f32.mrb[110].mxu1 }
 0x27f   : > { %7967 = vperm.xlu0 %12295, %v22803_v19   ;;  %22804 = vst [vmem:[#allocation53_spill] sm:$0xff] %v17889_v48  ;;  %12509 = vrsqrt.f32 %v5295_v9  ;;  %v17909_v56 = vmul.f32 0.020408163, %v17438_v40  ;;  %v17911_v57 = vmul.f32 %v12504_v16, %v5093_v2  ;;  %v17913_v49 = vpop.f32.mrb[129].mxu0  ;;  %v17921_v7 = vpop.f32.mrb[111].mxu1  ;;  %v17925_v40 = vmul.f32 %v17889_v48, %v17621_v0  ;;  %v12751_v2 = vld [vmem:[%s21700_s0 + $0x130] sm:$0xff] }
 0x280   : > { %6794 = vperm.xlu1 %12296, %v17188_v10   ;;  %v12750_v10 = vld [vmem:[%s21700_s0 + $0x188] sm:$0xff]  ;;  %v8603_v25 = vadd.f32 %v7808_v41, %v7415_v27  ;;  %v17919_v29 = vpop.permute.xlu0 %6639  ;;  %12511 = vrsqrt.f32 %v5296_v53  ;;  %v17927_v19 = vpack.c.bf16 %v8788_v13, %v8787_v23  ;;  %v17933_v16 = vmul.f32 %v12751_v2, %v17420_v47  ;;  %v5095_v23 = vld [vmem:[%s21702_s2 + $0x340] sm:$0xff]  ;;  %v11853_v2 = vpop.f32.mrb[112].mxu1 }
 0x281   : > { %22805 = vst [vmem:[#allocation67_spill] sm:$0xff] %v17911_v57  ;;  %v7416_v18 = vmul.f32 %v12750_v10, %v17782_v42  ;;  %22806 = vst [vmem:[#allocation91_spill] sm:$0xff] %v17925_v40  ;;  %v12752_v42 = vld [vmem:[%s21700_s0 + $0x138] sm:$0xff]  ;;  %v7813_v53 = vpop.permute.xlu1 %7812  ;;  %v5096_v0 = vld [vmem:[%s21702_s2 + $0x348] sm:$0xff]  ;;  %v17947_v28 = vmul.f32 %v17911_v57, %v17629_v31  ;;  %v22808_v27 = vsub.f32 %v17702_v51, %v22783_v33  ;;  %v17961_v31 = vpop.f32.mrb[130].mxu0 }
 0x282   : > { %v17939_v41 = vmul.f32 %v12752_v42, %v17474_v32  ;;  %v12506_v47 = vpop.eup %12505  ;;  %v4510_v32 = vmul.f32 %v17902_v34, %v17902_v34  ;;  %22809 = vst [vmem:[#allocation97_spill] sm:$0xff] %v17961_v31  ;;  %v4509_v33 = vmul.f32 %v17909_v56, %v17909_v56  ;;  %v17975_v42 = vmul.f32 0.020408163, %v17513_v21  ;;  %v3572_v40 = vpop.f32.mrb[113].mxu1  ;;  %v22825_v57 = vld [vmem:[#allocation76_spill] sm:$0xff] }
 0x283   : > { %6799 = vperm.xlu0 %12295, %v17237_v44   ;;  %22807 = vst [vmem:[#allocation48_spill] sm:$0xff] %v17947_v28  ;;  %v8604_v9 = vadd.f32 %v7813_v53, %v7416_v18  ;;  %v17956_v44 = vmul.f32 0.020408163, %v17456_v38  ;;  %v12753_v18 = vld [vmem:[%s21700_s0 + $0x140] sm:$0xff]  ;;  %v17972_v38 = vmul.f32 0.020408163, %v17472_v50  ;;  %v17979_v28 = vmul.f32 %v12506_v47, %v5096_v0 }
 0x284   : > { %7972 = vperm.xlu1 %12296, %v22808_v27   ;;  %v12508_v10 = vpop.eup %12507  ;;  %v17967_v51 = vmul.f32 %v12753_v18, %v17489_v61  ;;  %v17977_v53 = vpop.f32.mrb[131].mxu0  ;;  %v8801_v27 = vmax.f32 %v8603_v25, 0.0  ;;  %v4312_v31 = vmul.f32 0.020408163, %v11853_v2  ;;  %v12754_v61 = vld [vmem:[%s21700_s0 + $0x190] sm:$0xff]  ;;  %v22812_v21 = vsub.f32 %v17714_v39, %v22790_v24  ;;  %v22815_v0 = vld [vmem:[#allocation89_spill] sm:$0xff] }
 0x285   : > { %22810 = vst [vmem:[#allocation38_spill] sm:$0xff] %v17977_v53  ;;  %v8802_v35 = vmax.f32 %v8604_v9, 0.0  ;;  %v7818_v13 = vpop.permute.xlu0 %7817  ;;  %22811 = vst [vmem:[#allocation4_spill] sm:$0xff] %v17979_v28  ;;  %v7417_v18 = vmul.f32 %v12754_v61, %v17815_v22  ;;  %v17985_v50 = vpop.permute.xlu1 %6644  ;;  %v4311_v25 = vmul.f32 0.020408163, %v3572_v40  ;;  %v22813_v9 = vld [vmem:[#allocation35_spill] sm:$0xff]  ;;  %v17993_v2 = vmul.f32 %v12508_v10, %v5095_v23 }
 0x286   : > { %v17991_v53 = vmul.f32 0.020408163, %v22813_v9  ;;  %v17997_v47 = vadd.f32 %v22815_v0, %v17882_v8  ;;  %v4708_v61 = vsub.f32 %v4312_v31, %v4510_v32  ;;  %v4512_v48 = vmul.f32 %v17956_v44, %v17956_v44  ;;  %v11856_v40 = vpop.f32.mrb[114].mxu1  ;;  %v22819_v10 = vld [vmem:[#allocation56_spill] sm:$0xff] }
 0x287   : > { %7977 = vperm.xlu0 %12295, %v22812_v21   ;;  %22814 = vst [vmem:[#allocation98_spill] sm:$0xff] %v17993_v2  ;;  %v12091_v22 = vpack.c.bf16 %v8802_v35, %v8801_v27  ;;  %v8605_v12 = vadd.f32 %v7818_v13, %v7417_v18  ;;  %v4707_v39 = vsub.f32 %v4311_v25, %v4509_v33  ;;  %v22817_v21 = vld [vmem:[#allocation47_spill] sm:$0xff]  ;;  %v4314_v32 = vmul.f32 0.020408163, %v11856_v40  ;;  %v3582_v31 = vpop.f32.mrb[115].mxu1  ;;  %v22821_v25 = vld [vmem:[#allocation24_spill] sm:$0xff] }
 0x288   : > { %6804 = vperm.xlu1 %12296, %v22816_v4   ;;  %v4511_v24 = vmul.f32 %v17972_v38, %v17972_v38  ;;  %v18006_v23 = vmul.f32 %v17993_v2, %v22817_v21  ;;  %v12755_v4 = vld [vmem:[%s21700_s0 + $0x198] sm:$0xff]  ;;  %v4906_v13 = vmax.f32 %v4708_v61, 0.0  ;;  %v18020_v33 = vmul.f32 %v17979_v28, %v22819_v10  ;;  %v5097_v61 = vld [vmem:[%s21702_s2 + $0x350] sm:$0xff]  ;;  %v18033_v40 = vpop.f32.mrb[132].mxu0 }
 0x289   : > { %v7418_v8 = vmul.f32 %v12755_v4, %v17884_v46  ;;  %12092 = vmatprep.subr.bf16.mxu1 %v12091_v22  ;;  %v18016_v35 = vpop.permute.xlu0 %6649  ;;  %v12510_v27 = vpop.eup %12509  ;;  %v4905_v9 = vmax.f32 %v4707_v39, 0.0  ;;  %v4313_v0 = vmul.f32 0.020408163, %v3582_v31  ;;  %v4514_v46 = vmul.f32 %v17975_v42, %v17975_v42  ;;  %22822 = vst [vmem:[#allocation23_spill] sm:$0xff] %v18033_v40  ;;  %v22824_v10 = vld [vmem:[#allocation73_spill] sm:$0xff] }
 0x28a   : > { %22818 = vst [vmem:[#allocation61_spill] sm:$0xff] %v18006_v23  ;;  %22820 = vst [vmem:[#allocation44_spill] sm:$0xff] %v18020_v33  ;;  %12094 = vmatpush3.bf16.msra.mxu1 %v17869_v3  ;;  %v7823_v18 = vpop.permute.xlu1 %7822  ;;  %v18028_v22 = vmul.f32 %v17991_v53, %v17991_v53  ;;  %v12512_v3 = vpop.eup %12511  ;;  %v22823_v39 = vsub.f32 %v17758_v45, %v17252_v37  ;;  %v5302_v4 = vadd.f32 1e-05, %v4906_v13  ;;  %v5098_v33 = vld [vmem:[%s21702_s2 + $0x358] sm:$0xff]  ;;  %v8803_v28 = vmax.f32 %v8605_v12, 0.0 }
 0x28b   : > { %6809 = vperm.xlu0 %12295, %v22821_v25   ;;  %v8606_v21 = vadd.f32 %v7823_v18, %v7418_v8  ;;  %v4710_v31 = vsub.f32 %v4314_v32, %v4512_v48  ;;  %v18040_v25 = vmul.f32 0.020408163, %v22824_v10  ;;  %v18045_v23 = vpop.f32.mrb[133].mxu0  ;;  %v5301_v40 = vadd.f32 1e-05, %v4905_v9  ;;  %v11859_v13 = vpop.f32.mrb[116].mxu1 }
 0x28c   : > { %7982 = vperm.xlu1 %12296, %v22823_v39   ;;  %v4709_v2 = vsub.f32 %v4313_v0, %v4511_v24  ;;  %v18048_v8 = vmul.f32 0.020408163, %v22825_v57  ;;  %12513 = vrsqrt.f32 %v5302_v4  ;;  %v18053_v32 = vmul.f32 %v12510_v27, %v5097_v61  ;;  %v3592_v9 = vpop.f32.mrb[117].mxu1  ;;  %v12756_v27 = vld [vmem:[%s21700_s0 + $0x1a0] sm:$0xff]  ;;  %v22827_v39 = vld [vmem:[#allocation83_spill] sm:$0xff] }
 0x28d   : > { %v8804_v37 = vmax.f32 %v8606_v21, 0.0  ;;  %v7828_v45 = vpop.permute.xlu0 %7827  ;;  %v4908_v48 = vmax.f32 %v4710_v31, 0.0  ;;  %v22826_v12 = vsub.f32 %v17769_v52, %v17290_v60  ;;  %12515 = vrsqrt.f32 %v5301_v40  ;;  %v18069_v52 = vpop.f32.mrb[134].mxu0 }
 0x28e   : > { %v18055_v18 = vpop.permute.xlu1 %6654  ;;  %v4907_v24 = vmax.f32 %v4709_v2, 0.0  ;;  %v4316_v57 = vmul.f32 0.020408163, %v11859_v13  ;;  %v18060_v0 = vmul.f32 %v12512_v3, %v5098_v33  ;;  %v8790_v21 = vmax.f32 %v17997_v47, 0.0  ;;  %22828 = vst [vmem:[#allocation78_spill] sm:$0xff] %v18069_v52  ;;  %v8952_v13 = vld [vmem:[%s18076_s16 + $0x8] sm:$0xff] }
 0x28f   : > { %7987 = vperm.xlu0 %12295, %v22826_v12   ;;  %v7419_v61 = vmul.f32 %v12756_v27, %v17919_v29  ;;  %v12095_v4 = vpack.c.bf16 %v8804_v37, %v8803_v28  ;;  %v4315_v60 = vmul.f32 0.020408163, %v3592_v9  ;;  %v5304_v2 = vadd.f32 1e-05, %v4908_v48  ;;  %v18078_v29 = vpop.f32.mrb[135].mxu0  ;;  %v12757_v28 = vld [vmem:[%s21700_s0 + $0x1a8] sm:$0xff]  ;;  %9112 = vmatprep.mubr.f32.mxu0 %v8952_v13 }
 0x290   : > { %6814 = vperm.xlu1 %12296, %v22827_v39   ;;  %v5303_v40 = vadd.f32 1e-05, %v4907_v24  ;;  %v4712_v31 = vsub.f32 %v4316_v57, %v4514_v46  ;;  %v4516_v33 = vmul.f32 %v18040_v25, %v18040_v25  ;;  %22829 = vst [vmem:[#allocation62_spill] sm:$0xff] %v18078_v29  ;;  %v7420_v47 = vmul.f32 %v12757_v28, %v17985_v50  ;;  %v22830_v37 = vld [vmem:[#allocation9_spill] sm:$0xff]  ;;  %v8951_v12 = vld [vmem:[%s18076_s16] sm:$0xff]  ;;  %v22831_v57 = vld [vmem:[#allocation51_spill] sm:$0xff] }
 0x291   : > { %v8607_v3 = vadd.f32 %v7828_v45, %v7419_v61  ;;  %12096 = vmatprep.subr.bf16.mxu1 %v12095_v4  ;;  %v18084_v46 = vpop.permute.xlu0 %6659  ;;  %v4711_v10 = vsub.f32 %v4315_v60, %v18028_v22  ;;  %v18089_v48 = vmul.f32 %v18053_v32, %v22830_v37  ;;  %v4515_v50 = vmul.f32 %v18048_v8, %v18048_v8  ;;  %v11862_v45 = vpop.f32.mrb[118].mxu1  ;;  %v22832_v27 = vld [vmem:[#allocation2_spill] sm:$0xff]  ;;  %v22833_v61 = vld [vmem:[#allocation21_spill] sm:$0xff] }
 0x292   : > { %12098 = vmatpush3.bf16.msra.mxu1 %v17927_v19  ;;  %v7833_v24 = vpop.permute.xlu1 %7832  ;;  %12517 = vrsqrt.f32 %v5303_v40  ;;  %v4910_v9 = vmax.f32 %v4712_v31, 0.0  ;;  %v18099_v22 = vmul.f32 %v18060_v0, %v22832_v27  ;;  %v18103_v39 = vadd.f32 %v22833_v61, %v17933_v16  ;;  %v3602_v31 = vpop.f32.mrb[119].mxu1  ;;  %9113 = vmatmul.mubr.f32.vlgmr.msra.gmra.mrb[198].mxu0 %v8951_v12  ;;  %v22838_v13 = vld [vmem:[#allocation34_spill] sm:$0xff] }
 0x293   : > { %6819 = vperm.xlu0 %12295, %v22831_v57   ;;  %v8608_v4 = vadd.f32 %v7833_v24, %v7420_v47  ;;  %v22834_v19 = vsub.f32 %v17809_v6, %v17303_v5  ;;  %v4909_v60 = vmax.f32 %v4711_v10, 0.0  ;;  %v4318_v40 = vmul.f32 0.020408163, %v11862_v45  ;;  %v18110_v29 = vpop.f32.mrb[136].mxu0  ;;  %v5104_v5 = vld [vmem:[%s21702_s2 + $0x388] sm:$0xff] }
 0x294   : > { %v22835_v28 = vmax.f32 %v17892_v59, 0.0  ;;  %12519 = vrsqrt.f32 %v5304_v2  ;;  %v5306_v57 = vadd.f32 1e-05, %v4910_v9  ;;  %v4317_v27 = vmul.f32 0.020408163, %v3602_v31  ;;  %v18115_v6 = vpop.f32.mrb[137].mxu0 }
 0x295   : > { %7992 = vperm.xlu1 %12296, %v22834_v19   ;;  %v8805_v16 = vmax.f32 %v8607_v3, 0.0  ;;  %v8806_v61 = vmax.f32 %v8608_v4, 0.0  ;;  %v7838_v47 = vpop.permute.xlu0 %7837  ;;  %v5305_v24 = vadd.f32 1e-05, %v4909_v60  ;;  %v4714_v52 = vsub.f32 %v4318_v40, %v4516_v33  ;;  %v12758_v59 = vld [vmem:[%s21700_s0 + $0x148] sm:$0xff]  ;;  %v22839_v9 = vld [vmem:[#allocation77_spill] sm:$0xff] }
 0x296   : > { %v12101_v37 = vpack.c.bf16 %v8790_v21, %v22835_v28  ;;  %v22836_v21 = vld [vmem:[#allocation10_spill] sm:$0xff]  ;;  %v18123_v10 = vpop.permute.xlu1 %6664  ;;  %v22837_v3 = vsub.f32 %v17826_v1, %v17337_v55  ;;  %v4713_v33 = vsub.f32 %v4317_v27, %v4515_v50  ;;  %v18129_v12 = vmul.f32 0.020408163, %v22838_v13  ;;  %v12514_v19 = vpop.eup %12513  ;;  %v12759_v60 = vld [vmem:[%s21700_s0 + $0x1b0] sm:$0xff]  ;;  %v12760_v13 = vld [vmem:[%s21700_s0 + $0x1b8] sm:$0xff] }
 0x297   : > { %v18121_v2 = vmul.f32 %v12758_v59, %v22836_v21  ;;  %v18132_v45 = vmul.f32 0.020408163, %v22839_v9  ;;  %v5103_v4 = vld [vmem:[%s21702_s2 + $0x380] sm:$0xff]  ;;  %v7421_v40 = vmul.f32 %v12759_v60, %v18016_v35  ;;  %v12099_v1 = vpack.c.bf16 %v8806_v61, %v8805_v16  ;;  %v12516_v31 = vpop.eup %12515 }
 0x298   : > { %7997 = vperm.xlu0 %12295, %v22837_v3   ;;  %v22840_v55 = vld [vmem:[#allocation26_spill] sm:$0xff]  ;;  %12521 = vrsqrt.f32 %v5305_v24  ;;  %v4912_v50 = vmax.f32 %v4714_v52, 0.0  ;;  %v4911_v59 = vmax.f32 %v4713_v33, 0.0  ;;  %v18144_v21 = vmul.f32 %v12514_v19, %v5104_v5  ;;  %v18146_v3 = vpop.f32.mrb[138].mxu0  ;;  %v5105_v33 = vld [vmem:[%s21702_s2 + $0x390] sm:$0xff] }
 0x299   : > { %6824 = vperm.xlu1 %12296, %v22840_v55   ;;  %v22841_v28 = vld [vmem:[#allocation106_spill] sm:$0xff]  ;;  %12523 = vrsqrt.f32 %v5306_v57  ;;  %22843 = vst [vmem:[#allocation59_spill] sm:$0xff] %v18146_v3  ;;  %v7422_v35 = vmul.f32 %v12760_v13, %v18055_v18  ;;  %v8609_v9 = vadd.f32 %v7838_v47, %v7421_v40  ;;  %12100 = vmatprep.subr.bf16.mxu1 %v12099_v1  ;;  %v18152_v16 = vpop.permute.xlu0 %6669  ;;  %v22845_v57 = vld [vmem:[#allocation20_spill] sm:$0xff]  ;;  %v11865_v40 = vpop.f32.mrb[120].mxu1 }
 0x29a   : > { %v8594_v27 = vadd.f32 %v22841_v28, %v17939_v41  ;;  %22842 = vst [vmem:[#allocation65_spill] sm:$0xff] %v18144_v21  ;;  %v5308_v52 = vadd.f32 1e-05, %v4912_v50  ;;  %v18154_v61 = vmul.f32 %v12516_v31, %v5103_v4  ;;  %12102 = vmatpush3.bf16.msra.mxu1 %v12101_v37  ;;  %v7843_v41 = vpop.permute.xlu1 %7842  ;;  %v18159_v24 = vmul.f32 %v18129_v12, %v18129_v12  ;;  %v22846_v18 = vld [vmem:[#allocation90_spill] sm:$0xff]  ;;  %v18175_v4 = vpop.f32.mrb[139].mxu0  ;;  %v22849_v55 = vld [vmem:[#allocation72_spill] sm:$0xff] }
 0x29b   : > { %v18163_v5 = vmul.f32 %v18132_v45, %v18132_v45  ;;  %v18166_v47 = vmul.f32 0.020408163, %v22846_v18  ;;  %v18173_v37 = vmul.f32 %v18144_v21, %v17902_v34  ;;  %22847 = vst [vmem:[#allocation3_spill] sm:$0xff] %v18175_v4  ;;  %v8610_v19 = vadd.f32 %v7843_v41, %v7422_v35  ;;  %v12761_v34 = vld [vmem:[%s21700_s0 + $0x1c0] sm:$0xff] }
 0x29c   : > { %22844 = vst [vmem:[#allocation28_spill] sm:$0xff] %v18154_v61  ;;  %6829 = vperm.xlu0 %12295, %v22845_v57   ;;  %v22848_v60 = vsub.f32 %v17831_v43, %v17359_v20  ;;  %12525 = vrsqrt.f32 %v5308_v52  ;;  %v18181_v1 = vmul.f32 0.020408163, %v22849_v55  ;;  %v18185_v50 = vmul.f32 %v18154_v61, %v17909_v56  ;;  %v12518_v31 = vpop.eup %12517  ;;  %v3612_v43 = vpop.f32.mrb[121].mxu1  ;;  %v22852_v21 = vld [vmem:[#allocation6_spill] sm:$0xff] }
 0x29d   : > { %v8792_v28 = vmax.f32 %v8594_v27, 0.0  ;;  %v7423_v13 = vmul.f32 %v12761_v34, %v18084_v46  ;;  %v5307_v35 = vadd.f32 1e-05, %v4911_v59  ;;  %v4320_v20 = vmul.f32 0.020408163, %v11865_v40  ;;  %v7848_v57 = vpop.permute.xlu0 %7847  ;;  %v18193_v55 = vpop.f32.mrb[140].mxu0 }
 0x29e   : > { %8002 = vperm.xlu1 %12296, %v22848_v60   ;;  %v8807_v52 = vmax.f32 %v8609_v9, 0.0  ;;  %v8808_v41 = vmax.f32 %v8610_v19, 0.0  ;;  %v4319_v18 = vmul.f32 0.020408163, %v3612_v43  ;;  %v18191_v60 = vmul.f32 %v12518_v31, %v5105_v33  ;;  %22851 = vst [vmem:[#allocation12_spill] sm:$0xff] %v18193_v55  ;;  %v12520_v56 = vpop.eup %12519  ;;  %v18200_v3 = vpop.permute.xlu1 %6674  ;;  %v5872_v59 = vld [vmem:[%s21703_s3 + $0x2c8] sm:$0xff] }
 0x29f   : > { %v8791_v27 = vmax.f32 %v18103_v39, 0.0  ;;  %v18198_v4 = vadd.f32 %v22852_v21, %v17967_v51  ;;  %v22853_v46 = vsub.f32 %v17859_v26, %v17392_v58  ;;  %v4716_v9 = vsub.f32 %v4320_v20, %v18159_v24  ;;  %v5106_v39 = vld [vmem:[%s21702_s2 + $0x398] sm:$0xff]  ;;  %v18212_v33 = vpop.f32.mrb[141].mxu0  ;;  %v22855_v51 = vld [vmem:[#allocation8_spill] sm:$0xff] }
 0x2a0   : > { %22850 = vst [vmem:[#allocation19_spill] sm:$0xff] %v18191_v60  ;;  %22854 = vst [vmem:[#allocation100_spill] sm:$0xff] %v18212_v33  ;;  %v8596_v21 = vadd.f32 %v22855_v51, %v18121_v2  ;;  %v8611_v19 = vadd.f32 %v7848_v57, %v7423_v13  ;;  %v22856_v40 = vld [vmem:[#allocation105_spill] sm:$0xff]  ;;  %v12103_v58 = vpack.c.bf16 %v8808_v41, %v8807_v52  ;;  %v5873_v26 = vld [vmem:[%s21703_s3 + $0x2d0] sm:$0xff]  ;;  %12527 = vrsqrt.f32 %v5307_v35  ;;  %v11868_v41 = vpop.f32.mrb[122].mxu1 }
 0x2a1   : > { %8007 = vperm.xlu0 %12295, %v22853_v46   ;;  %v4715_v31 = vsub.f32 %v4319_v18, %v18163_v5  ;;  %v12105_v24 = vpack.c.bf16 %v8792_v28, %v8791_v27  ;;  %v18223_v34 = vmul.f32 %v18166_v47, %v18166_v47  ;;  %v18227_v20 = vmul.f32 %v18191_v60, %v17972_v38  ;;  %v12762_v13 = vld [vmem:[%s21700_s0 + $0x1c8] sm:$0xff]  ;;  %v18233_v52 = vpop.permute.xlu0 %6679  ;;  %v22857_v5 = vld [vmem:[#allocation33_spill] sm:$0xff]  ;;  %v5107_v38 = vld [vmem:[%s21702_s2 + $0x3a0] sm:$0xff] }
 0x2a2   : > { %6834 = vperm.xlu1 %12296, %v22856_v40   ;;  %v12522_v2 = vpop.eup %12521  ;;  %v7424_v43 = vmul.f32 %v12762_v13, %v18123_v10  ;;  %12104 = vmatprep.subr.bf16.mxu1 %v12103_v58  ;;  %v6268_v28 = vsub.f32 %v5872_v59, %v22857_v5  ;;  %v18238_v35 = vmul.f32 %v18181_v1, %v18181_v1  ;;  %v8793_v27 = vmax.f32 %v18198_v4, 0.0  ;;  %v7853_v10 = vpop.permute.xlu1 %7852  ;;  %v22859_v46 = vld [vmem:[#allocation30_spill] sm:$0xff]  ;;  %v22860_v51 = vld [vmem:[#allocation32_spill] sm:$0xff]  ;;  %v5874_v40 = vld [vmem:[%s21703_s3 + $0x2d8] sm:$0xff] }
 0x2a3   : > { %v18240_v57 = vmul.f32 %v12520_v56, %v5106_v39  ;;  %v12524_v18 = vpop.eup %12523  ;;  %12106 = vmatpush3.bf16.msra.mxu1 %v12105_v24  ;;  %v6269_v59 = vsub.f32 %v5873_v26, %v22860_v51  ;;  %v18251_v58 = vmul.f32 0.020408163, %v11868_v41  ;;  %v3622_v56 = vpop.f32.mrb[123].mxu1  ;;  %v5108_v39 = vld [vmem:[%s21702_s2 + $0x3a8] sm:$0xff]  ;;  %v8794_v13 = vmax.f32 %v8596_v21, 0.0  ;;  %v5110_v26 = vld [vmem:[%s21702_s2 + $0x3b8] sm:$0xff] }
 0x2a4   : > { %v8809_v5 = vmax.f32 %v8611_v19, 0.0  ;;  %v8612_v4 = vadd.f32 %v7853_v10, %v7424_v43  ;;  %v18256_v24 = vmul.f32 0.020408163, %v3622_v56  ;;  %v4914_v51 = vmax.f32 %v4716_v9, 0.0  ;;  %v12763_v9 = vld [vmem:[%s21700_s0 + $0x158] sm:$0xff] }
 0x2a5   : > { %22858 = vst [vmem:[#allocation15_spill] sm:$0xff] %v18240_v57  ;;  %6839 = vperm.xlu0 %12295, %v22859_v46   ;;  %v18261_v46 = vpop.f32.mrb[142].mxu0  ;;  %v4913_v41 = vmax.f32 %v4715_v31, 0.0  ;;  %v18265_v55 = vmul.f32 %v12522_v2, %v5107_v38  ;;  %v7858_v43 = vpop.permute.xlu0 %7857  ;;  %v18271_v10 = vmul.f32 %v12524_v18, %v5108_v39  ;;  %v18275_v56 = vmul.f32 %v18240_v57, %v17956_v44  ;;  %v22865_v31 = vld [vmem:[#allocation42_spill] sm:$0xff]  ;;  %v12764_v44 = vld [vmem:[%s21700_s0 + $0x150] sm:$0xff]  ;;  %v12766_v57 = vld [vmem:[%s21700_s0 + $0x1d8] sm:$0xff] }
 0x2a6   : > { %8012 = vperm.xlu1 %12296, %v6268_v28   ;;  %22861 = vst [vmem:[#allocation52_spill] sm:$0xff] %v18261_v46  ;;  %v18267_v60 = vpop.f32.mrb[143].mxu0  ;;  %v12526_v21 = vpop.eup %12525  ;;  %v8810_v19 = vmax.f32 %v8612_v4, 0.0  ;;  %v7410_v2 = vmul.f32 %v12763_v9, %v22865_v31  ;;  %v22866_v4 = vld [vmem:[#allocation37_spill] sm:$0xff]  ;;  %v22868_v18 = vld [vmem:[#allocation14_spill] sm:$0xff]  ;;  %v12109_v46 = vpack.c.bf16 %v8794_v13, %v8793_v27  ;;  %v12765_v9 = vld [vmem:[%s21700_s0 + $0x1d0] sm:$0xff] }
 0x2a7   : > { %22862 = vst [vmem:[#allocation60_spill] sm:$0xff] %v18265_v55  ;;  %22863 = vst [vmem:[#allocation103_spill] sm:$0xff] %v18267_v60  ;;  %v18281_v38 = vpop.permute.xlu1 %6684  ;;  %v6270_v33 = vsub.f32 %v5874_v40, %v22866_v4  ;;  %v18284_v60 = vmul.f32 %v12526_v21, %v5110_v26  ;;  %v18286_v28 = vpop.f32.mrb[144].mxu0  ;;  %v7409_v39 = vmul.f32 %v12764_v44, %v22868_v18  ;;  %v22870_v21 = vld [vmem:[#allocation71_spill] sm:$0xff]  ;;  %v5309_v27 = vadd.f32 1e-05, %v4913_v41 }
 0x2a8   : > { %22864 = vst [vmem:[#allocation101_spill] sm:$0xff] %v18271_v10  ;;  %v7425_v31 = vmul.f32 %v12765_v9, %v18152_v16  ;;  %v12107_v40 = vpack.c.bf16 %v8810_v19, %v8809_v5  ;;  %v18297_v26 = vpop.f32.mrb[145].mxu0  ;;  %v8598_v4 = vadd.f32 %v22870_v21, %v7410_v2  ;;  %v7426_v44 = vmul.f32 %v12766_v57, %v18200_v3  ;;  %v18304_v13 = vpop.f32.mrb[124].mxu1  ;;  %v5875_v19 = vld [vmem:[%s21703_s3 + $0x2e0] sm:$0xff] }
 0x2a9   : > { %8017 = vperm.xlu0 %12295, %v6269_v59   ;;  %22867 = vst [vmem:[#allocation68_spill] sm:$0xff] %v18284_v60  ;;  %v22869_v59 = vld [vmem:[#allocation13_spill] sm:$0xff]  ;;  %v18308_v18 = vmul.f32 %v18265_v55, %v17991_v53  ;;  %v18310_v5 = vpop.permute.xlu0 %6689  ;;  %v5310_v2 = vadd.f32 1e-05, %v4914_v51  ;;  %v18315_v9 = vpop.f32.mrb[125].mxu1  ;;  %v18319_v3 = vmul.f32 %v18271_v10, %v17975_v42  ;;  %v18323_v57 = vmul.f32 %v18284_v60, %v18040_v25  ;;  %v22872_v41 = vld [vmem:[#allocation94_spill] sm:$0xff] }
 0x2aa   : > { %6844 = vperm.xlu1 %12296, %v22869_v59   ;;  %v8613_v16 = vadd.f32 %v7858_v43, %v7425_v31  ;;  %12108 = vmatprep.subr.bf16.mxu1 %v12107_v40  ;;  %v12528_v53 = vpop.eup %12527  ;;  %v8597_v43 = vadd.f32 %v22872_v41, %v7409_v39  ;;  %v22873_v59 = vld [vmem:[#allocation41_spill] sm:$0xff]  ;;  %v5109_v51 = vld [vmem:[%s21702_s2 + $0x3b0] sm:$0xff]  ;;  %v18330_v40 = vpop.f32.mrb[146].mxu0  ;;  %v12767_v25 = vld [vmem:[%s21700_s0 + $0x168] sm:$0xff]  ;;  %12529 = vrsqrt.f32 %v5309_v27 }
 0x2ab   : > { %22871 = vst [vmem:[#allocation74_spill] sm:$0xff] %v18323_v57  ;;  %12110 = vmatpush3.bf16.msra.mxu1 %v12109_v46  ;;  %v7863_v31 = vpop.permute.xlu1 %7862  ;;  %22874 = vst [vmem:[#allocation64_spill] sm:$0xff] %v18330_v40  ;;  %v18332_v42 = vpop.f32.mrb[147].mxu0  ;;  %v22876_v60 = vld [vmem:[#allocation45_spill] sm:$0xff]  ;;  %v8796_v46 = vmax.f32 %v8598_v4, 0.0  ;;  %v22877_v41 = vld [vmem:[#allocation27_spill] sm:$0xff]  ;;  %12531 = vrsqrt.f32 %v5310_v2  ;;  %v18339_v61 = vmul.f32 %v12528_v53, %v5109_v51 }
 0x2ac   : > { %v8614_v21 = vadd.f32 %v7863_v31, %v7426_v44  ;;  %22875 = vst [vmem:[#allocation69_spill] sm:$0xff] %v18332_v42  ;;  %v7412_v39 = vmul.f32 %v12767_v25, %v22876_v60  ;;  %v6271_v10 = vsub.f32 %v5875_v19, %v22877_v41  ;;  %v8795_v44 = vmax.f32 %v8597_v43, 0.0  ;;  %v5876_v31 = vld [vmem:[%s21703_s3 + $0x2e8] sm:$0xff]  ;;  %v22879_v4 = vld [vmem:[#allocation86_spill] sm:$0xff]  ;;  %v18362_v51 = vpop.f32.mrb[148].mxu0 }
 0x2ad   : > { %6849 = vperm.xlu0 %12295, %v22873_v59   ;;  %v8811_v59 = vmax.f32 %v8613_v16, 0.0  ;;  %v7868_v57 = vpop.permute.xlu0 %7867  ;;  %22878 = vst [vmem:[#allocation49_spill] sm:$0xff] %v18339_v61  ;;  %v18347_v60 = vmul.f32 0.020408163, %v17904_v54  ;;  %v12768_v27 = vld [vmem:[%s21700_s0 + $0x1e0] sm:$0xff]  ;;  %22881 = vst [vmem:[#allocation55_spill] sm:$0xff] %v18362_v51 }
 0x2ae   : > { %8022 = vperm.xlu1 %12296, %v6270_v33   ;;  %v8812_v55 = vmax.f32 %v8614_v21, 0.0  ;;  %v18350_v19 = vadd.f32 %v22879_v4, %v7412_v39  ;;  %v7427_v16 = vmul.f32 %v12768_v27, %v18233_v52  ;;  %v22880_v2 = vld [vmem:[#allocation70_spill] sm:$0xff]  ;;  %v18360_v43 = vmul.f32 0.020408163, %v17913_v49  ;;  %v22882_v21 = vld [vmem:[#allocation31_spill] sm:$0xff] }
 0x2af   : > { %v18341_v33 = vpop.permute.xlu1 %6694  ;;  %v12769_v54 = vld [vmem:[%s21700_s0 + $0x160] sm:$0xff]  ;;  %v12113_v39 = vpack.c.bf16 %v8796_v46, %v8795_v44  ;;  %v22883_v52 = vsub.f32 %v18256_v24, %v18238_v35  ;;  %v12770_v49 = vld [vmem:[%s21700_s0 + $0x1e8] sm:$0xff]  ;;  %v5877_v46 = vld [vmem:[%s21703_s3 + $0x2f0] sm:$0xff]  ;;  %v18385_v35 = vmul.f32 %v18339_v61, %v18048_v8  ;;  %v18387_v24 = vpop.f32.mrb[149].mxu0 }
 0x2b0   : > { %v12111_v53 = vpack.c.bf16 %v8812_v55, %v8811_v59  ;;  %v7411_v25 = vmul.f32 %v12769_v54, %v22882_v21  ;;  %v7428_v55 = vmul.f32 %v12770_v49, %v18281_v38  ;;  %v8615_v59 = vadd.f32 %v7868_v57, %v7427_v16  ;;  %22887 = vst [vmem:[#allocation104_spill] sm:$0xff] %v18387_v24  ;;  %v22888_v44 = vld [vmem:[#allocation92_spill] sm:$0xff]  ;;  %v5878_v8 = vld [vmem:[%s21703_s3 + $0x2f8] sm:$0xff] }
 0x2b1   : > { %8027 = vperm.xlu0 %12295, %v6271_v10   ;;  %v18357_v10 = vpop.f32.mrb[126].mxu1  ;;  %v4915_v41 = vmax.f32 %v22883_v52, 0.0  ;;  %v18377_v27 = vpop.permute.xlu0 %6699  ;;  %22886 = vst [vmem:[#allocation96_spill] sm:$0xff] %v18385_v35  ;;  %v22889_v57 = vld [vmem:[#allocation40_spill] sm:$0xff]  ;;  %v18393_v16 = vmul.f32 %v18347_v60, %v18347_v60  ;;  %v18401_v21 = vmul.f32 %v18360_v43, %v18360_v43  ;;  %v22898_v35 = vld [vmem:[#allocation5_spill] sm:$0xff] }
 0x2b2   : > { %6854 = vperm.xlu1 %12296, %v22880_v2   ;;  %v18371_v4 = vpop.f32.mrb[127].mxu1  ;;  %12112 = vmatprep.subr.bf16.mxu1 %v12111_v53  ;;  %22884 = vst [vmem:[#allocation25_spill] sm:$0xff] %v18377_v27  ;;  %v22885_v2 = vld [vmem:[#allocation81_spill] sm:$0xff]  ;;  %v8599_v54 = vadd.f32 %v22888_v44, %v7411_v25 }
 0x2b3   : > { %v6272_v51 = vsub.f32 %v5876_v31, %v22885_v2  ;;  %12114 = vmatpush3.bf16.msra.mxu1 %v12113_v39  ;;  %v7873_v38 = vpop.permute.xlu1 %7872  ;;  %v8798_v31 = vmax.f32 %v18350_v19, 0.0  ;;  %v11877_v25 = vpop.f32.mrb[128].mxu1  ;;  %v22890_v39 = vld [vmem:[#allocation102_spill] sm:$0xff]  ;;  %v5311_v49 = vadd.f32 1e-05, %v4915_v41  ;;  %v8813_v19 = vmax.f32 %v8615_v59, 0.0 }
 0x2b4   : > { %v8616_v53 = vadd.f32 %v7873_v38, %v7428_v55  ;;  %v6273_v52 = vsub.f32 %v5877_v46, %v22890_v39  ;;  %v18404_v2 = vmul.f32 0.020408163, %v11877_v25  ;;  %v3652_v44 = vpop.f32.mrb[129].mxu1  ;;  %v22892_v38 = vsub.f32 %v18251_v58, %v18223_v34  ;;  %v12530_v61 = vpop.eup %12529  ;;  %v12771_v41 = vld [vmem:[%s21700_s0 + $0x178] sm:$0xff]  ;;  %v22894_v46 = vld [vmem:[#allocation79_spill] sm:$0xff]  ;;  %v5111_v34 = vld [vmem:[%s21702_s2 + $0x3c0] sm:$0xff] }
 0x2b5   : > { %6859 = vperm.xlu0 %12295, %v22889_v57   ;;  %v18406_v57 = vpop.f32.mrb[150].mxu0  ;;  %v18411_v42 = vmul.f32 0.020408163, %v3652_v44  ;;  %v7414_v25 = vmul.f32 %v12771_v41, %v22894_v46  ;;  %v8797_v39 = vmax.f32 %v8599_v54, 0.0  ;;  %v12532_v58 = vpop.eup %12531  ;;  %v22897_v41 = vld [vmem:[#allocation7_spill] sm:$0xff]  ;;  %12533 = vrsqrt.f32 %v5311_v49 }
 0x2b6   : > { %8032 = vperm.xlu1 %12296, %v6272_v51   ;;  %22891 = vst [vmem:[#allocation75_spill] sm:$0xff] %v18406_v57  ;;  %v8814_v55 = vmax.f32 %v8616_v53, 0.0  ;;  %v7878_v51 = vpop.permute.xlu0 %7877  ;;  %v4916_v24 = vmax.f32 %v22892_v38, 0.0  ;;  %v18413_v40 = vpop.f32.mrb[151].mxu0  ;;  %v12772_v53 = vld [vmem:[%s21700_s0 + $0x1f0] sm:$0xff]  ;;  %v6274_v46 = vsub.f32 %v5878_v8, %v22897_v41 }
 0x2b7   : > { %22893 = vst [vmem:[#allocation46_spill] sm:$0xff] %v18413_v40  ;;  %v18419_v57 = vpop.permute.xlu1 %6704  ;;  %v7429_v44 = vmul.f32 %v12772_v53, %v18310_v5  ;;  %v22896_v38 = vld [vmem:[#allocation88_spill] sm:$0xff]  ;;  %v18434_v59 = vpop.f32.mrb[130].mxu1  ;;  %v5112_v40 = vld [vmem:[%s21702_s2 + $0x3c8] sm:$0xff]  ;;  %v12117_v53 = vpack.c.bf16 %v8798_v31, %v8797_v39  ;;  %v18457_v31 = vmul.f32 %v12530_v61, %v5111_v34 }
 0x2b8   : > { %22895 = vst [vmem:[#allocation66_spill] sm:$0xff] %v18419_v57  ;;  %v12115_v54 = vpack.c.bf16 %v8814_v55, %v8813_v19  ;;  %v12773_v57 = vld [vmem:[%s21700_s0 + $0x170] sm:$0xff]  ;;  %v8602_v19 = vadd.f32 %v17820_v15, %v7414_v25  ;;  %v18444_v8 = vpop.f32.mrb[131].mxu1  ;;  %v18446_v55 = vpop.f32.mrb[152].mxu0  ;;  %v5312_v15 = vadd.f32 1e-05, %v4916_v24 }
 0x2b9   : > { %8037 = vperm.xlu0 %12295, %v6273_v52   ;;  %v7413_v5 = vmul.f32 %v12773_v57, %v22898_v35  ;;  %22899 = vst [vmem:[#allocation16_spill] sm:$0xff] %v18446_v55  ;;  %v8617_v52 = vadd.f32 %v7878_v51, %v7429_v44  ;;  %v5879_v35 = vld [vmem:[%s21703_s3 + $0x300] sm:$0xff]  ;;  %22900 = vst [vmem:[#allocation84_spill] sm:$0xff] %v18457_v31  ;;  %v18459_v49 = vpop.f32.mrb[153].mxu0  ;;  %v22902_v57 = vld [vmem:[#allocation39_spill] sm:$0xff] }
 0x2ba   : > { %6864 = vperm.xlu1 %12296, %v22896_v38   ;;  %v12774_v38 = vld [vmem:[%s21700_s0 + $0x1f8] sm:$0xff]  ;;  %12116 = vmatprep.subr.bf16.mxu1 %v12115_v54  ;;  %v18452_v27 = vpop.permute.xlu0 %6709  ;;  %22901 = vst [vmem:[#allocation82_spill] sm:$0xff] %v18459_v49  ;;  %v8800_v44 = vmax.f32 %v8602_v19, 0.0  ;;  %v22904_v54 = vld [vmem:[#allocation11_spill] sm:$0xff]  ;;  %v18466_v55 = vpop.f32.mrb[154].mxu0  ;;  %12535 = vrsqrt.f32 %v5312_v15 }
 0x2bb   : > { %v7430_v41 = vmul.f32 %v12774_v38, %v18341_v33  ;;  %v8601_v25 = vadd.f32 %v22902_v57, %v7413_v5  ;;  %12118 = vmatpush3.bf16.msra.mxu1 %v12117_v53  ;;  %v7883_v39 = vpop.permute.xlu1 %7882  ;;  %v18463_v33 = vmul.f32 %v12532_v58, %v5112_v40  ;;  %v6275_v38 = vsub.f32 %v5879_v35, %v22904_v54  ;;  %v18474_v53 = vpop.f32.mrb[155].mxu0  ;;  %v22907_v40 = vld [vmem:[#allocation54_spill] sm:$0xff] }
 0x2bc   : > { %22905 = vst [vmem:[#allocation17_spill] sm:$0xff] %v18466_v55  ;;  %v8815_v24 = vmax.f32 %v8617_v52, 0.0  ;;  %v18472_v5 = vmul.f32 %v18457_v31, %v18132_v45  ;;  %22906 = vst [vmem:[#allocation29_spill] sm:$0xff] %v18474_v53  ;;  %v18477_v58 = vmul.f32 0.020408163, %v22907_v40  ;;  %v5880_v52 = vld [vmem:[%s21703_s3 + $0x308] sm:$0xff] }
 0x2bd   : > { %6869 = vperm.xlu0 %12295, %v17780_v30   ;;  %22903 = vst [vmem:[#allocation18_spill] sm:$0xff] %v18463_v33  ;;  %v8618_v51 = vadd.f32 %v7883_v39, %v7430_v41  ;;  %v8799_v30 = vmax.f32 %v8601_v25, 0.0  ;;  %v18484_v19 = vpop.f32.mrb[132].mxu1  ;;  %v18488_v41 = vmul.f32 %v18463_v33, %v18129_v12  ;;  %v22910_v45 = vld [vmem:[#allocation95_spill] sm:$0xff]  ;;  %v18493_v25 = vpop.f32.mrb[156].mxu0  ;;  %v22914_v53 = vld [vmem:[#allocation22_spill] sm:$0xff] }
 0x2be   : > { %8042 = vperm.xlu1 %12296, %v6274_v46   ;;  %v18468_v34 = vpop.permute.xlu0 %7887  ;;  %22908 = vst [vmem:[#allocation35_spill] sm:$0xff] %v18477_v58  ;;  %v18491_v15 = vpop.f32.mrb[133].mxu1  ;;  %22911 = vst [vmem:[#allocation36_spill] sm:$0xff] %v18493_v25 }
 0x2bf   : > { %v8816_v61 = vmax.f32 %v8618_v51, 0.0  ;;  %v18479_v46 = vpop.permute.xlu1 %6714  ;;  %22909 = vst [vmem:[#allocation89_spill] sm:$0xff] %v18488_v41  ;;  %v12121_v57 = vpack.c.bf16 %v8800_v44, %v8799_v30  ;;  %v22912_v51 = vld [vmem:[#allocation85_spill] sm:$0xff]  ;;  %v18501_v40 = vpop.f32.mrb[157].mxu0  ;;  %v4505_v44 = vmul.f32 %v18477_v58, %v18477_v58 }
 0x2c0   : > { %v6276_v54 = vsub.f32 %v5880_v52, %v22912_v51  ;;  %22913 = vst [vmem:[#allocation47_spill] sm:$0xff] %v18501_v40  ;;  %v12534_v12 = vpop.eup %12533  ;;  %v18512_v30 = vpop.f32.mrb[134].mxu1  ;;  %v5113_v52 = vld [vmem:[%s21702_s2 + $0x3d0] sm:$0xff] }
 0x2c1   : > { %8047 = vperm.xlu0 %12295, %v6275_v38   ;;  %v12119_v35 = vpack.c.bf16 %v8816_v61, %v8815_v24  ;;  %v5881_v38 = vld [vmem:[%s21703_s3 + $0x310] sm:$0xff]  ;;  %v4307_v24 = vmul.f32 0.020408163, %v17861_v63  ;;  %v18523_v63 = vpop.f32.mrb[158].mxu0  ;;  %v18530_v25 = vmul.f32 %v12534_v12, %v5113_v52  ;;  %v4310_v52 = vmul.f32 0.020408163, %v17906_v36 }
 0x2c2   : > { %6874 = vperm.xlu1 %12296, %v22910_v45   ;;  %v18495_v39 = vpop.permute.xlu0 %6719  ;;  %v18504_v45 = vmul.f32 0.020408163, %v22914_v53  ;;  %v18520_v53 = vpop.f32.mrb[135].mxu1  ;;  %v6277_v58 = vsub.f32 %v5881_v38, %v17813_v14  ;;  %22918 = vst [vmem:[#allocation73_spill] sm:$0xff] %v18523_v63  ;;  %v5882_v14 = vld [vmem:[%s21703_s3 + $0x318] sm:$0xff] }
 0x2c3   : > { %12120 = vmatprep.subr.bf16.mxu1 %v12119_v35  ;;  %v18509_v61 = vpop.permute.xlu1 %7892  ;;  %v22916_v35 = vld [vmem:[#allocation63_spill] sm:$0xff]  ;;  %22922 = vst [vmem:[#allocation9_spill] sm:$0xff] %v18530_v25  ;;  %v18532_v55 = vpop.f32.mrb[159].mxu0  ;;  %v4703_v49 = vsub.f32 %v4307_v24, %v4505_v44  ;;  %v18565_v36 = vmul.f32 %v18530_v25, %v18181_v1 }
 0x2c4   : > { %22915 = vst [vmem:[#allocation56_spill] sm:$0xff] %v18504_v45  ;;  %12122 = vmatpush3.bf16.msra.mxu1 %v12121_v57  ;;  %v18518_v51 = vmul.f32 0.020408163, %v22916_v35  ;;  %v22919_v57 = vld [vmem:[#allocation80_spill] sm:$0xff]  ;;  %22923 = vst [vmem:[#allocation51_spill] sm:$0xff] %v18532_v55  ;;  %v4506_v35 = vmul.f32 %v18504_v45, %v18504_v45  ;;  %v12536_v38 = vpop.eup %12535  ;;  %v22932_v25 = vld [vmem:[#allocation43_spill] sm:$0xff] }
 0x2c5   : > { %6879 = vperm.xlu0 %12295, %v17833_v62   ;;  %v18526_v40 = vmul.f32 0.020408163, %v22919_v57  ;;  %v18546_v57 = vpop.f32.mrb[136].mxu1 }
 0x2c6   : > { %22917 = vst [vmem:[#allocation24_spill] sm:$0xff] %v18518_v51  ;;  %8052 = vperm.xlu1 %12296, %v6276_v54   ;;  %v18528_v62 = vpop.permute.xlu0 %7897  ;;  %v4308_v54 = vmul.f32 0.020408163, %v17840_v11  ;;  %v4508_v12 = vmul.f32 %v18518_v51, %v18518_v51  ;;  %v5114_v11 = vld [vmem:[%s21702_s2 + $0x3d8] sm:$0xff]  ;;  %v18551_v44 = vpop.f32.mrb[137].mxu1  ;;  %v22927_v51 = vld [vmem:[#allocation87_spill] sm:$0xff] }
 0x2c7   : > { %22920 = vst [vmem:[#allocation76_spill] sm:$0xff] %v18526_v40  ;;  %22921 = vst [vmem:[#allocation83_spill] sm:$0xff] %v18528_v62  ;;  %v18537_v33 = vpop.permute.xlu1 %6724  ;;  %v4507_v24 = vmul.f32 %v18526_v40, %v18526_v40  ;;  %v6278_v55 = vsub.f32 %v5882_v14, %v22927_v51  ;;  %v22929_v40 = vld [vmem:[#allocation67_spill] sm:$0xff]  ;;  %v22931_v14 = vsub.f32 %v18411_v42, %v18401_v21  ;;  %v18578_v1 = vpop.f32.mrb[138].mxu1 }
 0x2c8   : > { %22924 = vst [vmem:[#allocation2_spill] sm:$0xff] %v18537_v33  ;;  %v4704_v31 = vsub.f32 %v4308_v54, %v4506_v35  ;;  %v4901_v33 = vmax.f32 %v4703_v49, 0.0  ;;  %v4706_v51 = vsub.f32 %v4310_v52, %v4508_v12  ;;  %v18581_v35 = vpop.f32.mrb[139].mxu1  ;;  %v5884_v42 = vld [vmem:[%s21703_s3 + $0x328] sm:$0xff]  ;;  %v22937_v12 = vld [vmem:[#allocation53_spill] sm:$0xff] }
 0x2c9   : > { %8057 = vperm.xlu0 %12295, %v6277_v58   ;;  %v18553_v58 = vpop.f32.mrb[160].mxu0  ;;  %v4921_v41 = vmax.f32 %v22931_v14, 0.0 }
 0x2ca   : > { %6884 = vperm.xlu1 %12296, %v17817_v17   ;;  %22925 = vst [vmem:[#allocation21_spill] sm:$0xff] %v18553_v58  ;;  %v18557_v45 = vpop.permute.xlu0 %6729  ;;  %v5883_v17 = vld [vmem:[%s21703_s3 + $0x320] sm:$0xff]  ;;  %v18567_v63 = vpop.f32.mrb[161].mxu0  ;;  %v4309_v58 = vmul.f32 0.020408163, %v17921_v7  ;;  %v4902_v54 = vmax.f32 %v4704_v31, 0.0 }
 0x2cb   : > { %22926 = vst [vmem:[#allocation10_spill] sm:$0xff] %v18557_v45  ;;  %22928 = vst [vmem:[#allocation34_spill] sm:$0xff] %v18567_v63  ;;  %v18570_v62 = vpop.permute.xlu1 %7902  ;;  %v18573_v45 = vmul.f32 %v12536_v38, %v5114_v11  ;;  %v6279_v63 = vsub.f32 %v5883_v17, %v22932_v25  ;;  %v18583_v49 = vpop.f32.mrb[162].mxu0  ;;  %v4904_v25 = vmax.f32 %v4706_v51, 0.0  ;;  %v5317_v52 = vadd.f32 1e-05, %v4921_v41 }
 0x2cc   : > { %22933 = vst [vmem:[#allocation26_spill] sm:$0xff] %v18583_v49  ;;  %v4705_v38 = vsub.f32 %v4309_v58, %v4507_v24  ;;  %v18599_v31 = vpop.f32.mrb[140].mxu1  ;;  %v5885_v51 = vld [vmem:[%s21703_s3 + $0x330] sm:$0xff]  ;;  %v5298_v41 = vadd.f32 1e-05, %v4902_v54 }
 0x2cd   : > { %6889 = vperm.xlu0 %12295, %v22929_v40   ;;  %22930 = vst [vmem:[#allocation77_spill] sm:$0xff] %v18573_v45  ;;  %v5297_v40 = vadd.f32 1e-05, %v4901_v33  ;;  %v18594_v21 = vmul.f32 %v18573_v45, %v18166_v47  ;;  %v22938_v33 = vsub.f32 %v18404_v2, %v18393_v16  ;;  %v18604_v58 = vpop.f32.mrb[141].mxu1  ;;  %v22941_v47 = vld [vmem:[#allocation93_spill] sm:$0xff]  ;;  %v22944_v16 = vld [vmem:[#allocation98_spill] sm:$0xff] }
 0x2ce   : > { %8062 = vperm.xlu1 %12296, %v6278_v55   ;;  %v18585_v7 = vpop.permute.xlu0 %7907  ;;  %v18596_v55 = vpop.f32.mrb[163].mxu0  ;;  %v6280_v14 = vsub.f32 %v5884_v42, %v22941_v47  ;;  %v18620_v2 = vmul.f32 0.020408163, %v18286_v28  ;;  %v18625_v47 = vmul.f32 0.020408163, %v18297_v26 }
 0x2cf   : > { %v18587_v11 = vpop.permute.xlu1 %6734  ;;  %22935 = vst [vmem:[#allocation20_spill] sm:$0xff] %v18594_v21  ;;  %22936 = vst [vmem:[#allocation90_spill] sm:$0xff] %v18596_v55  ;;  %v18606_v24 = vpop.f32.mrb[164].mxu0  ;;  %12537 = vrsqrt.f32 %v5297_v40  ;;  %v4903_v55 = vmax.f32 %v4705_v38, 0.0 }
 0x2d0   : > { %22934 = vst [vmem:[#allocation106_spill] sm:$0xff] %v18587_v11  ;;  %22939 = vst [vmem:[#allocation72_spill] sm:$0xff] %v18606_v24  ;;  %12539 = vrsqrt.f32 %v5317_v52  ;;  %v18622_v42 = vpop.f32.mrb[142].mxu1  ;;  %v22948_v24 = vld [vmem:[#allocation48_spill] sm:$0xff]  ;;  %v18641_v26 = vmul.f32 %v18620_v2, %v18620_v2 }
 0x2d1   : > { %8067 = vperm.xlu0 %12295, %v6279_v63   ;;  %v4922_v63 = vmax.f32 %v22938_v33, 0.0  ;;  %22945 = vst [vmem:[#allocation33_spill] sm:$0xff] %v18620_v2  ;;  %v5300_v33 = vadd.f32 1e-05, %v4904_v25  ;;  %22946 = vst [vmem:[#allocation30_spill] sm:$0xff] %v18622_v42  ;;  %v18628_v40 = vpop.f32.mrb[143].mxu1  ;;  %12541 = vrsqrt.f32 %v5298_v41 }
 0x2d2   : > { %6894 = vperm.xlu1 %12296, %v22937_v12   ;;  %v18608_v17 = vpop.permute.xlu0 %6739  ;;  %v18614_v12 = vpop.f32.mrb[165].mxu0  ;;  %22947 = vst [vmem:[#allocation32_spill] sm:$0xff] %v18625_v47  ;;  %22949 = vst [vmem:[#allocation42_spill] sm:$0xff] %v18628_v40  ;;  %v5299_v28 = vadd.f32 1e-05, %v4903_v55  ;;  %v5886_v25 = vld [vmem:[%s21703_s3 + $0x338] sm:$0xff] }
 0x2d3   : > { %22940 = vst [vmem:[#allocation6_spill] sm:$0xff] %v18608_v17  ;;  %22942 = vst [vmem:[#allocation8_spill] sm:$0xff] %v18614_v12  ;;  %v18616_v49 = vpop.permute.xlu1 %7912  ;;  %v6281_v12 = vsub.f32 %v5885_v51, %v22948_v24  ;;  %v5318_v54 = vadd.f32 1e-05, %v4922_v63  ;;  %v18632_v45 = vpop.f32.mrb[166].mxu0  ;;  %12543 = vrsqrt.f32 %v5300_v33  ;;  %v22954_v63 = vld [vmem:[#allocation4_spill] sm:$0xff]  ;;  %v18648_v24 = vmul.f32 %v18625_v47, %v18625_v47 }
 0x2d4   : > { %22943 = vst [vmem:[#allocation105_spill] sm:$0xff] %v18616_v49  ;;  %22951 = vst [vmem:[#allocation14_spill] sm:$0xff] %v18632_v45  ;;  %v18643_v52 = vpop.f32.mrb[167].mxu0  ;;  %v11901_v55 = vpop.f32.mrb[144].mxu1  ;;  %v22957_v45 = vld [vmem:[#allocation91_spill] sm:$0xff]  ;;  %v5887_v33 = vld [vmem:[%s21703_s3 + $0x340] sm:$0xff] }
 0x2d5   : > { %6899 = vperm.xlu0 %12295, %v22944_v16   ;;  %22953 = vst [vmem:[#allocation71_spill] sm:$0xff] %v18643_v52  ;;  %12545 = vrsqrt.f32 %v5318_v54  ;;  %v3732_v51 = vpop.f32.mrb[145].mxu1  ;;  %v6282_v2 = vsub.f32 %v5886_v25, %v22957_v45  ;;  %v4324_v45 = vmul.f32 0.020408163, %v18304_v13 }
 0x2d6   : > { %8072 = vperm.xlu1 %12296, %v6280_v14   ;;  %v18630_v38 = vpop.permute.xlu0 %7917  ;;  %v18650_v14 = vmul.f32 0.020408163, %v11901_v55  ;;  %v18663_v47 = vmul.f32 0.020408163, %v3732_v51  ;;  %12547 = vrsqrt.f32 %v5299_v28  ;;  %v22962_v55 = vld [vmem:[#allocation50_spill] sm:$0xff] }
 0x2d7   : > { %22950 = vst [vmem:[#allocation37_spill] sm:$0xff] %v18630_v38  ;;  %v18634_v16 = vpop.permute.xlu1 %6744 }
 0x2d8   : > { %22952 = vst [vmem:[#allocation13_spill] sm:$0xff] %v18634_v16 }
 0x2d9   : > { %8077 = vperm.xlu0 %12295, %v6281_v12   ;;  %v18652_v12 = vpop.f32.mrb[168].mxu0  ;;  %v12538_v51 = vpop.eup %12537 }
 0x2da   : > { %6904 = vperm.xlu1 %12296, %v22954_v63   ;;  %22955 = vst [vmem:[#allocation94_spill] sm:$0xff] %v18652_v12  ;;  %v18654_v41 = vpop.permute.xlu0 %6749  ;;  %v22958_v63 = vld [vmem:[#allocation58_spill] sm:$0xff]  ;;  %v18665_v16 = vpop.f32.mrb[169].mxu0  ;;  %v18671_v12 = vmul.f32 0.020408163, %v22962_v55 }
 0x2db   : > { %22956 = vst [vmem:[#allocation41_spill] sm:$0xff] %v18654_v41  ;;  %v18661_v52 = vmul.f32 0.020408163, %v22958_v63  ;;  %22960 = vst [vmem:[#allocation27_spill] sm:$0xff] %v18665_v16  ;;  %v18667_v54 = vpop.permute.xlu1 %7922  ;;  %v18677_v63 = vpop.f32.mrb[146].mxu1  ;;  %v22965_v41 = vld [vmem:[#allocation61_spill] sm:$0xff] }
 0x2dc   : > { %22961 = vst [vmem:[#allocation86_spill] sm:$0xff] %v18667_v54  ;;  %22963 = vst [vmem:[#allocation70_spill] sm:$0xff] %v18671_v12  ;;  %v6283_v16 = vsub.f32 %v5887_v33, %v22965_v41  ;;  %v18680_v28 = vpop.f32.mrb[147].mxu1  ;;  %v18682_v54 = vpop.f32.mrb[170].mxu0  ;;  %v5099_v55 = vld [vmem:[%s21702_s2 + $0x360] sm:$0xff] }
 0x2dd   : > { %22959 = vst [vmem:[#allocation45_spill] sm:$0xff] %v18661_v52  ;;  %6909 = vperm.xlu0 %12295, %v18053_v32   ;;  %22964 = vst [vmem:[#allocation31_spill] sm:$0xff] %v18677_v63  ;;  %v12540_v32 = vpop.eup %12539  ;;  %v5119_v41 = vld [vmem:[%s21702_s2 + $0x400] sm:$0xff]  ;;  %v18695_v33 = vpop.f32.mrb[171].mxu0  ;;  %v22973_v63 = vld [vmem:[#allocation57_spill] sm:$0xff] }
 0x2de   : > { %8082 = vperm.xlu1 %12296, %v6282_v2   ;;  %22966 = vst [vmem:[#allocation81_spill] sm:$0xff] %v18680_v28  ;;  %22967 = vst [vmem:[#allocation92_spill] sm:$0xff] %v18682_v54  ;;  %v18684_v38 = vpop.permute.xlu0 %7927  ;;  %v4522_v2 = vmul.f32 %v18661_v52, %v18661_v52  ;;  %v5888_v54 = vld [vmem:[%s21703_s3 + $0x348] sm:$0xff]  ;;  %v4323_v52 = vmul.f32 0.020408163, %v18315_v9  ;;  %v18716_v40 = vmul.f32 %v12540_v32, %v5119_v41 }
 0x2df   : > { %22968 = vst [vmem:[#allocation40_spill] sm:$0xff] %v18684_v38  ;;  %22969 = vst [vmem:[#allocation102_spill] sm:$0xff] %v18695_v33  ;;  %v18697_v25 = vpop.permute.xlu1 %6754  ;;  %v4521_v38 = vmul.f32 %v18671_v12, %v18671_v12  ;;  %v22971_v28 = vld [vmem:[#allocation99_spill] sm:$0xff]  ;;  %v18710_v21 = vmul.f32 0.020408163, %v22973_v63  ;;  %v18712_v33 = vpop.f32.mrb[148].mxu1 }
 0x2e0   : > { %22970 = vst [vmem:[#allocation79_spill] sm:$0xff] %v18697_v25  ;;  %v18706_v13 = vmul.f32 0.020408163, %v22971_v28  ;;  %22975 = vst [vmem:[#allocation5_spill] sm:$0xff] %v18712_v33  ;;  %v18714_v25 = vmul.f32 %v12538_v51, %v5099_v55  ;;  %v18718_v17 = vpop.f32.mrb[149].mxu1  ;;  %v18720_v12 = vpop.f32.mrb[172].mxu0  ;;  %v4720_v32 = vsub.f32 %v4324_v45, %v4522_v2 }
 0x2e1   : > { %8087 = vperm.xlu0 %12295, %v6283_v16   ;;  %22974 = vst [vmem:[#allocation7_spill] sm:$0xff] %v18710_v21  ;;  %v12542_v16 = vpop.eup %12541  ;;  %22977 = vst [vmem:[#allocation11_spill] sm:$0xff] %v18716_v40  ;;  %v22981_v28 = vld [vmem:[#allocation44_spill] sm:$0xff]  ;;  %v18734_v51 = vld [vmem:[%s21703_s3 + $0x358] sm:$0xff]  ;;  %v18736_v55 = vpop.f32.mrb[173].mxu0  ;;  %v4523_v2 = vmul.f32 %v18710_v21, %v18710_v21 }
 0x2e2   : > { %22972 = vst [vmem:[#allocation88_spill] sm:$0xff] %v18706_v13  ;;  %6914 = vperm.xlu1 %12296, %v18060_v0   ;;  %22976 = vst [vmem:[#allocation39_spill] sm:$0xff] %v18714_v25  ;;  %v12544_v9 = vpop.eup %12543  ;;  %v18722_v49 = vpop.permute.xlu0 %6759  ;;  %v6284_v42 = vsub.f32 %v5888_v54, %v22981_v28  ;;  %v5100_v0 = vld [vmem:[%s21702_s2 + $0x368] sm:$0xff]  ;;  %v5889_v63 = vld [vmem:[%s21703_s3 + $0x350] sm:$0xff]  ;;  %v4719_v28 = vsub.f32 %v4323_v52, %v4521_v38 }
 0x2e3   : > { %22978 = vst [vmem:[#allocation54_spill] sm:$0xff] %v18718_v17  ;;  %22979 = vst [vmem:[#allocation95_spill] sm:$0xff] %v18720_v12  ;;  %v12546_v41 = vpop.eup %12545  ;;  %v18738_v12 = vpop.permute.xlu1 %7932  ;;  %v5102_v54 = vld [vmem:[%s21702_s2 + $0x378] sm:$0xff]  ;;  %v4326_v17 = vmul.f32 0.020408163, %v18357_v10  ;;  %v5120_v45 = vld [vmem:[%s21702_s2 + $0x408] sm:$0xff]  ;;  %v18758_v52 = vmul.f32 %v12542_v16, %v5100_v0  ;;  %v6285_v10 = vsub.f32 %v5889_v63, %v18089_v48  ;;  %v6286_v48 = vsub.f32 %v18734_v51, %v18099_v22 }
 0x2e4   : > { %22980 = vst [vmem:[#allocation85_spill] sm:$0xff] %v18722_v49  ;;  %22982 = vst [vmem:[#allocation22_spill] sm:$0xff] %v18736_v55  ;;  %v4524_v49 = vmul.f32 %v18706_v13, %v18706_v13  ;;  %v22984_v33 = vld [vmem:[#allocation97_spill] sm:$0xff]  ;;  %v18756_v55 = vpop.f32.mrb[150].mxu1  ;;  %v12548_v38 = vpop.eup %12547  ;;  %v22988_v13 = vld [vmem:[#allocation38_spill] sm:$0xff]  ;;  %v18779_v16 = vmul.f32 %v12544_v9, %v5102_v54  ;;  %v4918_v0 = vmax.f32 %v4720_v32, 0.0  ;;  %v18786_v63 = vmul.f32 %v12546_v41, %v5120_v45 }
 0x2e5   : > { %22983 = vst [vmem:[#allocation63_spill] sm:$0xff] %v18738_v12  ;;  %6919 = vperm.xlu0 %12295, %v18714_v25   ;;  %v18748_v11 = vmul.f32 0.020408163, %v22984_v33  ;;  %v4325_v25 = vmul.f32 0.020408163, %v18371_v4  ;;  %22986 = vst [vmem:[#allocation87_spill] sm:$0xff] %v18756_v55 }
 0x2e6   : > { %8092 = vperm.xlu1 %12296, %v6284_v42   ;;  %22987 = vst [vmem:[#allocation67_spill] sm:$0xff] %v18758_v52  ;;  %v5101_v33 = vld [vmem:[%s21702_s2 + $0x370] sm:$0xff]  ;;  %v18765_v12 = vmul.f32 0.020408163, %v22988_v13  ;;  %v18769_v42 = vmul.f32 %v18716_v40, %v18360_v43  ;;  %v18771_v21 = vpop.f32.mrb[151].mxu1  ;;  %v18773_v4 = vpop.f32.mrb[174].mxu0 }
 0x2e7   : > { %22985 = vst [vmem:[#allocation80_spill] sm:$0xff] %v18748_v11  ;;  %22991 = vst [vmem:[#allocation93_spill] sm:$0xff] %v18771_v21  ;;  %v18775_v55 = vpop.permute.xlu0 %7937  ;;  %v18784_v13 = vld [vmem:[%s21703_s3 + $0x380] sm:$0xff]  ;;  %v18788_v43 = vpop.f32.mrb[175].mxu0  ;;  %v18795_v22 = vld [vmem:[%s21703_s3 + $0x388] sm:$0xff]  ;;  %v4528_v51 = vmul.f32 %v18748_v11, %v18748_v11 }
 0x2e8   : > { %22989 = vst [vmem:[#allocation43_spill] sm:$0xff] %v18765_v12  ;;  %22990 = vst [vmem:[#allocation53_spill] sm:$0xff] %v18769_v42  ;;  %v18790_v40 = vpop.permute.xlu1 %6764  ;;  %v4722_v42 = vsub.f32 %v4326_v17, %v4524_v49  ;;  %v18800_v9 = vld [vmem:[%s21703_s3 + $0x390] sm:$0xff]  ;;  %v4330_v32 = vmul.f32 0.020408163, %v18434_v59  ;;  %v18808_v41 = vld [vmem:[%s21703_s3 + $0x398] sm:$0xff]  ;;  %v18811_v49 = vmul.f32 %v12548_v38, %v5101_v33  ;;  %v4721_v17 = vsub.f32 %v4325_v25, %v4523_v2 }
 0x2e9   : > { %22992 = vst [vmem:[#allocation98_spill] sm:$0xff] %v18773_v4  ;;  %22993 = vst [vmem:[#allocation48_spill] sm:$0xff] %v18775_v55  ;;  %8097 = vperm.xlu0 %12295, %v6285_v10   ;;  %v4917_v4 = vmax.f32 %v4719_v28, 0.0  ;;  %v18816_v54 = vld [vmem:[%s21703_s3 + $0x3a0] sm:$0xff]  ;;  %v22999_v28 = vld [vmem:[#allocation23_spill] sm:$0xff]  ;;  %v18824_v10 = vpop.f32.mrb[152].mxu1  ;;  %v4527_v38 = vmul.f32 %v18765_v12, %v18765_v12 }
 0x2ea   : > { %22994 = vst [vmem:[#allocation4_spill] sm:$0xff] %v18779_v16  ;;  %22995 = vst [vmem:[#allocation91_spill] sm:$0xff] %v18786_v63  ;;  %6924 = vperm.xlu1 %12296, %v18758_v52   ;;  %v18819_v45 = vmul.f32 0.020408163, %v22999_v28  ;;  %v18822_v59 = vmul.f32 0.020408163, %v18045_v23 }
 0x2eb   : > { %22996 = vst [vmem:[#allocation58_spill] sm:$0xff] %v18788_v43  ;;  %22997 = vst [vmem:[#allocation50_spill] sm:$0xff] %v18790_v40  ;;  %v4329_v25 = vmul.f32 0.020408163, %v18444_v8  ;;  %v18834_v2 = vld [vmem:[%s21703_s3 + $0x3a8] sm:$0xff]  ;;  %v23003_v33 = vld [vmem:[#allocation78_spill] sm:$0xff]  ;;  %v18841_v52 = vpop.permute.xlu0 %6769  ;;  %v18850_v8 = vmul.f32 %v18786_v63, %v18347_v60 }
 0x2ec   : > { %22998 = vst [vmem:[#allocation61_spill] sm:$0xff] %v18811_v49  ;;  %23000 = vst [vmem:[#allocation99_spill] sm:$0xff] %v18819_v45  ;;  %v18837_v28 = vmul.f32 0.020408163, %v23003_v33  ;;  %v18839_v23 = vpop.f32.mrb[153].mxu1  ;;  %v18852_v40 = vpop.f32.mrb[176].mxu0 }
 0x2ed   : > { %23001 = vst [vmem:[#allocation57_spill] sm:$0xff] %v18822_v59  ;;  %23002 = vst [vmem:[#allocation44_spill] sm:$0xff] %v18824_v10  ;;  %v5314_v43 = vadd.f32 1e-05, %v4918_v0  ;;  %v23007_v10 = vld [vmem:[#allocation62_spill] sm:$0xff]  ;;  %v18854_v55 = vpop.permute.xlu1 %7942  ;;  %6929 = vperm.xlu0 %12295, %v18811_v49   ;;  %v18859_v11 = vpop.f32.mrb[177].mxu0 }
 0x2ee   : > { %23004 = vst [vmem:[#allocation97_spill] sm:$0xff] %v18837_v28  ;;  %23005 = vst [vmem:[#allocation38_spill] sm:$0xff] %v18839_v23  ;;  %v18846_v12 = vmul.f32 0.020408163, %v23007_v10  ;;  %v5313_v33 = vadd.f32 1e-05, %v4917_v4  ;;  %8102 = vperm.xlu1 %12296, %v6286_v48   ;;  %v18871_v4 = vmul.f32 %v18819_v45, %v18819_v45  ;;  %v18875_v48 = vmul.f32 %v18822_v59, %v18822_v59 }
 0x2ef   : > { %23006 = vst [vmem:[#allocation23_spill] sm:$0xff] %v18841_v52  ;;  %23009 = vst [vmem:[#allocation62_spill] sm:$0xff] %v18850_v8  ;;  %v4920_v23 = vmax.f32 %v4722_v42, 0.0  ;;  %v4726_v52 = vsub.f32 %v4330_v32, %v4528_v51  ;;  %v4919_v10 = vmax.f32 %v4721_v17, 0.0  ;;  %v18867_v49 = vpop.f32.mrb[154].mxu1  ;;  %v4725_v42 = vsub.f32 %v4329_v25, %v4527_v38  ;;  %v18880_v51 = vld [vmem:[%s21703_s3 + $0x3b0] sm:$0xff]  ;;  %v18889_v38 = vpop.permute.xlu0 %7947 }
 0x2f0   : > { %23008 = vst [vmem:[#allocation78_spill] sm:$0xff] %v18846_v12  ;;  %23010 = vst [vmem:[#allocation107_spill] sm:$0xff] %v18852_v40  ;;  %v18883_v32 = vmul.f32 0.020408163, %v18110_v29  ;;  %v18885_v17 = vpop.f32.mrb[155].mxu1  ;;  %v18887_v63 = vpop.f32.mrb[178].mxu0  ;;  %12549 = vrsqrt.f32 %v5314_v43  ;;  %v18893_v25 = vmul.f32 %v18837_v28, %v18837_v28  ;;  %v18897_v40 = vmul.f32 %v18846_v12, %v18846_v12 }
 0x2f1   : > { %23011 = vst [vmem:[#allocation108_spill] sm:$0xff] %v18854_v55  ;;  %23012 = vst [vmem:[#allocation109_spill] sm:$0xff] %v18859_v11  ;;  %v18900_v60 = vmul.f32 0.020408163, %v18115_v6  ;;  %v18902_v29 = vpop.f32.mrb[179].mxu0  ;;  %v18904_v0 = vpop.permute.xlu1 %6774  ;;  %v23021_v45 = vld [vmem:[#allocation28_spill] sm:$0xff]  ;;  %12551 = vrsqrt.f32 %v5313_v33 }
 0x2f2   : > { %23013 = vst [vmem:[#allocation110_spill] sm:$0xff] %v18867_v49  ;;  %23014 = vst [vmem:[#allocation111_spill] sm:$0xff] %v18883_v32  ;;  %6939 = vperm.xlu0 %12295, %v23021_v45   ;;  %v5316_v59 = vadd.f32 1e-05, %v4920_v23  ;;  %v4924_v43 = vmax.f32 %v4726_v52, 0.0  ;;  %v18911_v28 = vld [vmem:[%s21703_s3 + $0x3b8] sm:$0xff]  ;;  %6934 = vperm.xlu1 %12296, %v18779_v16  }
 0x2f3   : > { %23015 = vst [vmem:[#allocation112_spill] sm:$0xff] %v18885_v17  ;;  %23016 = vst [vmem:[#allocation113_spill] sm:$0xff] %v18887_v63  ;;  %v4332_v63 = vmul.f32 0.020408163, %v18484_v19  ;;  %v12775_v6 = vld [vmem:[%s21700_s0 + $0x200] sm:$0xff]  ;;  %v23022_v12 = vld [vmem:[#allocation25_spill] sm:$0xff]  ;;  %v18926_v17 = vmul.f32 %v18883_v32, %v18883_v32  ;;  %v18937_v52 = vpop.permute.xlu0 %6779 }
 0x2f4   : > { %23017 = vst [vmem:[#allocation114_spill] sm:$0xff] %v18889_v38  ;;  %23018 = vst [vmem:[#allocation115_spill] sm:$0xff] %v18900_v60  ;;  %v5315_v11 = vadd.f32 1e-05, %v4919_v10  ;;  %v4331_v45 = vmul.f32 0.020408163, %v18491_v15  ;;  %12553 = vrsqrt.f32 %v5316_v59 }
 0x2f5   : > { %23019 = vst [vmem:[#allocation116_spill] sm:$0xff] %v18902_v29  ;;  %23020 = vst [vmem:[#allocation117_spill] sm:$0xff] %v18904_v0  ;;  %v7431_v29 = vmul.f32 %v12775_v6, %v23022_v12  ;;  %v23023_v23 = vld [vmem:[#allocation96_spill] sm:$0xff]  ;;  %v18921_v19 = vpop.f32.mrb[156].mxu1  ;;  %v4923_v33 = vmax.f32 %v4725_v42, 0.0  ;;  %v23025_v8 = vld [vmem:[#allocation59_spill] sm:$0xff] }
 0x2f6   : > { %23024 = vst [vmem:[#allocation28_spill] sm:$0xff] %v18921_v19  ;;  %v4334_v0 = vmul.f32 0.020408163, %v18512_v30  ;;  %v18929_v38 = vmul.f32 0.020408163, %v23025_v8  ;;  %v18931_v12 = vpop.f32.mrb[157].mxu1  ;;  %v18941_v30 = vmul.f32 %v18900_v60, %v18900_v60  ;;  %v18951_v19 = vpop.permute.xlu1 %7952  ;;  %12555 = vrsqrt.f32 %v5315_v11 }
 0x2f7   : > { %23027 = vst [vmem:[#allocation96_spill] sm:$0xff] %v18931_v12  ;;  %v12776_v15 = vld [vmem:[%s21700_s0 + $0x208] sm:$0xff]  ;;  %v23028_v10 = vld [vmem:[#allocation66_spill] sm:$0xff]  ;;  %v18949_v12 = vadd.f32 %v18468_v34, %v7431_v29  ;;  %v18955_v55 = vpop.f32.mrb[180].mxu0  ;;  %v12777_v32 = vld [vmem:[%s21700_s0 + $0x210] sm:$0xff]  ;;  %v4727_v34 = vsub.f32 %v4331_v45, %v18875_v48 }
 0x2f8   : > { %23026 = vst [vmem:[#allocation25_spill] sm:$0xff] %v18929_v38  ;;  %v7432_v6 = vmul.f32 %v12776_v15, %v23028_v10  ;;  %v23029_v42 = vld [vmem:[#allocation74_spill] sm:$0xff]  ;;  %v23030_v16 = vld [vmem:[#allocation3_spill] sm:$0xff]  ;;  %23032 = vst [vmem:[#allocation66_spill] sm:$0xff] %v18951_v19  ;;  %v5320_v15 = vadd.f32 1e-05, %v4924_v43  ;;  %v4728_v10 = vsub.f32 %v4332_v63, %v18871_v4  ;;  %v4730_v4 = vsub.f32 %v4334_v0, %v18893_v25  ;;  %v18988_v25 = vpop.permute.xlu0 %7957 }
 0x2f9   : > { %v18946_v8 = vmul.f32 0.020408163, %v23030_v16  ;;  %v23033_v49 = vld [vmem:[#allocation19_spill] sm:$0xff]  ;;  %23034 = vst [vmem:[#allocation74_spill] sm:$0xff] %v18955_v55  ;;  %v7433_v16 = vmul.f32 %v12777_v32, %v18452_v27  ;;  %v23035_v60 = vld [vmem:[#allocation65_spill] sm:$0xff]  ;;  %v18966_v59 = vpop.f32.mrb[181].mxu0  ;;  %v18971_v43 = vmul.f32 %v18929_v38, %v18929_v38  ;;  %v23044_v55 = vsub.f32 %v18784_v13, %v18185_v50 }
 0x2fa   : > { %6949 = vperm.xlu0 %12295, %v23033_v49   ;;  %6944 = vperm.xlu1 %12296, %v23035_v60   ;;  %v4333_v29 = vmul.f32 0.020408163, %v18520_v53  ;;  %v18964_v49 = vpop.f32.mrb[158].mxu1  ;;  %23037 = vst [vmem:[#allocation19_spill] sm:$0xff] %v18966_v59  ;;  %v5319_v63 = vadd.f32 1e-05, %v4923_v33  ;;  %v8620_v32 = vadd.f32 %v18509_v61, %v7432_v6  ;;  %v18998_v59 = vpop.permute.xlu1 %6784  ;;  %12557 = vrsqrt.f32 %v5320_v15 }
 0x2fb   : > { %23031 = vst [vmem:[#allocation59_spill] sm:$0xff] %v18946_v8  ;;  %23036 = vst [vmem:[#allocation3_spill] sm:$0xff] %v18964_v49  ;;  %v18976_v27 = vld [vmem:[%s21703_s3 + $0x3c0] sm:$0xff]  ;;  %v23038_v11 = vld [vmem:[#allocation12_spill] sm:$0xff]  ;;  %v18981_v53 = vpop.f32.mrb[159].mxu1  ;;  %v18992_v45 = vmul.f32 %v18946_v8, %v18946_v8  ;;  %v4925_v8 = vmax.f32 %v4727_v34, 0.0 }
 0x2fc   : > { %v18979_v60 = vmul.f32 0.020408163, %v23038_v11  ;;  %23040 = vst [vmem:[#allocation12_spill] sm:$0xff] %v18981_v53  ;;  %v12778_v48 = vld [vmem:[%s21700_s0 + $0x218] sm:$0xff]  ;;  %23041 = vst [vmem:[#allocation118_spill] sm:$0xff] %v18988_v25  ;;  %v23042_v33 = vld [vmem:[#allocation100_spill] sm:$0xff]  ;;  %12559 = vrsqrt.f32 %v5319_v63  ;;  %v23055_v53 = vsub.f32 %v18795_v22, %v18173_v37 }
 0x2fd   : > { %v7434_v0 = vmul.f32 %v12778_v48, %v18479_v46  ;;  %v18995_v38 = vmul.f32 0.020408163, %v23042_v33  ;;  %v8817_v11 = vmax.f32 %v18949_v12, 0.0  ;;  %v4926_v46 = vmax.f32 %v4728_v10, 0.0  ;;  %v19007_v6 = vld [vmem:[%s21703_s3 + $0x3c8] sm:$0xff]  ;;  %v12550_v48 = vpop.eup %12549  ;;  %v23046_v50 = vld [vmem:[#allocation52_spill] sm:$0xff] }
 0x2fe   : > { %23039 = vst [vmem:[#allocation65_spill] sm:$0xff] %v18979_v60  ;;  %8127 = vperm.xlu0 %12295, %v23044_v55   ;;  %v4336_v61 = vmul.f32 0.020408163, %v18546_v57  ;;  %v23045_v33 = vld [vmem:[#allocation15_spill] sm:$0xff]  ;;  %v4729_v12 = vsub.f32 %v4333_v29, %v18897_v40  ;;  %v19014_v55 = vmul.f32 0.020408163, %v23046_v50  ;;  %v12552_v57 = vpop.eup %12551  ;;  %v19021_v49 = vmul.f32 %v18979_v60, %v18979_v60 }
 0x2ff   : > { %23043 = vst [vmem:[#allocation100_spill] sm:$0xff] %v18995_v38  ;;  %6954 = vperm.xlu1 %12296, %v23045_v33   ;;  %v19016_v13 = vpop.f32.mrb[160].mxu1  ;;  %v4928_v15 = vmax.f32 %v4730_v4, 0.0  ;;  %v4335_v10 = vmul.f32 0.020408163, %v18551_v44  ;;  %v5115_v40 = vld [vmem:[%s21702_s2 + $0x3e0] sm:$0xff]  ;;  %v19034_v4 = vpop.permute.xlu0 %6789  ;;  %v19038_v44 = vmul.f32 %v18995_v38, %v18995_v38  ;;  %v23053_v38 = vsub.f32 %v18663_v47, %v18648_v24 }
 0x300   : > { %23047 = vst [vmem:[#allocation15_spill] sm:$0xff] %v19014_v55  ;;  %23048 = vst [vmem:[#allocation52_spill] sm:$0xff] %v19016_v13  ;;  %v19026_v34 = vpop.f32.mrb[161].mxu1  ;;  %v8818_v29 = vmax.f32 %v8620_v32, 0.0  ;;  %v12779_v33 = vld [vmem:[%s21700_s0 + $0x220] sm:$0xff]  ;;  %v5116_v32 = vld [vmem:[%s21702_s2 + $0x3e8] sm:$0xff]  ;;  %v19048_v13 = vpop.permute.xlu1 %7962  ;;  %v4732_v25 = vsub.f32 %v4336_v61, %v18926_v17 }
 0x301   : > { %23049 = vst [vmem:[#allocation119_spill] sm:$0xff] %v19026_v34  ;;  %v19032_v63 = vmul.f32 %v12779_v33, %v18495_v39  ;;  %v23051_v60 = vld [vmem:[#allocation83_spill] sm:$0xff]  ;;  %v23052_v39 = vld [vmem:[#allocation60_spill] sm:$0xff]  ;;  %v5322_v33 = vadd.f32 1e-05, %v4926_v46  ;;  %v4937_v19 = vmax.f32 %v23053_v38, 0.0  ;;  %v19070_v47 = vpop.eup %12553  ;;  %v4731_v38 = vsub.f32 %v4335_v10, %v18941_v30 }
 0x302   : > { %v19046_v34 = vadd.f32 %v23051_v60, %v7433_v16  ;;  %6959 = vperm.xlu0 %12295, %v23052_v39   ;;  %v19055_v21 = vpop.f32.mrb[182].mxu0  ;;  %v5321_v50 = vadd.f32 1e-05, %v4925_v8  ;;  %v4927_v16 = vmax.f32 %v4729_v12, 0.0  ;;  %v19060_v60 = vmul.f32 %v12552_v57, %v5115_v40  ;;  %v19066_v46 = vpop.f32.mrb[162].mxu1  ;;  %v23058_v61 = vld [vmem:[#allocation103_spill] sm:$0xff] }
 0x303   : > { %23054 = vst [vmem:[#allocation83_spill] sm:$0xff] %v19055_v21  ;;  %8132 = vperm.xlu1 %12296, %v23055_v53   ;;  %v19064_v39 = vmul.f32 %v19014_v55, %v19014_v55  ;;  %v19068_v17 = vpop.f32.mrb[183].mxu0  ;;  %v5324_v24 = vadd.f32 1e-05, %v4928_v15  ;;  %v19074_v37 = vmul.f32 0.020408163, %v23058_v61  ;;  %v19076_v22 = vmul.f32 %v12550_v48, %v5116_v32  ;;  %v19080_v53 = vpop.eup %12555 }
 0x304   : > { %23056 = vst [vmem:[#allocation60_spill] sm:$0xff] %v19060_v60  ;;  %23057 = vst [vmem:[#allocation120_spill] sm:$0xff] %v19068_v17  ;;  %v19078_v8 = vpop.f32.mrb[163].mxu1  ;;  %v19082_v12 = vpack.c.bf16 %v8818_v29, %v8817_v11  ;;  %v12780_v57 = vld [vmem:[%s21700_s0 + $0x228] sm:$0xff]  ;;  %v23061_v40 = vld [vmem:[#allocation2_spill] sm:$0xff]  ;;  %v8622_v30 = vadd.f32 %v18570_v62, %v7434_v0  ;;  %v7968_v15 = vpop.permute.xlu0 %7967  ;;  %v8819_v48 = vmax.f32 %v19046_v34, 0.0  ;;  %v23062_v11 = vsub.f32 %v18800_v9, %v18227_v20 }
 0x305   : > { %23059 = vst [vmem:[#allocation103_spill] sm:$0xff] %v19074_v37  ;;  %23060 = vst [vmem:[#allocation121_spill] sm:$0xff] %v19076_v22  ;;  %v19088_v55 = vmul.f32 %v12780_v57, %v23061_v40  ;;  %v4338_v10 = vmul.f32 0.020408163, %v18578_v1  ;;  %v19093_v32 = vpop.permute.xlu1 %6794  ;;  %12561 = vrsqrt.f32 %v5322_v33  ;;  %v4930_v29 = vmax.f32 %v4732_v25, 0.0  ;;  %v19098_v17 = vpop.f32.mrb[184].mxu0 }
 0x306   : > { %8137 = vperm.xlu0 %12295, %v23062_v11   ;;  %v5333_v61 = vadd.f32 1e-05, %v4937_v19  ;;  %23063 = vst [vmem:[#allocation2_spill] sm:$0xff] %v19098_v17  ;;  %v12781_v62 = vld [vmem:[%s21700_s0 + $0x280] sm:$0xff]  ;;  %v23064_v0 = vld [vmem:[#allocation101_spill] sm:$0xff]  ;;  %12563 = vrsqrt.f32 %v5321_v50  ;;  %v23065_v20 = vsub.f32 %v18650_v14, %v18641_v26  ;;  %v19108_v33 = vpop.f32.mrb[164].mxu1  ;;  %v19112_v25 = vpop.eup %12557 }
 0x307   : > { %v7447_v1 = vmul.f32 %v12781_v62, %v18937_v52  ;;  %6964 = vperm.xlu1 %12296, %v23064_v0   ;;  %v5323_v34 = vadd.f32 1e-05, %v4927_v16  ;;  %v19110_v19 = vpop.f32.mrb[185].mxu0  ;;  %12565 = vrsqrt.f32 %v5324_v24  ;;  %v4929_v57 = vmax.f32 %v4731_v38, 0.0  ;;  %v19122_v50 = vld [vmem:[%s21703_s3 + $0x3d0] sm:$0xff]  ;;  %v19124_v26 = vpop.f32.mrb[165].mxu1 }
 0x308   : > { %v4938_v9 = vmax.f32 %v23065_v20, 0.0  ;;  %23066 = vst [vmem:[#allocation101_spill] sm:$0xff] %v19110_v19  ;;  %v4337_v40 = vmul.f32 0.020408163, %v18581_v35  ;;  %v19117_v52 = vmul.f32 %v19074_v37, %v19074_v37  ;;  %v8954_v14 = vld [vmem:[%s18076_s16 + $0x18] sm:$0xff]  ;;  %v8820_v16 = vmax.f32 %v8622_v30, 0.0  ;;  %v19131_v11 = vpop.permute.xlu0 %6799  ;;  %v19134_v0 = vpop.eup %12559 }
 0x309   : > { %v12782_v24 = vld [vmem:[%s21700_s0 + $0x288] sm:$0xff]  ;;  %v8635_v35 = vadd.f32 %v7968_v15, %v7447_v1  ;;  %v4734_v62 = vsub.f32 %v4338_v10, %v18971_v43  ;;  %9207 = vmatprep.mubr.f32.mxu1 %v8954_v14  ;;  %v12783_v20 = vld [vmem:[%s21700_s0 + $0x230] sm:$0xff]  ;;  %v23067_v37 = vld [vmem:[#allocation10_spill] sm:$0xff]  ;;  %v7973_v19 = vpop.permute.xlu1 %7972  ;;  %v5326_v21 = vadd.f32 1e-05, %v4930_v29  ;;  %12567 = vrsqrt.f32 %v5333_v61  ;;  %v19151_v14 = vpop.f32.mrb[186].mxu0 }
 0x30a   : > { %v7448_v38 = vmul.f32 %v12782_v24, %v18998_v59  ;;  %v19140_v30 = vmul.f32 %v12783_v20, %v23067_v37  ;;  %v23068_v17 = vld [vmem:[#allocation49_spill] sm:$0xff]  ;;  %v4340_v59 = vmul.f32 0.020408163, %v18599_v31  ;;  %v23069_v43 = vsub.f32 %v18808_v41, %v18275_v56  ;;  %v19149_v37 = vpop.f32.mrb[166].mxu1  ;;  %23070 = vst [vmem:[#allocation10_spill] sm:$0xff] %v19151_v14  ;;  %v19161_v61 = vpop.f32.mrb[187].mxu0 }
 0x30b   : > { %6969 = vperm.xlu0 %12295, %v23068_v17   ;;  %12569 = vrsqrt.f32 %v5323_v34  ;;  %v5334_v1 = vadd.f32 1e-05, %v4938_v9  ;;  %v19155_v17 = vadd.f32 %v18585_v7, %v19032_v63  ;;  %v5325_v31 = vadd.f32 1e-05, %v4929_v57  ;;  %v19159_v41 = vpop.f32.mrb[167].mxu1  ;;  %23071 = vst [vmem:[#allocation49_spill] sm:$0xff] %v19161_v61 }
 0x30c   : > { %v8636_v15 = vadd.f32 %v7973_v19, %v7448_v38  ;;  %8142 = vperm.xlu1 %12296, %v23069_v43   ;;  %v4733_v29 = vsub.f32 %v4337_v40, %v18992_v45  ;;  %v4339_v56 = vmul.f32 0.020408163, %v18604_v58  ;;  %v19163_v34 = vpack.c.bf16 %v8820_v16, %v8819_v48  ;;  %v7978_v24 = vpop.permute.xlu0 %7977  ;;  %v8953_v20 = vld [vmem:[%s18076_s16 + $0x10] sm:$0xff]  ;;  %v12784_v7 = vld [vmem:[%s21700_s0 + $0x238] sm:$0xff]  ;;  %v23072_v63 = vld [vmem:[#allocation106_spill] sm:$0xff] }
 0x30d   : > { %v8833_v9 = vmax.f32 %v8635_v35, 0.0  ;;  %v4932_v38 = vmax.f32 %v4734_v62, 0.0  ;;  %v19170_v57 = vmul.f32 %v12784_v7, %v23072_v63  ;;  %v19172_v45 = vpop.permute.xlu1 %6804  ;;  %v23073_v58 = vsub.f32 %v18816_v54, %v18308_v18  ;;  %v23074_v40 = vld [vmem:[#allocation30_spill] sm:$0xff]  ;;  %v19179_v35 = vpop.f32.mrb[188].mxu0  ;;  %9208 = vmatmul.mubr.f32.vlgmr.msra.gmra.mrb[198].mxu1 %v8953_v20  ;;  %v12785_v62 = vld [vmem:[%s21700_s0 + $0x290] sm:$0xff] }
 0x30e   : > { %v8834_v19 = vmax.f32 %v8636_v15, 0.0  ;;  %12571 = vrsqrt.f32 %v5326_v21  ;;  %v4736_v48 = vsub.f32 %v4340_v59, %v19021_v49  ;;  %v4342_v16 = vmul.f32 0.020408163, %v23074_v40  ;;  %23075 = vst [vmem:[#allocation106_spill] sm:$0xff] %v19179_v35  ;;  %v23076_v43 = vld [vmem:[#allocation68_spill] sm:$0xff]  ;;  %v19189_v21 = vpop.f32.mrb[168].mxu1 }
 0x30f   : > { %8147 = vperm.xlu0 %12295, %v23073_v58   ;;  %v7449_v15 = vmul.f32 %v12785_v62, %v19034_v4  ;;  %12573 = vrsqrt.f32 %v5334_v1  ;;  %v23077_v18 = vld [vmem:[#allocation64_spill] sm:$0xff]  ;;  %v19191_v49 = vpop.f32.mrb[189].mxu0  ;;  %v19193_v59 = vpop.eup %12561  ;;  %v4931_v63 = vmax.f32 %v4733_v29, 0.0  ;;  %v4735_v58 = vsub.f32 %v4339_v56, %v19038_v44  ;;  %v19200_v4 = vld [vmem:[%s21703_s3 + $0x3d8] sm:$0xff] }
 0x310   : > { %6974 = vperm.xlu1 %12296, %v23076_v43   ;;  %v12123_v7 = vpack.c.bf16 %v8834_v19, %v8833_v9  ;;  %v19187_v54 = vmul.f32 0.020408163, %v23077_v18  ;;  %23079 = vst [vmem:[#allocation68_spill] sm:$0xff] %v19191_v49  ;;  %12575 = vrsqrt.f32 %v5325_v31  ;;  %v19202_v1 = vpop.f32.mrb[169].mxu1  ;;  %v19204_v9 = vpop.eup %12563  ;;  %v23081_v19 = vld [vmem:[#allocation105_spill] sm:$0xff]  ;;  %v5117_v43 = vld [vmem:[%s21702_s2 + $0x3f0] sm:$0xff]  ;;  %v23086_v35 = vsub.f32 %v18834_v2, %v18319_v3 }
 0x311   : > { %23080 = vst [vmem:[#allocation64_spill] sm:$0xff] %v19202_v1  ;;  %v8624_v40 = vadd.f32 %v23081_v19, %v19088_v55  ;;  %v12786_v62 = vld [vmem:[%s21700_s0 + $0x298] sm:$0xff]  ;;  %v8637_v29 = vadd.f32 %v7978_v24, %v7449_v15  ;;  %v19212_v44 = vpop.permute.xlu0 %6809  ;;  %v5328_v56 = vadd.f32 1e-05, %v4932_v38  ;;  %v19217_v18 = vpop.eup %12565  ;;  %v12787_v55 = vld [vmem:[%s21700_s0 + $0x240] sm:$0xff]  ;;  %v4934_v24 = vmax.f32 %v4736_v48, 0.0 }
 0x312   : > { %23078 = vst [vmem:[#allocation30_spill] sm:$0xff] %v19187_v54  ;;  %v7450_v31 = vmul.f32 %v12786_v62, %v19093_v32  ;;  %12124 = vmatprep.subr.bf16.mxu0 %v12123_v7  ;;  %v23082_v19 = vld [vmem:[#allocation6_spill] sm:$0xff]  ;;  %v7983_v20 = vpop.permute.xlu1 %7982  ;;  %v23083_v32 = vld [vmem:[#allocation84_spill] sm:$0xff]  ;;  %v4738_v38 = vsub.f32 %v4342_v16, %v19064_v39  ;;  %v19229_v62 = vpop.f32.mrb[190].mxu0  ;;  %v4933_v3 = vmax.f32 %v4735_v58, 0.0  ;;  %v19247_v2 = vmul.f32 %v19080_v53, %v5117_v43 }
 0x313   : > { %v19223_v10 = vmul.f32 %v12787_v55, %v23082_v19  ;;  %12126 = vmatpush3.bf16.msra.mxu0 %v19082_v12  ;;  %6979 = vperm.xlu0 %12295, %v23083_v32   ;;  %v23084_v15 = vld [vmem:[#allocation42_spill] sm:$0xff]  ;;  %23085 = vst [vmem:[#allocation105_spill] sm:$0xff] %v19229_v62  ;;  %v23087_v61 = vld [vmem:[#allocation20_spill] sm:$0xff]  ;;  %v4544_v12 = vmul.f32 %v19187_v54, %v19187_v54  ;;  %v23088_v19 = vld [vmem:[#allocation31_spill] sm:$0xff]  ;;  %v19242_v48 = vpop.f32.mrb[170].mxu1  ;;  %v19244_v16 = vpop.f32.mrb[191].mxu0  ;;  %12577 = vrsqrt.f32 %v5328_v56 }
 0x314   : > { %v4341_v7 = vmul.f32 0.020408163, %v23084_v15  ;;  %v8638_v49 = vadd.f32 %v7983_v20, %v7450_v31  ;;  %8152 = vperm.xlu1 %12296, %v23086_v35   ;;  %v4346_v32 = vmul.f32 0.020408163, %v23088_v19  ;;  %v5135_v39 = vld [vmem:[%s21702_s2 + $0x480] sm:$0xff]  ;;  %23089 = vst [vmem:[#allocation6_spill] sm:$0xff] %v19242_v48  ;;  %v12568_v20 = vpop.eup %12567  ;;  %v23096_v53 = vsub.f32 %v18880_v51, %v23023_v23 }
 0x315   : > { %23090 = vst [vmem:[#allocation84_spill] sm:$0xff] %v19244_v16  ;;  %v5327_v31 = vadd.f32 1e-05, %v4931_v63  ;;  %23091 = vst [vmem:[#allocation42_spill] sm:$0xff] %v19247_v2  ;;  %v23092_v35 = vld [vmem:[#allocation69_spill] sm:$0xff]  ;;  %v19252_v55 = vpop.f32.mrb[171].mxu1  ;;  %v19254_v19 = vpop.eup %12569 }
 0x316   : > { %v19250_v15 = vmul.f32 0.020408163, %v23092_v35  ;;  %23094 = vst [vmem:[#allocation31_spill] sm:$0xff] %v19252_v55  ;;  %v8822_v54 = vmax.f32 %v8624_v40, 0.0  ;;  %v8835_v62 = vmax.f32 %v8637_v29, 0.0  ;;  %v8836_v14 = vmax.f32 %v8638_v49, 0.0  ;;  %v7988_v1 = vpop.permute.xlu0 %7987  ;;  %v19260_v63 = vpop.permute.xlu1 %6814 }
 0x317   : > { %v23095_v16 = vld [vmem:[#allocation37_spill] sm:$0xff]  ;;  %8157 = vperm.xlu0 %12295, %v23096_v53   ;;  %v5330_v58 = vadd.f32 1e-05, %v4934_v24  ;;  %v4936_v43 = vmax.f32 %v4738_v38, 0.0  ;;  %v4737_v35 = vsub.f32 %v4341_v7, %v19117_v52  ;;  %v12788_v49 = vld [vmem:[%s21700_s0 + $0x2a0] sm:$0xff]  ;;  %v4742_v56 = vsub.f32 %v4346_v32, %v4544_v12  ;;  %v19273_v55 = vpop.f32.mrb[172].mxu1 }
 0x318   : > { %23093 = vst [vmem:[#allocation20_spill] sm:$0xff] %v19250_v15  ;;  %v19258_v48 = vadd.f32 %v23095_v16, %v19140_v30  ;;  %v7451_v40 = vmul.f32 %v12788_v49, %v19131_v11  ;;  %v23097_v29 = vld [vmem:[#allocation18_spill] sm:$0xff]  ;;  %v12127_v30 = vpack.c.bf16 %v8836_v14, %v8835_v62  ;;  %v19271_v16 = vmul.f32 %v12568_v20, %v5135_v39  ;;  %v19275_v51 = vpop.f32.mrb[192].mxu0  ;;  %v19277_v23 = vpop.eup %12571  ;;  %v23099_v38 = vld [vmem:[#allocation81_spill] sm:$0xff]  ;;  %v12789_v32 = vld [vmem:[%s21700_s0 + $0x248] sm:$0xff] }
 0x319   : > { %6984 = vperm.xlu1 %12296, %v23097_v29   ;;  %23098 = vst [vmem:[#allocation69_spill] sm:$0xff] %v19275_v51  ;;  %12579 = vrsqrt.f32 %v5327_v31  ;;  %v5329_v52 = vadd.f32 1e-05, %v4933_v3  ;;  %v4543_v24 = vmul.f32 %v19250_v15, %v19250_v15  ;;  %v4345_v7 = vmul.f32 0.020408163, %v23099_v38  ;;  %v19282_v11 = vpop.f32.mrb[173].mxu1  ;;  %v12574_v14 = vpop.eup %12573 }
 0x31a   : > { %23100 = vst [vmem:[#allocation37_spill] sm:$0xff] %v19282_v11  ;;  %v19284_v53 = vpop.f32.mrb[193].mxu0  ;;  %v23102_v62 = vmax.f32 %v19155_v17, 0.0  ;;  %v23103_v39 = vld [vmem:[#allocation13_spill] sm:$0xff]  ;;  %v12790_v31 = vld [vmem:[%s21700_s0 + $0x2a8] sm:$0xff]  ;;  %v8639_v49 = vadd.f32 %v7988_v1, %v7451_v40  ;;  %12128 = vmatprep.subr.bf16.mxu0 %v12127_v30  ;;  %v19298_v29 = vpop.permute.xlu0 %6819  ;;  %v4935_v40 = vmax.f32 %v4737_v35, 0.0  ;;  %v23106_v15 = vsub.f32 %v18911_v28, %v23029_v42 }
 0x31b   : > { %23101 = vst [vmem:[#allocation18_spill] sm:$0xff] %v19284_v53  ;;  %v7440_v20 = vmul.f32 %v12789_v32, %v23103_v39  ;;  %v7452_v3 = vmul.f32 %v12790_v31, %v19172_v45  ;;  %v5136_v17 = vld [vmem:[%s21702_s2 + $0x488] sm:$0xff]  ;;  %v7993_v39 = vpop.permute.xlu1 %7992  ;;  %12130 = vmatpush3.bf16.msra.mxu0 %v19163_v34  ;;  %v23105_v45 = vld [vmem:[#allocation9_spill] sm:$0xff]  ;;  %v5332_v1 = vadd.f32 1e-05, %v4936_v43  ;;  %12581 = vrsqrt.f32 %v5330_v58  ;;  %v19322_v34 = vpop.f32.mrb[174].mxu1 }
 0x31c   : > { %v19288_v12 = vpack.c.bf16 %v8822_v54, %v23102_v62  ;;  %v19303_v54 = vpop.eup %12575  ;;  %v23104_v62 = vld [vmem:[#allocation86_spill] sm:$0xff]  ;;  %6989 = vperm.xlu0 %12295, %v23105_v45   ;;  %v5118_v30 = vld [vmem:[%s21702_s2 + $0x3f8] sm:$0xff]  ;;  %v4940_v38 = vmax.f32 %v4742_v56, 0.0  ;;  %23108 = vst [vmem:[#allocation81_spill] sm:$0xff] %v19322_v34  ;;  %v19324_v45 = vpop.f32.mrb[194].mxu0  ;;  %v12791_v43 = vld [vmem:[%s21700_s0 + $0x250] sm:$0xff]  ;;  %12583 = vrsqrt.f32 %v5329_v52  ;;  %v4741_v28 = vsub.f32 %v4345_v7, %v4543_v24 }
 0x31d   : > { %v19308_v32 = vadd.f32 %v23104_v62, %v19170_v57  ;;  %v8640_v31 = vadd.f32 %v7993_v39, %v7452_v3  ;;  %8162 = vperm.xlu1 %12296, %v23106_v15   ;;  %v23107_v57 = vld [vmem:[#allocation32_spill] sm:$0xff]  ;;  %23109 = vst [vmem:[#allocation13_spill] sm:$0xff] %v19324_v45  ;;  %v23110_v35 = vld [vmem:[#allocation41_spill] sm:$0xff]  ;;  %v19332_v42 = vmul.f32 %v12574_v14, %v5136_v17  ;;  %v19334_v15 = vpop.f32.mrb[175].mxu1  ;;  %v19336_v58 = vpop.f32.mrb[195].mxu0  ;;  %v8837_v56 = vmax.f32 %v8639_v49, 0.0 }
 0x31e   : > { %v19320_v62 = vmul.f32 %v19271_v16, %v23107_v57  ;;  %v19330_v3 = vmul.f32 %v12791_v43, %v23110_v35  ;;  %23111 = vst [vmem:[#allocation86_spill] sm:$0xff] %v19334_v15  ;;  %23112 = vst [vmem:[#allocation9_spill] sm:$0xff] %v19336_v58  ;;  %v7998_v57 = vpop.permute.xlu0 %7997  ;;  %v19339_v45 = vmul.f32 %v19070_v47, %v5118_v30  ;;  %v23114_v53 = vld [vmem:[#allocation55_spill] sm:$0xff]  ;;  %12585 = vrsqrt.f32 %v5332_v1  ;;  %v23117_v7 = vld [vmem:[#allocation104_spill] sm:$0xff]  ;;  %v19353_v49 = vpop.eup %12577 }
 0x31f   : > { %v8838_v39 = vmax.f32 %v8640_v31, 0.0  ;;  %v19342_v51 = vmul.f32 0.020408163, %v23114_v53  ;;  %v8824_v43 = vmax.f32 %v19308_v32, 0.0  ;;  %v19345_v35 = vpop.permute.xlu1 %6824  ;;  %v23116_v52 = vsub.f32 %v18976_v27, %v18472_v5  ;;  %v23119_v47 = vld [vmem:[#allocation40_spill] sm:$0xff]  ;;  %v23120_v30 = vld [vmem:[#allocation77_spill] sm:$0xff] }
 0x320   : > { %23113 = vst [vmem:[#allocation32_spill] sm:$0xff] %v19339_v45  ;;  %v5331_v24 = vadd.f32 1e-05, %v4935_v40  ;;  %v19351_v14 = vmul.f32 0.020408163, %v23117_v7  ;;  %v19357_v17 = vadd.f32 %v23119_v47, %v19223_v10  ;;  %v12792_v53 = vld [vmem:[%s21700_s0 + $0x2b0] sm:$0xff] }
 0x321   : > { %23115 = vst [vmem:[#allocation41_spill] sm:$0xff] %v19342_v51  ;;  %8167 = vperm.xlu0 %12295, %v23116_v52   ;;  %v7453_v32 = vmul.f32 %v12792_v53, %v19212_v44  ;;  %6994 = vperm.xlu1 %12296, %v23120_v30   ;;  %v12131_v5 = vpack.c.bf16 %v8838_v39, %v8837_v56  ;;  %v5336_v27 = vadd.f32 1e-05, %v4940_v38  ;;  %v19364_v1 = vpop.f32.mrb[176].mxu1  ;;  %v4939_v40 = vmax.f32 %v4741_v28, 0.0  ;;  %v23122_v31 = vld [vmem:[#allocation5_spill] sm:$0xff] }
 0x322   : > { %23118 = vst [vmem:[#allocation55_spill] sm:$0xff] %v19351_v14  ;;  %23121 = vst [vmem:[#allocation104_spill] sm:$0xff] %v19364_v1  ;;  %v19367_v52 = vmul.f32 0.020408163, %v23122_v31  ;;  %v23123_v7 = vld [vmem:[#allocation54_spill] sm:$0xff]  ;;  %v23124_v10 = vld [vmem:[#allocation33_spill] sm:$0xff]  ;;  %v19385_v39 = vpop.permute.xlu0 %6829  ;;  %v4546_v31 = vmul.f32 %v19342_v51, %v19342_v51  ;;  %12587 = vrsqrt.f32 %v5331_v24 }
 0x323   : > { %v19370_v58 = vmul.f32 0.020408163, %v23123_v7  ;;  %v19374_v47 = vmul.f32 %v19332_v42, %v23124_v10  ;;  %v19376_v15 = vpop.f32.mrb[177].mxu1  ;;  %v23126_v44 = vld [vmem:[#allocation63_spill] sm:$0xff]  ;;  %v12793_v38 = vld [vmem:[%s21700_s0 + $0x2b8] sm:$0xff]  ;;  %v8641_v56 = vadd.f32 %v7998_v57, %v7453_v32  ;;  %12132 = vmatprep.subr.bf16.mxu0 %v12131_v5  ;;  %v5121_v30 = vld [vmem:[%s21702_s2 + $0x410] sm:$0xff]  ;;  %v8003_v10 = vpop.permute.xlu1 %8002  ;;  %12589 = vrsqrt.f32 %v5336_v27 }
 0x324   : > { %23125 = vst [vmem:[#allocation40_spill] sm:$0xff] %v19376_v15  ;;  %v19379_v53 = vadd.f32 %v23126_v44, %v7440_v20  ;;  %v7454_v28 = vmul.f32 %v12793_v38, %v19260_v63  ;;  %v19392_v7 = vpop.f32.mrb[196].mxu0  ;;  %v19394_v20 = vpop.eup %12579  ;;  %12134 = vmatpush3.bf16.msra.mxu0 %v19288_v12  ;;  %v4545_v63 = vmul.f32 %v19351_v14, %v19351_v14  ;;  %v23128_v57 = vld [vmem:[#allocation75_spill] sm:$0xff]  ;;  %v23130_v5 = vld [vmem:[#allocation46_spill] sm:$0xff]  ;;  %v23133_v51 = vmax.f32 %v19258_v48, 0.0  ;;  %v12794_v12 = vld [vmem:[%s21700_s0 + $0x258] sm:$0xff] }
 0x325   : > { %23127 = vst [vmem:[#allocation77_spill] sm:$0xff] %v19392_v7  ;;  %6999 = vperm.xlu0 %12295, %v19060_v60   ;;  %v19401_v32 = vmul.f32 0.020408163, %v23128_v57  ;;  %v19404_v44 = vmul.f32 0.020408163, %v23130_v5  ;;  %v19406_v38 = vpop.f32.mrb[197].mxu0 }
 0x326   : > { %23132 = vst [vmem:[#allocation33_spill] sm:$0xff] %v19406_v38  ;;  %v12137_v7 = vpack.c.bf16 %v8824_v43, %v23133_v51  ;;  %v23134_v60 = vld [vmem:[#allocation79_spill] sm:$0xff]  ;;  %v8825_v14 = vmax.f32 %v19357_v17, 0.0  ;;  %v8642_v15 = vadd.f32 %v8003_v10, %v7454_v28  ;;  %v23135_v57 = vld [vmem:[#allocation89_spill] sm:$0xff]  ;;  %v19420_v5 = vpop.f32.mrb[178].mxu1  ;;  %v12795_v48 = vld [vmem:[%s21700_s0 + $0x260] sm:$0xff]  ;;  %v19431_v17 = vpop.eup %12581 }
 0x327   : > { %23129 = vst [vmem:[#allocation5_spill] sm:$0xff] %v19401_v32  ;;  %23131 = vst [vmem:[#allocation54_spill] sm:$0xff] %v19404_v44  ;;  %v19414_v24 = vmul.f32 %v12794_v12, %v23134_v60  ;;  %v23136_v1 = vsub.f32 %v19007_v6, %v23135_v57  ;;  %v23138_v51 = vld [vmem:[#allocation85_spill] sm:$0xff]  ;;  %v5335_v38 = vadd.f32 1e-05, %v4939_v40  ;;  %v19429_v60 = vmul.f32 %v19134_v0, %v5121_v30  ;;  %v8008_v10 = vpop.permute.xlu0 %8007  ;;  %v19440_v27 = vpop.eup %12583  ;;  %v23142_v30 = vld [vmem:[#allocation87_spill] sm:$0xff] }
 0x328   : > { %23137 = vst [vmem:[#allocation63_spill] sm:$0xff] %v19420_v5  ;;  %v19426_v43 = vmul.f32 %v12795_v48, %v23138_v51  ;;  %v8826_v28 = vmax.f32 %v19379_v53, 0.0  ;;  %v8839_v6 = vmax.f32 %v8641_v56, 0.0  ;;  %v4744_v12 = vsub.f32 %v19367_v52, %v4546_v31  ;;  %v5122_v57 = vld [vmem:[%s21702_s2 + $0x418] sm:$0xff]  ;;  %v19438_v48 = vpop.f32.mrb[179].mxu1  ;;  %v19442_v40 = vpop.permute.xlu1 %6834 }
 0x329   : > { %8172 = vperm.xlu1 %12296, %v23136_v1   ;;  %23139 = vst [vmem:[#allocation75_spill] sm:$0xff] %v19429_v60  ;;  %v8840_v1 = vmax.f32 %v8642_v15, 0.0  ;;  %23140 = vst [vmem:[#allocation46_spill] sm:$0xff] %v19438_v48  ;;  %v23141_v0 = vsub.f32 %v19122_v50, %v18565_v36  ;;  %v4743_v53 = vsub.f32 %v19370_v58, %v4545_v63  ;;  %v19451_v15 = vld [vmem:[%s21703_s3 + $0x400] sm:$0xff]  ;;  %v4350_v31 = vmul.f32 0.020408163, %v23142_v30  ;;  %v19469_v5 = vpop.eup %12585 }
 0x32a   : > { %v4548_v52 = vmul.f32 %v19401_v32, %v19401_v32  ;;  %v4547_v56 = vmul.f32 %v19404_v44, %v19404_v44  ;;  %v12796_v36 = vld [vmem:[%s21700_s0 + $0x2c0] sm:$0xff]  ;;  %v23143_v63 = vld [vmem:[#allocation93_spill] sm:$0xff]  ;;  %v19467_v32 = vpop.f32.mrb[180].mxu1  ;;  %v23147_v30 = vld [vmem:[#allocation48_spill] sm:$0xff]  ;;  %12591 = vrsqrt.f32 %v5335_v38  ;;  %v19476_v34 = vmul.f32 %v19112_v25, %v5122_v57 }
 0x32b   : > { %8177 = vperm.xlu0 %12295, %v23141_v0   ;;  %v7455_v50 = vmul.f32 %v12796_v36, %v19298_v29  ;;  %v12135_v58 = vpack.c.bf16 %v8840_v1, %v8839_v6  ;;  %v4349_v51 = vmul.f32 0.020408163, %v23143_v63  ;;  %v23144_v0 = vld [vmem:[#allocation16_spill] sm:$0xff]  ;;  %23146 = vst [vmem:[#allocation89_spill] sm:$0xff] %v19467_v32  ;;  %v19473_v44 = vadd.f32 %v23147_v30, %v19330_v3  ;;  %v23149_v29 = vld [vmem:[#allocation82_spill] sm:$0xff]  ;;  %v19481_v6 = vpop.f32.mrb[181].mxu1 }
 0x32c   : > { %v19465_v48 = vmul.f32 0.020408163, %v23144_v0  ;;  %23148 = vst [vmem:[#allocation85_spill] sm:$0xff] %v19476_v34  ;;  %v19479_v36 = vmul.f32 0.020408163, %v23149_v29  ;;  %23151 = vst [vmem:[#allocation93_spill] sm:$0xff] %v19481_v6  ;;  %v12141_v57 = vpack.c.bf16 %v8826_v28, %v8825_v14  ;;  %v8013_v32 = vpop.permute.xlu1 %8012 }
 0x32d   : > { %7004 = vperm.xlu1 %12296, %v19076_v22   ;;  %v12797_v1 = vld [vmem:[%s21700_s0 + $0x2c8] sm:$0xff]  ;;  %v8643_v0 = vadd.f32 %v8008_v10, %v7455_v50  ;;  %12136 = vmatprep.subr.bf16.mxu0 %v12135_v58  ;;  %v19487_v22 = vpop.permute.xlu0 %6839  ;;  %v4942_v3 = vmax.f32 %v4744_v12, 0.0  ;;  %v23152_v38 = vld [vmem:[#allocation53_spill] sm:$0xff]  ;;  %v23153_v29 = vld [vmem:[#allocation50_spill] sm:$0xff]  ;;  %v4746_v10 = vsub.f32 %v4350_v31, %v4548_v52  ;;  %v23154_v12 = vsub.f32 %v19200_v4, %v23087_v61 }
 0x32e   : > { %23145 = vst [vmem:[#allocation79_spill] sm:$0xff] %v19465_v48  ;;  %23150 = vst [vmem:[#allocation87_spill] sm:$0xff] %v19479_v36  ;;  %v7456_v63 = vmul.f32 %v12797_v1, %v19345_v35  ;;  %v12798_v30 = vld [vmem:[%s21700_s0 + $0x268] sm:$0xff]  ;;  %12138 = vmatpush3.bf16.msra.mxu0 %v12137_v7  ;;  %v4941_v35 = vmax.f32 %v4743_v53, 0.0  ;;  %v4745_v58 = vsub.f32 %v4349_v51, %v4547_v56  ;;  %v5123_v14 = vld [vmem:[%s21702_s2 + $0x420] sm:$0xff]  ;;  %v19507_v7 = vpop.f32.mrb[182].mxu1 }
 0x32f   : > { %v19495_v6 = vmul.f32 %v12798_v30, %v23153_v29  ;;  %7009 = vperm.xlu0 %12295, %v19247_v2   ;;  %v4550_v28 = vmul.f32 %v19465_v48, %v19465_v48  ;;  %v23155_v1 = vld [vmem:[#allocation44_spill] sm:$0xff]  ;;  %23156 = vst [vmem:[#allocation16_spill] sm:$0xff] %v19507_v7  ;;  %v19509_v29 = vpop.eup %12587  ;;  %v4549_v61 = vmul.f32 %v19479_v36, %v19479_v36  ;;  %v23157_v4 = vld [vmem:[#allocation38_spill] sm:$0xff]  ;;  %v23158_v52 = vld [vmem:[#allocation17_spill] sm:$0xff]  ;;  %v19518_v31 = vpop.f32.mrb[183].mxu1  ;;  %v4944_v11 = vmax.f32 %v4746_v10, 0.0 }
 0x330   : > { %v8644_v50 = vadd.f32 %v8013_v32, %v7456_v63  ;;  %v4352_v30 = vmul.f32 0.020408163, %v23155_v1  ;;  %v8827_v32 = vmax.f32 %v19473_v44, 0.0  ;;  %v4351_v53 = vmul.f32 0.020408163, %v23157_v4  ;;  %23160 = vst [vmem:[#allocation82_spill] sm:$0xff] %v19518_v31  ;;  %v19522_v2 = vpop.eup %12589 }
 0x331   : > { %8182 = vperm.xlu1 %12296, %v23154_v12   ;;  %v19516_v56 = vmul.f32 0.020408163, %v23158_v52  ;;  %v23161_v51 = vld [vmem:[#allocation108_spill] sm:$0xff]  ;;  %v8841_v12 = vmax.f32 %v8643_v0, 0.0  ;;  %v8018_v25 = vpop.permute.xlu0 %8017  ;;  %v5338_v48 = vadd.f32 1e-05, %v4942_v3  ;;  %v19530_v52 = vpop.permute.xlu1 %6844 }
 0x332   : > { %v8630_v63 = vadd.f32 %v23161_v51, %v19414_v24  ;;  %v8842_v1 = vmax.f32 %v8644_v50, 0.0  ;;  %v12799_v44 = vld [vmem:[%s21700_s0 + $0x270] sm:$0xff]  ;;  %v23162_v36 = vld [vmem:[#allocation23_spill] sm:$0xff]  ;;  %v5337_v31 = vadd.f32 1e-05, %v4941_v35  ;;  %v19534_v24 = vmul.f32 %v19204_v9, %v5123_v14  ;;  %v19546_v10 = vpop.f32.mrb[184].mxu1 }
 0x333   : > { %23159 = vst [vmem:[#allocation48_spill] sm:$0xff] %v19516_v56  ;;  %v19528_v4 = vmul.f32 %v12799_v44, %v23162_v36  ;;  %v23163_v7 = vld [vmem:[#allocation11_spill] sm:$0xff]  ;;  %v12800_v0 = vld [vmem:[%s21700_s0 + $0x2d0] sm:$0xff]  ;;  %v4943_v36 = vmax.f32 %v4745_v58, 0.0  ;;  %v4748_v35 = vsub.f32 %v4352_v30, %v4550_v28  ;;  %23165 = vst [vmem:[#allocation50_spill] sm:$0xff] %v19546_v10  ;;  %v4747_v9 = vsub.f32 %v4351_v53, %v4549_v61 }
 0x334   : > { %7019 = vperm.xlu0 %12295, %v23163_v7   ;;  %23164 = vst [vmem:[#allocation53_spill] sm:$0xff] %v19534_v24  ;;  %v7457_v3 = vmul.f32 %v12800_v0, %v19385_v39  ;;  %v12139_v50 = vpack.c.bf16 %v8842_v1, %v8841_v12  ;;  %v19544_v51 = vld [vmem:[%s21703_s3 + $0x408] sm:$0xff]  ;;  %v4552_v39 = vmul.f32 %v19516_v56, %v19516_v56  ;;  %v23166_v7 = vld [vmem:[#allocation29_spill] sm:$0xff]  ;;  %v23168_v58 = vld [vmem:[#allocation110_spill] sm:$0xff]  ;;  %v19557_v1 = vpop.f32.mrb[185].mxu1  ;;  %v8828_v0 = vmax.f32 %v8630_v63, 0.0  ;;  %v19565_v56 = vpop.eup %12591 }
 0x335   : > { %7014 = vperm.xlu1 %12296, %v19339_v45   ;;  %v5124_v14 = vld [vmem:[%s21702_s2 + $0x428] sm:$0xff]  ;;  %v19554_v44 = vmul.f32 0.020408163, %v23166_v7  ;;  %v4354_v12 = vmul.f32 0.020408163, %v23168_v58  ;;  %23169 = vst [vmem:[#allocation38_spill] sm:$0xff] %v19557_v1  ;;  %v19563_v53 = vpop.permute.xlu0 %6849  ;;  %12593 = vrsqrt.f32 %v5338_v48  ;;  %v8023_v58 = vpop.permute.xlu1 %8022 }
 0x336   : > { %v12801_v28 = vld [vmem:[%s21700_s0 + $0x2d8] sm:$0xff]  ;;  %v8645_v61 = vadd.f32 %v8018_v25, %v7457_v3  ;;  %12140 = vmatprep.subr.bf16.mxu0 %v12139_v50  ;;  %v23170_v7 = vld [vmem:[#allocation114_spill] sm:$0xff]  ;;  %12595 = vrsqrt.f32 %v5337_v31  ;;  %v5340_v63 = vadd.f32 1e-05, %v4944_v11  ;;  %v23172_v3 = vld [vmem:[#allocation91_spill] sm:$0xff]  ;;  %v4946_v48 = vmax.f32 %v4748_v35, 0.0 }
 0x337   : > { %23167 = vst [vmem:[#allocation44_spill] sm:$0xff] %v19554_v44  ;;  %v7458_v30 = vmul.f32 %v12801_v28, %v19442_v40  ;;  %v19569_v45 = vadd.f32 %v23170_v7, %v19426_v43  ;;  %12142 = vmatpush3.bf16.msra.mxu0 %v12141_v57  ;;  %v23171_v1 = vld [vmem:[#allocation62_spill] sm:$0xff]  ;;  %v5339_v50 = vadd.f32 1e-05, %v4943_v36  ;;  %v19576_v28 = vmul.f32 %v19193_v59, %v5124_v14  ;;  %v19578_v10 = vpop.f32.mrb[186].mxu1  ;;  %v23174_v31 = vld [vmem:[#allocation112_spill] sm:$0xff] }
 0x338   : > { %7029 = vperm.xlu0 %12295, %v19429_v60   ;;  %v6308_v40 = vsub.f32 %v19544_v51, %v23171_v1  ;;  %v4945_v43 = vmax.f32 %v4747_v9, 0.0  ;;  %v4551_v57 = vmul.f32 %v19554_v44, %v19554_v44  ;;  %v4750_v7 = vsub.f32 %v4354_v12, %v4552_v39  ;;  %v19583_v60 = vpop.f32.mrb[187].mxu1  ;;  %v5125_v59 = vld [vmem:[%s21702_s2 + $0x430] sm:$0xff]  ;;  %v12802_v9 = vld [vmem:[%s21700_s0 + $0x278] sm:$0xff] }
 0x339   : > { %v8646_v25 = vadd.f32 %v8023_v58, %v7458_v30  ;;  %7024 = vperm.xlu1 %12296, %v23172_v3   ;;  %23173 = vst [vmem:[#allocation17_spill] sm:$0xff] %v19576_v28  ;;  %v4353_v11 = vmul.f32 0.020408163, %v23174_v31  ;;  %v12145_v51 = vpack.c.bf16 %v8828_v0, %v8827_v32  ;;  %v8843_v1 = vmax.f32 %v8645_v61, 0.0  ;;  %v8028_v58 = vpop.permute.xlu0 %8027  ;;  %v23175_v36 = vld [vmem:[#allocation36_spill] sm:$0xff]  ;;  %v23177_v14 = vld [vmem:[#allocation117_spill] sm:$0xff]  ;;  %v19598_v32 = vpop.permute.xlu1 %6854 }
 0x33a   : > { %v19589_v35 = vmul.f32 0.020408163, %v23175_v36  ;;  %v19595_v39 = vmul.f32 %v12802_v9, %v23177_v14  ;;  %v8829_v12 = vmax.f32 %v19569_v45, 0.0  ;;  %v23178_v0 = vsub.f32 %v19451_v15, %v23152_v38  ;;  %v23179_v61 = vld [vmem:[#allocation47_spill] sm:$0xff]  ;;  %v23181_v3 = vld [vmem:[#allocation66_spill] sm:$0xff]  ;;  %v19613_v44 = vpop.f32.mrb[188].mxu1 }
 0x33b   : > { %v8844_v30 = vmax.f32 %v8646_v25, 0.0  ;;  %12597 = vrsqrt.f32 %v5340_v63  ;;  %v19604_v25 = vmul.f32 0.020408163, %v23179_v61  ;;  %v8632_v31 = vadd.f32 %v23181_v3, %v19495_v6  ;;  %v12803_v36 = vld [vmem:[%s21700_s0 + $0x2e0] sm:$0xff]  ;;  %v5126_v6 = vld [vmem:[%s21702_s2 + $0x438] sm:$0xff]  ;;  %v19621_v61 = vpop.f32.mrb[189].mxu1 }
 0x33c   : > { %23176 = vst [vmem:[#allocation108_spill] sm:$0xff] %v19589_v35  ;;  %8207 = vperm.xlu0 %12295, %v23178_v0   ;;  %v7459_v9 = vmul.f32 %v12803_v36, %v19487_v22  ;;  %v5342_v14 = vadd.f32 1e-05, %v4946_v48  ;;  %v5341_v15 = vadd.f32 1e-05, %v4945_v43  ;;  %v19616_v38 = vmul.f32 %v19254_v19, %v5125_v59  ;;  %v12804_v22 = vld [vmem:[%s21700_s0 + $0x2e8] sm:$0xff] }
 0x33d   : > { %23180 = vst [vmem:[#allocation23_spill] sm:$0xff] %v19604_v25  ;;  %7034 = vperm.xlu1 %12296, %v19476_v34   ;;  %v12143_v45 = vpack.c.bf16 %v8844_v30, %v8843_v1  ;;  %v4948_v63 = vmax.f32 %v4750_v7, 0.0  ;;  %v4749_v0 = vsub.f32 %v4353_v11, %v4551_v57  ;;  %v7460_v48 = vmul.f32 %v12804_v22, %v19530_v52  ;;  %v19627_v43 = vpop.permute.xlu0 %6859  ;;  %v5127_v19 = vld [vmem:[%s21702_s2 + $0x440] sm:$0xff]  ;;  %v23183_v7 = vld [vmem:[#allocation28_spill] sm:$0xff]  ;;  %v8033_v30 = vpop.permute.xlu1 %8032  ;;  %v23185_v3 = vld [vmem:[#allocation73_spill] sm:$0xff] }
 0x33e   : > { %23182 = vst [vmem:[#allocation11_spill] sm:$0xff] %v19616_v38  ;;  %v8647_v1 = vadd.f32 %v8028_v58, %v7459_v9  ;;  %v4554_v57 = vmul.f32 %v19589_v35, %v19589_v35  ;;  %v4356_v11 = vmul.f32 0.020408163, %v23183_v7  ;;  %12599 = vrsqrt.f32 %v5339_v50  ;;  %v23184_v58 = vld [vmem:[#allocation96_spill] sm:$0xff]  ;;  %v19647_v50 = vpop.f32.mrb[190].mxu1  ;;  %v23188_v35 = vld [vmem:[#allocation118_spill] sm:$0xff] }
 0x33f   : > { %12144 = vmatprep.subr.bf16.mxu0 %v12143_v45  ;;  %v4553_v52 = vmul.f32 %v19604_v25, %v19604_v25  ;;  %v4355_v59 = vmul.f32 0.020408163, %v23184_v58  ;;  %v19640_v36 = vmul.f32 0.020408163, %v23185_v3  ;;  %v19642_v9 = vpop.eup %12593  ;;  %v8830_v45 = vmax.f32 %v8632_v31, 0.0  ;;  %v19658_v31 = vpop.f32.mrb[191].mxu1 }
 0x340   : > { %12146 = vmatpush3.bf16.msra.mxu0 %v12145_v51  ;;  %7039 = vperm.xlu0 %12295, %v19534_v24   ;;  %v8648_v22 = vadd.f32 %v8033_v30, %v7460_v48  ;;  %12601 = vrsqrt.f32 %v5342_v14  ;;  %v19645_v7 = vmul.f32 %v19217_v18, %v5126_v6  ;;  %v19649_v51 = vpop.eup %12595  ;;  %v19653_v25 = vadd.f32 %v23188_v35, %v19528_v4  ;;  %v5128_v30 = vld [vmem:[%s21702_s2 + $0x448] sm:$0xff] }
 0x341   : > { %23186 = vst [vmem:[#allocation29_spill] sm:$0xff] %v19640_v36  ;;  %8212 = vperm.xlu1 %12296, %v6308_v40   ;;  %12603 = vrsqrt.f32 %v5341_v15  ;;  %v4947_v58 = vmax.f32 %v4749_v0, 0.0  ;;  %v19656_v3 = vmul.f32 %v19303_v54, %v5127_v19  ;;  %v8845_v40 = vmax.f32 %v8647_v1, 0.0  ;;  %v8038_v48 = vpop.permute.xlu0 %8037  ;;  %v19663_v24 = vpop.permute.xlu1 %6864  ;;  %v23190_v35 = vld [vmem:[#allocation51_spill] sm:$0xff] }
 0x342   : > { %23187 = vst [vmem:[#allocation110_spill] sm:$0xff] %v19645_v7  ;;  %v8846_v14 = vmax.f32 %v8648_v22, 0.0  ;;  %v5344_v18 = vadd.f32 1e-05, %v4948_v63  ;;  %v4752_v6 = vsub.f32 %v4356_v11, %v4554_v57  ;;  %v4751_v4 = vsub.f32 %v4355_v59, %v4553_v52  ;;  %v23192_v0 = vld [vmem:[#allocation3_spill] sm:$0xff]  ;;  %v12805_v63 = vld [vmem:[%s21700_s0 + $0x2f0] sm:$0xff] }
 0x343   : > { %23189 = vst [vmem:[#allocation114_spill] sm:$0xff] %v19656_v3  ;;  %v4556_v54 = vmul.f32 %v19640_v36, %v19640_v36  ;;  %v19669_v15 = vmul.f32 0.020408163, %v23190_v35  ;;  %v4358_v1 = vmul.f32 0.020408163, %v23192_v0  ;;  %v12149_v19 = vpack.c.bf16 %v8830_v45, %v8829_v12  ;;  %v23193_v22 = vld [vmem:[#allocation21_spill] sm:$0xff] }
 0x344   : > { %7049 = vperm.xlu0 %12295, %v19616_v38   ;;  %v7461_v57 = vmul.f32 %v12805_v63, %v19563_v53  ;;  %v12147_v11 = vpack.c.bf16 %v8846_v14, %v8845_v40  ;;  %v19678_v52 = vmul.f32 0.020408163, %v23193_v22  ;;  %v19680_v59 = vpop.f32.mrb[192].mxu1  ;;  %v8831_v35 = vmax.f32 %v19653_v25, 0.0  ;;  %v12806_v40 = vld [vmem:[%s21700_s0 + $0x2f8] sm:$0xff] }
 0x345   : > { %23191 = vst [vmem:[#allocation62_spill] sm:$0xff] %v19669_v15  ;;  %7044 = vperm.xlu1 %12296, %v19576_v28   ;;  %23195 = vst [vmem:[#allocation112_spill] sm:$0xff] %v19680_v59  ;;  %v19682_v36 = vpop.eup %12597  ;;  %v8634_v12 = vadd.f32 %v19048_v13, %v19595_v39  ;;  %v5343_v45 = vadd.f32 1e-05, %v4947_v58  ;;  %v19688_v0 = vmul.f32 %v19277_v23, %v5128_v30  ;;  %v19690_v53 = vpop.f32.mrb[193].mxu1  ;;  %12605 = vrsqrt.f32 %v5344_v18  ;;  %v5129_v13 = vld [vmem:[%s21702_s2 + $0x450] sm:$0xff] }
 0x346   : > { %23194 = vst [vmem:[#allocation91_spill] sm:$0xff] %v19678_v52  ;;  %v7462_v14 = vmul.f32 %v12806_v40, %v19598_v32  ;;  %v8649_v63 = vadd.f32 %v8038_v48, %v7461_v57  ;;  %12148 = vmatprep.subr.bf16.mxu0 %v12147_v11  ;;  %v19696_v22 = vpop.permute.xlu0 %6869  ;;  %v4950_v25 = vmax.f32 %v4752_v6, 0.0  ;;  %v8043_v23 = vpop.permute.xlu1 %8042  ;;  %v4949_v39 = vmax.f32 %v4751_v4, 0.0  ;;  %v23197_v32 = vld [vmem:[#allocation12_spill] sm:$0xff]  ;;  %v5131_v18 = vld [vmem:[%s21702_s2 + $0x460] sm:$0xff] }
 0x347   : > { %23196 = vst [vmem:[#allocation36_spill] sm:$0xff] %v19688_v0  ;;  %12150 = vmatpush3.bf16.msra.mxu0 %v12149_v19  ;;  %v4555_v58 = vmul.f32 %v19669_v15, %v19669_v15  ;;  %v4754_v30 = vsub.f32 %v4358_v1, %v4556_v54  ;;  %v4357_v48 = vmul.f32 0.020408163, %v23197_v32  ;;  %v4558_v57 = vmul.f32 %v19678_v52, %v19678_v52  ;;  %v23198_v19 = vld [vmem:[#allocation34_spill] sm:$0xff]  ;;  %v23200_v4 = vld [vmem:[#allocation52_spill] sm:$0xff] }
 0x348   : > { %7059 = vperm.xlu0 %12295, %v19656_v3   ;;  %v8650_v6 = vadd.f32 %v8043_v23, %v7462_v14  ;;  %v19712_v11 = vmul.f32 0.020408163, %v23198_v19  ;;  %v4360_v40 = vmul.f32 0.020408163, %v23200_v4  ;;  %v19715_v3 = vpop.f32.mrb[194].mxu1  ;;  %v19717_v54 = vpop.eup %12599  ;;  %v8832_v1 = vmax.f32 %v8634_v12, 0.0 }
 0x349   : > { %7054 = vperm.xlu1 %12296, %v19645_v7   ;;  %23201 = vst [vmem:[#allocation47_spill] sm:$0xff] %v19715_v3  ;;  %12607 = vrsqrt.f32 %v5343_v45  ;;  %v19720_v32 = vmul.f32 %v19394_v20, %v5129_v13  ;;  %v23203_v14 = vld [vmem:[#allocation26_spill] sm:$0xff]  ;;  %v19725_v15 = vpop.f32.mrb[195].mxu1  ;;  %v8847_v19 = vmax.f32 %v8649_v63, 0.0  ;;  %v5346_v52 = vadd.f32 1e-05, %v4950_v25 }
 0x34a   : > { %23199 = vst [vmem:[#allocation117_spill] sm:$0xff] %v19712_v11  ;;  %v19723_v23 = vmul.f32 0.020408163, %v23203_v14  ;;  %23205 = vst [vmem:[#allocation96_spill] sm:$0xff] %v19725_v15  ;;  %v19727_v7 = vpop.eup %12601  ;;  %v8848_v38 = vmax.f32 %v8650_v6, 0.0  ;;  %v19729_v4 = vpop.permute.xlu0 %8047  ;;  %v19732_v28 = vmul.f32 %v19440_v27, %v5131_v18  ;;  %v4952_v13 = vmax.f32 %v4754_v30, 0.0 }
 0x34b   : > { %23202 = vst [vmem:[#allocation66_spill] sm:$0xff] %v19720_v32  ;;  %v19734_v12 = vpop.eup %12603  ;;  %v19736_v45 = vpop.permute.xlu1 %6874  ;;  %v5345_v20 = vadd.f32 1e-05, %v4949_v39  ;;  %v4753_v14 = vsub.f32 %v4357_v48, %v4555_v58  ;;  %v5130_v63 = vld [vmem:[%s21702_s2 + $0x458] sm:$0xff]  ;;  %v23207_v6 = vld [vmem:[#allocation119_spill] sm:$0xff]  ;;  %v4557_v27 = vmul.f32 %v19712_v11, %v19712_v11  ;;  %v4756_v18 = vsub.f32 %v4360_v40, %v4558_v57  ;;  %v5133_v39 = vld [vmem:[%s21702_s2 + $0x470] sm:$0xff] }
 0x34c   : > { %23204 = vst [vmem:[#allocation28_spill] sm:$0xff] %v19723_v23  ;;  %23206 = vst [vmem:[#allocation73_spill] sm:$0xff] %v19732_v28  ;;  %7069 = vperm.xlu0 %12295, %v19720_v32   ;;  %v4359_v25 = vmul.f32 0.020408163, %v23207_v6  ;;  %v12151_v34 = vpack.c.bf16 %v8848_v38, %v8847_v19  ;;  %v23208_v32 = vld [vmem:[#allocation90_spill] sm:$0xff]  ;;  %v19752_v58 = vpop.f32.mrb[196].mxu1  ;;  %v12153_v48 = vpack.c.bf16 %v8832_v1, %v8831_v35  ;;  %12609 = vrsqrt.f32 %v5346_v52 }
 0x34d   : > { %7064 = vperm.xlu1 %12296, %v19688_v0   ;;  %v19750_v30 = vmul.f32 0.020408163, %v23208_v32  ;;  %23210 = vst [vmem:[#allocation51_spill] sm:$0xff] %v19752_v58  ;;  %v4560_v6 = vmul.f32 %v19723_v23, %v19723_v23  ;;  %v4362_v0 = vmul.f32 0.020408163, %v19066_v46  ;;  %v23211_v38 = vld [vmem:[#allocation72_spill] sm:$0xff]  ;;  %v19765_v40 = vmul.f32 %v19353_v49, %v5130_v63 }
 0x34e   : > { %v19758_v19 = vmul.f32 0.020408163, %v23211_v38  ;;  %v19760_v11 = vpop.f32.mrb[197].mxu1  ;;  %12152 = vmatprep.subr.bf16.mxu0 %v12151_v34  ;;  %v19762_v57 = vpop.permute.xlu0 %6879  ;;  %v23215_v32 = vld [vmem:[#allocation8_spill] sm:$0xff]  ;;  %12611 = vrsqrt.f32 %v5345_v20  ;;  %v5348_v35 = vadd.f32 1e-05, %v4952_v13  ;;  %v19777_v52 = vmul.f32 %v19509_v29, %v5133_v39 }
 0x34f   : > { %23209 = vst [vmem:[#allocation118_spill] sm:$0xff] %v19750_v30  ;;  %23213 = vst [vmem:[#allocation21_spill] sm:$0xff] %v19760_v11  ;;  %v19768_v58 = vmul.f32 0.020408163, %v23215_v32  ;;  %v19770_v1 = vpop.permute.xlu1 %8052  ;;  %12154 = vmatpush3.bf16.msra.mxu0 %v12153_v48  ;;  %v4951_v46 = vmax.f32 %v4753_v14, 0.0  ;;  %v5132_v34 = vld [vmem:[%s21702_s2 + $0x468] sm:$0xff]  ;;  %v19779_v49 = vpop.eup %12605  ;;  %v4755_v20 = vsub.f32 %v4359_v25, %v4557_v27  ;;  %v4559_v13 = vmul.f32 %v19750_v30, %v19750_v30 }
 0x350   : > { %23212 = vst [vmem:[#allocation3_spill] sm:$0xff] %v19758_v19  ;;  %23214 = vst [vmem:[#allocation12_spill] sm:$0xff] %v19765_v40  ;;  %7079 = vperm.xlu0 %12295, %v19732_v28   ;;  %v4954_v63 = vmax.f32 %v4756_v18, 0.0  ;;  %v4361_v14 = vmul.f32 0.020408163, %v19078_v8  ;;  %v4758_v48 = vsub.f32 %v4362_v0, %v4560_v6  ;;  %v5134_v38 = vld [vmem:[%s21702_s2 + $0x478] sm:$0xff]  ;;  %v4562_v29 = vmul.f32 %v19758_v19, %v19758_v19 }
 0x351   : > { %23216 = vst [vmem:[#allocation34_spill] sm:$0xff] %v19768_v58  ;;  %23217 = vst [vmem:[#allocation52_spill] sm:$0xff] %v19777_v52  ;;  %7074 = vperm.xlu1 %12296, %v19765_v40   ;;  %v4364_v39 = vmul.f32 0.020408163, %v19108_v33  ;;  %v23218_v32 = vld [vmem:[#allocation14_spill] sm:$0xff]  ;;  %v19797_v25 = vmul.f32 %v19431_v17, %v5132_v34  ;;  %v4561_v8 = vmul.f32 %v19768_v58, %v19768_v58  ;;  %v23221_v27 = vld [vmem:[#allocation71_spill] sm:$0xff]  ;;  %12613 = vrsqrt.f32 %v5348_v35 }
 0x352   : > { %v19792_v28 = vmul.f32 0.020408163, %v23218_v32  ;;  %v19794_v18 = vpop.permute.xlu0 %8057  ;;  %v4363_v0 = vmul.f32 0.020408163, %v19124_v26  ;;  %v19803_v6 = vmul.f32 0.020408163, %v23221_v27  ;;  %v4757_v58 = vsub.f32 %v4361_v14, %v4559_v13 }
 0x353   : > { %23220 = vst [vmem:[#allocation119_spill] sm:$0xff] %v19797_v25  ;;  %v19805_v40 = vpop.eup %12607  ;;  %v5347_v33 = vadd.f32 1e-05, %v4951_v46  ;;  %v19807_v32 = vpop.permute.xlu1 %6884  ;;  %v23223_v19 = vld [vmem:[#allocation94_spill] sm:$0xff]  ;;  %v5350_v17 = vadd.f32 1e-05, %v4954_v63  ;;  %v19815_v26 = vmul.f32 %v19469_v5, %v5134_v38  ;;  %v4760_v11 = vsub.f32 %v4364_v39, %v4562_v29 }
 0x354   : > { %23219 = vst [vmem:[#allocation26_spill] sm:$0xff] %v19792_v28  ;;  %23222 = vst [vmem:[#allocation90_spill] sm:$0xff] %v19803_v6  ;;  %7089 = vperm.xlu0 %12295, %v19777_v52   ;;  %v19811_v23 = vmul.f32 0.020408163, %v23223_v19  ;;  %v4953_v34 = vmax.f32 %v4755_v20, 0.0  ;;  %v8965_v27 = vld [vmem:[%s18076_s16 + $0x70] sm:$0xff]  ;;  %v4564_v35 = vmul.f32 %v19792_v28, %v19792_v28  ;;  %v4759_v19 = vsub.f32 %v4363_v0, %v4561_v8 }
 0x355   : > { %7084 = vperm.xlu1 %12296, %v19797_v25   ;;  %23225 = vst [vmem:[#allocation8_spill] sm:$0xff] %v19815_v26  ;;  %v4956_v30 = vmax.f32 %v4758_v48, 0.0  ;;  %v4366_v46 = vmul.f32 0.020408163, %v19149_v37  ;;  %9117 = vmatprep.mubr.f32.mxu0 %v8965_v27  ;;  %v5137_v63 = vld [vmem:[%s21702_s2 + $0x490] sm:$0xff]  ;;  %v4563_v5 = vmul.f32 %v19803_v6, %v19803_v6  ;;  %v23226_v13 = vld [vmem:[#allocation27_spill] sm:$0xff]  ;;  %12615 = vrsqrt.f32 %v5347_v33 }
 0x356   : > { %23224 = vst [vmem:[#allocation72_spill] sm:$0xff] %v19811_v23  ;;  %v19821_v52 = vpop.permute.xlu0 %6889  ;;  %v4365_v20 = vmul.f32 0.020408163, %v19159_v41  ;;  %v19830_v14 = vmul.f32 0.020408163, %v23226_v13  ;;  %v4566_v48 = vmul.f32 %v19811_v23, %v19811_v23  ;;  %v23228_v29 = vld [vmem:[#allocation92_spill] sm:$0xff]  ;;  %v19841_v8 = vpop.eup %12609  ;;  %12617 = vrsqrt.f32 %v5350_v17 }
 0x357   : > { %v19832_v37 = vpop.permute.xlu1 %8062  ;;  %v4368_v38 = vmul.f32 0.020408163, %v19189_v21  ;;  %v19839_v39 = vmul.f32 0.020408163, %v23228_v29  ;;  %v5349_v41 = vadd.f32 1e-05, %v4953_v34  ;;  %v19849_v23 = vmul.f32 %v19565_v56, %v5137_v63 }
 0x358   : > { %23227 = vst [vmem:[#allocation14_spill] sm:$0xff] %v19830_v14  ;;  %7099 = vperm.xlu0 %12295, %v19271_v16   ;;  %v4955_v0 = vmax.f32 %v4757_v58, 0.0  ;;  %v8964_v33 = vld [vmem:[%s18076_s16 + $0x68] sm:$0xff]  ;;  %v8978_v27 = vld [vmem:[%s18076_s16 + $0xd8] sm:$0xff]  ;;  %v19846_v13 = vpop.eup %12611  ;;  %v5352_v16 = vadd.f32 1e-05, %v4956_v30  ;;  %v4762_v21 = vsub.f32 %v4366_v46, %v4564_v35  ;;  %v4761_v17 = vsub.f32 %v4365_v20, %v4563_v5 }
 0x359   : > { %23229 = vst [vmem:[#allocation71_spill] sm:$0xff] %v19839_v39  ;;  %7094 = vperm.xlu1 %12296, %v19815_v26   ;;  %v4958_v25 = vmax.f32 %v4760_v11, 0.0  ;;  %23230 = vst [vmem:[#allocation94_spill] sm:$0xff] %v19849_v23  ;;  %9118 = vmatmul.mubr.f32.gmra.mrb[200].mxu0 %v8964_v33  ;;  %v4957_v28 = vmax.f32 %v4759_v19, 0.0  ;;  %v5927_v58 = vld [vmem:[%s21703_s3 + $0x480] sm:$0xff]  ;;  %v4565_v34 = vmul.f32 %v19830_v14, %v19830_v14  ;;  %v23231_v30 = vld [vmem:[#allocation64_spill] sm:$0xff]  ;;  %12619 = vrsqrt.f32 %v5349_v41 }
 0x35a   : > { %v19851_v29 = vpop.permute.xlu0 %8067  ;;  %v4367_v11 = vmul.f32 0.020408163, %v23231_v30  ;;  %9122 = vmatprep.mubr.f32.mxu0 %v8978_v27  ;;  %v5138_v35 = vld [vmem:[%s21702_s2 + $0x498] sm:$0xff]  ;;  %v4764_v46 = vsub.f32 %v4368_v38, %v4566_v48  ;;  %v4568_v19 = vmul.f32 %v19839_v39, %v19839_v39  ;;  %v23232_v63 = vld [vmem:[#allocation102_spill] sm:$0xff]  ;;  %v5351_v30 = vadd.f32 1e-05, %v4955_v0 }
 0x35b   : > { %v19859_v56 = vpop.permute.xlu1 %6894  ;;  %v19868_v5 = vmul.f32 0.020408163, %v23232_v63  ;;  %v23234_v20 = vld [vmem:[#allocation6_spill] sm:$0xff]  ;;  %v8977_v27 = vld [vmem:[%s18076_s16 + $0xd0] sm:$0xff]  ;;  %v19874_v14 = vpop.eup %12613  ;;  %12621 = vrsqrt.f32 %v5352_v16  ;;  %v5354_v6 = vadd.f32 1e-05, %v4958_v25  ;;  %v6323_v48 = vsub.f32 %v5927_v58, %v19320_v62 }
 0x35c   : > { %7109 = vperm.xlu0 %12295, %v19849_v23   ;;  %v4370_v33 = vmul.f32 0.020408163, %v23234_v20  ;;  %v8991_v26 = vld [vmem:[%s18076_s16 + $0x140] sm:$0xff]  ;;  %v4960_v23 = vmax.f32 %v4762_v21, 0.0  ;;  %v5353_v38 = vadd.f32 1e-05, %v4957_v28  ;;  %v19880_v20 = vmul.f32 %v19522_v2, %v5138_v35 }
 0x35d   : > { %23233 = vst [vmem:[#allocation27_spill] sm:$0xff] %v19868_v5  ;;  %7104 = vperm.xlu1 %12296, %v19332_v42   ;;  %9123 = vmatmul.mubr.f32.gmra.mrb[202].mxu0 %v8977_v27  ;;  %v4959_v63 = vmax.f32 %v4761_v17, 0.0  ;;  %v4763_v41 = vsub.f32 %v4367_v11, %v4565_v34  ;;  %v5139_v42 = vld [vmem:[%s21702_s2 + $0x4a0] sm:$0xff]  ;;  %v4962_v25 = vmax.f32 %v4764_v46, 0.0  ;;  %v5928_v62 = vld [vmem:[%s21703_s3 + $0x488] sm:$0xff]  ;;  %v4567_v28 = vmul.f32 %v19868_v5, %v19868_v5 }
 0x35e   : > { %v19877_v39 = vpop.permute.xlu0 %6899  ;;  %23235 = vst [vmem:[#allocation92_spill] sm:$0xff] %v19880_v20  ;;  %9127 = vmatprep.mubr.f32.mxu0 %v8991_v26  ;;  %v4766_v2 = vsub.f32 %v4370_v33, %v4568_v19  ;;  %v23236_v16 = vld [vmem:[#allocation31_spill] sm:$0xff]  ;;  %12623 = vrsqrt.f32 %v5351_v30  ;;  %v23239_v58 = vld [vmem:[#allocation22_spill] sm:$0xff]  ;;  %v5356_v35 = vadd.f32 1e-05, %v4960_v23  ;;  %v19903_v46 = vmul.f32 %v19649_v51, %v5139_v42  ;;  %v8990_v19 = vld [vmem:[%s18076_s16 + $0x138] sm:$0xff] }
 0x35f   : > { %v19885_v0 = vpop.permute.xlu1 %8072  ;;  %v4369_v21 = vmul.f32 0.020408163, %v23236_v16  ;;  %v23237_v26 = vld [vmem:[#allocation95_spill] sm:$0xff]  ;;  %v19898_v34 = vmul.f32 0.020408163, %v23239_v58  ;;  %v19900_v11 = vpop.eup %12615  ;;  %12625 = vrsqrt.f32 %v5354_v6  ;;  %v5141_v16 = vld [vmem:[%s21702_s2 + $0x4b0] sm:$0xff] }
 0x360   : > { %8287 = vperm.xlu0 %12295, %v6323_v48   ;;  %v19895_v17 = vmul.f32 0.020408163, %v23237_v26  ;;  %23241 = vst [vmem:[#allocation6_spill] sm:$0xff] %v19903_v46  ;;  %v19906_v33 = vpop.eup %12617  ;;  %12627 = vrsqrt.f32 %v5353_v38  ;;  %v5355_v30 = vadd.f32 1e-05, %v4959_v63  ;;  %v6324_v48 = vsub.f32 %v5928_v62, %v19374_v47  ;;  %v9004_v26 = vld [vmem:[%s18076_s16 + $0x1a8] sm:$0xff] }
 0x361   : > { %7114 = vperm.xlu1 %12296, %v19880_v20   ;;  %23240 = vst [vmem:[#allocation102_spill] sm:$0xff] %v19898_v34  ;;  %9128 = vmatmul.mubr.f32.gmra.mrb[204].mxu0 %v8990_v19  ;;  %v5358_v6 = vadd.f32 1e-05, %v4962_v25  ;;  %v4961_v51 = vmax.f32 %v4763_v41, 0.0  ;;  %v4964_v42 = vmax.f32 %v4766_v2, 0.0  ;;  %v4765_v58 = vsub.f32 %v4369_v21, %v4567_v28  ;;  %v5140_v38 = vld [vmem:[%s21702_s2 + $0x4a8] sm:$0xff] }
 0x362   : > { %23238 = vst [vmem:[#allocation64_spill] sm:$0xff] %v19895_v17  ;;  %v19908_v27 = vpop.permute.xlu0 %8077  ;;  %9132 = vmatprep.mubr.f32.mxu0 %v9004_v26  ;;  %v4570_v47 = vmul.f32 %v19895_v17, %v19895_v17  ;;  %v4569_v63 = vmul.f32 %v19898_v34, %v19898_v34  ;;  %v4372_v25 = vmul.f32 0.020408163, %v19273_v55  ;;  %v23244_v41 = vld [vmem:[#allocation37_spill] sm:$0xff]  ;;  %12629 = vrsqrt.f32 %v5356_v35  ;;  %v5143_v2 = vld [vmem:[%s21702_s2 + $0x4c0] sm:$0xff] }
 0x363   : > { %23242 = vst [vmem:[#allocation31_spill] sm:$0xff] %v19908_v27  ;;  %v19915_v23 = vpop.permute.xlu1 %6904  ;;  %v4371_v62 = vmul.f32 0.020408163, %v23244_v41  ;;  %v19928_v28 = vmul.f32 %v19717_v54, %v5141_v16  ;;  %v23246_v21 = vld [vmem:[#allocation98_spill] sm:$0xff]  ;;  %v19939_v17 = vpop.eup %12619  ;;  %12631 = vrsqrt.f32 %v5355_v30  ;;  %v19944_v35 = vmul.f32 %v19642_v9, %v5140_v38  ;;  %v23252_v54 = vld [vmem:[#allocation107_spill] sm:$0xff]  ;;  %v5142_v9 = vld [vmem:[%s21702_s2 + $0x4b8] sm:$0xff] }
 0x364   : > { %23243 = vst [vmem:[#allocation95_spill] sm:$0xff] %v19915_v23  ;;  %7119 = vperm.xlu0 %12295, %v19903_v46   ;;  %v19934_v19 = vmul.f32 0.020408163, %v23246_v21  ;;  %v19947_v16 = vmul.f32 0.020408163, %v23252_v54  ;;  %v9003_v41 = vld [vmem:[%s18076_s16 + $0x1a0] sm:$0xff]  ;;  %12633 = vrsqrt.f32 %v5358_v6  ;;  %v4768_v54 = vsub.f32 %v4372_v25, %v4570_v47 }
 0x365   : > { %8292 = vperm.xlu1 %12296, %v6324_v48   ;;  %23245 = vst [vmem:[#allocation22_spill] sm:$0xff] %v19928_v28  ;;  %v23248_v48 = vld [vmem:[#allocation58_spill] sm:$0xff]  ;;  %23251 = vst [vmem:[#allocation122_spill] sm:$0xff] %v19944_v35  ;;  %v19950_v34 = vpop.eup %12621  ;;  %v5357_v21 = vadd.f32 1e-05, %v4961_v51  ;;  %9133 = vmatmul.mubr.f32.gmra.mrb[206].mxu0 %v9003_v41  ;;  %v9017_v30 = vld [vmem:[%s18076_s16 + $0x210] sm:$0xff]  ;;  %v4767_v46 = vsub.f32 %v4371_v62, %v4569_v63  ;;  %v19961_v6 = vmul.f32 %v19734_v12, %v5143_v2 }
 0x366   : > { %23247 = vst [vmem:[#allocation37_spill] sm:$0xff] %v19934_v19  ;;  %v19937_v26 = vmul.f32 0.020408163, %v23248_v48  ;;  %v19941_v55 = vpop.permute.xlu0 %6909  ;;  %23253 = vst [vmem:[#allocation107_spill] sm:$0xff] %v19947_v16  ;;  %v4963_v48 = vmax.f32 %v4765_v58, 0.0  ;;  %9137 = vmatprep.mubr.f32.mxu0 %v9017_v30  ;;  %v9016_v51 = vld [vmem:[%s18076_s16 + $0x208] sm:$0xff]  ;;  %v4572_v58 = vmul.f32 %v19934_v19, %v19934_v19  ;;  %v19976_v12 = vmul.f32 %v19682_v36, %v5142_v9 }
 0x367   : > { %23250 = vst [vmem:[#allocation58_spill] sm:$0xff] %v19941_v55  ;;  %v19952_v5 = vpop.permute.xlu1 %8082  ;;  %v5360_v38 = vadd.f32 1e-05, %v4964_v42  ;;  %23254 = vst [vmem:[#allocation123_spill] sm:$0xff] %v19961_v6  ;;  %v23255_v20 = vld [vmem:[#allocation81_spill] sm:$0xff]  ;;  %v23256_v41 = vld [vmem:[#allocation86_spill] sm:$0xff]  ;;  %12635 = vrsqrt.f32 %v5357_v21 }
 0x368   : > { %23249 = vst [vmem:[#allocation98_spill] sm:$0xff] %v19937_v26  ;;  %7129 = vperm.xlu0 %12295, %v19928_v28   ;;  %v4571_v28 = vmul.f32 %v19937_v26, %v19937_v26  ;;  %v4374_v55 = vmul.f32 0.020408163, %v23255_v20  ;;  %v4373_v3 = vmul.f32 0.020408163, %v23256_v41  ;;  %v8956_v42 = vld [vmem:[%s18076_s16 + $0x28] sm:$0xff]  ;;  %v19971_v23 = vpop.eup %12623  ;;  %v4574_v20 = vmul.f32 %v19947_v16, %v19947_v16 }
 0x369   : > { %7124 = vperm.xlu1 %12296, %v19944_v35   ;;  %23258 = vst [vmem:[#allocation86_spill] sm:$0xff] %v19976_v12  ;;  %v5144_v63 = vld [vmem:[%s21702_s2 + $0x4c8] sm:$0xff]  ;;  %v5145_v25 = vld [vmem:[%s21702_s2 + $0x4d0] sm:$0xff]  ;;  %v23259_v62 = vld [vmem:[#allocation109_spill] sm:$0xff]  ;;  %v19990_v19 = vpop.eup %12625  ;;  %v5359_v36 = vadd.f32 1e-05, %v4963_v48  ;;  %9138 = vmatmul.mubr.f32.gmra.mrb[208].mxu0 %v9016_v51  ;;  %12637 = vrsqrt.f32 %v5360_v38 }
 0x36a   : > { %v19973_v47 = vpop.permute.xlu0 %8087  ;;  %v19987_v2 = vmul.f32 0.020408163, %v23259_v62  ;;  %v23261_v30 = vld [vmem:[#allocation104_spill] sm:$0xff]  ;;  %v23263_v26 = vld [vmem:[#allocation113_spill] sm:$0xff]  ;;  %v20001_v62 = vpop.eup %12627  ;;  %v4965_v16 = vmax.f32 %v4767_v46, 0.0  ;;  %v23267_v21 = vld [vmem:[#allocation74_spill] sm:$0xff]  ;;  %9302 = vmatprep.mubr.f32.mxu0 %v8956_v42  ;;  %v4769_v27 = vsub.f32 %v4373_v3, %v4571_v28 }
 0x36b   : > { %23257 = vst [vmem:[#allocation81_spill] sm:$0xff] %v19973_v47  ;;  %v4376_v41 = vmul.f32 0.020408163, %v23261_v30  ;;  %v19992_v9 = vpop.permute.xlu1 %6914  ;;  %v19996_v35 = vmul.f32 0.020408163, %v23263_v26  ;;  %v23265_v47 = vld [vmem:[#allocation116_spill] sm:$0xff]  ;;  %v20009_v26 = vmul.f32 %v19727_v7, %v5144_v63  ;;  %12639 = vrsqrt.f32 %v5359_v36 }
 0x36c   : > { %23260 = vst [vmem:[#allocation109_spill] sm:$0xff] %v19987_v2  ;;  %23262 = vst [vmem:[#allocation104_spill] sm:$0xff] %v19992_v9  ;;  %7139 = vperm.xlu0 %12295, %v19961_v6   ;;  %v19999_v15 = vmul.f32 0.020408163, %v23265_v47  ;;  %v4966_v30 = vmax.f32 %v4768_v54, 0.0  ;;  %v8955_v9 = vld [vmem:[%s18076_s16 + $0x20] sm:$0xff]  ;;  %v4770_v6 = vsub.f32 %v4374_v55, %v4572_v58  ;;  %v20012_v47 = vmul.f32 %v19805_v40, %v5145_v25  ;;  %v20025_v7 = vpop.eup %12629 }
 0x36d   : > { %23264 = vst [vmem:[#allocation113_spill] sm:$0xff] %v19996_v35  ;;  %7134 = vperm.xlu1 %12296, %v19976_v12   ;;  %v20005_v48 = vmul.f32 0.020408163, %v23267_v21  ;;  %23269 = vst [vmem:[#allocation124_spill] sm:$0xff] %v20009_v26  ;;  %v4573_v46 = vmul.f32 %v19987_v2, %v19987_v2  ;;  %v4772_v38 = vsub.f32 %v4376_v41, %v4574_v20  ;;  %v23272_v54 = vld [vmem:[#allocation40_spill] sm:$0xff]  ;;  %v5147_v42 = vld [vmem:[%s21702_s2 + $0x4e0] sm:$0xff]  ;;  %9303 = vmatmul.mubr.f32.vlgmr.msra.gmra.mrb[210].mxu0 %v8955_v9 }
 0x36e   : > { %23266 = vst [vmem:[#allocation116_spill] sm:$0xff] %v19999_v15  ;;  %23270 = vst [vmem:[#allocation125_spill] sm:$0xff] %v20012_v47  ;;  %v20014_v51 = vpop.permute.xlu0 %6919  ;;  %v4375_v12 = vmul.f32 0.020408163, %v23272_v54  ;;  %v23273_v55 = vld [vmem:[#allocation19_spill] sm:$0xff]  ;;  %v5146_v40 = vld [vmem:[%s21702_s2 + $0x4d8] sm:$0xff]  ;;  %v4576_v58 = vmul.f32 %v19996_v35, %v19996_v35  ;;  %v4575_v63 = vmul.f32 %v19999_v15, %v19999_v15  ;;  %v20039_v54 = vpop.eup %12631 }
 0x36f   : > { %23268 = vst [vmem:[#allocation74_spill] sm:$0xff] %v20005_v48  ;;  %23271 = vst [vmem:[#allocation126_spill] sm:$0xff] %v20014_v51  ;;  %v20023_v3 = vmul.f32 0.020408163, %v23273_v55  ;;  %v20027_v28 = vpop.permute.xlu1 %8092  ;;  %v23276_v25 = vld [vmem:[#allocation63_spill] sm:$0xff]  ;;  %v23277_v41 = vld [vmem:[#allocation46_spill] sm:$0xff]  ;;  %v4578_v51 = vmul.f32 %v20005_v48, %v20005_v48  ;;  %v20045_v35 = vpop.eup %12633 }
 0x370   : > { %23275 = vst [vmem:[#allocation19_spill] sm:$0xff] %v20027_v28  ;;  %7149 = vperm.xlu0 %12295, %v20012_v47   ;;  %v4378_v20 = vmul.f32 0.020408163, %v23276_v25  ;;  %v4377_v21 = vmul.f32 0.020408163, %v23277_v41  ;;  %v23278_v47 = vld [vmem:[#allocation89_spill] sm:$0xff]  ;;  %v20048_v25 = vmul.f32 %v19846_v13, %v5147_v42  ;;  %v4771_v36 = vsub.f32 %v4375_v12, %v4573_v46 }
 0x371   : > { %23274 = vst [vmem:[#allocation40_spill] sm:$0xff] %v20023_v3  ;;  %v5362_v55 = vadd.f32 1e-05, %v4966_v30  ;;  %7144 = vperm.xlu1 %12296, %v20009_v26   ;;  %v4380_v2 = vmul.f32 0.020408163, %v23278_v47  ;;  %v4968_v28 = vmax.f32 %v4770_v6, 0.0  ;;  %v20056_v30 = vmul.f32 %v19779_v49, %v5146_v40 }
 0x372   : > { %v4967_v15 = vmax.f32 %v4769_v27, 0.0  ;;  %23279 = vst [vmem:[#allocation63_spill] sm:$0xff] %v20048_v25  ;;  %v23280_v41 = vld [vmem:[#allocation83_spill] sm:$0xff]  ;;  %v20053_v59 = vpop.permute.xlu0 %8097  ;;  %v5149_v47 = vld [vmem:[%s21702_s2 + $0x4f0] sm:$0xff]  ;;  %v4577_v6 = vmul.f32 %v20023_v3, %v20023_v3  ;;  %v23283_v27 = vld [vmem:[#allocation93_spill] sm:$0xff]  ;;  %v4970_v42 = vmax.f32 %v4772_v38, 0.0  ;;  %v4773_v12 = vsub.f32 %v4377_v21, %v4575_v63 }
 0x373   : > { %v20051_v9 = vmul.f32 0.020408163, %v23280_v41  ;;  %23282 = vst [vmem:[#allocation89_spill] sm:$0xff] %v20056_v30  ;;  %v4379_v48 = vmul.f32 0.020408163, %v23283_v27  ;;  %v20064_v26 = vpop.permute.xlu1 %6924  ;;  %v4774_v41 = vsub.f32 %v4378_v20, %v4576_v58  ;;  %v5148_v49 = vld [vmem:[%s21702_s2 + $0x4e8] sm:$0xff]  ;;  %12641 = vrsqrt.f32 %v5362_v55  ;;  %v20074_v27 = vpop.eup %12635 }
 0x374   : > { %v5361_v13 = vadd.f32 1e-05, %v4965_v16  ;;  %23284 = vst [vmem:[#allocation83_spill] sm:$0xff] %v20064_v26  ;;  %7159 = vperm.xlu0 %12295, %v20048_v25   ;;  %v4776_v46 = vsub.f32 %v4380_v2, %v4578_v51  ;;  %v23285_v40 = vld [vmem:[#allocation120_spill] sm:$0xff]  ;;  %v5364_v16 = vadd.f32 1e-05, %v4968_v28  ;;  %v20077_v38 = vmul.f32 %v19900_v11, %v5149_v47  ;;  %v20082_v21 = vpop.eup %12637 }
 0x375   : > { %23281 = vst [vmem:[#allocation46_spill] sm:$0xff] %v20051_v9  ;;  %7154 = vperm.xlu1 %12296, %v20056_v30   ;;  %v20072_v3 = vmul.f32 0.020408163, %v23285_v40  ;;  %v4580_v58 = vmul.f32 %v20051_v9, %v20051_v9  ;;  %v23288_v63 = vld [vmem:[#allocation16_spill] sm:$0xff]  ;;  %v5363_v55 = vadd.f32 1e-05, %v4967_v15  ;;  %v20087_v2 = vmul.f32 %v19841_v8, %v5148_v49 }
 0x376   : > { %23287 = vst [vmem:[#allocation120_spill] sm:$0xff] %v20077_v38  ;;  %v4382_v20 = vmul.f32 0.020408163, %v23288_v63  ;;  %v4969_v26 = vmax.f32 %v4771_v36, 0.0  ;;  %v20084_v25 = vpop.permute.xlu0 %6929  ;;  %v4775_v51 = vsub.f32 %v4379_v48, %v4577_v6  ;;  %v5151_v11 = vld [vmem:[%s21702_s2 + $0x500] sm:$0xff]  ;;  %12643 = vrsqrt.f32 %v5361_v13  ;;  %v5150_v15 = vld [vmem:[%s21702_s2 + $0x4f8] sm:$0xff] }
 0x377   : > { %23286 = vst [vmem:[#allocation93_spill] sm:$0xff] %v20072_v3  ;;  %23289 = vst [vmem:[#allocation16_spill] sm:$0xff] %v20084_v25  ;;  %v5366_v28 = vadd.f32 1e-05, %v4970_v42  ;;  %v4972_v47 = vmax.f32 %v4774_v41, 0.0  ;;  %v20092_v40 = vpop.permute.xlu1 %8102  ;;  %v4971_v63 = vmax.f32 %v4773_v12, 0.0  ;;  %v4579_v48 = vmul.f32 %v20072_v3, %v20072_v3 }
 0x378   : > { %23290 = vst [vmem:[#allocation127_spill] sm:$0xff] %v20087_v2  ;;  %7169 = vperm.xlu0 %12295, %v20077_v38   ;;  %v4974_v8 = vmax.f32 %v4776_v46, 0.0  ;;  %v23291_v36 = vld [vmem:[#allocation82_spill] sm:$0xff]  ;;  %12645 = vrsqrt.f32 %v5364_v16  ;;  %v20106_v41 = vmul.f32 %v19939_v17, %v5151_v11  ;;  %v4778_v12 = vsub.f32 %v4382_v20, %v4580_v58  ;;  %v23294_v49 = vld [vmem:[#allocation101_spill] sm:$0xff]  ;;  %v20111_v38 = vpop.eup %12639  ;;  %v5153_v16 = vld [vmem:[%s21702_s2 + $0x510] sm:$0xff] }
 0x379   : > { %7164 = vperm.xlu1 %12296, %v20087_v2   ;;  %v4381_v6 = vmul.f32 0.020408163, %v23291_v36  ;;  %v23292_v13 = vld [vmem:[#allocation2_spill] sm:$0xff]  ;;  %v20109_v25 = vmul.f32 0.020408163, %v23294_v49  ;;  %12647 = vrsqrt.f32 %v5363_v55  ;;  %v4973_v9 = vmax.f32 %v4775_v51, 0.0 }
 0x37a   : > { %v20103_v42 = vmul.f32 0.020408163, %v23292_v13  ;;  %v5365_v46 = vadd.f32 1e-05, %v4969_v26  ;;  %v20113_v2 = vpop.permute.xlu0 %6939  ;;  %v20116_v36 = vmul.f32 %v19874_v14, %v5150_v15  ;;  %v12807_v17 = vld [vmem:[%s21700_s0 + $0x300] sm:$0xff]  ;;  %12649 = vrsqrt.f32 %v5366_v28  ;;  %v5152_v14 = vld [vmem:[%s21702_s2 + $0x508] sm:$0xff] }
 0x37b   : > { %23295 = vst [vmem:[#allocation2_spill] sm:$0xff] %v20109_v25  ;;  %v7463_v58 = vmul.f32 %v12807_v17, %v19627_v43  ;;  %v5368_v20 = vadd.f32 1e-05, %v4972_v47  ;;  %v5367_v55 = vadd.f32 1e-05, %v4971_v63  ;;  %v20125_v26 = vpop.permute.xlu1 %6934  ;;  %v4777_v11 = vsub.f32 %v4381_v6, %v4579_v48  ;;  %v23298_v13 = vld [vmem:[#allocation50_spill] sm:$0xff] }
 0x37c   : > { %23293 = vst [vmem:[#allocation82_spill] sm:$0xff] %v20103_v42  ;;  %23296 = vst [vmem:[#allocation101_spill] sm:$0xff] %v20116_v36  ;;  %7179 = vperm.xlu0 %12295, %v20106_v41   ;;  %v5370_v51 = vadd.f32 1e-05, %v4974_v8  ;;  %v4582_v15 = vmul.f32 %v20103_v42, %v20103_v42  ;;  %v4384_v43 = vmul.f32 0.020408163, %v23298_v13  ;;  %v20136_v47 = vmul.f32 %v19971_v23, %v5153_v16 }
 0x37d   : > { %23297 = vst [vmem:[#allocation128_spill] sm:$0xff] %v20125_v26  ;;  %7174 = vperm.xlu1 %12296, %v20116_v36   ;;  %v4976_v28 = vmax.f32 %v4778_v12, 0.0  ;;  %v4581_v63 = vmul.f32 %v20109_v25, %v20109_v25  ;;  %v23299_v49 = vld [vmem:[#allocation38_spill] sm:$0xff]  ;;  %v20141_v26 = vpop.eup %12641  ;;  %v20144_v8 = vadd.f32 %v19729_v4, %v7463_v58  ;;  %12651 = vrsqrt.f32 %v5365_v46  ;;  %v12808_v12 = vld [vmem:[%s21700_s0 + $0x308] sm:$0xff]  ;;  %v12809_v58 = vld [vmem:[%s21700_s0 + $0x310] sm:$0xff] }
 0x37e   : > { %v4383_v17 = vmul.f32 0.020408163, %v23299_v49  ;;  %v5369_v48 = vadd.f32 1e-05, %v4973_v9  ;;  %v20146_v6 = vpop.permute.xlu0 %6949  ;;  %v20149_v13 = vmul.f32 %v19906_v33, %v5152_v14  ;;  %v5155_v23 = vld [vmem:[%s21702_s2 + $0x520] sm:$0xff]  ;;  %v7464_v16 = vmul.f32 %v12808_v12, %v19663_v24  ;;  %v5154_v9 = vld [vmem:[%s21702_s2 + $0x518] sm:$0xff] }
 0x37f   : > { %12653 = vrsqrt.f32 %v5368_v20  ;;  %v6945_v4 = vpop.permute.xlu1 %6944  ;;  %v23300_v33 = vld [vmem:[#allocation10_spill] sm:$0xff]  ;;  %v7465_v14 = vmul.f32 %v12809_v58, %v19696_v22  ;;  %v4975_v49 = vmax.f32 %v4777_v11, 0.0  ;;  %v4780_v24 = vsub.f32 %v4384_v43, %v4582_v15 }
 0x380   : > { %7189 = vperm.xlu0 %12295, %v20136_v47   ;;  %v20163_v46 = vmul.f32 0.020408163, %v23300_v33  ;;  %12655 = vrsqrt.f32 %v5367_v55  ;;  %v20170_v20 = vpop.eup %12643  ;;  %v5372_v12 = vadd.f32 1e-05, %v4976_v28  ;;  %v4779_v36 = vsub.f32 %v4383_v17, %v4581_v63  ;;  %v12810_v33 = vld [vmem:[%s21700_s0 + $0x318] sm:$0xff]  ;;  %v5156_v17 = vld [vmem:[%s21702_s2 + $0x528] sm:$0xff] }
 0x381   : > { %7184 = vperm.xlu1 %12296, %v20149_v13   ;;  %12657 = vrsqrt.f32 %v5370_v51  ;;  %v20173_v42 = vmul.f32 %v20001_v62, %v5155_v23  ;;  %v20179_v25 = vmul.f32 %v12810_v33, %v19736_v45  ;;  %v8849_v22 = vmax.f32 %v20144_v8, 0.0  ;;  %v5157_v51 = vld [vmem:[%s21702_s2 + $0x530] sm:$0xff]  ;;  %v23302_v28 = vld [vmem:[#allocation49_spill] sm:$0xff]  ;;  %v12812_v23 = vld [vmem:[%s21700_s0 + $0x380] sm:$0xff] }
 0x382   : > { %23301 = vst [vmem:[#allocation50_spill] sm:$0xff] %v20163_v46  ;;  %12659 = vrsqrt.f32 %v5369_v48  ;;  %v8128_v55 = vpop.permute.xlu0 %8127  ;;  %v20183_v11 = vmul.f32 %v19950_v34, %v5154_v9  ;;  %v20188_v62 = vpop.eup %12645  ;;  %v8652_v15 = vadd.f32 %v19770_v1, %v7464_v16  ;;  %v4584_v45 = vmul.f32 %v20163_v46, %v20163_v46  ;;  %v12811_v1 = vld [vmem:[%s21700_s0 + $0x320] sm:$0xff] }
 0x383   : > { %v20191_v43 = vpop.permute.xlu1 %6954  ;;  %v20197_v63 = vmul.f32 0.020408163, %v23302_v28  ;;  %v4386_v34 = vmul.f32 0.020408163, %v19578_v10  ;;  %v20203_v8 = vpop.eup %12647  ;;  %v20209_v48 = vmul.f32 %v12811_v1, %v19762_v57  ;;  %v7479_v16 = vmul.f32 %v12812_v23, %v20113_v2  ;;  %v23305_v46 = vld [vmem:[#allocation106_spill] sm:$0xff]  ;;  %v12813_v1 = vld [vmem:[%s21700_s0 + $0x388] sm:$0xff] }
 0x384   : > { %7199 = vperm.xlu0 %12295, %v20173_v42   ;;  %v5371_v10 = vadd.f32 1e-05, %v4975_v49  ;;  %v4978_v9 = vmax.f32 %v4780_v24, 0.0  ;;  %v20216_v58 = vpop.eup %12649  ;;  %12661 = vrsqrt.f32 %v5372_v12  ;;  %v4977_v33 = vmax.f32 %v4779_v36, 0.0  ;;  %v23307_v23 = vld [vmem:[#allocation68_spill] sm:$0xff] }
 0x385   : > { %23303 = vst [vmem:[#allocation38_spill] sm:$0xff] %v20197_v63  ;;  %7194 = vperm.xlu1 %12296, %v20183_v11   ;;  %v20219_v28 = vmul.f32 %v20039_v54, %v5157_v51  ;;  %v20222_v57 = vmul.f32 0.020408163, %v23305_v46  ;;  %v7480_v3 = vmul.f32 %v12813_v1, %v6945_v4  ;;  %v8667_v2 = vadd.f32 %v8128_v55, %v7479_v16  ;;  %v5159_v54 = vld [vmem:[%s21702_s2 + $0x540] sm:$0xff] }
 0x386   : > { %v20227_v49 = vpop.permute.xlu0 %6959  ;;  %v20230_v24 = vmul.f32 %v19990_v19, %v5156_v17  ;;  %v20233_v12 = vmul.f32 0.020408163, %v23307_v23  ;;  %v8850_v36 = vmax.f32 %v8652_v15, 0.0  ;;  %v4583_v46 = vmul.f32 %v20197_v63, %v20197_v63  ;;  %v5158_v19 = vld [vmem:[%s21702_s2 + $0x538] sm:$0xff] }
 0x387   : > { %23304 = vst [vmem:[#allocation10_spill] sm:$0xff] %v20219_v28  ;;  %23306 = vst [vmem:[#allocation49_spill] sm:$0xff] %v20222_v57  ;;  %v4782_v51 = vsub.f32 %v4386_v34, %v4584_v45  ;;  %v8133_v30 = vpop.permute.xlu1 %8132  ;;  %v4385_v4 = vmul.f32 0.020408163, %v19583_v60  ;;  %v20245_v55 = vpop.eup %12651  ;;  %v20248_v17 = vadd.f32 %v19794_v18, %v7465_v14  ;;  %12663 = vrsqrt.f32 %v5371_v10 }
 0x388   : > { %23308 = vst [vmem:[#allocation106_spill] sm:$0xff] %v20233_v12  ;;  %7209 = vperm.xlu0 %12295, %v20219_v28   ;;  %v5374_v15 = vadd.f32 1e-05, %v4978_v9  ;;  %v8668_v16 = vadd.f32 %v8133_v30, %v7480_v3  ;;  %v4586_v60 = vmul.f32 %v20222_v57, %v20222_v57  ;;  %v4388_v34 = vmul.f32 0.020408163, %v19613_v44  ;;  %v5161_v44 = vld [vmem:[%s21702_s2 + $0x550] sm:$0xff] }
 0x389   : > { %7204 = vperm.xlu1 %12296, %v20230_v24   ;;  %v20251_v45 = vpop.eup %12653  ;;  %v4387_v1 = vmul.f32 0.020408163, %v19621_v61  ;;  %v20258_v23 = vmul.f32 %v20074_v27, %v5159_v54  ;;  %v8865_v18 = vmax.f32 %v8667_v2, 0.0  ;;  %v4585_v3 = vmul.f32 %v20233_v12, %v20233_v12  ;;  %v5160_v2 = vld [vmem:[%s21702_s2 + $0x548] sm:$0xff] }
 0x38a   : > { %v20260_v63 = vpop.eup %12655  ;;  %v8866_v14 = vmax.f32 %v8668_v16, 0.0  ;;  %v8138_v30 = vpop.permute.xlu0 %8137  ;;  %v20265_v10 = vmul.f32 %v20025_v7, %v5158_v19  ;;  %v12157_v61 = vpack.c.bf16 %v8850_v36, %v8849_v22  ;;  %v5373_v27 = vadd.f32 1e-05, %v4977_v33  ;;  %v12814_v19 = vld [vmem:[%s21700_s0 + $0x328] sm:$0xff]  ;;  %v12815_v22 = vld [vmem:[%s21700_s0 + $0x390] sm:$0xff]  ;;  %v23311_v36 = vld [vmem:[#allocation105_spill] sm:$0xff] }
 0x38b   : > { %23309 = vst [vmem:[#allocation68_spill] sm:$0xff] %v20258_v23  ;;  %v20270_v9 = vpop.eup %12657  ;;  %v4980_v54 = vmax.f32 %v4782_v51, 0.0  ;;  %v4781_v57 = vsub.f32 %v4385_v4, %v4583_v46  ;;  %v20272_v28 = vpop.permute.xlu1 %6964  ;;  %v7468_v16 = vmul.f32 %v12814_v19, %v19807_v32  ;;  %v7481_v33 = vmul.f32 %v12815_v22, %v20146_v6  ;;  %v12816_v19 = vld [vmem:[%s21700_s0 + $0x398] sm:$0xff] }
 0x38c   : > { %23310 = vst [vmem:[#allocation129_spill] sm:$0xff] %v20265_v10  ;;  %7219 = vperm.xlu0 %12295, %v20258_v23   ;;  %v20278_v7 = vpop.eup %12659  ;;  %v20290_v46 = vmul.f32 0.020408163, %v23311_v36  ;;  %v12155_v51 = vpack.c.bf16 %v8866_v14, %v8865_v18  ;;  %v8851_v4 = vmax.f32 %v20248_v17, 0.0  ;;  %v8654_v12 = vadd.f32 %v19832_v37, %v20179_v25  ;;  %v5163_v37 = vld [vmem:[%s21702_s2 + $0x560] sm:$0xff] }
 0x38d   : > { %7214 = vperm.xlu1 %12296, %v20265_v10   ;;  %v4784_v23 = vsub.f32 %v4388_v34, %v4586_v60  ;;  %v20296_v32 = vmul.f32 %v20111_v38, %v5161_v44  ;;  %v7482_v6 = vmul.f32 %v12816_v19, %v20191_v43  ;;  %v8669_v22 = vadd.f32 %v8138_v30, %v7481_v33  ;;  %v23312_v34 = vld [vmem:[#allocation84_spill] sm:$0xff] }
 0x38e   : > { %v4783_v10 = vsub.f32 %v4387_v1, %v4585_v3  ;;  %12156 = vmatprep.subr.bf16.mxu1 %v12155_v51  ;;  %v20302_v36 = vpop.permute.xlu0 %6969  ;;  %v20305_v17 = vmul.f32 %v20045_v35, %v5160_v2  ;;  %v20310_v25 = vpop.eup %12661  ;;  %12665 = vrsqrt.f32 %v5374_v15  ;;  %v5376_v38 = vadd.f32 1e-05, %v4980_v54  ;;  %v5162_v35 = vld [vmem:[%s21702_s2 + $0x558] sm:$0xff]  ;;  %v12817_v3 = vld [vmem:[%s21700_s0 + $0x330] sm:$0xff] }
 0x38f   : > { %v4979_v60 = vmax.f32 %v4781_v57, 0.0  ;;  %v20313_v18 = vmul.f32 0.020408163, %v23312_v34  ;;  %v8143_v43 = vpop.permute.xlu1 %8142  ;;  %12158 = vmatpush3.bf16.msra.mxu1 %v12157_v61  ;;  %12667 = vrsqrt.f32 %v5373_v27  ;;  %v4588_v1 = vmul.f32 %v20290_v46, %v20290_v46 }
 0x390   : > { %7229 = vperm.xlu0 %12295, %v20296_v32   ;;  %v4390_v14 = vmul.f32 0.020408163, %v19647_v50  ;;  %v8670_v15 = vadd.f32 %v8143_v43, %v7482_v6  ;;  %v8852_v57 = vmax.f32 %v8654_v12, 0.0  ;;  %v20327_v30 = vmul.f32 %v12817_v3, %v19821_v52  ;;  %v5165_v12 = vld [vmem:[%s21702_s2 + $0x570] sm:$0xff]  ;;  %v12819_v43 = vld [vmem:[%s21700_s0 + $0x3a8] sm:$0xff] }
 0x391   : > { %7224 = vperm.xlu1 %12296, %v20305_v17   ;;  %v4982_v44 = vmax.f32 %v4784_v23, 0.0  ;;  %v20330_v61 = vmul.f32 %v20170_v20, %v5163_v37  ;;  %v20332_v27 = vpop.eup %12663  ;;  %v8867_v54 = vmax.f32 %v8669_v22, 0.0  ;;  %v4981_v2 = vmax.f32 %v4783_v10, 0.0  ;;  %v12818_v10 = vld [vmem:[%s21700_s0 + $0x3a0] sm:$0xff] }
 0x392   : > { %v8868_v50 = vmax.f32 %v8670_v15, 0.0  ;;  %v8148_v33 = vpop.permute.xlu0 %8147  ;;  %v20335_v51 = vmul.f32 %v20082_v21, %v5162_v35  ;;  %v20342_v52 = vadd.f32 %v19851_v29, %v20209_v48  ;;  %12669 = vrsqrt.f32 %v5376_v38  ;;  %v5164_v21 = vld [vmem:[%s21702_s2 + $0x568] sm:$0xff]  ;;  %v23315_v15 = vld [vmem:[#allocation18_spill] sm:$0xff] }
 0x393   : > { %v5375_v20 = vadd.f32 1e-05, %v4979_v60  ;;  %v4587_v23 = vmul.f32 %v20313_v18, %v20313_v18  ;;  %v20346_v19 = vpop.permute.xlu1 %6974  ;;  %v7483_v29 = vmul.f32 %v12818_v10, %v20227_v49  ;;  %v4786_v48 = vsub.f32 %v4390_v14, %v4588_v1 }
 0x394   : > { %7239 = vperm.xlu0 %12295, %v20330_v61   ;;  %v4389_v6 = vmul.f32 0.020408163, %v19658_v31  ;;  %v12159_v22 = vpack.c.bf16 %v8868_v50, %v8867_v54  ;;  %v12161_v37 = vpack.c.bf16 %v8852_v57, %v8851_v4  ;;  %v8656_v38 = vadd.f32 %v19885_v0, %v7468_v16  ;;  %v5167_v0 = vld [vmem:[%s21702_s2 + $0x580] sm:$0xff] }
 0x395   : > { %7234 = vperm.xlu1 %12296, %v20335_v51   ;;  %v5378_v60 = vadd.f32 1e-05, %v4982_v44  ;;  %v20360_v34 = vmul.f32 %v20203_v8, %v5165_v12  ;;  %v7484_v35 = vmul.f32 %v12819_v43, %v20272_v28  ;;  %v5377_v49 = vadd.f32 1e-05, %v4981_v2  ;;  %v12820_v8 = vld [vmem:[%s21700_s0 + $0x338] sm:$0xff]  ;;  %v12821_v12 = vld [vmem:[%s21700_s0 + $0x340] sm:$0xff] }
 0x396   : > { %v8671_v1 = vadd.f32 %v8148_v33, %v7483_v29  ;;  %12160 = vmatprep.subr.bf16.mxu1 %v12159_v22  ;;  %v20366_v31 = vpop.permute.xlu0 %6979  ;;  %v20369_v14 = vmul.f32 %v20141_v26, %v5164_v21  ;;  %v7470_v16 = vmul.f32 %v12820_v8, %v19859_v56  ;;  %12671 = vrsqrt.f32 %v5375_v20  ;;  %v23313_v28 = vld [vmem:[#allocation69_spill] sm:$0xff] }
 0x397   : > { %v20379_v4 = vmul.f32 0.020408163, %v23313_v28  ;;  %v20382_v57 = vmul.f32 0.020408163, %v23315_v15  ;;  %v8153_v3 = vpop.permute.xlu1 %8152  ;;  %12162 = vmatpush3.bf16.msra.mxu1 %v12161_v37  ;;  %v5166_v26 = vld [vmem:[%s21702_s2 + $0x578] sm:$0xff]  ;;  %v8853_v44 = vmax.f32 %v20342_v52, 0.0  ;;  %v4785_v2 = vsub.f32 %v4389_v6, %v4587_v23 }
 0x398   : > { %7249 = vperm.xlu0 %12295, %v20360_v34   ;;  %v4984_v54 = vmax.f32 %v4786_v48, 0.0  ;;  %v8672_v56 = vadd.f32 %v8153_v3, %v7484_v35  ;;  %v20390_v50 = vpop.eup %12665  ;;  %v8854_v33 = vmax.f32 %v8656_v38, 0.0  ;;  %v20396_v20 = vmul.f32 %v12821_v12, %v19877_v39  ;;  %v5169_v6 = vld [vmem:[%s21702_s2 + $0x590] sm:$0xff]  ;;  %v23317_v37 = vld [vmem:[#allocation9_spill] sm:$0xff] }
 0x399   : > { %23314 = vst [vmem:[#allocation105_spill] sm:$0xff] %v20379_v4  ;;  %7244 = vperm.xlu1 %12296, %v20369_v14   ;;  %12673 = vrsqrt.f32 %v5378_v60  ;;  %v20399_v21 = vmul.f32 %v20245_v55, %v5167_v0  ;;  %v20401_v52 = vpop.eup %12667  ;;  %v8869_v23 = vmax.f32 %v8671_v1, 0.0  ;;  %v20404_v48 = vmul.f32 %v20188_v62, %v5166_v26  ;;  %v5168_v62 = vld [vmem:[%s21702_s2 + $0x588] sm:$0xff]  ;;  %v12822_v35 = vld [vmem:[%s21700_s0 + $0x3b0] sm:$0xff] }
 0x39a   : > { %12675 = vrsqrt.f32 %v5377_v49  ;;  %v8870_v10 = vmax.f32 %v8672_v56, 0.0  ;;  %v8158_v29 = vpop.permute.xlu0 %8157  ;;  %v20411_v39 = vmul.f32 %v20379_v4, %v20379_v4  ;;  %v4589_v55 = vmul.f32 %v20382_v57, %v20382_v57  ;;  %v23319_v15 = vld [vmem:[#allocation112_spill] sm:$0xff] }
 0x39b   : > { %23316 = vst [vmem:[#allocation84_spill] sm:$0xff] %v20404_v48  ;;  %v4391_v22 = vmul.f32 0.020408163, %v19690_v53  ;;  %v20417_v38 = vmul.f32 0.020408163, %v23317_v37  ;;  %v20419_v60 = vpop.permute.xlu1 %6984  ;;  %v7485_v49 = vmul.f32 %v12822_v35, %v20302_v36  ;;  %v4983_v1 = vmax.f32 %v4785_v2, 0.0 }
 0x39c   : > { %7259 = vperm.xlu0 %12295, %v20399_v21   ;;  %v5380_v43 = vadd.f32 1e-05, %v4984_v54  ;;  %v12163_v53 = vpack.c.bf16 %v8870_v10, %v8869_v23  ;;  %v20430_v0 = vpop.eup %12669  ;;  %v12165_v8 = vpack.c.bf16 %v8854_v33, %v8853_v44  ;;  %v8658_v28 = vadd.f32 %v19952_v5, %v7470_v16  ;;  %v23320_v54 = vld [vmem:[#allocation31_spill] sm:$0xff]  ;;  %v12823_v36 = vld [vmem:[%s21700_s0 + $0x3b8] sm:$0xff]  ;;  %v23323_v10 = vld [vmem:[#allocation96_spill] sm:$0xff] }
 0x39d   : > { %23318 = vst [vmem:[#allocation69_spill] sm:$0xff] %v20417_v38  ;;  %7254 = vperm.xlu1 %12296, %v20404_v48   ;;  %v4392_v3 = vmul.f32 0.020408163, %v23319_v15  ;;  %v20435_v26 = vmul.f32 %v20260_v63, %v5169_v6  ;;  %v8657_v56 = vadd.f32 %v23320_v54, %v20327_v30  ;;  %v7486_v2 = vmul.f32 %v12823_v36, %v20346_v19  ;;  %v5171_v63 = vld [vmem:[%s21702_s2 + $0x5a0] sm:$0xff]  ;;  %v23321_v44 = vld [vmem:[#allocation13_spill] sm:$0xff]  ;;  %v12824_v35 = vld [vmem:[%s21700_s0 + $0x348] sm:$0xff] }
 0x39e   : > { %v8673_v12 = vadd.f32 %v8158_v29, %v7485_v49  ;;  %12164 = vmatprep.subr.bf16.mxu1 %v12163_v53  ;;  %v20443_v23 = vpop.permute.xlu0 %6989  ;;  %v20446_v5 = vmul.f32 %v20216_v58, %v5168_v62  ;;  %v4787_v16 = vsub.f32 %v4391_v22, %v4589_v55  ;;  %v20452_v30 = vmul.f32 0.020408163, %v23321_v44  ;;  %v5170_v58 = vld [vmem:[%s21702_s2 + $0x598] sm:$0xff]  ;;  %v23326_v49 = vld [vmem:[#allocation95_spill] sm:$0xff] }
 0x39f   : > { %v4591_v33 = vmul.f32 %v20417_v38, %v20417_v38  ;;  %v4393_v19 = vmul.f32 0.020408163, %v23323_v10  ;;  %v8163_v29 = vpop.permute.xlu1 %8162  ;;  %12166 = vmatpush3.bf16.msra.mxu1 %v12165_v8  ;;  %12677 = vrsqrt.f32 %v5380_v43  ;;  %v5379_v6 = vadd.f32 1e-05, %v4983_v1  ;;  %v23324_v37 = vld [vmem:[#allocation33_spill] sm:$0xff]  ;;  %v5173_v10 = vld [vmem:[%s21702_s2 + $0x5b0] sm:$0xff] }
 0x3a0   : > { %23322 = vst [vmem:[#allocation18_spill] sm:$0xff] %v20452_v30  ;;  %7269 = vperm.xlu0 %12295, %v20435_v26   ;;  %v20462_v55 = vmul.f32 0.020408163, %v23324_v37  ;;  %v8674_v22 = vadd.f32 %v8163_v29, %v7486_v2  ;;  %v20465_v62 = vpop.eup %12671  ;;  %v7472_v53 = vmul.f32 %v12824_v35, %v23326_v49  ;;  %v8856_v8 = vmax.f32 %v8658_v28, 0.0  ;;  %v23327_v28 = vld [vmem:[#allocation47_spill] sm:$0xff] }
 0x3a1   : > { %7264 = vperm.xlu1 %12296, %v20446_v5   ;;  %v4788_v15 = vsub.f32 %v4392_v3, %v20411_v39  ;;  %v20473_v43 = vmul.f32 %v20278_v7, %v5171_v63  ;;  %v8855_v1 = vmax.f32 %v8657_v56, 0.0  ;;  %v8871_v54 = vmax.f32 %v8673_v12, 0.0  ;;  %v12825_v63 = vld [vmem:[%s21700_s0 + $0x3c0] sm:$0xff]  ;;  %v23329_v49 = vld [vmem:[#allocation19_spill] sm:$0xff] }
 0x3a2   : > { %23325 = vst [vmem:[#allocation9_spill] sm:$0xff] %v20462_v55  ;;  %v8872_v36 = vmax.f32 %v8674_v22, 0.0  ;;  %v8168_v2 = vpop.permute.xlu0 %8167  ;;  %v20476_v44 = vmul.f32 %v20251_v45, %v5170_v58  ;;  %v4985_v37 = vmax.f32 %v4787_v16, 0.0  ;;  %v4592_v39 = vmul.f32 %v20452_v30, %v20452_v30  ;;  %v5172_v45 = vld [vmem:[%s21702_s2 + $0x5a8] sm:$0xff]  ;;  %v23330_v30 = vld [vmem:[#allocation77_spill] sm:$0xff] }
 0x3a3   : > { %v20481_v29 = vpop.eup %12673  ;;  %v4394_v7 = vmul.f32 0.020408163, %v23327_v28  ;;  %v4789_v3 = vsub.f32 %v4393_v19, %v4591_v33  ;;  %v20486_v56 = vpop.permute.xlu1 %6994  ;;  %v7487_v16 = vmul.f32 %v12825_v63, %v20366_v31  ;;  %v4593_v58 = vmul.f32 %v20462_v55, %v20462_v55  ;;  %v23328_v33 = vld [vmem:[#allocation21_spill] sm:$0xff]  ;;  %v12826_v31 = vld [vmem:[%s21700_s0 + $0x3c8] sm:$0xff] }
 0x3a4   : > { %7279 = vperm.xlu0 %12295, %v20473_v43   ;;  %v20492_v12 = vpop.eup %12675  ;;  %v4395_v19 = vmul.f32 0.020408163, %v23328_v33  ;;  %v12167_v22 = vpack.c.bf16 %v8872_v36, %v8871_v54  ;;  %v12169_v35 = vpack.c.bf16 %v8856_v8, %v8855_v1  ;;  %v8660_v28 = vadd.f32 %v23329_v49, %v7472_v53  ;;  %v23333_v36 = vld [vmem:[#allocation58_spill] sm:$0xff] }
 0x3a5   : > { %7274 = vperm.xlu1 %12296, %v20476_v44   ;;  %v20504_v38 = vmul.f32 0.020408163, %v23330_v30  ;;  %v20507_v4 = vmul.f32 %v20332_v27, %v5173_v10  ;;  %v4986_v48 = vmax.f32 %v4788_v15, 0.0  ;;  %v7488_v63 = vmul.f32 %v12826_v31, %v20419_v60  ;;  %v5175_v30 = vld [vmem:[%s21702_s2 + $0x5c0] sm:$0xff]  ;;  %v23332_v27 = vld [vmem:[#allocation81_spill] sm:$0xff] }
 0x3a6   : > { %v8675_v33 = vadd.f32 %v8168_v2, %v7487_v16  ;;  %12168 = vmatprep.subr.bf16.mxu1 %v12167_v22  ;;  %v20513_v55 = vpop.permute.xlu0 %6999  ;;  %v20516_v8 = vmul.f32 %v20270_v9, %v5172_v45  ;;  %v8659_v53 = vadd.f32 %v23332_v27, %v20396_v20  ;;  %12679 = vrsqrt.f32 %v5379_v6  ;;  %v5174_v60 = vld [vmem:[%s21702_s2 + $0x5b8] sm:$0xff]  ;;  %v12827_v9 = vld [vmem:[%s21700_s0 + $0x350] sm:$0xff] }
 0x3a7   : > { %23331 = vst [vmem:[#allocation112_spill] sm:$0xff] %v20504_v38  ;;  %v5381_v15 = vadd.f32 1e-05, %v4985_v37  ;;  %v4790_v1 = vsub.f32 %v4394_v7, %v4592_v39  ;;  %12170 = vmatpush3.bf16.msra.mxu1 %v12169_v35  ;;  %v7473_v2 = vmul.f32 %v12827_v9, %v23333_v36  ;;  %v4987_v10 = vmax.f32 %v4789_v3, 0.0  ;;  %v23334_v39 = vld [vmem:[#allocation51_spill] sm:$0xff] }
 0x3a8   : > { %v8173_v54 = vpop.permute.xlu1 %8172  ;;  %7289 = vperm.xlu0 %12295, %v20507_v4   ;;  %v4791_v45 = vsub.f32 %v4395_v19, %v4593_v58  ;;  %v8858_v6 = vmax.f32 %v8660_v28, 0.0  ;;  %v4594_v37 = vmul.f32 %v20504_v38, %v20504_v38  ;;  %v4396_v7 = vmul.f32 0.020408163, %v23334_v39  ;;  %v5177_v58 = vld [vmem:[%s21702_s2 + $0x5d0] sm:$0xff]  ;;  %v12828_v19 = vld [vmem:[%s21700_s0 + $0x358] sm:$0xff] }
 0x3a9   : > { %v8676_v20 = vadd.f32 %v8173_v54, %v7488_v63  ;;  %7284 = vperm.xlu1 %12296, %v20516_v8   ;;  %v20536_v16 = vmul.f32 %v20401_v52, %v5175_v30  ;;  %v20538_v22 = vpop.eup %12677  ;;  %v5382_v35 = vadd.f32 1e-05, %v4986_v48  ;;  %v8873_v49 = vmax.f32 %v8675_v33, 0.0  ;;  %v23335_v28 = vld [vmem:[#allocation104_spill] sm:$0xff] }
 0x3aa   : > { %v8178_v27 = vpop.permute.xlu0 %8177  ;;  %v20541_v3 = vmul.f32 %v20310_v25, %v5174_v60  ;;  %v7474_v52 = vmul.f32 %v12828_v19, %v23335_v28  ;;  %v8857_v63 = vmax.f32 %v8659_v53, 0.0  ;;  %12681 = vrsqrt.f32 %v5381_v15  ;;  %v5176_v25 = vld [vmem:[%s21702_s2 + $0x5c8] sm:$0xff]  ;;  %v12829_v60 = vld [vmem:[%s21700_s0 + $0x3d0] sm:$0xff] }
 0x3ab   : > { %v8874_v31 = vmax.f32 %v8676_v20, 0.0  ;;  %v4988_v30 = vmax.f32 %v4790_v1, 0.0  ;;  %v5383_v33 = vadd.f32 1e-05, %v4987_v10  ;;  %v4989_v54 = vmax.f32 %v4791_v45, 0.0  ;;  %v12830_v10 = vld [vmem:[%s21700_s0 + $0x3d8] sm:$0xff] }
 0x3ac   : > { %v20550_v48 = vpop.permute.xlu1 %7004  ;;  %7299 = vperm.xlu0 %12295, %v20536_v16   ;;  %v7489_v9 = vmul.f32 %v12829_v60, %v20443_v23  ;;  %v12173_v15 = vpack.c.bf16 %v8858_v6, %v8857_v63  ;;  %v8662_v1 = vadd.f32 %v20092_v40, %v7474_v52  ;;  %v4792_v36 = vsub.f32 %v4396_v7, %v4594_v37  ;;  %v5179_v40 = vld [vmem:[%s21702_s2 + $0x5e0] sm:$0xff]  ;;  %v5181_v52 = vld [vmem:[%s21702_s2 + $0x5f0] sm:$0xff] }
 0x3ad   : > { %7294 = vperm.xlu1 %12296, %v20541_v3   ;;  %v12171_v53 = vpack.c.bf16 %v8874_v31, %v8873_v49  ;;  %v20563_v20 = vmul.f32 %v20465_v62, %v5177_v58  ;;  %v7490_v45 = vmul.f32 %v12830_v10, %v20486_v56  ;;  %v20572_v23 = vmul.f32 %v20390_v50, %v5176_v25  ;;  %v5178_v56 = vld [vmem:[%s21702_s2 + $0x5d8] sm:$0xff] }
 0x3ae   : > { %v8677_v39 = vadd.f32 %v8178_v27, %v7489_v9  ;;  %v20569_v19 = vpop.permute.xlu0 %7009  ;;  %v8661_v62 = vadd.f32 %v20053_v59, %v7473_v2  ;;  %12683 = vrsqrt.f32 %v5382_v35  ;;  %v5385_v37 = vadd.f32 1e-05, %v4989_v54 }
 0x3af   : > { %12172 = vmatprep.subr.bf16.mxu1 %v12171_v53  ;;  %23336 = vst [vmem:[#allocation31_spill] sm:$0xff] %v20569_v19  ;;  %12685 = vrsqrt.f32 %v5383_v33  ;;  %v8860_v49 = vmax.f32 %v8662_v1, 0.0  ;;  %v5384_v31 = vadd.f32 1e-05, %v4988_v30  ;;  %v4990_v27 = vmax.f32 %v4792_v36, 0.0  ;;  %v5182_v36 = vld [vmem:[%s21702_s2 + $0x5f8] sm:$0xff] }
 0x3b0   : > { %v8183_v6 = vpop.permute.xlu1 %8182  ;;  %12174 = vmatpush3.bf16.msra.mxu1 %v12173_v15  ;;  %7309 = vperm.xlu0 %12295, %v20563_v20   ;;  %v12680_v50 = vpop.eup %12679  ;;  %v20584_v59 = vmul.f32 %v20492_v12, %v5179_v40  ;;  %v8875_v2 = vmax.f32 %v8677_v39, 0.0  ;;  %v20589_v28 = vmul.f32 %v20430_v0, %v5178_v56  ;;  %v8859_v63 = vmax.f32 %v8661_v62, 0.0  ;;  %v5180_v12 = vld [vmem:[%s21702_s2 + $0x5e8] sm:$0xff]  ;;  %v5183_v15 = vld [vmem:[%s21702_s2 + $0x600] sm:$0xff]  ;;  %v5185_v62 = vld [vmem:[%s21702_s2 + $0x610] sm:$0xff] }
 0x3b1   : > { %v8678_v7 = vadd.f32 %v8183_v6, %v7490_v45  ;;  %7304 = vperm.xlu1 %12296, %v20572_v23   ;;  %12687 = vrsqrt.f32 %v5385_v37  ;;  %v5386_v54 = vadd.f32 1e-05, %v4990_v27  ;;  %v20601_v60 = vmul.f32 %v12680_v50, %v5181_v52  ;;  %v5184_v56 = vld [vmem:[%s21702_s2 + $0x608] sm:$0xff]  ;;  %v23341_v52 = vld [vmem:[#allocation70_spill] sm:$0xff] }
 0x3b2   : > { %v12177_v0 = vpack.c.bf16 %v8860_v49, %v8859_v63  ;;  %12689 = vrsqrt.f32 %v5384_v31  ;;  %v20606_v53 = vmul.f32 %v20481_v29, %v5180_v12  ;;  %v20623_v40 = vmul.f32 %v20538_v22, %v5182_v36  ;;  %v5187_v49 = vld [vmem:[%s21702_s2 + $0x620] sm:$0xff]  ;;  %v23342_v63 = vld [vmem:[#allocation60_spill] sm:$0xff]  ;;  %v5188_v36 = vld [vmem:[%s21702_s2 + $0x628] sm:$0xff] }
 0x3b3   : > { %v8876_v35 = vmax.f32 %v8678_v7, 0.0  ;;  %v20586_v58 = vpop.permute.xlu0 %7019  ;;  %12691 = vrsqrt.f32 %v5386_v54  ;;  %v6105_v12 = vmul.f32 %v23342_v63, %v23341_v52  ;;  %v5891_v63 = vld [vmem:[%s21703_s3 + $0x360] sm:$0xff] }
 0x3b4   : > { %v20594_v25 = vpop.permute.xlu1 %7014  ;;  %7319 = vperm.xlu0 %12295, %v20584_v59   ;;  %v12682_v33 = vpop.eup %12681 }
 0x3b5   : > { %23337 = vst [vmem:[#allocation13_spill] sm:$0xff] %v20594_v25  ;;  %7314 = vperm.xlu1 %12296, %v20589_v28   ;;  %v12175_v30 = vpack.c.bf16 %v8876_v35, %v8875_v2  ;;  %v20618_v45 = vmul.f32 %v12682_v33, %v5183_v15  ;;  %v5186_v2 = vld [vmem:[%s21702_s2 + $0x618] sm:$0xff]  ;;  %v5893_v25 = vld [vmem:[%s21703_s3 + $0x370] sm:$0xff] }
 0x3b7   : > { %12176 = vmatprep.subr.bf16.mxu1 %v12175_v30  ;;  %v20603_v9 = vpop.permute.xlu0 %7029 }
 0x3b8   : > { %23338 = vst [vmem:[#allocation96_spill] sm:$0xff] %v20603_v9  ;;  %v20611_v1 = vpop.permute.xlu1 %7024  ;;  %12178 = vmatpush3.bf16.msra.mxu1 %v12177_v0  ;;  %7329 = vperm.xlu0 %12295, %v20601_v60   ;;  %v12684_v10 = vpop.eup %12683  ;;  %v5907_v0 = vld [vmem:[%s21703_s3 + $0x3e0] sm:$0xff]  ;;  %v23385_v9 = vld [vmem:[#allocation17_spill] sm:$0xff] }
 0x3b9   : > { %7324 = vperm.xlu1 %12296, %v20606_v53   ;;  %v12686_v29 = vpop.eup %12685  ;;  %v20639_v22 = vmul.f32 %v12684_v10, %v5184_v56  ;;  %v6303_v10 = vsub.f32 %v5907_v0, %v6105_v12  ;;  %v5908_v12 = vld [vmem:[%s21703_s3 + $0x3e8] sm:$0xff] }
 0x3ba   : > { %v20635_v37 = vmul.f32 %v12686_v29, %v5185_v62  ;;  %v23345_v29 = vld [vmem:[#allocation35_spill] sm:$0xff] }
 0x3bb   : > { %v20620_v39 = vpop.permute.xlu0 %8207  ;;  %v12688_v7 = vpop.eup %12687  ;;  %v23346_v62 = vld [vmem:[#allocation39_spill] sm:$0xff] }
 0x3bc   : > { %v20628_v6 = vpop.permute.xlu1 %7034  ;;  %7339 = vperm.xlu0 %12295, %v20618_v45   ;;  %v12690_v31 = vpop.eup %12689  ;;  %v20651_v35 = vmul.f32 %v12688_v7, %v5187_v49  ;;  %v6089_v56 = vmul.f32 %v23346_v62, %v23345_v29  ;;  %v23352_v29 = vld [vmem:[#allocation20_spill] sm:$0xff] }
 0x3bd   : > { %23339 = vst [vmem:[#allocation33_spill] sm:$0xff] %v20628_v6  ;;  %7334 = vperm.xlu1 %12296, %v20623_v40   ;;  %v20657_v33 = vmul.f32 %v12690_v31, %v5186_v2  ;;  %v12692_v54 = vpop.eup %12691  ;;  %v23349_v31 = vld [vmem:[#allocation45_spill] sm:$0xff]  ;;  %v23384_v6 = vld [vmem:[#allocation99_spill] sm:$0xff] }
 0x3be   : > { %v20673_v49 = vmul.f32 %v12692_v54, %v5188_v36  ;;  %v23350_v2 = vld [vmem:[#allocation121_spill] sm:$0xff]  ;;  %v6287_v0 = vsub.f32 %v5891_v63, %v6089_v56  ;;  %v23353_v54 = vld [vmem:[#allocation94_spill] sm:$0xff]  ;;  %v5892_v56 = vld [vmem:[%s21703_s3 + $0x368] sm:$0xff] }
 0x3bf   : > { %v20637_v50 = vpop.permute.xlu0 %7039  ;;  %v6106_v52 = vmul.f32 %v23350_v2, %v23349_v31  ;;  %v6127_v36 = vmul.f32 %v23353_v54, %v23352_v29  ;;  %v23355_v2 = vld [vmem:[#allocation56_spill] sm:$0xff]  ;;  %v23358_v29 = vld [vmem:[#allocation43_spill] sm:$0xff] }
 0x3c0   : > { %23340 = vst [vmem:[#allocation95_spill] sm:$0xff] %v20637_v50  ;;  %v20644_v27 = vpop.permute.xlu1 %8212  ;;  %7349 = vperm.xlu0 %12295, %v20635_v37   ;;  %23348 = vst [vmem:[#allocation77_spill] sm:$0xff] %v20673_v49  ;;  %v23359_v54 = vld [vmem:[#allocation75_spill] sm:$0xff] }
 0x3c1   : > { %7344 = vperm.xlu1 %12296, %v20639_v22   ;;  %v6304_v31 = vsub.f32 %v5908_v12, %v6106_v52 }
 0x3c3   : > { %v20655_v30 = vpop.permute.xlu0 %7049 }
 0x3c4   : > { %23343 = vst [vmem:[#allocation47_spill] sm:$0xff] %v20655_v30  ;;  %v20662_v15 = vpop.permute.xlu1 %7044  ;;  %7359 = vperm.xlu0 %12295, %v20651_v35  }
 0x3c5   : > { %23344 = vst [vmem:[#allocation21_spill] sm:$0xff] %v20662_v15  ;;  %7354 = vperm.xlu1 %12296, %v20657_v33  }
 0x3c7   : > { %v20671_v7 = vpop.permute.xlu0 %7059 }
 0x3c8   : > { %23347 = vst [vmem:[#allocation19_spill] sm:$0xff] %v20671_v7  ;;  %v20680_v30 = vpop.permute.xlu1 %7054  ;;  %8187 = vperm.xlu0 %12295, %v6303_v10   ;;  %v23356_v7 = vld [vmem:[#allocation67_spill] sm:$0xff]  ;;  %v5929_v10 = vld [vmem:[%s21703_s3 + $0x490] sm:$0xff] }
 0x3c9   : > { %23351 = vst [vmem:[#allocation81_spill] sm:$0xff] %v20680_v30  ;;  %7364 = vperm.xlu1 %12296, %v20673_v49   ;;  %v6090_v15 = vmul.f32 %v23356_v7, %v23355_v2  ;;  %v6325_v63 = vsub.f32 %v5929_v10, %v6127_v36  ;;  %v23361_v7 = vld [vmem:[#allocation30_spill] sm:$0xff]  ;;  %v23362_v2 = vld [vmem:[#allocation92_spill] sm:$0xff]  ;;  %v5930_v36 = vld [vmem:[%s21703_s3 + $0x498] sm:$0xff] }
 0x3ca   : > { %v6128_v50 = vmul.f32 %v23362_v2, %v23361_v7  ;;  %v23364_v10 = vld [vmem:[#allocation7_spill] sm:$0xff]  ;;  %v23367_v7 = vld [vmem:[#allocation80_spill] sm:$0xff]  ;;  %v23368_v2 = vld [vmem:[#allocation85_spill] sm:$0xff] }
 0x3cb   : > { %v20688_v62 = vpop.permute.xlu0 %7069  ;;  %v6288_v12 = vsub.f32 %v5892_v56, %v6090_v15  ;;  %v23382_v49 = vld [vmem:[#allocation122_spill] sm:$0xff] }
 0x3cc   : > { %23354 = vst [vmem:[#allocation58_spill] sm:$0xff] %v20688_v62  ;;  %v20695_v30 = vpop.permute.xlu1 %7064  ;;  %8107 = vperm.xlu0 %12295, %v6287_v0   ;;  %v6111_v62 = vmul.f32 %v23359_v54, %v23358_v29  ;;  %v23365_v29 = vld [vmem:[#allocation42_spill] sm:$0xff]  ;;  %v6326_v56 = vsub.f32 %v5930_v36, %v6128_v50 }
 0x3cd   : > { %23357 = vst [vmem:[#allocation51_spill] sm:$0xff] %v20695_v30  ;;  %8192 = vperm.xlu1 %12296, %v6304_v31   ;;  %v5913_v30 = vld [vmem:[%s21703_s3 + $0x410] sm:$0xff]  ;;  %v6107_v54 = vmul.f32 %v23365_v29, %v23364_v10  ;;  %v23371_v10 = vld [vmem:[#allocation61_spill] sm:$0xff] }
 0x3ce   : > { %v6309_v31 = vsub.f32 %v5913_v30, %v6111_v62  ;;  %v5914_v30 = vld [vmem:[%s21703_s3 + $0x418] sm:$0xff] }
 0x3cf   : > { %v20702_v52 = vpop.permute.xlu0 %7079 }
 0x3d0   : > { %23360 = vst [vmem:[#allocation104_spill] sm:$0xff] %v20702_v52  ;;  %v20709_v0 = vpop.permute.xlu1 %7074  ;;  %8297 = vperm.xlu0 %12295, %v6325_v63   ;;  %v6112_v52 = vmul.f32 %v23368_v2, %v23367_v7  ;;  %v23373_v7 = vld [vmem:[#allocation32_spill] sm:$0xff] }
 0x3d1   : > { %23363 = vst [vmem:[#allocation70_spill] sm:$0xff] %v20709_v0  ;;  %8112 = vperm.xlu1 %12296, %v6288_v12   ;;  %v5909_v0 = vld [vmem:[%s21703_s3 + $0x3f0] sm:$0xff] }
 0x3d2   : > { %v6305_v62 = vsub.f32 %v5909_v0, %v6107_v54  ;;  %v23370_v12 = vld [vmem:[#allocation76_spill] sm:$0xff]  ;;  %v6310_v36 = vsub.f32 %v5914_v30, %v6112_v52  ;;  %v23375_v54 = vld [vmem:[#allocation55_spill] sm:$0xff] }
 0x3d3   : > { %v20716_v15 = vpop.permute.xlu0 %7089  ;;  %v6091_v29 = vmul.f32 %v23371_v10, %v23370_v12  ;;  %v23378_v10 = vld [vmem:[#allocation4_spill] sm:$0xff] }
 0x3d4   : > { %23366 = vst [vmem:[#allocation60_spill] sm:$0xff] %v20716_v15  ;;  %v20723_v63 = vpop.permute.xlu1 %7084  ;;  %8217 = vperm.xlu0 %12295, %v6309_v31   ;;  %v23372_v15 = vld [vmem:[#allocation88_spill] sm:$0xff]  ;;  %v5910_v31 = vld [vmem:[%s21703_s3 + $0x3f8] sm:$0xff] }
 0x3d5   : > { %23369 = vst [vmem:[#allocation35_spill] sm:$0xff] %v20723_v63  ;;  %8302 = vperm.xlu1 %12296, %v6326_v56   ;;  %v6108_v2 = vmul.f32 %v23373_v7, %v23372_v15  ;;  %v6289_v0 = vsub.f32 %v5893_v25, %v6091_v29  ;;  %v23376_v56 = vld [vmem:[#allocation6_spill] sm:$0xff]  ;;  %v23377_v15 = vld [vmem:[#allocation24_spill] sm:$0xff]  ;;  %v23379_v29 = vld [vmem:[#allocation57_spill] sm:$0xff] }
 0x3d6   : > { %v6129_v12 = vmul.f32 %v23376_v56, %v23375_v54  ;;  %v6092_v7 = vmul.f32 %v23378_v10, %v23377_v15  ;;  %v23380_v54 = vld [vmem:[#allocation53_spill] sm:$0xff]  ;;  %v5915_v10 = vld [vmem:[%s21703_s3 + $0x420] sm:$0xff] }
 0x3d7   : > { %v7100_v50 = vpop.permute.xlu0 %7099  ;;  %v6306_v30 = vsub.f32 %v5910_v31, %v6108_v2  ;;  %v6113_v56 = vmul.f32 %v23380_v54, %v23379_v29  ;;  %v23381_v31 = vld [vmem:[#allocation41_spill] sm:$0xff] }
 0x3d8   : > { %v20735_v63 = vpop.permute.xlu1 %7094  ;;  %8197 = vperm.xlu0 %12295, %v6305_v62   ;;  %v6130_v15 = vmul.f32 %v23382_v49, %v23381_v31  ;;  %v12832_v49 = vld [vmem:[%s21700_s0 + $0x480] sm:$0xff]  ;;  %v23383_v29 = vld [vmem:[#allocation109_spill] sm:$0xff]  ;;  %v12834_v31 = vld [vmem:[%s21700_s0 + $0x488] sm:$0xff] }
 0x3d9   : > { %23374 = vst [vmem:[#allocation39_spill] sm:$0xff] %v20735_v63  ;;  %8222 = vperm.xlu1 %12296, %v6310_v36   ;;  %v5931_v63 = vld [vmem:[%s21703_s3 + $0x4a0] sm:$0xff]  ;;  %v5894_v36 = vld [vmem:[%s21703_s3 + $0x378] sm:$0xff]  ;;  %v6157_v54 = vmul.f32 %v20399_v21, %v23383_v29  ;;  %v5916_v21 = vld [vmem:[%s21703_s3 + $0x428] sm:$0xff] }
 0x3da   : > { %v6327_v25 = vsub.f32 %v5931_v63, %v6129_v12  ;;  %v6290_v2 = vsub.f32 %v5894_v36, %v6092_v7  ;;  %v5932_v63 = vld [vmem:[%s21703_s3 + $0x4a8] sm:$0xff]  ;;  %v7511_v12 = vmul.f32 %v12832_v49, %v7100_v50  ;;  %v12833_v7 = vld [vmem:[%s21700_s0 + $0x400] sm:$0xff] }
 0x3db   : > { %v20742_v52 = vpop.permute.xlu0 %7109  ;;  %v7495_v36 = vmul.f32 %v12833_v7, %v20586_v58  ;;  %v6328_v49 = vsub.f32 %v5932_v63, %v6130_v15  ;;  %v6114_v58 = vmul.f32 %v23385_v9, %v23384_v6 }
 0x3dc   : > { %v7105_v62 = vpop.permute.xlu1 %7104  ;;  %8117 = vperm.xlu0 %12295, %v6289_v0   ;;  %v12831_v0 = vld [vmem:[%s21700_s0 + $0x408] sm:$0xff] }
 0x3dd   : > { %8202 = vperm.xlu1 %12296, %v6306_v30   ;;  %v7496_v38 = vmul.f32 %v12831_v0, %v20611_v1  ;;  %v7512_v50 = vmul.f32 %v12834_v31, %v7105_v62  ;;  %v5943_v31 = vld [vmem:[%s21703_s3 + $0x500] sm:$0xff] }
 0x3df   : > { %v8288_v19 = vpop.permute.xlu0 %8287  ;;  %v8684_v1 = vadd.f32 %v20644_v27, %v7496_v38  ;;  %v5959_v38 = vld [vmem:[%s21703_s3 + $0x580] sm:$0xff]  ;;  %v8683_v27 = vadd.f32 %v20620_v39, %v7495_v36  ;;  %v6312_v36 = vsub.f32 %v5916_v21, %v6114_v58 }
 0x3e0   : > { %v20763_v30 = vpop.permute.xlu1 %7114  ;;  %8307 = vperm.xlu0 %12295, %v6327_v25   ;;  %v6311_v25 = vsub.f32 %v5915_v10, %v6113_v56  ;;  %v8966_v10 = vld [vmem:[%s18076_s16 + $0x78] sm:$0xff]  ;;  %v6355_v63 = vsub.f32 %v5959_v38, %v6157_v54  ;;  %v23388_v38 = vld [vmem:[#allocation54_spill] sm:$0xff] }
 0x3e1   : > { %8122 = vperm.xlu1 %12296, %v6290_v2   ;;  %v8699_v2 = vadd.f32 %v8288_v19, %v7511_v12  ;;  %v8967_v19 = vld [vmem:[%s18076_s16 + $0x80] sm:$0xff]  ;;  %v8882_v15 = vmax.f32 %v8684_v1, 0.0  ;;  %v23386_v12 = vld [vmem:[#allocation117_spill] sm:$0xff]  ;;  %v8881_v1 = vmax.f32 %v8683_v27, 0.0 }
 0x3e2   : > { %v6141_v9 = vmul.f32 %v20106_v41, %v23386_v12  ;;  %9212 = vmatprep.mubr.f32.mxu1 %v8967_v19  ;;  %v5960_v41 = vld [vmem:[%s21703_s3 + $0x588] sm:$0xff] }
 0x3e3   : > { %v20781_v0 = vpop.permute.xlu0 %7119  ;;  %v8897_v6 = vmax.f32 %v8699_v2, 0.0  ;;  %9213 = vmatmul.mubr.f32.gmra.mrb[200].mxu1 %v8966_v10  ;;  %v8980_v2 = vld [vmem:[%s18076_s16 + $0xe8] sm:$0xff]  ;;  %v12189_v58 = vpack.c.bf16 %v8882_v15, %v8881_v1  ;;  %v23393_v1 = vld [vmem:[#allocation5_spill] sm:$0xff] }
 0x3e4   : > { %v8293_v56 = vpop.permute.xlu1 %8292  ;;  %8227 = vperm.xlu0 %12295, %v6311_v25   ;;  %v23387_v25 = vld [vmem:[#allocation107_spill] sm:$0xff]  ;;  %9217 = vmatprep.mubr.f32.mxu1 %v8980_v2  ;;  %v5917_v2 = vld [vmem:[%s21703_s3 + $0x430] sm:$0xff] }
 0x3e5   : > { %v8700_v62 = vadd.f32 %v8293_v56, %v7512_v50  ;;  %8312 = vperm.xlu1 %12296, %v6328_v49   ;;  %v6158_v29 = vmul.f32 %v20446_v5, %v23387_v25  ;;  %v8979_v49 = vld [vmem:[%s18076_s16 + $0xe0] sm:$0xff]  ;;  %v6339_v5 = vsub.f32 %v5943_v31, %v6141_v9  ;;  %v23390_v19 = vld [vmem:[#allocation91_spill] sm:$0xff]  ;;  %v8993_v9 = vld [vmem:[%s18076_s16 + $0x150] sm:$0xff] }
 0x3e6   : > { %v23389_v56 = vld [vmem:[#allocation22_spill] sm:$0xff]  ;;  %v6142_v10 = vmul.f32 %v20149_v13, %v23390_v19  ;;  %v5944_v15 = vld [vmem:[%s21703_s3 + $0x508] sm:$0xff] }
 0x3e7   : > { %v8898_v39 = vmax.f32 %v8700_v62, 0.0  ;;  %v20796_v7 = vpop.permute.xlu0 %7129  ;;  %v6131_v21 = vmul.f32 %v23389_v56, %v23388_v38  ;;  %v6356_v62 = vsub.f32 %v5960_v41, %v6158_v29  ;;  %9218 = vmatmul.mubr.f32.gmra.mrb[202].mxu1 %v8979_v49  ;;  %v23391_v13 = vld [vmem:[#allocation78_spill] sm:$0xff]  ;;  %v9005_v38 = vld [vmem:[%s18076_s16 + $0x1b0] sm:$0xff] }
 0x3e8   : > { %v20803_v54 = vpop.permute.xlu1 %7124  ;;  %8447 = vperm.xlu0 %12295, %v6355_v63   ;;  %v5933_v63 = vld [vmem:[%s21703_s3 + $0x4b0] sm:$0xff]  ;;  %9222 = vmatprep.mubr.f32.mxu1 %v8993_v9  ;;  %v6340_v31 = vsub.f32 %v5944_v15, %v6142_v10  ;;  %v23394_v41 = vld [vmem:[#allocation86_spill] sm:$0xff] }
 0x3e9   : > { %8232 = vperm.xlu1 %12296, %v6312_v36   ;;  %v12187_v50 = vpack.c.bf16 %v8898_v39, %v8897_v6  ;;  %v8992_v6 = vld [vmem:[%s18076_s16 + $0x148] sm:$0xff]  ;;  %v6329_v39 = vsub.f32 %v5933_v63, %v6131_v21  ;;  %v23395_v21 = vld [vmem:[#allocation116_spill] sm:$0xff]  ;;  %v23397_v63 = vld [vmem:[#allocation97_spill] sm:$0xff] }
 0x3ea   : > { %v23392_v36 = vld [vmem:[#allocation11_spill] sm:$0xff]  ;;  %v23398_v15 = vld [vmem:[#allocation110_spill] sm:$0xff] }
 0x3eb   : > { %12188 = vmatprep.subr.bf16.mxu0 %v12187_v50  ;;  %v20812_v27 = vpop.permute.xlu0 %7139  ;;  %v6115_v25 = vmul.f32 %v23392_v36, %v23391_v13  ;;  %v6132_v50 = vmul.f32 %v23394_v41, %v23393_v1  ;;  %9223 = vmatmul.mubr.f32.gmra.mrb[204].mxu1 %v8992_v6  ;;  %v6116_v9 = vmul.f32 %v23398_v15, %v23397_v63  ;;  %v5961_v6 = vld [vmem:[%s21703_s3 + $0x590] sm:$0xff]  ;;  %v5918_v13 = vld [vmem:[%s21703_s3 + $0x438] sm:$0xff] }
 0x3ec   : > { %v20819_v12 = vpop.permute.xlu1 %7134  ;;  %12190 = vmatpush3.bf16.msra.mxu0 %v12189_v58  ;;  %8367 = vperm.xlu0 %12295, %v6339_v5   ;;  %v5934_v58 = vld [vmem:[%s21703_s3 + $0x4b8] sm:$0xff] }
 0x3ed   : > { %8452 = vperm.xlu1 %12296, %v6356_v62   ;;  %v9006_v5 = vld [vmem:[%s18076_s16 + $0x1b8] sm:$0xff]  ;;  %v6313_v56 = vsub.f32 %v5917_v2, %v6115_v25  ;;  %v6159_v62 = vmul.f32 %v20435_v26, %v23395_v21  ;;  %v6330_v10 = vsub.f32 %v5934_v58, %v6132_v50  ;;  %v9019_v26 = vld [vmem:[%s18076_s16 + $0x220] sm:$0xff]  ;;  %v6314_v50 = vsub.f32 %v5918_v13, %v6116_v9  ;;  %v23405_v9 = vld [vmem:[#allocation28_spill] sm:$0xff] }
 0x3ee   : > { %9227 = vmatprep.mubr.f32.mxu1 %v9006_v5  ;;  %v9018_v36 = vld [vmem:[%s18076_s16 + $0x218] sm:$0xff]  ;;  %v5945_v5 = vld [vmem:[%s21703_s3 + $0x510] sm:$0xff]  ;;  %v5935_v13 = vld [vmem:[%s21703_s3 + $0x4c0] sm:$0xff] }
 0x3ef   : > { %v20828_v29 = vpop.permute.xlu0 %7149  ;;  %9228 = vmatmul.mubr.f32.gmra.mrb[206].mxu1 %v9005_v38  ;;  %v6357_v25 = vsub.f32 %v5961_v6, %v6159_v62  ;;  %v23401_v2 = vld [vmem:[#allocation113_spill] sm:$0xff]  ;;  %v23403_v62 = vld [vmem:[#allocation87_spill] sm:$0xff]  ;;  %v6144_v6 = vmul.f32 %v20183_v11, %v23405_v9 }
 0x3f0   : > { %v20835_v49 = vpop.permute.xlu1 %7144  ;;  %8317 = vperm.xlu0 %12295, %v6329_v39   ;;  %9232 = vmatprep.mubr.f32.mxu1 %v9019_v26  ;;  %v6160_v58 = vmul.f32 %v20476_v44, %v23401_v2  ;;  %v23409_v11 = vld [vmem:[#allocation79_spill] sm:$0xff] }
 0x3f1   : > { %8372 = vperm.xlu1 %12296, %v6340_v31   ;;  %v23399_v31 = vld [vmem:[#allocation118_spill] sm:$0xff] }
 0x3f2   : > { %v6143_v1 = vmul.f32 %v20136_v47, %v23399_v31  ;;  %v8958_v47 = vld [vmem:[%s18076_s16 + $0x38] sm:$0xff]  ;;  %v23407_v31 = vld [vmem:[#allocation115_spill] sm:$0xff] }
 0x3f3   : > { %v20844_v19 = vpop.permute.xlu0 %7159  ;;  %9233 = vmatmul.mubr.f32.gmra.mrb[208].mxu1 %v9018_v36  ;;  %v5946_v36 = vld [vmem:[%s21703_s3 + $0x518] sm:$0xff] }
 0x3f4   : > { %23396 = vst [vmem:[#allocation45_spill] sm:$0xff] %v20844_v19  ;;  %v20851_v39 = vpop.permute.xlu1 %7154  ;;  %8237 = vperm.xlu0 %12295, %v6313_v56   ;;  %v5962_v56 = vld [vmem:[%s21703_s3 + $0x598] sm:$0xff]  ;;  %v6341_v21 = vsub.f32 %v5945_v5, %v6143_v1  ;;  %9397 = vmatprep.mubr.f32.mxu1 %v8958_v47  ;;  %v23408_v1 = vld [vmem:[#allocation114_spill] sm:$0xff]  ;;  %v23410_v5 = vld [vmem:[#allocation124_spill] sm:$0xff] }
 0x3f5   : > { %8322 = vperm.xlu1 %12296, %v6330_v10   ;;  %v23404_v10 = vld [vmem:[#allocation123_spill] sm:$0xff]  ;;  %v6358_v15 = vsub.f32 %v5962_v56, %v6160_v58  ;;  %v6342_v58 = vsub.f32 %v5946_v36, %v6144_v6  ;;  %v6134_v56 = vmul.f32 %v23410_v5, %v23409_v11  ;;  %v5919_v47 = vld [vmem:[%s21703_s3 + $0x440] sm:$0xff]  ;;  %v23413_v36 = vld [vmem:[#allocation36_spill] sm:$0xff] }
 0x3f6   : > { %v6133_v63 = vmul.f32 %v23404_v10, %v23403_v62  ;;  %v5936_v62 = vld [vmem:[%s21703_s3 + $0x4c8] sm:$0xff]  ;;  %v5925_v19 = vld [vmem:[%s21703_s3 + $0x470] sm:$0xff] }
 0x3f7   : > { %v20860_v41 = vpop.permute.xlu0 %7169  ;;  %v6332_v6 = vsub.f32 %v5936_v62, %v6134_v56 }
 0x3f8   : > { %23400 = vst [vmem:[#allocation121_spill] sm:$0xff] %v20860_v41  ;;  %v20867_v38 = vpop.permute.xlu1 %7164  ;;  %8457 = vperm.xlu0 %12295, %v6357_v25   ;;  %v6331_v25 = vsub.f32 %v5935_v13, %v6133_v63  ;;  %v23411_v63 = vld [vmem:[#allocation40_spill] sm:$0xff]  ;;  %v23412_v13 = vld [vmem:[#allocation111_spill] sm:$0xff] }
 0x3f9   : > { %23402 = vst [vmem:[#allocation20_spill] sm:$0xff] %v20867_v38  ;;  %8242 = vperm.xlu1 %12296, %v6314_v50   ;;  %v6117_v50 = vmul.f32 %v23408_v1, %v23407_v31  ;;  %v6118_v31 = vmul.f32 %v23413_v36, %v23412_v13  ;;  %v5963_v1 = vld [vmem:[%s21703_s3 + $0x5a0] sm:$0xff]  ;;  %v23417_v13 = vld [vmem:[#allocation125_spill] sm:$0xff] }
 0x3fb   : > { %v20875_v44 = vpop.permute.xlu0 %7179  ;;  %v6315_v10 = vsub.f32 %v5919_v47, %v6117_v50  ;;  %v5920_v50 = vld [vmem:[%s21703_s3 + $0x448] sm:$0xff]  ;;  %v23415_v47 = vld [vmem:[#allocation74_spill] sm:$0xff] }
 0x3fc   : > { %v20882_v26 = vpop.permute.xlu1 %7174  ;;  %8377 = vperm.xlu0 %12295, %v6341_v21   ;;  %v6316_v56 = vsub.f32 %v5920_v50, %v6118_v31  ;;  %v6162_v62 = vmul.f32 %v20516_v8, %v23415_v47  ;;  %v23419_v8 = vld [vmem:[#allocation3_spill] sm:$0xff] }
 0x3fd   : > { %23406 = vst [vmem:[#allocation94_spill] sm:$0xff] %v20882_v26  ;;  %8462 = vperm.xlu1 %12296, %v6358_v15   ;;  %v6161_v15 = vmul.f32 %v20473_v43, %v23411_v63  ;;  %v23414_v43 = vld [vmem:[#allocation34_spill] sm:$0xff]  ;;  %v6146_v50 = vmul.f32 %v20230_v24, %v23419_v8  ;;  %v23420_v47 = vld [vmem:[#allocation59_spill] sm:$0xff]  ;;  %v23423_v24 = vld [vmem:[#allocation48_spill] sm:$0xff] }
 0x3fe   : > { %v6145_v11 = vmul.f32 %v20173_v42, %v23414_v43  ;;  %v5947_v63 = vld [vmem:[%s21703_s3 + $0x520] sm:$0xff]  ;;  %v23416_v42 = vld [vmem:[#allocation44_spill] sm:$0xff] }
 0x3ff   : > { %v20889_v2 = vpop.permute.xlu0 %7189  ;;  %v6135_v36 = vmul.f32 %v23417_v13, %v23416_v42  ;;  %v5937_v43 = vld [vmem:[%s21703_s3 + $0x4d0] sm:$0xff]  ;;  %v23424_v13 = vld [vmem:[#allocation89_spill] sm:$0xff] }
 0x400   : > { %v20896_v21 = vpop.permute.xlu1 %7184  ;;  %8327 = vperm.xlu0 %12295, %v6331_v25   ;;  %v6136_v8 = vmul.f32 %v23424_v13, %v23423_v24  ;;  %v5921_v26 = vld [vmem:[%s21703_s3 + $0x450] sm:$0xff] }
 0x401   : > { %8382 = vperm.xlu1 %12296, %v6342_v58   ;;  %v6359_v58 = vsub.f32 %v5963_v1, %v6161_v15  ;;  %v5964_v15 = vld [vmem:[%s21703_s3 + $0x5a8] sm:$0xff]  ;;  %v23429_v24 = vld [vmem:[#allocation12_spill] sm:$0xff] }
 0x402   : > { %v6360_v1 = vsub.f32 %v5964_v15, %v6162_v62 }
 0x403   : > { %v20903_v9 = vpop.permute.xlu0 %7199 }
 0x404   : > { %v20910_v25 = vpop.permute.xlu1 %7194  ;;  %8247 = vperm.xlu0 %12295, %v6315_v10  }
 0x405   : > { %8332 = vperm.xlu1 %12296, %v6332_v6   ;;  %v6343_v6 = vsub.f32 %v5947_v63, %v6145_v11  ;;  %v5948_v11 = vld [vmem:[%s21703_s3 + $0x528] sm:$0xff]  ;;  %v23421_v63 = vld [vmem:[#allocation66_spill] sm:$0xff] }
 0x406   : > { %v6119_v42 = vmul.f32 %v23421_v63, %v23420_v47  ;;  %v6344_v15 = vsub.f32 %v5948_v11, %v6146_v50  ;;  %v23428_v63 = vld [vmem:[#allocation25_spill] sm:$0xff] }
 0x407   : > { %v20917_v5 = vpop.permute.xlu0 %7209  ;;  %v6120_v13 = vmul.f32 %v23429_v24, %v23428_v63  ;;  %v23434_v63 = vld [vmem:[#allocation46_spill] sm:$0xff] }
 0x408   : > { %v20924_v10 = vpop.permute.xlu1 %7204  ;;  %8467 = vperm.xlu0 %12295, %v6359_v58   ;;  %v6164_v24 = vmul.f32 %v20541_v3, %v23434_v63  ;;  %v23438_v3 = vld [vmem:[#allocation26_spill] sm:$0xff]  ;;  %v23439_v63 = vld [vmem:[#allocation129_spill] sm:$0xff] }
 0x409   : > { %8252 = vperm.xlu1 %12296, %v6316_v56   ;;  %v6333_v56 = vsub.f32 %v5937_v43, %v6135_v36  ;;  %v5938_v36 = vld [vmem:[%s21703_s3 + $0x4d8] sm:$0xff] }
 0x40a   : > { %v23426_v43 = vld [vmem:[#allocation93_spill] sm:$0xff]  ;;  %v6334_v11 = vsub.f32 %v5938_v36, %v6136_v8 }
 0x40b   : > { %v20931_v31 = vpop.permute.xlu0 %7219  ;;  %v6163_v47 = vmul.f32 %v20507_v4, %v23426_v43  ;;  %v23431_v4 = vld [vmem:[#allocation90_spill] sm:$0xff] }
 0x40c   : > { %23418 = vst [vmem:[#allocation56_spill] sm:$0xff] %v20931_v31  ;;  %v20938_v58 = vpop.permute.xlu1 %7214  ;;  %8387 = vperm.xlu0 %12295, %v6343_v6  }
 0x40d   : > { %8472 = vperm.xlu1 %12296, %v6360_v1   ;;  %v6317_v1 = vsub.f32 %v5921_v26, %v6119_v42  ;;  %v5922_v26 = vld [vmem:[%s21703_s3 + $0x458] sm:$0xff] }
 0x40e   : > { %v6318_v36 = vsub.f32 %v5922_v26, %v6120_v13 }
 0x40f   : > { %v20945_v62 = vpop.permute.xlu0 %7229 }
 0x410   : > { %23422 = vst [vmem:[#allocation67_spill] sm:$0xff] %v20945_v62  ;;  %v20952_v6 = vpop.permute.xlu1 %7224  ;;  %8337 = vperm.xlu0 %12295, %v6333_v56   ;;  %v5965_v62 = vld [vmem:[%s21703_s3 + $0x5b0] sm:$0xff] }
 0x411   : > { %23425 = vst [vmem:[#allocation43_spill] sm:$0xff] %v20952_v6  ;;  %8392 = vperm.xlu1 %12296, %v6344_v15   ;;  %v6361_v42 = vsub.f32 %v5965_v62, %v6163_v47  ;;  %v23432_v15 = vld [vmem:[#allocation10_spill] sm:$0xff]  ;;  %v5966_v62 = vld [vmem:[%s21703_s3 + $0x5b8] sm:$0xff] }
 0x412   : > { %v6147_v43 = vmul.f32 %v23432_v15, %v23431_v4  ;;  %v23437_v4 = vld [vmem:[#allocation63_spill] sm:$0xff]  ;;  %v6362_v26 = vsub.f32 %v5966_v62, %v6164_v24  ;;  %v5951_v6 = vld [vmem:[%s21703_s3 + $0x540] sm:$0xff] }
 0x413   : > { %v20959_v50 = vpop.permute.xlu0 %7239 }
 0x414   : > { %23427 = vst [vmem:[#allocation75_spill] sm:$0xff] %v20959_v50  ;;  %v20966_v56 = vpop.permute.xlu1 %7234  ;;  %8257 = vperm.xlu0 %12295, %v6317_v1   ;;  %v5949_v50 = vld [vmem:[%s21703_s3 + $0x530] sm:$0xff] }
 0x415   : > { %23430 = vst [vmem:[#allocation30_spill] sm:$0xff] %v20966_v56  ;;  %8342 = vperm.xlu1 %12296, %v6334_v11   ;;  %v6345_v47 = vsub.f32 %v5949_v50, %v6147_v43  ;;  %v23436_v11 = vld [vmem:[#allocation23_spill] sm:$0xff]  ;;  %v5950_v50 = vld [vmem:[%s21703_s3 + $0x538] sm:$0xff] }
 0x416   : > { %v6137_v15 = vmul.f32 %v23437_v4, %v23436_v11  ;;  %v23442_v11 = vld [vmem:[#allocation73_spill] sm:$0xff] }
 0x417   : > { %v20973_v8 = vpop.permute.xlu0 %7249 }
 0x418   : > { %23433 = vst [vmem:[#allocation92_spill] sm:$0xff] %v20973_v8  ;;  %v20980_v1 = vpop.permute.xlu1 %7244  ;;  %8477 = vperm.xlu0 %12295, %v6361_v42   ;;  %v6148_v8 = vmul.f32 %v23439_v63, %v23438_v3  ;;  %v23443_v3 = vld [vmem:[#allocation108_spill] sm:$0xff]  ;;  %v23444_v63 = vld [vmem:[#allocation127_spill] sm:$0xff] }
 0x419   : > { %23435 = vst [vmem:[#allocation7_spill] sm:$0xff] %v20980_v1  ;;  %8262 = vperm.xlu1 %12296, %v6318_v36   ;;  %v5939_v1 = vld [vmem:[%s21703_s3 + $0x4e0] sm:$0xff]  ;;  %v23441_v36 = vld [vmem:[#allocation100_spill] sm:$0xff]  ;;  %v6138_v56 = vmul.f32 %v23444_v63, %v23443_v3  ;;  %v23447_v3 = vld [vmem:[#allocation119_spill] sm:$0xff] }
 0x41a   : > { %v6335_v43 = vsub.f32 %v5939_v1, %v6137_v15  ;;  %v6121_v4 = vmul.f32 %v23442_v11, %v23441_v36  ;;  %v6346_v62 = vsub.f32 %v5950_v50, %v6148_v8  ;;  %v5940_v1 = vld [vmem:[%s21703_s3 + $0x4e8] sm:$0xff]  ;;  %v23446_v11 = vld [vmem:[#allocation65_spill] sm:$0xff] }
 0x41b   : > { %v20987_v13 = vpop.permute.xlu0 %7259  ;;  %v6336_v50 = vsub.f32 %v5940_v1, %v6138_v56  ;;  %v6122_v63 = vmul.f32 %v23447_v3, %v23446_v11  ;;  %v23450_v11 = vld [vmem:[#allocation82_spill] sm:$0xff] }
 0x41c   : > { %v20994_v42 = vpop.permute.xlu1 %7254  ;;  %8397 = vperm.xlu0 %12295, %v6345_v47   ;;  %v6166_v3 = vmul.f32 %v20572_v23, %v23450_v11  ;;  %v23454_v11 = vld [vmem:[#allocation72_spill] sm:$0xff] }
 0x41d   : > { %23440 = vst [vmem:[#allocation42_spill] sm:$0xff] %v20994_v42  ;;  %8482 = vperm.xlu1 %12296, %v6362_v26   ;;  %v5923_v42 = vld [vmem:[%s21703_s3 + $0x460] sm:$0xff]  ;;  %v6150_v31 = vmul.f32 %v20305_v17, %v23454_v11  ;;  %v8982_v17 = vld [vmem:[%s18076_s16 + $0xf8] sm:$0xff] }
 0x41e   : > { %v6319_v15 = vsub.f32 %v5923_v42, %v6121_v4  ;;  %v23445_v26 = vld [vmem:[#allocation2_spill] sm:$0xff]  ;;  %v5924_v42 = vld [vmem:[%s21703_s3 + $0x468] sm:$0xff]  ;;  %v23458_v11 = vld [vmem:[#allocation29_spill] sm:$0xff] }
 0x41f   : > { %v21001_v24 = vpop.permute.xlu0 %7269  ;;  %v6165_v36 = vmul.f32 %v20536_v16, %v23445_v26  ;;  %v23448_v4 = vld [vmem:[#allocation14_spill] sm:$0xff]  ;;  %v6320_v26 = vsub.f32 %v5924_v42, %v6122_v63  ;;  %v23452_v42 = vld [vmem:[#allocation120_spill] sm:$0xff] }
 0x420   : > { %v21008_v47 = vpop.permute.xlu1 %7264  ;;  %8347 = vperm.xlu0 %12295, %v6335_v43   ;;  %v5967_v43 = vld [vmem:[%s21703_s3 + $0x5c0] sm:$0xff] }
 0x421   : > { %8402 = vperm.xlu1 %12296, %v6346_v62   ;;  %v6363_v16 = vsub.f32 %v5967_v43, %v6165_v36  ;;  %v23449_v62 = vld [vmem:[#allocation68_spill] sm:$0xff]  ;;  %v5968_v36 = vld [vmem:[%s21703_s3 + $0x5c8] sm:$0xff]  ;;  %v23451_v63 = vld [vmem:[#allocation62_spill] sm:$0xff] }
 0x422   : > { %v6149_v56 = vmul.f32 %v23449_v62, %v23448_v4  ;;  %v6139_v4 = vmul.f32 %v23452_v42, %v23451_v63  ;;  %v6364_v62 = vsub.f32 %v5968_v36, %v6166_v3  ;;  %v23456_v3 = vld [vmem:[#allocation52_spill] sm:$0xff] }
 0x423   : > { %v21015_v8 = vpop.permute.xlu0 %7279 }
 0x424   : > { %v21022_v41 = vpop.permute.xlu1 %7274  ;;  %8267 = vperm.xlu0 %12295, %v6319_v15   ;;  %v6347_v43 = vsub.f32 %v5951_v6, %v6149_v56  ;;  %v5952_v6 = vld [vmem:[%s21703_s3 + $0x548] sm:$0xff] }
 0x425   : > { %8352 = vperm.xlu1 %12296, %v6336_v50   ;;  %v8969_v50 = vld [vmem:[%s18076_s16 + $0x90] sm:$0xff]  ;;  %v8968_v56 = vld [vmem:[%s18076_s16 + $0x88] sm:$0xff]  ;;  %v6348_v42 = vsub.f32 %v5952_v6, %v6150_v31  ;;  %v23460_v31 = vld [vmem:[#allocation38_spill] sm:$0xff] }
 0x426   : > { %9307 = vmatprep.mubr.f32.mxu0 %v8969_v50  ;;  %v23455_v50 = vld [vmem:[#allocation103_spill] sm:$0xff]  ;;  %v6167_v6 = vmul.f32 %v20563_v20, %v23460_v31  ;;  %v5926_v20 = vld [vmem:[%s21703_s3 + $0x478] sm:$0xff] }
 0x427   : > { %v21029_v1 = vpop.permute.xlu0 %7289  ;;  %v6123_v36 = vmul.f32 %v23456_v3, %v23455_v50  ;;  %9308 = vmatmul.mubr.f32.gmra.mrb[212].mxu0 %v8968_v56 }
 0x428   : > { %v21036_v15 = vpop.permute.xlu1 %7284  ;;  %8487 = vperm.xlu0 %12295, %v6363_v16   ;;  %v5941_v16 = vld [vmem:[%s21703_s3 + $0x4f0] sm:$0xff]  ;;  %9312 = vmatprep.mubr.f32.mxu0 %v8982_v17  ;;  %v23461_v17 = vld [vmem:[#allocation15_spill] sm:$0xff] }
 0x429   : > { %8272 = vperm.xlu1 %12296, %v6320_v26   ;;  %v6337_v26 = vsub.f32 %v5941_v16, %v6139_v4  ;;  %v5942_v4 = vld [vmem:[%s21703_s3 + $0x4f8] sm:$0xff]  ;;  %v8981_v16 = vld [vmem:[%s18076_s16 + $0xf0] sm:$0xff]  ;;  %v6321_v56 = vsub.f32 %v5925_v19, %v6123_v36 }
 0x42a   : > { %v8994_v19 = vld [vmem:[%s18076_s16 + $0x158] sm:$0xff] }
 0x42b   : > { %v21044_v23 = vpop.permute.xlu0 %7299  ;;  %9313 = vmatmul.mubr.f32.gmra.mrb[214].mxu0 %v8981_v16  ;;  %v9008_v16 = vld [vmem:[%s18076_s16 + $0x1c8] sm:$0xff] }
 0x42c   : > { %23453 = vst [vmem:[#allocation80_spill] sm:$0xff] %v21044_v23  ;;  %v21051_v38 = vpop.permute.xlu1 %7294  ;;  %8407 = vperm.xlu0 %12295, %v6347_v43   ;;  %v23459_v23 = vld [vmem:[#allocation101_spill] sm:$0xff] }
 0x42d   : > { %8492 = vperm.xlu1 %12296, %v6364_v62   ;;  %v6140_v43 = vmul.f32 %v23459_v23, %v23458_v11  ;;  %v8995_v23 = vld [vmem:[%s18076_s16 + $0x160] sm:$0xff]  ;;  %v23462_v11 = vld [vmem:[#allocation8_spill] sm:$0xff] }
 0x42e   : > { %9317 = vmatprep.mubr.f32.mxu0 %v8995_v23 }
 0x42f   : > { %v21060_v63 = vpop.permute.xlu0 %7309  ;;  %v6338_v3 = vsub.f32 %v5942_v4, %v6140_v43  ;;  %v23463_v43 = vld [vmem:[#allocation27_spill] sm:$0xff]  ;;  %9318 = vmatmul.mubr.f32.gmra.mrb[216].mxu0 %v8994_v19 }
 0x430   : > { %23457 = vst [vmem:[#allocation85_spill] sm:$0xff] %v21060_v63  ;;  %v21067_v62 = vpop.permute.xlu1 %7304  ;;  %8357 = vperm.xlu0 %12295, %v6337_v26   ;;  %v6124_v26 = vmul.f32 %v23462_v11, %v23461_v17  ;;  %v5969_v63 = vld [vmem:[%s21703_s3 + $0x5d0] sm:$0xff]  ;;  %v6151_v4 = vmul.f32 %v20296_v32, %v23463_v43  ;;  %v23465_v17 = vld [vmem:[#allocation50_spill] sm:$0xff]  ;;  %9322 = vmatprep.mubr.f32.mxu0 %v9008_v16  ;;  %v5970_v32 = vld [vmem:[%s21703_s3 + $0x5d8] sm:$0xff] }
 0x431   : > { %8412 = vperm.xlu1 %12296, %v6348_v42   ;;  %v6365_v36 = vsub.f32 %v5969_v63, %v6167_v6  ;;  %v5953_v11 = vld [vmem:[%s21703_s3 + $0x550] sm:$0xff]  ;;  %v9007_v63 = vld [vmem:[%s18076_s16 + $0x1c0] sm:$0xff]  ;;  %v23467_v16 = vld [vmem:[#allocation71_spill] sm:$0xff] }
 0x432   : > { %v6322_v23 = vsub.f32 %v5926_v20, %v6124_v26  ;;  %v6349_v6 = vsub.f32 %v5953_v11, %v6151_v4  ;;  %v23466_v26 = vld [vmem:[#allocation106_spill] sm:$0xff]  ;;  %v9020_v4 = vld [vmem:[%s18076_s16 + $0x228] sm:$0xff] }
 0x433   : > { %v21076_v50 = vpop.permute.xlu0 %7319  ;;  %v6169_v20 = vmul.f32 %v20584_v59, %v23466_v26  ;;  %9323 = vmatmul.mubr.f32.gmra.mrb[218].mxu0 %v9007_v63  ;;  %v5954_v59 = vld [vmem:[%s21703_s3 + $0x558] sm:$0xff]  ;;  %v23468_v11 = vld [vmem:[#allocation102_spill] sm:$0xff] }
 0x434   : > { %v21083_v42 = vpop.permute.xlu1 %7314  ;;  %8277 = vperm.xlu0 %12295, %v6321_v56   ;;  %v6168_v56 = vmul.f32 %v20589_v28, %v23465_v17  ;;  %v9021_v28 = vld [vmem:[%s18076_s16 + $0x230] sm:$0xff]  ;;  %v6152_v17 = vmul.f32 %v20335_v51, %v23467_v16  ;;  %v23469_v63 = vld [vmem:[#allocation49_spill] sm:$0xff] }
 0x435   : > { %8362 = vperm.xlu1 %12296, %v6338_v3   ;;  %9327 = vmatprep.mubr.f32.mxu0 %v9021_v28  ;;  %v6170_v26 = vmul.f32 %v20606_v53, %v23469_v63  ;;  %v6172_v63 = vmul.f32 %v20623_v40, %v20290_v46  ;;  %v6173_v46 = vmul.f32 %v20618_v45, %v20382_v57  ;;  %v12836_v40 = vld [vmem:[%s21700_s0 + $0x3e8] sm:$0xff]  ;;  %v5958_v57 = vld [vmem:[%s21703_s3 + $0x578] sm:$0xff]  ;;  %v23476_v45 = vld [vmem:[#allocation126_spill] sm:$0xff] }
 0x436   : > { %v6366_v43 = vsub.f32 %v5970_v32, %v6168_v56  ;;  %v6153_v56 = vmul.f32 %v20330_v61, %v23468_v11  ;;  %v6350_v32 = vsub.f32 %v5954_v59, %v6152_v17  ;;  %v23471_v17 = vld [vmem:[#allocation64_spill] sm:$0xff]  ;;  %v8960_v11 = vld [vmem:[%s18076_s16 + $0x48] sm:$0xff] }
 0x437   : > { %v21092_v31 = vpop.permute.xlu0 %7329  ;;  %9328 = vmatmul.mubr.f32.gmra.mrb[220].mxu0 %v9020_v4  ;;  %v5973_v59 = vld [vmem:[%s21703_s3 + $0x5f0] sm:$0xff] }
 0x438   : > { %23464 = vst [vmem:[#allocation76_spill] sm:$0xff] %v21092_v31  ;;  %v21099_v3 = vpop.permute.xlu1 %7324  ;;  %8497 = vperm.xlu0 %12295, %v6365_v36   ;;  %v5971_v36 = vld [vmem:[%s21703_s3 + $0x5e0] sm:$0xff]  ;;  %9492 = vmatprep.mubr.f32.mxu0 %v8960_v11  ;;  %v23475_v11 = vld [vmem:[#allocation84_spill] sm:$0xff] }
 0x439   : > { %8282 = vperm.xlu1 %12296, %v6322_v23   ;;  %v6367_v23 = vsub.f32 %v5971_v36, %v6169_v20  ;;  %v5972_v20 = vld [vmem:[%s21703_s3 + $0x5e8] sm:$0xff]  ;;  %v6154_v36 = vmul.f32 %v20369_v14, %v23471_v17 }
 0x43a   : > { %v6368_v53 = vsub.f32 %v5972_v20, %v6170_v26  ;;  %v5957_v26 = vld [vmem:[%s21703_s3 + $0x570] sm:$0xff]  ;;  %v5974_v20 = vld [vmem:[%s21703_s3 + $0x5f8] sm:$0xff] }
 0x43b   : > { %v21108_v19 = vpop.permute.xlu0 %7339 }
 0x43c   : > { %v21115_v31 = vpop.permute.xlu1 %7334  ;;  %8417 = vperm.xlu0 %12295, %v6349_v6   ;;  %v5955_v6 = vld [vmem:[%s21703_s3 + $0x560] sm:$0xff] }
 0x43d   : > { %8502 = vperm.xlu1 %12296, %v6366_v43   ;;  %v6351_v61 = vsub.f32 %v5955_v6, %v6153_v56  ;;  %v6171_v43 = vmul.f32 %v20601_v60, %v20313_v18  ;;  %v23472_v60 = vld [vmem:[#allocation98_spill] sm:$0xff] }
 0x43e   : > { %v6155_v56 = vmul.f32 %v20360_v34, %v23472_v60  ;;  %v12835_v34 = vld [vmem:[%s21700_s0 + $0x3e0] sm:$0xff] }
 0x43f   : > { %v21123_v51 = vpop.permute.xlu0 %7349  ;;  %v6369_v18 = vsub.f32 %v5973_v59, %v6171_v43  ;;  %v6370_v59 = vsub.f32 %v5974_v20, %v6172_v63  ;;  %v23477_v63 = vld [vmem:[#allocation83_spill] sm:$0xff] }
 0x440   : > { %v21130_v28 = vpop.permute.xlu1 %7344  ;;  %8507 = vperm.xlu0 %12295, %v6367_v23   ;;  %v5956_v23 = vld [vmem:[%s21703_s3 + $0x568] sm:$0xff]  ;;  %v6353_v43 = vsub.f32 %v5957_v26, %v6155_v56 }
 0x441   : > { %8422 = vperm.xlu1 %12296, %v6350_v32   ;;  %v6352_v14 = vsub.f32 %v5956_v23, %v6154_v36  ;;  %v23474_v23 = vld [vmem:[#allocation37_spill] sm:$0xff] }
 0x443   : > { %v21137_v16 = vpop.permute.xlu0 %7359 }
 0x444   : > { %23470 = vst [vmem:[#allocation61_spill] sm:$0xff] %v21137_v16  ;;  %v21144_v4 = vpop.permute.xlu1 %7354  ;;  %8427 = vperm.xlu0 %12295, %v6351_v61   ;;  %v7491_v61 = vmul.f32 %v12835_v34, %v20513_v55  ;;  %v5975_v55 = vld [vmem:[%s21703_s3 + $0x600] sm:$0xff]  ;;  %v23478_v34 = vld [vmem:[#allocation105_spill] sm:$0xff] }
 0x445   : > { %8512 = vperm.xlu1 %12296, %v6368_v53   ;;  %v7492_v53 = vmul.f32 %v12836_v40, %v20550_v48  ;;  %v12837_v48 = vld [vmem:[%s21700_s0 + $0x360] sm:$0xff]  ;;  %v6371_v20 = vsub.f32 %v5975_v55, %v6173_v46 }
 0x446   : > { %v7475_v56 = vmul.f32 %v12837_v48, %v23476_v45  ;;  %v23481_v45 = vld [vmem:[#allocation9_spill] sm:$0xff] }
 0x447   : > { %v8188_v32 = vpop.permute.xlu0 %8187 }
 0x448   : > { %v21157_v6 = vpop.permute.xlu1 %7364  ;;  %8517 = vperm.xlu0 %12295, %v6369_v18   ;;  %v8679_v17 = vadd.f32 %v8188_v32, %v7491_v61  ;;  %v6156_v18 = vmul.f32 %v23475_v11, %v23474_v23  ;;  %v6174_v61 = vmul.f32 %v20639_v22, %v23478_v34  ;;  %v12839_v22 = vld [vmem:[%s21700_s0 + $0x490] sm:$0xff]  ;;  %v5978_v34 = vld [vmem:[%s21703_s3 + $0x618] sm:$0xff] }
 0x449   : > { %23473 = vst [vmem:[#allocation88_spill] sm:$0xff] %v21157_v6  ;;  %8432 = vperm.xlu1 %12296, %v6352_v14   ;;  %v12838_v14 = vld [vmem:[%s21700_s0 + $0x368] sm:$0xff] }
 0x44a   : > { %v7476_v26 = vmul.f32 %v12838_v14, %v23477_v63  ;;  %v8877_v23 = vmax.f32 %v8679_v17, 0.0  ;;  %v6354_v48 = vsub.f32 %v5958_v57, %v6156_v18 }
 0x44b   : > { %v8108_v36 = vpop.permute.xlu0 %8107 }
 0x44c   : > { %v8193_v60 = vpop.permute.xlu1 %8192  ;;  %8437 = vperm.xlu0 %12295, %v6353_v43   ;;  %v23479_v43 = vld [vmem:[#allocation69_spill] sm:$0xff]  ;;  %v8663_v6 = vadd.f32 %v8108_v36, %v7475_v56  ;;  %v6177_v56 = vmul.f32 %v20651_v35, %v23481_v45  ;;  %v12843_v45 = vld [vmem:[%s21700_s0 + $0x3f0] sm:$0xff] }
 0x44d   : > { %v8680_v32 = vadd.f32 %v8193_v60, %v7492_v53  ;;  %8522 = vperm.xlu1 %12296, %v6370_v59   ;;  %v6175_v40 = vmul.f32 %v20635_v37, %v23479_v43  ;;  %v5976_v53 = vld [vmem:[%s21703_s3 + $0x608] sm:$0xff]  ;;  %v5977_v59 = vld [vmem:[%s21703_s3 + $0x610] sm:$0xff]  ;;  %v7513_v37 = vmul.f32 %v12839_v22, %v20742_v52  ;;  %v23480_v60 = vld [vmem:[#allocation18_spill] sm:$0xff] }
 0x44e   : > { %v6372_v18 = vsub.f32 %v5976_v53, %v6174_v61  ;;  %v6176_v57 = vmul.f32 %v20657_v33, %v23480_v60  ;;  %v8861_v63 = vmax.f32 %v8663_v6, 0.0  ;;  %v5979_v33 = vld [vmem:[%s21703_s3 + $0x620] sm:$0xff]  ;;  %v12841_v61 = vld [vmem:[%s21700_s0 + $0x410] sm:$0xff] }
 0x44f   : > { %v8878_v11 = vmax.f32 %v8680_v32, 0.0  ;;  %v8298_v16 = vpop.permute.xlu0 %8297  ;;  %v6373_v55 = vsub.f32 %v5977_v59, %v6175_v40  ;;  %v12840_v32 = vld [vmem:[%s21700_s0 + $0x498] sm:$0xff]  ;;  %v6375_v53 = vsub.f32 %v5979_v33, %v6177_v56 }
 0x450   : > { %v8113_v46 = vpop.permute.xlu1 %8112  ;;  %8527 = vperm.xlu0 %12295, %v6371_v20   ;;  %v7514_v14 = vmul.f32 %v12840_v32, %v20763_v30  ;;  %v8701_v52 = vadd.f32 %v8298_v16, %v7513_v37  ;;  %v23482_v30 = vld [vmem:[#allocation96_spill] sm:$0xff]  ;;  %v12842_v40 = vld [vmem:[%s21700_s0 + $0x418] sm:$0xff] }
 0x451   : > { %v12179_v17 = vpack.c.bf16 %v8878_v11, %v8877_v23  ;;  %v8664_v36 = vadd.f32 %v8113_v46, %v7476_v26  ;;  %8442 = vperm.xlu1 %12296, %v6354_v48   ;;  %v7497_v6 = vmul.f32 %v12841_v61, %v23482_v30  ;;  %v23483_v23 = vld [vmem:[#allocation33_spill] sm:$0xff]  ;;  %v6374_v48 = vsub.f32 %v5978_v34, %v6176_v57  ;;  %v23486_v57 = vld [vmem:[#allocation31_spill] sm:$0xff] }
 0x452   : > { %v7498_v11 = vmul.f32 %v12842_v40, %v23483_v23  ;;  %v8899_v59 = vmax.f32 %v8701_v52, 0.0  ;;  %v7493_v56 = vmul.f32 %v12843_v45, %v23486_v57  ;;  %v12848_v45 = vld [vmem:[%s21700_s0 + $0x4a8] sm:$0xff] }
 0x453   : > { %v8862_v20 = vmax.f32 %v8664_v36, 0.0  ;;  %12180 = vmatprep.subr.bf16.mxu1 %v12179_v17  ;;  %v8218_v26 = vpop.permute.xlu0 %8217  ;;  %v23484_v17 = vld [vmem:[#allocation112_spill] sm:$0xff]  ;;  %v23485_v36 = vld [vmem:[#allocation77_spill] sm:$0xff]  ;;  %v7516_v57 = vmul.f32 %v12848_v45, %v20803_v54  ;;  %v12850_v54 = vld [vmem:[%s21700_s0 + $0x428] sm:$0xff] }
 0x454   : > { %v8303_v35 = vpop.permute.xlu1 %8302  ;;  %8537 = vperm.xlu0 %12295, %v6373_v55   ;;  %v8685_v22 = vadd.f32 %v8218_v26, %v7497_v6  ;;  %v6178_v55 = vmul.f32 %v23485_v36, %v23484_v17  ;;  %v12845_v6 = vld [vmem:[%s21700_s0 + $0x370] sm:$0xff]  ;;  %v12847_v36 = vld [vmem:[%s21700_s0 + $0x4a0] sm:$0xff] }
 0x455   : > { %v12181_v43 = vpack.c.bf16 %v8862_v20, %v8861_v63  ;;  %v8702_v16 = vadd.f32 %v8303_v35, %v7514_v14  ;;  %8532 = vperm.xlu1 %12296, %v6372_v18   ;;  %v5980_v18 = vld [vmem:[%s21703_s3 + $0x628] sm:$0xff]  ;;  %v12844_v63 = vld [vmem:[%s21700_s0 + $0x3f8] sm:$0xff] }
 0x456   : > { %v23487_v20 = vld [vmem:[#allocation13_spill] sm:$0xff]  ;;  %v8883_v26 = vmax.f32 %v8685_v22, 0.0  ;;  %v6376_v61 = vsub.f32 %v5980_v18, %v6178_v55  ;;  %v7515_v55 = vmul.f32 %v12847_v36, %v20781_v0  ;;  %v12849_v0 = vld [vmem:[%s21700_s0 + $0x420] sm:$0xff] }
 0x457   : > { %v8900_v46 = vmax.f32 %v8702_v16, 0.0  ;;  %12182 = vmatpush3.bf16.msra.mxu1 %v12181_v43  ;;  %v8198_v37 = vpop.permute.xlu0 %8197  ;;  %v7494_v52 = vmul.f32 %v12844_v63, %v23487_v20  ;;  %v23488_v43 = vld [vmem:[#allocation16_spill] sm:$0xff] }
 0x458   : > { %v8223_v60 = vpop.permute.xlu1 %8222  ;;  %8547 = vperm.xlu0 %12295, %v6375_v53   ;;  %v8681_v33 = vadd.f32 %v8198_v37, %v7493_v56  ;;  %v7477_v16 = vmul.f32 %v12845_v6, %v23488_v43 }
 0x459   : > { %v12191_v32 = vpack.c.bf16 %v8900_v46, %v8899_v59  ;;  %v8686_v14 = vadd.f32 %v8223_v60, %v7498_v11  ;;  %8542 = vperm.xlu1 %12296, %v6374_v48   ;;  %v12846_v11 = vld [vmem:[%s21700_s0 + $0x378] sm:$0xff]  ;;  %v23489_v48 = vld [vmem:[#allocation128_spill] sm:$0xff] }
 0x45a   : > { %v7478_v53 = vmul.f32 %v12846_v11, %v23489_v48  ;;  %v8879_v59 = vmax.f32 %v8681_v33, 0.0  ;;  %v8971_v11 = vld [vmem:[%s18076_s16 + $0xa0] sm:$0xff] }
 0x45b   : > { %v8884_v34 = vmax.f32 %v8686_v14, 0.0  ;;  %12192 = vmatprep.subr.bf16.mxu0 %v12191_v32  ;;  %v8118_v35 = vpop.permute.xlu0 %8117  ;;  %v12851_v48 = vld [vmem:[%s21700_s0 + $0x580] sm:$0xff] }
 0x45c   : > { %v8203_v30 = vpop.permute.xlu1 %8202  ;;  %v8665_v22 = vadd.f32 %v8118_v35, %v7477_v16  ;;  %v23491_v35 = vld [vmem:[#allocation21_spill] sm:$0xff] }
 0x45d   : > { %v12193_v40 = vpack.c.bf16 %v8884_v34, %v8883_v26  ;;  %v8682_v23 = vadd.f32 %v8203_v30, %v7494_v52  ;;  %8552 = vperm.xlu1 %12296, %v6376_v61   ;;  %v23490_v52 = vld [vmem:[#allocation95_spill] sm:$0xff]  ;;  %v7500_v61 = vmul.f32 %v12850_v54, %v23491_v35  ;;  %v8997_v54 = vld [vmem:[%s18076_s16 + $0x170] sm:$0xff] }
 0x45e   : > { %v8863_v56 = vmax.f32 %v8665_v22, 0.0  ;;  %v7499_v26 = vmul.f32 %v12849_v0, %v23490_v52  ;;  %v12852_v22 = vld [vmem:[%s21700_s0 + $0x588] sm:$0xff] }
 0x45f   : > { %v8880_v46 = vmax.f32 %v8682_v23, 0.0  ;;  %12194 = vmatpush3.bf16.msra.mxu0 %v12193_v40  ;;  %v8308_v37 = vpop.permute.xlu0 %8307  ;;  %v8957_v40 = vld [vmem:[%s18076_s16 + $0x30] sm:$0xff] }
 0x460   : > { %v8123_v17 = vpop.permute.xlu1 %8122  ;;  %v8703_v14 = vadd.f32 %v8308_v37, %v7515_v55  ;;  %v7544_v37 = vmul.f32 %v12852_v22, %v21008_v47 }
 0x461   : > { %v12183_v60 = vpack.c.bf16 %v8880_v46, %v8879_v59  ;;  %v8666_v18 = vadd.f32 %v8123_v17, %v7478_v53  ;;  %v7543_v53 = vmul.f32 %v12851_v48, %v20987_v13  ;;  %v12853_v13 = vld [vmem:[%s21700_s0 + $0x500] sm:$0xff] }
 0x462   : > { %v8901_v30 = vmax.f32 %v8703_v14, 0.0  ;;  %v7527_v45 = vmul.f32 %v12853_v13, %v20875_v44  ;;  %v11052_v44 = vpop.f32.mrb[198].mxu0 }
 0x463   : > { %v8864_v32 = vmax.f32 %v8666_v18, 0.0  ;;  %12184 = vmatprep.subr.bf16.mxu1 %v12183_v60  ;;  %v8228_v63 = vpop.permute.xlu0 %8227  ;;  %v8970_v18 = vld [vmem:[%s18076_s16 + $0x98] sm:$0xff]  ;;  %v11053_v35 = vpop.f32.mrb[199].mxu0 }
 0x464   : > { %v8313_v20 = vpop.permute.xlu1 %8312  ;;  %v8687_v43 = vadd.f32 %v8228_v63, %v7499_v26  ;;  %v12854_v63 = vld [vmem:[%s21700_s0 + $0x508] sm:$0xff] }
 0x465   : > { %v12185_v34 = vpack.c.bf16 %v8864_v32, %v8863_v56  ;;  %v8704_v33 = vadd.f32 %v8313_v20, %v7516_v57  ;;  %v8984_v56 = vld [vmem:[%s18076_s16 + $0x108] sm:$0xff]  ;;  %v7528_v20 = vmul.f32 %v12854_v63, %v20896_v21  ;;  %v11054_v21 = vadd.f32 %v11053_v35, %v11052_v44  ;;  %v9009_v35 = vld [vmem:[%s18076_s16 + $0x1d0] sm:$0xff] }
 0x466   : > { %v8885_v17 = vmax.f32 %v8687_v43, 0.0 }
 0x467   : > { %v8902_v6 = vmax.f32 %v8704_v33, 0.0  ;;  %12186 = vmatpush3.bf16.msra.mxu1 %v12185_v34  ;;  %v8448_v16 = vpop.permute.xlu0 %8447  ;;  %v8983_v34 = vld [vmem:[%s18076_s16 + $0x100] sm:$0xff] }
 0x468   : > { %v8233_v23 = vpop.permute.xlu1 %8232  ;;  %v8731_v55 = vadd.f32 %v8448_v16, %v7543_v53  ;;  %v11055_v16 = vpop.f32.mrb[200].mxu0 }
 0x469   : > { %v12195_v59 = vpack.c.bf16 %v8902_v6, %v8901_v30  ;;  %v8688_v46 = vadd.f32 %v8233_v23, %v7500_v61  ;;  %v12855_v61 = vld [vmem:[%s21700_s0 + $0x4b0] sm:$0xff]  ;;  %v12856_v23 = vld [vmem:[%s21700_s0 + $0x4b8] sm:$0xff]  ;;  %v11056_v53 = vpop.f32.mrb[201].mxu0 }
 0x46a   : > { %9398 = vmatmul.mubr.f32.vlgmr.msra.gmra.mrb[210].mxu1 %v8957_v40  ;;  %v8929_v0 = vmax.f32 %v8731_v55, 0.0  ;;  %v7517_v30 = vmul.f32 %v12855_v61, %v20796_v7  ;;  %v11102_v40 = vpop.f32.mrb[198].mxu1  ;;  %v11058_v55 = vpop.f32.mrb[202].mxu0 }
 0x46b   : > { %v8886_v36 = vmax.f32 %v8688_v46, 0.0  ;;  %12196 = vmatprep.subr.bf16.mxu0 %v12195_v59  ;;  %v8368_v60 = vpop.permute.xlu0 %8367  ;;  %9402 = vmatprep.mubr.f32.mxu1 %v8971_v11  ;;  %v7518_v11 = vmul.f32 %v12856_v23, %v20819_v12  ;;  %v11103_v59 = vpop.f32.mrb[199].mxu1  ;;  %v23492_v12 = vld [vmem:[#allocation47_spill] sm:$0xff] }
 0x46c   : > { %v8453_v57 = vpop.permute.xlu1 %8452  ;;  %v8715_v47 = vadd.f32 %v8368_v60, %v7527_v45  ;;  %v12857_v60 = vld [vmem:[%s21700_s0 + $0x430] sm:$0xff]  ;;  %v9010_v45 = vld [vmem:[%s18076_s16 + $0x1d8] sm:$0xff] }
 0x46d   : > { %v12197_v32 = vpack.c.bf16 %v8886_v36, %v8885_v17  ;;  %v8732_v14 = vadd.f32 %v8453_v57, %v7544_v37  ;;  %v8996_v37 = vld [vmem:[%s18076_s16 + $0x168] sm:$0xff]  ;;  %v21292_v17 = vadd.f32 %v11056_v53, %v11055_v16  ;;  %v11104_v36 = vadd.f32 %v11103_v59, %v11102_v40  ;;  %v11059_v57 = vpop.f32.mrb[203].mxu0  ;;  %v12859_v16 = vld [vmem:[%s21700_s0 + $0x590] sm:$0xff]  ;;  %v12860_v59 = vld [vmem:[%s21700_s0 + $0x598] sm:$0xff] }
 0x46e   : > { %9403 = vmatmul.mubr.f32.gmra.mrb[212].mxu1 %v8970_v18  ;;  %v8913_v48 = vmax.f32 %v8715_v47, 0.0  ;;  %v7501_v18 = vmul.f32 %v12857_v60, %v23492_v12  ;;  %v21299_v47 = vadd.f32 %v11059_v57, %v11058_v55  ;;  %v11061_v63 = vpop.f32.mrb[204].mxu0  ;;  %v7545_v40 = vmul.f32 %v12859_v16, %v21001_v24  ;;  %v9022_v24 = vld [vmem:[%s18076_s16 + $0x238] sm:$0xff]  ;;  %v12861_v57 = vld [vmem:[%s21700_s0 + $0x510] sm:$0xff] }
 0x46f   : > { %v8930_v52 = vmax.f32 %v8732_v14, 0.0  ;;  %12198 = vmatpush3.bf16.msra.mxu0 %v12197_v32  ;;  %v8318_v26 = vpop.permute.xlu0 %8317  ;;  %9407 = vmatprep.mubr.f32.mxu1 %v8984_v56  ;;  %v9210_v14 = vadd.f32 %v11104_v36, %v11054_v21 }
 0x470   : > { %v8373_v33 = vpop.permute.xlu1 %8372  ;;  %v8705_v22 = vadd.f32 %v8318_v26, %v7517_v30  ;;  %v11062_v26 = vpop.f32.mrb[205].mxu0 }
 0x471   : > { %v12219_v6 = vpack.c.bf16 %v8930_v52, %v8929_v0  ;;  %v8716_v43 = vadd.f32 %v8373_v33, %v7528_v20  ;;  %v12858_v20 = vld [vmem:[%s21700_s0 + $0x438] sm:$0xff]  ;;  %v21306_v61 = vadd.f32 %v11062_v26, %v11061_v63  ;;  %v11064_v30 = vpop.f32.mrb[206].mxu0 }
 0x472   : > { %9408 = vmatmul.mubr.f32.gmra.mrb[214].mxu1 %v8983_v34  ;;  %v23493_v0 = vld [vmem:[#allocation81_spill] sm:$0xff]  ;;  %v8903_v34 = vmax.f32 %v8705_v22, 0.0  ;;  %v11065_v21 = vpop.f32.mrb[207].mxu0 }
 0x473   : > { %v8914_v46 = vmax.f32 %v8716_v43, 0.0  ;;  %12220 = vmatprep.subr.bf16.mxu1 %v12219_v6  ;;  %v8238_v7 = vpop.permute.xlu0 %8237  ;;  %9412 = vmatprep.mubr.f32.mxu1 %v8997_v54  ;;  %v7502_v52 = vmul.f32 %v12858_v20, %v23493_v0  ;;  %v9023_v43 = vld [vmem:[%s18076_s16 + $0x240] sm:$0xff]  ;;  %v11067_v53 = vpop.f32.mrb[208].mxu0  ;;  %v12862_v20 = vld [vmem:[%s21700_s0 + $0x518] sm:$0xff] }
 0x474   : > { %v8323_v13 = vpop.permute.xlu1 %8322  ;;  %v8689_v33 = vadd.f32 %v8238_v7, %v7501_v18  ;;  %v11068_v22 = vpop.f32.mrb[209].mxu0  ;;  %v7530_v0 = vmul.f32 %v12862_v20, %v20910_v25  ;;  %v12864_v25 = vld [vmem:[%s21700_s0 + $0x4c8] sm:$0xff] }
 0x475   : > { %v12221_v56 = vpack.c.bf16 %v8914_v46, %v8913_v48  ;;  %v8706_v32 = vadd.f32 %v8323_v13, %v7518_v11  ;;  %v21313_v48 = vadd.f32 %v11065_v21, %v11064_v30  ;;  %v7546_v46 = vmul.f32 %v12860_v59, %v21022_v41  ;;  %v11152_v12 = vpop.f32.mrb[210].mxu0  ;;  %v8962_v13 = vld [vmem:[%s18076_s16 + $0x58] sm:$0xff] }
 0x476   : > { %9413 = vmatmul.mubr.f32.gmra.mrb[216].mxu1 %v8996_v37  ;;  %v8887_v7 = vmax.f32 %v8689_v33, 0.0  ;;  %v21320_v60 = vadd.f32 %v11068_v22, %v11067_v53  ;;  %v7529_v41 = vmul.f32 %v12861_v57, %v20889_v2  ;;  %v12863_v2 = vld [vmem:[%s21700_s0 + $0x4c0] sm:$0xff]  ;;  %v23494_v53 = vld [vmem:[#allocation19_spill] sm:$0xff] }
 0x477   : > { %v8904_v44 = vmax.f32 %v8706_v32, 0.0  ;;  %12222 = vmatpush3.bf16.msra.mxu1 %v12221_v56  ;;  %v8458_v54 = vpop.permute.xlu0 %8457  ;;  %9417 = vmatprep.mubr.f32.mxu1 %v9010_v45  ;;  %v11153_v45 = vpop.f32.mrb[211].mxu0  ;;  %v12866_v22 = vld [vmem:[%s21700_s0 + $0x448] sm:$0xff] }
 0x478   : > { %v8243_v6 = vpop.permute.xlu1 %8242  ;;  %v8733_v36 = vadd.f32 %v8458_v54, %v7545_v40  ;;  %v11154_v63 = vadd.f32 %v11153_v45, %v11152_v12 }
 0x479   : > { %v12199_v23 = vpack.c.bf16 %v8904_v44, %v8903_v34  ;;  %v8690_v11 = vadd.f32 %v8243_v6, %v7502_v52 }
 0x47a   : > { %9418 = vmatmul.mubr.f32.gmra.mrb[218].mxu1 %v9009_v35  ;;  %v8931_v52 = vmax.f32 %v8733_v36, 0.0  ;;  %v21331_v33 = vadd.f32 %v11154_v63, %v9210_v14  ;;  %v7519_v35 = vmul.f32 %v12863_v2, %v20812_v27 }
 0x47b   : > { %v8888_v37 = vmax.f32 %v8690_v11, 0.0  ;;  %12200 = vmatprep.subr.bf16.mxu0 %v12199_v23  ;;  %v8378_v55 = vpop.permute.xlu0 %8377  ;;  %9422 = vmatprep.mubr.f32.mxu1 %v9023_v43  ;;  %v7520_v43 = vmul.f32 %v12864_v25, %v20835_v49  ;;  %v12865_v11 = vld [vmem:[%s21700_s0 + $0x440] sm:$0xff] }
 0x47c   : > { %v8463_v18 = vpop.permute.xlu1 %8462  ;;  %v8717_v34 = vadd.f32 %v8378_v55, %v7529_v41  ;;  %v7503_v27 = vmul.f32 %v12865_v11, %v23494_v53  ;;  %v12868_v41 = vld [vmem:[%s21700_s0 + $0x5a8] sm:$0xff] }
 0x47d   : > { %v12201_v56 = vpack.c.bf16 %v8888_v37, %v8887_v7  ;;  %v8734_v32 = vadd.f32 %v8463_v18, %v7546_v46  ;;  %v23495_v7 = vld [vmem:[#allocation51_spill] sm:$0xff]  ;;  %v12867_v18 = vld [vmem:[%s21700_s0 + $0x5a0] sm:$0xff] }
 0x47e   : > { %9423 = vmatmul.mubr.f32.gmra.mrb[220].mxu1 %v9022_v24  ;;  %v8915_v21 = vmax.f32 %v8717_v34, 0.0  ;;  %v7504_v49 = vmul.f32 %v12866_v22, %v23495_v7 }
 0x47f   : > { %v8932_v26 = vmax.f32 %v8734_v32, 0.0  ;;  %12202 = vmatpush3.bf16.msra.mxu0 %v12201_v56  ;;  %v8328_v44 = vpop.permute.xlu0 %8327  ;;  %9587 = vmatprep.mubr.f32.mxu1 %v8962_v13  ;;  %v7547_v13 = vmul.f32 %v12867_v18, %v21015_v8  ;;  %v7548_v56 = vmul.f32 %v12868_v41, %v21036_v15 }
 0x480   : > { %v8383_v54 = vpop.permute.xlu1 %8382  ;;  %v8707_v40 = vadd.f32 %v8328_v44, %v7519_v35 }
 0x481   : > { %v12223_v30 = vpack.c.bf16 %v8932_v26, %v8931_v52  ;;  %v8718_v6 = vadd.f32 %v8383_v54, %v7530_v0  ;;  %v12869_v26 = vld [vmem:[%s21700_s0 + $0x520] sm:$0xff]  ;;  %v12870_v54 = vld [vmem:[%s21700_s0 + $0x528] sm:$0xff] }
 0x482   : > { %v8905_v37 = vmax.f32 %v8707_v40, 0.0  ;;  %v7531_v8 = vmul.f32 %v12869_v26, %v20903_v9  ;;  %v7532_v15 = vmul.f32 %v12870_v54, %v20924_v10  ;;  %v12872_v40 = vld [vmem:[%s21700_s0 + $0x4d8] sm:$0xff] }
 0x483   : > { %v8916_v16 = vmax.f32 %v8718_v6, 0.0  ;;  %12224 = vmatprep.subr.bf16.mxu1 %v12223_v30  ;;  %v8248_v14 = vpop.permute.xlu0 %8247  ;;  %v7522_v10 = vmul.f32 %v12872_v40, %v20851_v39  ;;  %v12878_v54 = vld [vmem:[%s21700_s0 + $0x538] sm:$0xff]  ;;  %v23499_v40 = vld [vmem:[#allocation20_spill] sm:$0xff] }
 0x484   : > { %v8333_v23 = vpop.permute.xlu1 %8332  ;;  %v8691_v55 = vadd.f32 %v8248_v14, %v7503_v27 }
 0x485   : > { %v12225_v59 = vpack.c.bf16 %v8916_v16, %v8915_v21  ;;  %v8708_v46 = vadd.f32 %v8333_v23, %v7520_v43  ;;  %v12871_v43 = vld [vmem:[%s21700_s0 + $0x4d0] sm:$0xff] }
 0x486   : > { %v8889_v32 = vmax.f32 %v8691_v55, 0.0  ;;  %v7521_v9 = vmul.f32 %v12871_v43, %v20828_v29  ;;  %v23498_v43 = vld [vmem:[#allocation45_spill] sm:$0xff] }
 0x487   : > { %v8906_v36 = vmax.f32 %v8708_v46, 0.0  ;;  %12226 = vmatpush3.bf16.msra.mxu1 %v12225_v59  ;;  %v8468_v24 = vpop.permute.xlu0 %8467  ;;  %v12873_v59 = vld [vmem:[%s21700_s0 + $0x450] sm:$0xff]  ;;  %v23496_v46 = vld [vmem:[#allocation58_spill] sm:$0xff] }
 0x488   : > { %v8253_v12 = vpop.permute.xlu1 %8252  ;;  %v8735_v20 = vadd.f32 %v8468_v24, %v7547_v13  ;;  %v7505_v29 = vmul.f32 %v12873_v59, %v23496_v46  ;;  %v12875_v13 = vld [vmem:[%s21700_s0 + $0x5b0] sm:$0xff] }
 0x489   : > { %v12203_v45 = vpack.c.bf16 %v8906_v36, %v8905_v37  ;;  %v8692_v57 = vadd.f32 %v8253_v12, %v7504_v49  ;;  %v12874_v49 = vld [vmem:[%s21700_s0 + $0x458] sm:$0xff]  ;;  %v23497_v37 = vld [vmem:[#allocation70_spill] sm:$0xff]  ;;  %v23500_v59 = vld [vmem:[#allocation104_spill] sm:$0xff] }
 0x48a   : > { %v8933_v2 = vmax.f32 %v8735_v20, 0.0  ;;  %v7506_v39 = vmul.f32 %v12874_v49, %v23497_v37  ;;  %v23501_v49 = vld [vmem:[#allocation35_spill] sm:$0xff] }
 0x48b   : > { %v8890_v63 = vmax.f32 %v8692_v57, 0.0  ;;  %12204 = vmatprep.subr.bf16.mxu0 %v12203_v45  ;;  %v8388_v0 = vpop.permute.xlu0 %8387  ;;  %v7549_v45 = vmul.f32 %v12875_v13, %v21029_v1  ;;  %v23502_v13 = vld [vmem:[#allocation80_spill] sm:$0xff] }
 0x48c   : > { %v8473_v52 = vpop.permute.xlu1 %8472  ;;  %v8719_v30 = vadd.f32 %v8388_v0, %v7531_v8  ;;  %v12877_v8 = vld [vmem:[%s21700_s0 + $0x530] sm:$0xff] }
 0x48d   : > { %v12205_v34 = vpack.c.bf16 %v8890_v63, %v8889_v32  ;;  %v8736_v44 = vadd.f32 %v8473_v52, %v7548_v56  ;;  %v12876_v56 = vld [vmem:[%s21700_s0 + $0x5b8] sm:$0xff]  ;;  %v7533_v1 = vmul.f32 %v12877_v8, %v20917_v5  ;;  %v12885_v8 = vld [vmem:[%s21700_s0 + $0x540] sm:$0xff] }
 0x48e   : > { %v8917_v14 = vmax.f32 %v8719_v30, 0.0  ;;  %v7550_v32 = vmul.f32 %v12876_v56, %v21051_v38  ;;  %v7534_v38 = vmul.f32 %v12878_v54, %v20938_v58  ;;  %v12884_v56 = vld [vmem:[%s21700_s0 + $0x5c8] sm:$0xff] }
 0x48f   : > { %v8934_v35 = vmax.f32 %v8736_v44, 0.0  ;;  %12206 = vmatpush3.bf16.msra.mxu0 %v12205_v34  ;;  %v8338_v6 = vpop.permute.xlu0 %8337 }
 0x490   : > { %v8393_v25 = vpop.permute.xlu1 %8392  ;;  %v8709_v11 = vadd.f32 %v8338_v6, %v7521_v9 }
 0x491   : > { %v12227_v21 = vpack.c.bf16 %v8934_v35, %v8933_v2  ;;  %v8720_v16 = vadd.f32 %v8393_v25, %v7532_v15  ;;  %v12879_v25 = vld [vmem:[%s21700_s0 + $0x4e0] sm:$0xff] }
 0x492   : > { %v8907_v36 = vmax.f32 %v8709_v11, 0.0  ;;  %v7523_v5 = vmul.f32 %v12879_v25, %v23498_v43  ;;  %v12887_v43 = vld [vmem:[%s21700_s0 + $0x4f0] sm:$0xff] }
 0x493   : > { %v8918_v23 = vmax.f32 %v8720_v16, 0.0  ;;  %12228 = vmatprep.subr.bf16.mxu1 %v12227_v21  ;;  %v8258_v53 = vpop.permute.xlu0 %8257  ;;  %v12880_v16 = vld [vmem:[%s21700_s0 + $0x4e8] sm:$0xff] }
 0x494   : > { %v8343_v27 = vpop.permute.xlu1 %8342  ;;  %v8693_v24 = vadd.f32 %v8258_v53, %v7505_v29  ;;  %v7524_v58 = vmul.f32 %v12880_v16, %v23499_v40  ;;  %v12888_v40 = vld [vmem:[%s21700_s0 + $0x4f8] sm:$0xff] }
 0x495   : > { %v12229_v22 = vpack.c.bf16 %v8918_v23, %v8917_v14  ;;  %v8710_v7 = vadd.f32 %v8343_v27, %v7522_v10  ;;  %v12881_v27 = vld [vmem:[%s21700_s0 + $0x460] sm:$0xff] }
 0x496   : > { %v8891_v63 = vmax.f32 %v8693_v24, 0.0  ;;  %v7507_v46 = vmul.f32 %v12881_v27, %v23500_v59  ;;  %v12889_v59 = vld [vmem:[%s21700_s0 + $0x470] sm:$0xff] }
 0x497   : > { %v8908_v55 = vmax.f32 %v8710_v7, 0.0  ;;  %12230 = vmatpush3.bf16.msra.mxu1 %v12229_v22  ;;  %v8478_v12 = vpop.permute.xlu0 %8477  ;;  %v12882_v7 = vld [vmem:[%s21700_s0 + $0x468] sm:$0xff] }
 0x498   : > { %v8263_v18 = vpop.permute.xlu1 %8262  ;;  %v8737_v0 = vadd.f32 %v8478_v12, %v7549_v45  ;;  %v7508_v37 = vmul.f32 %v12882_v7, %v23501_v49  ;;  %v12890_v49 = vld [vmem:[%s21700_s0 + $0x478] sm:$0xff] }
 0x499   : > { %v12207_v57 = vpack.c.bf16 %v8908_v55, %v8907_v36  ;;  %v8694_v41 = vadd.f32 %v8263_v18, %v7506_v39  ;;  %v12883_v18 = vld [vmem:[%s21700_s0 + $0x5c0] sm:$0xff] }
 0x49a   : > { %v8935_v15 = vmax.f32 %v8737_v0, 0.0  ;;  %v7551_v45 = vmul.f32 %v12883_v18, %v23502_v13  ;;  %v12891_v13 = vld [vmem:[%s21700_s0 + $0x5d0] sm:$0xff] }
 0x49b   : > { %v8892_v20 = vmax.f32 %v8694_v41, 0.0  ;;  %12208 = vmatprep.subr.bf16.mxu0 %v12207_v57  ;;  %v8398_v52 = vpop.permute.xlu0 %8397 }
 0x49c   : > { %v8483_v26 = vpop.permute.xlu1 %8482  ;;  %v8721_v35 = vadd.f32 %v8398_v52, %v7533_v1  ;;  %v23503_v1 = vld [vmem:[#allocation56_spill] sm:$0xff] }
 0x49d   : > { %v12209_v34 = vpack.c.bf16 %v8892_v20, %v8891_v63  ;;  %v8738_v44 = vadd.f32 %v8483_v26, %v7550_v32  ;;  %v7552_v32 = vmul.f32 %v12884_v56, %v21067_v62 }
 0x49e   : > { %v8919_v10 = vmax.f32 %v8721_v35, 0.0 }
 0x49f   : > { %v8936_v2 = vmax.f32 %v8738_v44, 0.0  ;;  %12210 = vmatpush3.bf16.msra.mxu0 %v12209_v34  ;;  %v8348_v30 = vpop.permute.xlu0 %8347  ;;  %v7535_v34 = vmul.f32 %v12885_v8, %v23503_v1 }
 0x4a0   : > { %v8403_v6 = vpop.permute.xlu1 %8402  ;;  %v8711_v23 = vadd.f32 %v8348_v30, %v7523_v5  ;;  %v23505_v5 = vld [vmem:[#allocation121_spill] sm:$0xff] }
 0x4a1   : > { %v12231_v9 = vpack.c.bf16 %v8936_v2, %v8935_v15  ;;  %v8722_v21 = vadd.f32 %v8403_v6, %v7534_v38  ;;  %v12886_v38 = vld [vmem:[%s21700_s0 + $0x548] sm:$0xff] }
 0x4a2   : > { %v8909_v39 = vmax.f32 %v8711_v23, 0.0  ;;  %v23504_v15 = vld [vmem:[#allocation43_spill] sm:$0xff] }
 0x4a3   : > { %v8920_v14 = vmax.f32 %v8722_v21, 0.0  ;;  %12232 = vmatprep.subr.bf16.mxu1 %v12231_v9  ;;  %v8268_v11 = vpop.permute.xlu0 %8267  ;;  %v7536_v62 = vmul.f32 %v12886_v38, %v23504_v15  ;;  %v7525_v9 = vmul.f32 %v12887_v43, %v23505_v5  ;;  %v23510_v38 = vld [vmem:[#allocation67_spill] sm:$0xff] }
 0x4a4   : > { %v8353_v53 = vpop.permute.xlu1 %8352  ;;  %v8695_v55 = vadd.f32 %v8268_v11, %v7507_v46  ;;  %v23507_v46 = vld [vmem:[#allocation60_spill] sm:$0xff] }
 0x4a5   : > { %v12233_v29 = vpack.c.bf16 %v8920_v14, %v8919_v10  ;;  %v8712_v22 = vadd.f32 %v8353_v53, %v7524_v58  ;;  %v23506_v58 = vld [vmem:[#allocation94_spill] sm:$0xff] }
 0x4a6   : > { %v8893_v63 = vmax.f32 %v8695_v55, 0.0  ;;  %v7526_v10 = vmul.f32 %v12888_v40, %v23506_v58 }
 0x4a7   : > { %v8910_v36 = vmax.f32 %v8712_v22, 0.0  ;;  %12234 = vmatpush3.bf16.msra.mxu1 %v12233_v29  ;;  %v8488_v24 = vpop.permute.xlu0 %8487  ;;  %v7509_v29 = vmul.f32 %v12889_v59, %v23507_v46  ;;  %v12896_v46 = vld [vmem:[%s21700_s0 + $0x5e8] sm:$0xff] }
 0x4a8   : > { %v8273_v12 = vpop.permute.xlu1 %8272  ;;  %v8739_v0 = vadd.f32 %v8488_v24, %v7551_v45  ;;  %v23509_v45 = vld [vmem:[#allocation85_spill] sm:$0xff] }
 0x4a9   : > { %v12211_v57 = vpack.c.bf16 %v8910_v36, %v8909_v39  ;;  %v8696_v41 = vadd.f32 %v8273_v12, %v7508_v37  ;;  %v23508_v37 = vld [vmem:[#allocation39_spill] sm:$0xff] }
 0x4aa   : > { %v8937_v2 = vmax.f32 %v8739_v0, 0.0  ;;  %v7510_v39 = vmul.f32 %v12890_v49, %v23508_v37 }
 0x4ab   : > { %v8894_v20 = vmax.f32 %v8696_v41, 0.0  ;;  %12212 = vmatprep.subr.bf16.mxu0 %v12211_v57  ;;  %v8408_v52 = vpop.permute.xlu0 %8407  ;;  %v7553_v57 = vmul.f32 %v12891_v13, %v23509_v45 }
 0x4ac   : > { %v8493_v26 = vpop.permute.xlu1 %8492  ;;  %v8723_v30 = vadd.f32 %v8408_v52, %v7535_v34 }
 0x4ad   : > { %v12213_v44 = vpack.c.bf16 %v8894_v20, %v8893_v63  ;;  %v8740_v54 = vadd.f32 %v8493_v26, %v7552_v32  ;;  %v12892_v63 = vld [vmem:[%s21700_s0 + $0x5d8] sm:$0xff] }
 0x4ae   : > { %v8921_v14 = vmax.f32 %v8723_v30, 0.0  ;;  %v7554_v20 = vmul.f32 %v12892_v63, %v21083_v42  ;;  %v12894_v30 = vld [vmem:[%s21700_s0 + $0x558] sm:$0xff] }
 0x4af   : > { %v8938_v35 = vmax.f32 %v8740_v54, 0.0  ;;  %12214 = vmatpush3.bf16.msra.mxu0 %v12213_v44  ;;  %v8358_v6 = vpop.permute.xlu0 %8357  ;;  %v12893_v54 = vld [vmem:[%s21700_s0 + $0x550] sm:$0xff] }
 0x4b0   : > { %v8413_v25 = vpop.permute.xlu1 %8412  ;;  %v8713_v11 = vadd.f32 %v8358_v6, %v7525_v9  ;;  %v7537_v15 = vmul.f32 %v12893_v54, %v23510_v38  ;;  %v23511_v6 = vld [vmem:[#allocation30_spill] sm:$0xff]  ;;  %v23514_v54 = vld [vmem:[#allocation76_spill] sm:$0xff] }
 0x4b1   : > { %v12235_v21 = vpack.c.bf16 %v8938_v35, %v8937_v2  ;;  %v8724_v16 = vadd.f32 %v8413_v25, %v7536_v62  ;;  %v7538_v25 = vmul.f32 %v12894_v30, %v23511_v6  ;;  %v12900_v30 = vld [vmem:[%s21700_s0 + $0x5f8] sm:$0xff] }
 0x4b2   : > { %v8911_v36 = vmax.f32 %v8713_v11, 0.0  ;;  %v7558_v6 = vmul.f32 %v12900_v30, %v21115_v31  ;;  %v12908_v30 = vld [vmem:[%s21700_s0 + $0x628] sm:$0xff] }
 0x4b3   : > { %v8922_v23 = vmax.f32 %v8724_v16, 0.0  ;;  %12236 = vmatprep.subr.bf16.mxu1 %v12235_v21  ;;  %v8278_v53 = vpop.permute.xlu0 %8277  ;;  %v8959_v16 = vld [vmem:[%s18076_s16 + $0x40] sm:$0xff] }
 0x4b4   : > { %v8363_v27 = vpop.permute.xlu1 %8362  ;;  %v8697_v24 = vadd.f32 %v8278_v53, %v7509_v29  ;;  %v7556_v29 = vmul.f32 %v12896_v46, %v21099_v3 }
 0x4b5   : > { %v12237_v22 = vpack.c.bf16 %v8922_v23, %v8921_v14  ;;  %v8714_v7 = vadd.f32 %v8363_v27, %v7526_v10  ;;  %v8973_v10 = vld [vmem:[%s18076_s16 + $0xb0] sm:$0xff] }
 0x4b6   : > { %v11105_v32 = vpop.f32.mrb[200].mxu1  ;;  %v8895_v0 = vmax.f32 %v8697_v24, 0.0 }
 0x4b7   : > { %v8912_v55 = vmax.f32 %v8714_v7, 0.0  ;;  %12238 = vmatpush3.bf16.msra.mxu1 %v12237_v22  ;;  %v8498_v12 = vpop.permute.xlu0 %8497  ;;  %v11106_v1 = vpop.f32.mrb[201].mxu1 }
 0x4b8   : > { %v8283_v18 = vpop.permute.xlu1 %8282  ;;  %v8741_v26 = vadd.f32 %v8498_v12, %v7553_v57  ;;  %v11107_v44 = vadd.f32 %v11106_v1, %v11105_v32  ;;  %v23512_v12 = vld [vmem:[#allocation75_spill] sm:$0xff] }
 0x4b9   : > { %v12215_v41 = vpack.c.bf16 %v8912_v55, %v8911_v36  ;;  %v8698_v56 = vadd.f32 %v8283_v18, %v7510_v39  ;;  %v8986_v55 = vld [vmem:[%s18076_s16 + $0x118] sm:$0xff] }
 0x4ba   : > { %v21458_v42 = vadd.f32 %v11107_v44, %v21292_v17  ;;  %v11108_v35 = vpop.f32.mrb[202].mxu1  ;;  %v8939_v43 = vmax.f32 %v8741_v26, 0.0  ;;  %v12895_v17 = vld [vmem:[%s21700_s0 + $0x5e0] sm:$0xff]  ;;  %v8985_v26 = vld [vmem:[%s18076_s16 + $0x110] sm:$0xff] }
 0x4bb   : > { %v8896_v52 = vmax.f32 %v8698_v56, 0.0  ;;  %12216 = vmatprep.subr.bf16.mxu0 %v12215_v41  ;;  %v8418_v8 = vpop.permute.xlu0 %8417  ;;  %v11109_v40 = vpop.f32.mrb[203].mxu1  ;;  %v7555_v23 = vmul.f32 %v12895_v17, %v21076_v50  ;;  %v8972_v50 = vld [vmem:[%s18076_s16 + $0xa8] sm:$0xff] }
 0x4bc   : > { %v8503_v34 = vpop.permute.xlu1 %8502  ;;  %v8725_v9 = vadd.f32 %v8418_v8, %v7537_v15  ;;  %v11110_v14 = vadd.f32 %v11109_v40, %v11108_v35  ;;  %v12898_v41 = vld [vmem:[%s21700_s0 + $0x568] sm:$0xff] }
 0x4bd   : > { %v12217_v62 = vpack.c.bf16 %v8896_v52, %v8895_v0  ;;  %v8742_v2 = vadd.f32 %v8503_v34, %v7554_v20  ;;  %v23513_v56 = vld [vmem:[#allocation7_spill] sm:$0xff]  ;;  %v8999_v34 = vld [vmem:[%s18076_s16 + $0x180] sm:$0xff] }
 0x4be   : > { %v21471_v27 = vadd.f32 %v11110_v14, %v21299_v47  ;;  %v11111_v59 = vpop.f32.mrb[204].mxu1  ;;  %v8923_v22 = vmax.f32 %v8725_v9, 0.0  ;;  %v12897_v47 = vld [vmem:[%s21700_s0 + $0x560] sm:$0xff]  ;;  %v7540_v32 = vmul.f32 %v12898_v41, %v23513_v56  ;;  %v23515_v14 = vld [vmem:[#allocation92_spill] sm:$0xff]  ;;  %v9024_v41 = vld [vmem:[%s18076_s16 + $0x248] sm:$0xff] }
 0x4bf   : > { %v8940_v5 = vmax.f32 %v8742_v2, 0.0  ;;  %12218 = vmatpush3.bf16.msra.mxu0 %v12217_v62  ;;  %v8508_v21 = vpop.permute.xlu0 %8507  ;;  %v11112_v39 = vpop.f32.mrb[205].mxu1  ;;  %v7539_v18 = vmul.f32 %v12897_v47, %v23512_v12  ;;  %v12904_v47 = vld [vmem:[%s21700_s0 + $0x608] sm:$0xff] }
 0x4c0   : > { %v8423_v58 = vpop.permute.xlu1 %8422  ;;  %v8743_v49 = vadd.f32 %v8508_v21, %v7555_v23  ;;  %v11113_v24 = vadd.f32 %v11112_v39, %v11111_v59  ;;  %v8998_v21 = vld [vmem:[%s18076_s16 + $0x178] sm:$0xff]  ;;  %v23516_v59 = vld [vmem:[#allocation42_spill] sm:$0xff]  ;;  %v9025_v39 = vld [vmem:[%s18076_s16 + $0x250] sm:$0xff]  ;;  %v7560_v12 = vmul.f32 %v12904_v47, %v21130_v28 }
 0x4c1   : > { %v12239_v11 = vpack.c.bf16 %v8940_v5, %v8939_v43  ;;  %v8726_v53 = vadd.f32 %v8423_v58, %v7538_v25  ;;  %v9012_v58 = vld [vmem:[%s18076_s16 + $0x1e8] sm:$0xff] }
 0x4c2   : > { %9493 = vmatmul.mubr.f32.vlgmr.msra.gmra.mrb[222].mxu0 %v8959_v16  ;;  %v21484_v45 = vadd.f32 %v11113_v24, %v21306_v61  ;;  %v11114_v57 = vpop.f32.mrb[206].mxu1  ;;  %v8941_v63 = vmax.f32 %v8743_v49, 0.0  ;;  %v12899_v61 = vld [vmem:[%s21700_s0 + $0x5f0] sm:$0xff] }
 0x4c3   : > { %v8924_v7 = vmax.f32 %v8726_v53, 0.0  ;;  %12240 = vmatprep.subr.bf16.mxu1 %v12239_v11  ;;  %v8428_v37 = vpop.permute.xlu0 %8427  ;;  %9497 = vmatprep.mubr.f32.mxu0 %v8973_v10  ;;  %v11115_v8 = vpop.f32.mrb[207].mxu1  ;;  %v7557_v38 = vmul.f32 %v12899_v61, %v23514_v54  ;;  %v12901_v10 = vld [vmem:[%s21700_s0 + $0x570] sm:$0xff]  ;;  %v12902_v53 = vld [vmem:[%s21700_s0 + $0x578] sm:$0xff]  ;;  %v23517_v54 = vmov 1.0|1.0  }
 0x4c4   : > { %v8513_v36 = vpop.permute.xlu1 %8512  ;;  %v8727_v0 = vadd.f32 %v8428_v37, %v7539_v18  ;;  %v11116_v44 = vadd.f32 %v11115_v8, %v11114_v57  ;;  %v7541_v17 = vmul.f32 %v12901_v10, %v23515_v14  ;;  %v7542_v46 = vmul.f32 %v12902_v53, %v23516_v59  ;;  %v9011_v37 = vld [vmem:[%s18076_s16 + $0x1e0] sm:$0xff]  ;;  %v9000_v53 = vld [vmem:[%s18076_s16 + $0x188] sm:$0xff] }
 0x4c5   : > { %v12241_v13 = vpack.c.bf16 %v8924_v7, %v8923_v22  ;;  %v8744_v3 = vadd.f32 %v8513_v36, %v7556_v29  ;;  %v8976_v59 = vld [vmem:[%s18076_s16 + $0xc8] sm:$0xff] }
 0x4c6   : > { %9498 = vmatmul.mubr.f32.gmra.mrb[224].mxu0 %v8972_v50  ;;  %v21497_v2 = vadd.f32 %v11116_v44, %v21313_v48  ;;  %v11117_v35 = vpop.f32.mrb[208].mxu1  ;;  %v8925_v25 = vmax.f32 %v8727_v0, 0.0  ;;  %v12906_v0 = vld [vmem:[%s21700_s0 + $0x618] sm:$0xff] }
 0x4c7   : > { %v8942_v20 = vmax.f32 %v8744_v3, 0.0  ;;  %12242 = vmatpush3.bf16.msra.mxu1 %v12241_v13  ;;  %v8518_v52 = vpop.permute.xlu0 %8517  ;;  %9502 = vmatprep.mubr.f32.mxu0 %v8986_v55  ;;  %v11118_v16 = vpop.f32.mrb[209].mxu1 }
 0x4c8   : > { %v8433_v1 = vpop.permute.xlu1 %8432  ;;  %v8745_v5 = vadd.f32 %v8518_v52, %v7557_v38  ;;  %v11119_v48 = vadd.f32 %v11118_v16, %v11117_v35  ;;  %v7562_v52 = vmul.f32 %v12906_v0, %v21144_v4  ;;  %v12907_v38 = vld [vmem:[%s21700_s0 + $0x620] sm:$0xff] }
 0x4c9   : > { %v12243_v15 = vpack.c.bf16 %v8942_v20, %v8941_v63  ;;  %v8728_v62 = vadd.f32 %v8433_v1, %v7540_v32  ;;  %v8963_v32 = vld [vmem:[%s18076_s16 + $0x60] sm:$0xff] }
 0x4ca   : > { %9503 = vmatmul.mubr.f32.gmra.mrb[226].mxu0 %v8985_v26  ;;  %v21510_v11 = vadd.f32 %v11119_v48, %v21320_v60  ;;  %v8943_v29 = vmax.f32 %v8745_v5, 0.0  ;;  %v12903_v60 = vld [vmem:[%s21700_s0 + $0x600] sm:$0xff] }
 0x4cb   : > { %v8926_v43 = vmax.f32 %v8728_v62, 0.0  ;;  %12244 = vmatprep.subr.bf16.mxu1 %v12243_v15  ;;  %v8438_v9 = vpop.permute.xlu0 %8437  ;;  %9507 = vmatprep.mubr.f32.mxu0 %v8999_v34  ;;  %v7559_v36 = vmul.f32 %v12903_v60, %v21108_v19  ;;  %v12905_v19 = vld [vmem:[%s21700_s0 + $0x610] sm:$0xff]  ;;  %v23518_v15 = vld [vmem:[#allocation61_spill] sm:$0xff]  ;;  %v9028_v60 = vld [vmem:[%s18076_s16 + $0x268] sm:$0xff] }
 0x4cc   : > { %v8523_v40 = vpop.permute.xlu1 %8522  ;;  %v8729_v7 = vadd.f32 %v8438_v9, %v7541_v17  ;;  %v7561_v63 = vmul.f32 %v12905_v19, %v21123_v51  ;;  %v8961_v34 = vld [vmem:[%s18076_s16 + $0x50] sm:$0xff]  ;;  %v8975_v51 = vld [vmem:[%s18076_s16 + $0xc0] sm:$0xff]  ;;  %v7563_v4 = vmul.f32 %v12907_v38, %v23518_v15 }
 0x4cd   : > { %v12245_v31 = vpack.c.bf16 %v8926_v43, %v8925_v25  ;;  %v8746_v23 = vadd.f32 %v8523_v40, %v7558_v6  ;;  %v23519_v6 = vld [vmem:[#allocation88_spill] sm:$0xff]  ;;  %v8988_v40 = vld [vmem:[%s18076_s16 + $0x128] sm:$0xff]  ;;  %v8987_v17 = vld [vmem:[%s18076_s16 + $0x120] sm:$0xff] }
 0x4ce   : > { %9508 = vmatmul.mubr.f32.gmra.mrb[228].mxu0 %v8998_v21  ;;  %v8927_v18 = vmax.f32 %v8729_v7, 0.0  ;;  %v7564_v25 = vmul.f32 %v12908_v30, %v23519_v6  ;;  %v8974_v21 = vld [vmem:[%s18076_s16 + $0xb8] sm:$0xff]  ;;  %v9013_v7 = vld [vmem:[%s18076_s16 + $0x1f0] sm:$0xff] }
 0x4cf   : > { %v8944_v22 = vmax.f32 %v8746_v23, 0.0  ;;  %12246 = vmatpush3.bf16.msra.mxu1 %v12245_v31  ;;  %v8528_v49 = vpop.permute.xlu0 %8527  ;;  %9512 = vmatprep.mubr.f32.mxu0 %v9012_v58  ;;  %v9001_v31 = vld [vmem:[%s18076_s16 + $0x190] sm:$0xff] }
 0x4d0   : > { %v8443_v50 = vpop.permute.xlu1 %8442  ;;  %v8747_v3 = vadd.f32 %v8528_v49, %v7559_v36  ;;  %v9002_v49 = vld [vmem:[%s18076_s16 + $0x198] sm:$0xff] }
 0x4d1   : > { %v12247_v55 = vpack.c.bf16 %v8944_v22, %v8943_v29  ;;  %v8730_v24 = vadd.f32 %v8443_v50, %v7542_v46  ;;  %v9014_v46 = vld [vmem:[%s18076_s16 + $0x1f8] sm:$0xff]  ;;  %v8989_v29 = vld [vmem:[%s18076_s16 + $0x130] sm:$0xff]  ;;  %v23520_v22 = vmov 1.0   ;;  %v9015_v50 = vld [vmem:[%s18076_s16 + $0x200] sm:$0xff] }
 0x4d2   : > { %9513 = vmatmul.mubr.f32.gmra.mrb[230].mxu0 %v9011_v37  ;;  %v8945_v26 = vmax.f32 %v8747_v3, 0.0  ;;  %v9027_v37 = vld [vmem:[%s18076_s16 + $0x260] sm:$0xff] }
 0x4d3   : > { %v8928_v13 = vmax.f32 %v8730_v24, 0.0  ;;  %12248 = vmatprep.subr.bf16.mxu1 %v12247_v55  ;;  %v8538_v57 = vpop.permute.xlu0 %8537  ;;  %9517 = vmatprep.mubr.f32.mxu0 %v9025_v39  ;;  %v9026_v39 = vld [vmem:[%s18076_s16 + $0x258] sm:$0xff]  ;;  %s21645_s16 = sshll.u32 %s23522_s29, 3 }
 0x4d4   : > { %v8533_v56 = vpop.permute.xlu1 %8532  ;;  %v8749_v1 = vadd.f32 %v8538_v57, %v7561_v63  ;;  %s21655_s7 = scalar_lea.vmem %s21704_s4, %s21645_s16  ;;  %s21667_s8 = scalar_lea.vmem %s21705_s5, %s21645_s16 }
 0x4d5   : > { %v12249_v20 = vpack.c.bf16 %v8928_v13, %v8927_v18  ;;  %v8748_v28 = vadd.f32 %v8533_v56, %v7560_v12  ;;  %s300_s11 = scalar_lea.vmem %s21706_s6, %s21645_s16 }
 0x4d6   : > { %9518 = vmatmul.mubr.f32.gmra.mrb[232].mxu0 %v9024_v41  ;;  %v8947_v43 = vmax.f32 %v8749_v1, 0.0 }
 0x4d7   : > { %v8946_v8 = vmax.f32 %v8748_v28, 0.0  ;;  %12250 = vmatpush3.bf16.msra.mxu1 %v12249_v20  ;;  %11992 = vmatprep.mubr.msk.f32.mxu0 %vm9029_vm2, %v8963_v32  ;;  %v8548_v61 = vpop.permute.xlu0 %8547 }
 0x4d8   : > { %v8543_v44 = vpop.permute.xlu1 %8542  ;;  %12263 = vmatprep.subr.bf16.mxu1 %v23517_v54  ;;  %v8751_v9 = vadd.f32 %v8548_v61, %v7563_v4 }
 0x4d9   : > { %v12251_v62 = vpack.c.bf16 %v8946_v8, %v8945_v26  ;;  %v8750_v35 = vadd.f32 %v8543_v44, %v7562_v52 }
 0x4da   : > { %9588 = vmatmul.mubr.f32.vlgmr.msra.gmra.mrb[222].mxu1 %v8961_v34  ;;  %v8949_v10 = vmax.f32 %v8751_v9, 0.0 }
 0x4db   : > { %v8948_v5 = vmax.f32 %v8750_v35, 0.0  ;;  %12252 = vmatprep.subr.bf16.mxu0 %v12251_v62  ;;  %9592 = vmatprep.mubr.f32.mxu1 %v8975_v51 }
 0x4dc   : > { %v8553_v16 = vpop.permute.xlu1 %8552  ;;  %12254 = vmatpush3.bf16.msra.mxu0 %v12251_v62  ;;  %12264 = vmatpush3.bf16.msra.mxu1 %v23517_v54 }
 0x4dd   : > { %v12255_v58 = vpack.c.bf16 %v8948_v5, %v8947_v43  ;;  %v8752_v48 = vadd.f32 %v8553_v16, %v7564_v25  ;;  %12265 = vmatprep.subr.bf16.mxu1 %v23517_v54 }
 0x4de   : > { %9593 = vmatmul.mubr.f32.gmra.mrb[224].mxu1 %v8974_v21 }
 0x4df   : > { %v8950_v14 = vmax.f32 %v8752_v48, 0.0  ;;  %12256 = vmatprep.subr.bf16.mxu0 %v12255_v58  ;;  %9597 = vmatprep.mubr.f32.mxu1 %v8988_v40 }
 0x4e0   : > { %12258 = vmatpush3.bf16.msra.mxu0 %v12255_v58  ;;  %12266 = vmatpush3.bf16.msra.mxu1 %v23517_v54 }
 0x4e1   : > { %v12259_v23 = vpack.c.bf16 %v8950_v14, %v8949_v10  ;;  %12267 = vmatprep.subr.bf16.mxu1 %v23517_v54 }
 0x4e2   : > { %9598 = vmatmul.mubr.f32.gmra.mrb[226].mxu1 %v8987_v17 }
 0x4e3   : > { %12260 = vmatprep.subr.bf16.mxu0 %v12259_v23  ;;  %9602 = vmatprep.mubr.f32.mxu1 %v9001_v31 }
 0x4e4   : > { %12262 = vmatpush3.bf16.msra.mxu0 %v12259_v23  ;;  %12268 = vmatpush3.bf16.msra.mxu1 %v23517_v54 }
 0x4e5   : > { %12269 = vmatprep.subr.bf16.mxu0 %v23517_v54  ;;  %12013 = vmatprep.subr.msk.mxu1 %vm1095_vm1, %v23520_v22 }
 0x4e6   : > { %9603 = vmatmul.mubr.f32.gmra.mrb[228].mxu1 %v9000_v53 }
 0x4e7   : > { %11993 = vmatmul.mubr.msk.f32.vlgmr.msra.gmra.mrb[234].mxu0 %vm9029_vm2, %v8976_v59  ;;  %9607 = vmatprep.mubr.f32.mxu1 %v9014_v46 }
 0x4e8   : > { %11995 = vmatprep.mubr.msk.f32.mxu0 %vm9029_vm2, %v8989_v29  ;;  %12270 = vmatpush3.bf16.msra.mxu0 %v23517_v54 }
 0x4e9   : > { %12271 = vmatprep.subr.bf16.mxu0 %v23517_v54  ;;  %12014 = vmatpush3.msk.msra.mxu1 %vm1095_vm1, %v23520_v22 }
 0x4ea   : > { %9608 = vmatmul.mubr.f32.gmra.mrb[230].mxu1 %v9013_v7  ;;  %12275 = vmatprep.subr.bf16.mxu1 %v23517_v54 }
 0x4eb   : > { %11996 = vmatmul.mubr.msk.f32.gmra.mrb[236].mxu0 %vm9029_vm2, %v9002_v49  ;;  %9612 = vmatprep.mubr.f32.mxu1 %v9027_v37 }
 0x4ec   : > { %11998 = vmatprep.mubr.msk.f32.mxu0 %vm9029_vm2, %v9015_v50  ;;  %12272 = vmatpush3.bf16.msra.mxu0 %v23517_v54 }
 0x4ed   : > { %12273 = vmatprep.subr.bf16.mxu0 %v23517_v54 }
 0x4ee   : > { %9613 = vmatmul.mubr.f32.gmra.mrb[232].mxu1 %v9026_v39 }
 0x4ef   : > { %11999 = vmatmul.mubr.msk.f32.gmra.mrb[238].mxu0 %vm9029_vm2, %v9028_v60 }
 0x4f0   : > { %12274 = vmatpush3.bf16.msra.mxu0 %v23517_v54 }
 0x4f1   : > { %12036 = vmatprep.subr.msk.mxu0 %vm1095_vm1, %v23520_v22 }
 0x4f4   : > { %12037 = vmatpush3.msk.msra.mxu0 %vm1095_vm1, %v23520_v22 }
 0x4fa   : > { %v11155_v36 = vpop.f32.mrb[212].mxu0 }
 0x4fb   : > { %v11156_v55 = vpop.f32.mrb[213].mxu0 }
 0x4fc   : > { %v11157_v24 = vadd.f32 %v11156_v55, %v11155_v36 }
 0x4fe   : > { %v9310_v47 = vadd.f32 %v11157_v24, %v21458_v42  ;;  %v11158_v12 = vpop.f32.mrb[214].mxu0 }
 0x4ff   : > { %v11159_v18 = vpop.f32.mrb[215].mxu0 }
 0x500   : > { %v11160_v13 = vadd.f32 %v11159_v18, %v11158_v12 }
 0x502   : > { %v9315_v3 = vadd.f32 %v11160_v13, %v21471_v27  ;;  %v11161_v57 = vpop.f32.mrb[216].mxu0 }
 0x503   : > { %v11162_v41 = vpop.f32.mrb[217].mxu0 }
 0x504   : > { %v11163_v56 = vadd.f32 %v11162_v41, %v11161_v57 }
 0x506   : > { %v9320_v32 = vadd.f32 %v11163_v56, %v21484_v45  ;;  %v11164_v19 = vpop.f32.mrb[218].mxu0 }
 0x507   : > { %v11165_v63 = vpop.f32.mrb[219].mxu0 }
 0x508   : > { %v11166_v20 = vadd.f32 %v11165_v63, %v11164_v19 }
 0x50a   : > { %v9325_v28 = vadd.f32 %v11166_v20, %v21497_v2  ;;  %v11167_v0 = vpop.f32.mrb[220].mxu0 }
 0x50b   : > { %v11168_v52 = vpop.f32.mrb[221].mxu0 }
 0x50c   : > { %v11169_v26 = vadd.f32 %v11168_v52, %v11167_v0 }
 0x50e   : > { %v9330_v42 = vadd.f32 %v11169_v26, %v21510_v11 }
 0x53d   : > { %v11202_v8 = vpop.f32.mrb[210].mxu1 }
 0x53e   : > { %v11203_v1 = vpop.f32.mrb[211].mxu1 }
 0x53f   : > { %v11204_v34 = vadd.f32 %v11203_v1, %v11202_v8 }
 0x541   : > { %v9400_v27 = vadd.f32 %v11204_v34, %v21331_v33  ;;  %v11205_v44 = vpop.f32.mrb[212].mxu1 }
 0x542   : > { %v11206_v61 = vpop.f32.mrb[213].mxu1 }
 0x543   : > { %v11207_v51 = vadd.f32 %v11206_v61, %v11205_v44 }
 0x545   : > { %v9405_v38 = vadd.f32 %v11207_v51, %v9310_v47  ;;  %v11208_v45 = vpop.f32.mrb[214].mxu1 }
 0x546   : > { %v11209_v15 = vpop.f32.mrb[215].mxu1 }
 0x547   : > { %v11210_v4 = vadd.f32 %v11209_v15, %v11208_v45 }
 0x549   : > { %v9410_v62 = vadd.f32 %v11210_v4, %v9315_v3  ;;  %v11211_v35 = vpop.f32.mrb[216].mxu1 }
 0x54a   : > { %v11212_v2 = vpop.f32.mrb[217].mxu1 }
 0x54b   : > { %v11213_v30 = vadd.f32 %v11212_v2, %v11211_v35 }
 0x54d   : > { %v9415_v6 = vadd.f32 %v11213_v30, %v9320_v32  ;;  %v11214_v25 = vpop.f32.mrb[218].mxu1 }
 0x54e   : > { %v11215_v43 = vpop.f32.mrb[219].mxu1 }
 0x54f   : > { %v11216_v11 = vadd.f32 %v11215_v43, %v11214_v25 }
 0x551   : > { %v9420_v5 = vadd.f32 %v11216_v11, %v9325_v28  ;;  %v11217_v9 = vpop.f32.mrb[220].mxu1 }
 0x552   : > { %v11218_v21 = vpop.f32.mrb[221].mxu1 }
 0x553   : > { %v11219_v16 = vadd.f32 %v11218_v21, %v11217_v9 }
 0x555   : > { %v9425_v33 = vadd.f32 %v11219_v16, %v9330_v42 }
 0x595   : > { %v11252_v40 = vpop.f32.mrb[222].mxu0 }
 0x596   : > { %v11253_v58 = vpop.f32.mrb[223].mxu0 }
 0x597   : > { %v11254_v48 = vadd.f32 %v11253_v58, %v11252_v40 }
 0x599   : > { %v9495_v10 = vadd.f32 %v11254_v48, %v9400_v27  ;;  %v11255_v14 = vpop.f32.mrb[224].mxu0 }
 0x59a   : > { %v11256_v17 = vpop.f32.mrb[225].mxu0 }
 0x59b   : > { %v11257_v31 = vadd.f32 %v11256_v17, %v11255_v14 }
 0x59d   : > { %v9500_v23 = vadd.f32 %v11257_v31, %v9405_v38  ;;  %v11258_v53 = vpop.f32.mrb[226].mxu0 }
 0x59e   : > { %v11259_v59 = vpop.f32.mrb[227].mxu0 }
 0x59f   : > { %v11260_v46 = vadd.f32 %v11259_v59, %v11258_v53 }
 0x5a1   : > { %v9505_v29 = vadd.f32 %v11260_v46, %v9410_v62  ;;  %v11261_v7 = vpop.f32.mrb[228].mxu0 }
 0x5a2   : > { %v11262_v49 = vpop.f32.mrb[229].mxu0 }
 0x5a3   : > { %v11263_v37 = vadd.f32 %v11262_v49, %v11261_v7 }
 0x5a5   : > { %v9510_v50 = vadd.f32 %v11263_v37, %v9415_v6  ;;  %v11264_v39 = vpop.f32.mrb[230].mxu0 }
 0x5a6   : > { %v11265_v60 = vpop.f32.mrb[231].mxu0 }
 0x5a7   : > { %v11266_v36 = vadd.f32 %v11265_v60, %v11264_v39 }
 0x5a9   : > { %v9515_v55 = vadd.f32 %v11266_v36, %v9420_v5  ;;  %v11267_v24 = vpop.f32.mrb[232].mxu0 }
 0x5aa   : > { %v11268_v47 = vpop.f32.mrb[233].mxu0 }
 0x5ab   : > { %v11269_v12 = vadd.f32 %v11268_v47, %v11267_v24 }
 0x5ad   : > { %v9520_v18 = vadd.f32 %v11269_v12, %v9425_v33  ;;  %v11302_v13 = vpop.f32.mrb[222].mxu1 }
 0x5ae   : > { %v11303_v3 = vpop.f32.mrb[223].mxu1 }
 0x5af   : > { %v11304_v57 = vadd.f32 %v11303_v3, %v11302_v13 }
 0x5b1   : > { %v11305_v41 = vpop.f32.mrb[224].mxu1  ;;  %v9590_v56 = vadd.f32 %v11304_v57, %v9495_v10 }
 0x5b2   : > { %v11306_v32 = vpop.f32.mrb[225].mxu1 }
 0x5b3   : > { %v11307_v19 = vadd.f32 %v11306_v32, %v11305_v41 }
 0x5b5   : > { %v11308_v63 = vpop.f32.mrb[226].mxu1  ;;  %v9595_v20 = vadd.f32 %v11307_v19, %v9500_v23 }
 0x5b6   : > { %v11309_v28 = vpop.f32.mrb[227].mxu1 }
 0x5b7   : > { %v11310_v0 = vadd.f32 %v11309_v28, %v11308_v63 }
 0x5b9   : > { %v11311_v52 = vpop.f32.mrb[228].mxu1  ;;  %v9600_v26 = vadd.f32 %v11310_v0, %v9505_v29 }
 0x5ba   : > { %v11312_v42 = vpop.f32.mrb[229].mxu1  ;;  %v11994_v8 = vpop.f32.mrb[234].mxu0 }
 0x5bb   : > { %v11313_v1 = vadd.f32 %v11312_v42, %v11311_v52  ;;  %v21593_v34 = vadd.f32 %v11994_v8, %v9595_v20  ;;  %v9684_v27 = vpop.f32.mrb[235].mxu0 }
 0x5bc   : > { %v21595_v44 = vadd.f32 %v9684_v27, %v9590_v56 }
 0x5bd   : > { %v11314_v61 = vpop.f32.mrb[230].mxu1  ;;  %v9605_v51 = vadd.f32 %v11313_v1, %v9510_v50  ;;  %v9827_v4 = vmul.f32 %v21593_v34, %v21593_v34  ;;  %v9976_v1 = vld [vmem:[%s21655_s7 + $0x8] sm:$0xff] }
 0x5be   : > { %v9826_v38 = vmul.f32 %v21595_v44, %v21595_v44  ;;  %v11315_v45 = vpop.f32.mrb[231].mxu1  ;;  %v11997_v15 = vpop.f32.mrb[236].mxu0  ;;  %12015 = vmatprep.mubr.msk.f32.mxu1 %vm500_vm0, %v21595_v44 }
 0x5bf   : > { %v11316_v62 = vadd.f32 %v11315_v45, %v11314_v61  ;;  %v21603_v35 = vadd.f32 %v11997_v15, %v9605_v51  ;;  %v9694_v2 = vpop.f32.mrb[237].mxu0  ;;  %12016 = vmatmul.mubr.msk.f32.vlgmr.msra.gmra.mrb[234].mxu1 %vm500_vm0, %v21593_v34 }
 0x5c0   : > { %v21607_v30 = vadd.f32 %v9694_v2, %v9600_v26  ;;  %12279 = vmatpush3.bf16.msra.mxu1 %v23517_v54  ;;  %12038 = vmatprep.mubr.msk.f32.mxu0 %vm500_vm0, %v9826_v38  ;;  %v9975_v38 = vld [vmem:[%s21655_s7] sm:$0xff] }
 0x5c1   : > { %v11317_v6 = vpop.f32.mrb[232].mxu1  ;;  %12039 = vmatmul.mubr.msk.f32.vlgmr.msra.gmra.mrb[240].mxu0 %vm500_vm0, %v9827_v4  ;;  %v9610_v25 = vadd.f32 %v11316_v62, %v9515_v55  ;;  %12276 = vmatprep.subr.bf16.mxu1 %v23517_v54  ;;  %v9829_v58 = vmul.f32 %v21603_v35, %v21603_v35 }
 0x5c2   : > { %v11318_v43 = vpop.f32.mrb[233].mxu1  ;;  %v12000_v11 = vpop.f32.mrb[238].mxu0  ;;  %12018 = vmatprep.mubr.msk.f32.mxu1 %vm500_vm0, %v21607_v30  ;;  %v9828_v40 = vmul.f32 %v21607_v30, %v21607_v30 }
 0x5c3   : > { %v11319_v5 = vadd.f32 %v11318_v43, %v11317_v6  ;;  %v9704_v9 = vpop.f32.mrb[239].mxu0  ;;  %12019 = vmatmul.mubr.msk.f32.gmra.mrb[236].mxu1 %vm500_vm0, %v21603_v35 }
 0x5c4   : > { %v21617_v21 = vadd.f32 %v9704_v9, %v9610_v25  ;;  %12280 = vmatpush3.bf16.msra.mxu1 %v23517_v54 }
 0x5c5   : > { %v9615_v16 = vadd.f32 %v11319_v5, %v9520_v18  ;;  %12277 = vmatprep.subr.bf16.mxu1 %v23517_v54  ;;  %v10000_v5 = vld [vmem:[%s21667_s8 + $0x8] sm:$0xff] }
 0x5c6   : > { %12021 = vmatprep.mubr.msk.f32.mxu1 %vm500_vm0, %v21617_v21  ;;  %v9830_v48 = vmul.f32 %v21617_v21, %v21617_v21 }
 0x5c7   : > { %v21623_v33 = vadd.f32 %v12000_v11, %v9615_v16 }
 0x5c8   : > { %12281 = vmatpush3.bf16.msra.mxu1 %v23517_v54 }
 0x5c9   : > { %12022 = vmatmul.mubr.msk.f32.gmra.mrb[238].mxu1 %vm500_vm0, %v21623_v33  ;;  %12278 = vmatprep.subr.msk.mxu1 %vm1095_vm1, %v23520_v22  ;;  %v9831_v54 = vmul.f32 %v21623_v33, %v21623_v33 }
 0x5ca   : > { %12041 = vmatprep.mubr.msk.f32.mxu1 %vm500_vm0, %v9828_v40  ;;  %v9999_v40 = vld [vmem:[%s21667_s8] sm:$0xff] }
 0x5cc   : > { %12282 = vmatpush3.msk.msra.mxu1 %vm1095_vm1, %v23520_v22 }
 0x5cd   : > { %12042 = vmatmul.mubr.msk.f32.vlgmr.msra.gmra.mrb[240].mxu1 %vm500_vm0, %v9829_v58 }
 0x5ce   : > { %12044 = vmatprep.mubr.msk.f32.mxu1 %vm500_vm0, %v9830_v48 }
 0x5d1   : > { %12045 = vmatmul.mubr.msk.f32.gmra.mrb[242].mxu1 %vm500_vm0, %v9831_v54 }
 0x692   : > { %v12017_v10 = vpop.f32.mrb[234].mxu1 }
 0x693   : > { %v9946_v14 = vmul.f32 0.020408163, %v12017_v10  ;;  %v9797_v17 = vpop.f32.mrb[235].mxu1 }
 0x694   : > { %v9945_v31 = vmul.f32 0.020408163, %v9797_v17  ;;  %v12040_v23 = vpop.f32.mrb[240].mxu0 }
 0x695   : > { %v9958_v53 = vmul.f32 %v9946_v14, %v9946_v14  ;;  %v9952_v59 = vmul.f32 0.020408163, %v12040_v23  ;;  %v9916_v46 = vpop.f32.mrb[241].mxu0  ;;  %v9978_v23 = vld [vmem:[%s21655_s7 + $0x18] sm:$0xff] }
 0x696   : > { %v9957_v29 = vmul.f32 %v9945_v31, %v9945_v31  ;;  %v9951_v22 = vmul.f32 0.020408163, %v9916_v46  ;;  %v12020_v7 = vpop.f32.mrb[236].mxu1 }
 0x697   : > { %v9964_v49 = vsub.f32 %v9952_v59, %v9958_v53  ;;  %v9807_v37 = vpop.f32.mrb[237].mxu1  ;;  %v9948_v47 = vmul.f32 0.020408163, %v12020_v7  ;;  %v9977_v53 = vld [vmem:[%s21655_s7 + $0x10] sm:$0xff]  ;;  %v9979_v7 = vld [vmem:[%s21655_s7 + $0x20] sm:$0xff] }
 0x698   : > { %v9963_v50 = vsub.f32 %v9951_v22, %v9957_v29  ;;  %v9947_v18 = vmul.f32 0.020408163, %v9807_v37  ;;  %v9980_v22 = vld [vmem:[%s21655_s7 + $0x28] sm:$0xff] }
 0x699   : > { %v9970_v39 = vmax.f32 %v9964_v49, 0.0  ;;  %v9960_v3 = vmul.f32 %v9948_v47, %v9948_v47 }
 0x69a   : > { %v9969_v60 = vmax.f32 %v9963_v50, 0.0  ;;  %v9959_v32 = vmul.f32 %v9947_v18, %v9947_v18 }
 0x69b   : > { %v9982_v36 = vadd.f32 1e-05, %v9970_v39 }
 0x69c   : > { %v9981_v55 = vadd.f32 1e-05, %v9969_v60  ;;  %v12023_v24 = vpop.f32.mrb[238].mxu1 }
 0x69d   : > { %12693 = vrsqrt.f32 %v9982_v36  ;;  %v9817_v12 = vpop.f32.mrb[239].mxu1  ;;  %v21647_v57 = vmul.f32 0.020408163, %v12023_v24  ;;  %v10002_v36 = vld [vmem:[%s21667_s8 + $0x18] sm:$0xff] }
 0x69e   : > { %12695 = vrsqrt.f32 %v9981_v55  ;;  %v21649_v19 = vmul.f32 0.020408163, %v9817_v12  ;;  %v10001_v55 = vld [vmem:[%s21667_s8 + $0x10] sm:$0xff] }
 0x69f   : > { %v9962_v52 = vmul.f32 %v21647_v57, %v21647_v57 }
 0x6a0   : > { %v12043_v13 = vpop.f32.mrb[240].mxu1  ;;  %v9961_v27 = vmul.f32 %v21649_v19, %v21649_v19 }
 0x6a1   : > { %v9954_v41 = vmul.f32 0.020408163, %v12043_v13  ;;  %v9926_v56 = vpop.f32.mrb[241].mxu1 }
 0x6a2   : > { %v9953_v63 = vmul.f32 0.020408163, %v9926_v56 }
 0x6a3   : > { %v9966_v20 = vsub.f32 %v9954_v41, %v9960_v3  ;;  %v10004_v41 = vld [vmem:[%s21667_s8 + $0x28] sm:$0xff] }
 0x6a4   : > { %v9965_v28 = vsub.f32 %v9953_v63, %v9959_v32  ;;  %v12046_v0 = vpop.f32.mrb[242].mxu1 }
 0x6a5   : > { %v9972_v26 = vmax.f32 %v9966_v20, 0.0  ;;  %v9956_v42 = vmul.f32 0.020408163, %v12046_v0  ;;  %v9936_v8 = vpop.f32.mrb[243].mxu1 }
 0x6a6   : > { %v9971_v61 = vmax.f32 %v9965_v28, 0.0  ;;  %v9955_v51 = vmul.f32 0.020408163, %v9936_v8 }
 0x6a7   : > { %v12694_v45 = vpop.eup %12693  ;;  %v9984_v15 = vadd.f32 1e-05, %v9972_v26  ;;  %v9968_v4 = vsub.f32 %v9956_v42, %v9962_v52 }
 0x6a8   : > { %v12696_v62 = vpop.eup %12695  ;;  %v9983_v2 = vadd.f32 1e-05, %v9971_v61  ;;  %v9967_v6 = vsub.f32 %v9955_v51, %v9961_v27  ;;  %v9994_v25 = vmul.f32 %v12694_v45, %v9976_v1 }
 0x6a9   : > { %12697 = vrsqrt.f32 %v9984_v15  ;;  %v9974_v43 = vmax.f32 %v9968_v4, 0.0  ;;  %v9993_v11 = vmul.f32 %v12696_v62, %v9975_v38 }
 0x6aa   : > { %12699 = vrsqrt.f32 %v9983_v2  ;;  %v9973_v9 = vmax.f32 %v9967_v6, 0.0  ;;  %10024 = vperm.xlu1 %12296, %v9994_v25   ;;  %v10006_v16 = vmul.f32 %v9994_v25, %v9946_v14 }
 0x6ab   : > { %v9986_v58 = vadd.f32 1e-05, %v9974_v43  ;;  %10019 = vperm.xlu0 %12295, %v9993_v11   ;;  %v10005_v48 = vmul.f32 %v9993_v11, %v9945_v31 }
 0x6ac   : > { %v9985_v54 = vadd.f32 1e-05, %v9973_v9  ;;  %v10012_v10 = vsub.f32 %v10000_v5, %v10006_v16 }
 0x6ad   : > { %12701 = vrsqrt.f32 %v9986_v58  ;;  %v10011_v17 = vsub.f32 %v9999_v40, %v10005_v48 }
 0x6ae   : > { %12703 = vrsqrt.f32 %v9985_v54  ;;  %10060 = vperm.xlu1 %12296, %v10012_v10  }
 0x6af   : > { %10055 = vperm.xlu0 %12295, %v10011_v17  }
 0x6b3   : > { %v12698_v59 = vpop.eup %12697 }
 0x6b4   : > { %v12700_v46 = vpop.eup %12699  ;;  %v9996_v14 = vmul.f32 %v12698_v59, %v9978_v23 }
 0x6b5   : > { %v9995_v29 = vmul.f32 %v12700_v46, %v9977_v53 }
 0x6b6   : > { %10034 = vperm.xlu1 %12296, %v9996_v14   ;;  %v10008_v31 = vmul.f32 %v9996_v14, %v9948_v47  ;;  %v10003_v47 = vld [vmem:[%s21667_s8 + $0x20] sm:$0xff] }
 0x6b7   : > { %v12702_v49 = vpop.eup %12701  ;;  %10029 = vperm.xlu0 %12295, %v9995_v29   ;;  %v10007_v37 = vmul.f32 %v9995_v29, %v9947_v18 }
 0x6b8   : > { %v12704_v50 = vpop.eup %12703  ;;  %v9998_v39 = vmul.f32 %v12702_v49, %v9980_v22  ;;  %v10014_v13 = vsub.f32 %v10002_v36, %v10008_v31 }
 0x6b9   : > { %v9997_v60 = vmul.f32 %v12704_v50, %v9979_v7  ;;  %v10013_v3 = vsub.f32 %v10001_v55, %v10007_v37 }
 0x6ba   : > { %10044 = vperm.xlu1 %12296, %v9998_v39   ;;  %v10010_v24 = vmul.f32 %v9998_v39, %v21647_v57 }
 0x6bb   : > { %10039 = vperm.xlu0 %12295, %v9997_v60   ;;  %v10009_v12 = vmul.f32 %v9997_v60, %v21649_v19 }
 0x6bc   : > { %v10016_v56 = vsub.f32 %v10004_v41, %v10010_v24 }
 0x6bd   : > { %v10015_v18 = vsub.f32 %v10003_v47, %v10009_v12 }
 0x6be   : > { %10070 = vperm.xlu1 %12296, %v10014_v13  }
 0x6bf   : > { %10065 = vperm.xlu0 %12295, %v10013_v3  }
 0x6c2   : > { %10080 = vperm.xlu1 %12296, %v10016_v56  }
 0x6c3   : > { %10075 = vperm.xlu0 %12295, %v10015_v18  }
 0x729   : > { %v10025_v32 = vpop.permute.xlu1 %10024 }
 0x72a   : > { %v10020_v63 = vpop.permute.xlu0 %10019  ;;  %v10048_v20 = vmul.f32 %v10025_v32, %v21593_v34 }
 0x72b   : > { %v10047_v57 = vmul.f32 %v10020_v63, %v21595_v44 }
 0x72d   : > { %v10061_v28 = vpop.permute.xlu1 %10060 }
 0x72e   : > { %v10084_v0 = vadd.f32 %v10061_v28, %v10048_v20  ;;  %v10056_v19 = vpop.permute.xlu0 %10055 }
 0x72f   : > { %v10083_v52 = vadd.f32 %v10056_v19, %v10047_v57 }
 0x730   : > { %v10090_v26 = vmax.f32 %v10084_v0, 0.0 }
 0x731   : > { %v10089_v42 = vmax.f32 %v10083_v52, 0.0 }
 0x732   : > { %10096 = vst.msk [vmem:[%s300_s11 + $0x8] sm:$0xff] %vm500_vm0, %v10090_v26 }
 0x733   : > { %10095 = vst.msk [vmem:[%s300_s11] sm:$0xff] %vm500_vm0, %v10089_v42 }
 0x735   : > { %v10035_v8 = vpop.permute.xlu1 %10034 }
 0x736   : > { %v10030_v1 = vpop.permute.xlu0 %10029  ;;  %v10050_v44 = vmul.f32 %v10035_v8, %v21603_v35 }
 0x737   : > { %v10049_v61 = vmul.f32 %v10030_v1, %v21607_v30 }
 0x739   : > { %v10045_v27 = vpop.permute.xlu1 %10044 }
 0x73a   : > { %v10040_v34 = vpop.permute.xlu0 %10039  ;;  %v10052_v4 = vmul.f32 %v10045_v27, %v21623_v33 }
 0x73b   : > { %v10051_v2 = vmul.f32 %v10040_v34, %v21617_v21 }
 0x73d   : > { %v10071_v51 = vpop.permute.xlu1 %10070 }
 0x73e   : > { %v10086_v38 = vadd.f32 %v10071_v51, %v10050_v44  ;;  %v10066_v45 = vpop.permute.xlu0 %10065 }
 0x73f   : > { %v10085_v15 = vadd.f32 %v10066_v45, %v10049_v61 }
 0x740   : > { %v10092_v62 = vmax.f32 %v10086_v38, 0.0 }
 0x741   : > { %v10091_v6 = vmax.f32 %v10085_v15, 0.0  ;;  %v10081_v25 = vpop.permute.xlu1 %10080 }
 0x742   : > { %10098 = vst.msk [vmem:[%s300_s11 + $0x18] sm:$0xff] %vm500_vm0, %v10092_v62  ;;  %v10088_v43 = vadd.f32 %v10081_v25, %v10052_v4  ;;  %v10076_v11 = vpop.permute.xlu0 %10075 }
 0x743   : > { %10097 = vst.msk [vmem:[%s300_s11 + $0x10] sm:$0xff] %vm500_vm0, %v10091_v6  ;;  %v10087_v35 = vadd.f32 %v10076_v11, %v10051_v2 }
 0x744   : > { %v10094_v5 = vmax.f32 %v10088_v43, 0.0 }
 0x745   : > { %v10093_v30 = vmax.f32 %v10087_v35, 0.0 }
 0x746   : > { %10100 = vst.msk [vmem:[%s300_s11 + $0x28] sm:$0xff] %vm500_vm0, %v10094_v5 }
 0x747   : > { %10099 = vst.msk [vmem:[%s300_s11 + $0x20] sm:$0xff] %vm500_vm0, %v10093_v30 }
 0x748 PF: > { %s16_s21 = sadd.s32 1, %s12915_s21  }
 0x749   : > { %p13_p4 = scmp.ge.s32.totalorder %s16_s21, 6  }
 0x74b   :  { %15 = sbr.rel (!%p13_p4) target bundleno = 1 (0x1), region = 80 }

</bundles_post_ra>
